<compile_context>
chip_gen: v7x
topology: tpu7x:2x2x1
jax: 0.10.0
libtpu: 0.0.40
codegen_flags: <defaults>
</compile_context>

<pallas_src>
import jax
import jax.numpy as jnp
from jax.experimental import pallas as pl
from jax.experimental.pallas import tpu as pltpu

B_IN = 64            # module's `B`
DIMS = [B_IN, 512, 256, 128, 256]
EPS = 1e-5


def _pick_tile(n):
    # 256-row tiles feed the 256-wide MXU on v6e/v7x; 128 is a full pass on v5e's
    # 128-wide MXU.  Fall back to the whole batch for tiny / irregular N.
    for t in (256, 128, 64, 32, 16, 8):
        if n % t == 0:
            return t
    return n


def _matmul_stats_tail(h, w_ref, z_ref, st_ref):
    """z = h @ W; stream z out; accumulate per-feature [sum(z); sum(z*z)]."""
    @pl.when(pl.program_id(0) == 0)
    def _():
        st_ref[...] = jnp.zeros_like(st_ref)

    z = jnp.dot(h, w_ref[...], preferred_element_type=jnp.float32)
    z_ref[...] = z
    # Column sums on the MXU (ones-row matmul) rather than an XLU axis-0 reduce.
    ones = jnp.ones((1, h.shape[0]), jnp.float32)
    st_ref[0:1, :] += jnp.dot(ones, z, preferred_element_type=jnp.float32)
    st_ref[1:2, :] += jnp.dot(ones, z * z, preferred_element_type=jnp.float32)


def _first_layer_kernel(x_ref, w_ref, z_ref, st_ref):
    # layer1: z1 = x @ W1 (bias cancelled by BN), plus batch stats of z1.
    _matmul_stats_tail(x_ref[...], w_ref, z_ref, st_ref)


def _mid_layer_kernel(z_prev_ref, ss_ref, w_ref, z_ref, st_ref):
    # Folded BN of the previous layer (single FMA) + ReLU, then this layer's matmul.
    h = jnp.maximum(z_prev_ref[...] * ss_ref[0:1, :] + ss_ref[1:2, :], 0.0)
    _matmul_stats_tail(h, w_ref, z_ref, st_ref)


def _final_apply_kernel(z_ref, ss_ref, o_ref):
    # layer4's BatchNorm (no ReLU) as one FMA.
    o_ref[...] = z_ref[...] * ss_ref[0:1, :] + ss_ref[1:2, :]


def _layer_matmul_stats(h, w, ss, *, tm):
    n, fin = h.shape
    fout = w.shape[1]
    grid = (n // tm,)

    row_in_spec = pl.BlockSpec((tm, fin), lambda i: (i, 0))
    w_spec = pl.BlockSpec((fin, fout), lambda i: (0, 0))       # resident, fetched once
    ss_spec = pl.BlockSpec((2, fin), lambda i: (0, 0))
    out_specs = (
        pl.BlockSpec((tm, fout), lambda i: (i, 0)),            # streamed activations
        pl.BlockSpec((2, fout), lambda i: (0, 0)),             # batch-stat accumulator
    )
    out_shape = (
        jax.ShapeDtypeStruct((n, fout), jnp.float32),
        jax.ShapeDtypeStruct((2, fout), jnp.float32),
    )

    if ss is None:
        kernel, in_specs, args = _first_layer_kernel, [row_in_spec, w_spec], (h, w)
    else:
        kernel, in_specs, args = _mid_layer_kernel, [row_in_spec, ss_spec, w_spec], (h, ss, w)

    return pl.pallas_call(
        kernel,
        out_shape=out_shape,
        grid=grid,
        in_specs=in_specs,
        out_specs=out_specs,
        compiler_params=pltpu.CompilerParams(
            dimension_semantics=("arbitrary",)),   # stats accumulate over this axis
    )(*args)


def _final_apply(z, ss, *, tm):
    n, f = z.shape
    return pl.pallas_call(
        _final_apply_kernel,
        out_shape=jax.ShapeDtypeStruct((n, f), jnp.float32),
        grid=(n // tm,),
        in_specs=[pl.BlockSpec((tm, f), lambda i: (i, 0)),
                  pl.BlockSpec((2, f), lambda i: (0, 0))],
        out_specs=pl.BlockSpec((tm, f), lambda i: (i, 0)),
        compiler_params=pltpu.CompilerParams(
            dimension_semantics=("parallel",)),    # independent tiles -> megacore ok
    )(z, ss)


def _fold_bn(stats, n, gamma, beta):
    """stats = [sum(z); sum(z*z)] over the full batch -> packed (scale; shift)."""
    mu = stats[0:1, :] * (1.0 / n)
    var = stats[1:2, :] * (1.0 / n) - mu * mu
    scale = gamma * jax.lax.rsqrt(var + EPS)
    shift = beta - mu * scale
    return jnp.concatenate([scale, shift], axis=0)   # (2, F)


def recover_channel(x, params):
    """x: (N, 64) float32. params: flat list (W, b, gamma, beta) * 4.
    The Linear bias is intentionally unused in the kernels (cancelled exactly by
    BatchNorm's batch-mean subtraction)."""
    n = x.shape[0]
    tm = _pick_tile(n)
    z = x.astype(jnp.float32)

    ss = None
    for i in range(4):
        w, _b, gamma, beta = params[4 * i: 4 * i + 4]
        z, stats = _layer_matmul_stats(z, w, ss, tm=tm)
        ss = _fold_bn(stats, n, gamma, beta)
    return _final_apply(z, ss, tm=tm)                # layer4 BN, no ReLU


def init_params(key):
    """Deterministic init mirroring the module's parameter shapes.
    Linear: W (in, out), b (1, out). BatchNorm1d: gamma (1, out) = 1, beta (1, out) = 0."""
    params = []
    for i in range(4):
        fan_in, fan_out = DIMS[i], DIMS[i + 1]
        key, kw, kb = jax.random.split(key, 3)
        bound = 1.0 / jnp.sqrt(fan_in)
        w = jax.random.uniform(kw, (fan_in, fan_out), jnp.float32, -bound, bound)
        b = jax.random.uniform(kb, (1, fan_out), jnp.float32, -bound, bound)
        gamma = jnp.ones((1, fan_out), jnp.float32)
        beta = jnp.zeros((1, fan_out), jnp.float32)
        params += [w, b, gamma, beta]
    return params


def reference(x, params):
    """Pure-JAX reference with the bias *included* and the textbook two-pass BN,
    matching the PyTorch module's training-mode forward."""
    h = x
    for i in range(4):
        w, b, g, be = params[4 * i: 4 * i + 4]
        z = h @ w + b
        mu = jnp.mean(z, axis=0, keepdims=True)
        var = jnp.mean((z - mu) ** 2, axis=0, keepdims=True)
        y = (z - mu) / jnp.sqrt(var + EPS) * g + be
        h = jnp.maximum(y, 0.0) if i < 3 else y
    return h


if __name__ == "__main__":
    key = jax.random.PRNGKey(0)
    kx, kp = jax.random.split(key)
    n = 512                      # exercises the batch grid (2 tiles of 256 rows)
    x = jax.random.normal(kx, (n, B_IN), jnp.float32)
    params = init_params(kp)

    out = jax.jit(recover_channel)(x, params)
    out = jax.block_until_ready(out)

    ref = reference(x, params)
    assert out.shape == (n, DIMS[-1])
    assert jnp.allclose(out, ref, atol=2e-3, rtol=2e-3)
    print("KERNEL_OK")
</pallas_src>

<mosaic_0001>
module attributes {stable_mosaic.version = 11 : i64} {
  func.func @_first_layer_kernel(%arg0: i32, %arg1: memref<256x64xf32, #tpu.memory_space<vmem>>, %arg2: memref<64x512xf32, #tpu.memory_space<vmem>>, %arg3: memref<256x512xf32, #tpu.memory_space<vmem>>, %arg4: memref<2x512xf32, #tpu.memory_space<vmem>>) attributes {dimension_semantics = [#tpu.dimension_semantics<arbitrary>], iteration_bounds = array<i64: 2>, scalar_prefetch = 0 : i64, scratch_operands = 0 : i64, tpu.core_type = #tpu.core_type<tc>, window_params = [{transform_indices = @transform_0, window_bounds = array<i64: 256, 64>}, {pipeline_mode = #tpu.pipeline_mode<synchronous>, transform_indices = @transform_1, window_bounds = array<i64: 64, 512>}, {transform_indices = @transform_2, window_bounds = array<i64: 256, 512>}, {pipeline_mode = #tpu.pipeline_mode<synchronous>, transform_indices = @transform_3, window_bounds = array<i64: 2, 512>}]} {
    %c0 = arith.constant 0 : index
    %c0_0 = arith.constant 0 : index
    %0 = vector.load %arg1[%c0, %c0_0] : memref<256x64xf32, #tpu.memory_space<vmem>>, vector<256x64xf32>
    %c0_i32 = arith.constant 0 : i32
    %1 = arith.cmpi eq, %arg0, %c0_i32 : i32
    %2 = arith.extui %1 : i1 to i32
    %c0_i32_1 = arith.constant 0 : i32
    %3 = arith.cmpi ne, %2, %c0_i32_1 : i32
    scf.if %3 {
      %cst_16 = arith.constant 0.000000e+00 : f32
      %17 = vector.broadcast %cst_16 : f32 to vector<2x512xf32>
      %c0_17 = arith.constant 0 : index
      %c0_18 = arith.constant 0 : index
      %18 = vector.load %arg4[%c0_17, %c0_18] : memref<2x512xf32, #tpu.memory_space<vmem>>, vector<2x512xf32>
      tpu.vector_store %arg4[%c0_17, %c0_18], %17 {strides = array<i32>} : memref<2x512xf32, #tpu.memory_space<vmem>>, vector<2x512xf32>,
    } else {
    }
    %c0_2 = arith.constant 0 : index
    %c0_3 = arith.constant 0 : index
    %4 = vector.load %arg2[%c0_2, %c0_3] : memref<64x512xf32, #tpu.memory_space<vmem>>, vector<64x512xf32>
    %cst = arith.constant dense<0.000000e+00> : vector<256x512xf32>
    %5 = tpu.matmul %0, %4, %cst {dimension_numbers = #tpu.dot_dimension_numbers<[1], [0], [0], [1], [0, 0, 1, 1], [], []>} : vector<256x64xf32>, vector<64x512xf32>, vector<256x512xf32> -> vector<256x512xf32>
    %c0_4 = arith.constant 0 : index
    %c0_5 = arith.constant 0 : index
    %6 = vector.load %arg3[%c0_4, %c0_5] : memref<256x512xf32, #tpu.memory_space<vmem>>, vector<256x512xf32>
    tpu.vector_store %arg3[%c0_4, %c0_5], %5 {strides = array<i32>} : memref<256x512xf32, #tpu.memory_space<vmem>>, vector<256x512xf32>,
    %cst_6 = arith.constant 1.000000e+00 : f32
    %7 = vector.broadcast %cst_6 : f32 to vector<1x256xf32>
    %c0_7 = arith.constant 0 : index
    %c0_8 = arith.constant 0 : index
    %8 = vector.load %arg4[%c0_7, %c0_8] : memref<2x512xf32, #tpu.memory_space<vmem>>, vector<1x512xf32>
    %cst_9 = arith.constant dense<0.000000e+00> : vector<1x512xf32>
    %9 = tpu.matmul %7, %5, %cst_9 {dimension_numbers = #tpu.dot_dimension_numbers<[1], [0], [0], [1], [0, 0, 1, 1], [], []>} : vector<1x256xf32>, vector<256x512xf32>, vector<1x512xf32> -> vector<1x512xf32>
    %10 = arith.addf %8, %9 : vector<1x512xf32>
    %c0_10 = arith.constant 0 : index
    %c0_11 = arith.constant 0 : index
    %11 = vector.load %arg4[%c0_10, %c0_11] : memref<2x512xf32, #tpu.memory_space<vmem>>, vector<1x512xf32>
    tpu.vector_store %arg4[%c0_10, %c0_11], %10 {strides = array<i32>} : memref<2x512xf32, #tpu.memory_space<vmem>>, vector<1x512xf32>,
    %c1 = arith.constant 1 : index
    %c0_12 = arith.constant 0 : index
    %12 = vector.load %arg4[%c1, %c0_12] : memref<2x512xf32, #tpu.memory_space<vmem>>, vector<1x512xf32>
    %13 = arith.mulf %5, %5 : vector<256x512xf32>
    %cst_13 = arith.constant dense<0.000000e+00> : vector<1x512xf32>
    %14 = tpu.matmul %7, %13, %cst_13 {dimension_numbers = #tpu.dot_dimension_numbers<[1], [0], [0], [1], [0, 0, 1, 1], [], []>} : vector<1x256xf32>, vector<256x512xf32>, vector<1x512xf32> -> vector<1x512xf32>
    %15 = arith.addf %12, %14 : vector<1x512xf32>
    %c1_14 = arith.constant 1 : index
    %c0_15 = arith.constant 0 : index
    %16 = vector.load %arg4[%c1_14, %c0_15] : memref<2x512xf32, #tpu.memory_space<vmem>>, vector<1x512xf32>
    tpu.vector_store %arg4[%c1_14, %c0_15], %15 {strides = array<i32>} : memref<2x512xf32, #tpu.memory_space<vmem>>, vector<1x512xf32>,
    return
  }
  func.func @transform_0(%arg0: i32) -> (i32, i32) {
    %c0_i32 = arith.constant 0 : i32
    %c0_i32_0 = arith.constant 0 : i32
    return %arg0, %c0_i32 : i32, i32
  }
  func.func @transform_1(%arg0: i32) -> (i32, i32) {
    %c0_i32 = arith.constant 0 : i32
    %c0_i32_0 = arith.constant 0 : i32
    %c0_i32_1 = arith.constant 0 : i32
    return %c0_i32, %c0_i32_0 : i32, i32
  }
  func.func @transform_2(%arg0: i32) -> (i32, i32) {
    %c0_i32 = arith.constant 0 : i32
    %c0_i32_0 = arith.constant 0 : i32
    return %arg0, %c0_i32 : i32, i32
  }
  func.func @transform_3(%arg0: i32) -> (i32, i32) {
    %c0_i32 = arith.constant 0 : i32
    %c0_i32_0 = arith.constant 0 : i32
    %c0_i32_1 = arith.constant 0 : i32
    return %c0_i32, %c0_i32_0 : i32, i32
  }
}

module attributes {stable_mosaic.version = 11 : i64} {
  func.func @_mid_layer_kernel(%arg0: i32, %arg1: memref<256x512xf32, #tpu.memory_space<vmem>>, %arg2: memref<2x512xf32, #tpu.memory_space<vmem>>, %arg3: memref<512x256xf32, #tpu.memory_space<vmem>>, %arg4: memref<256x256xf32, #tpu.memory_space<vmem>>, %arg5: memref<2x256xf32, #tpu.memory_space<vmem>>) attributes {dimension_semantics = [#tpu.dimension_semantics<arbitrary>], iteration_bounds = array<i64: 2>, scalar_prefetch = 0 : i64, scratch_operands = 0 : i64, tpu.core_type = #tpu.core_type<tc>, window_params = [{transform_indices = @transform_0, window_bounds = array<i64: 256, 512>}, {pipeline_mode = #tpu.pipeline_mode<synchronous>, transform_indices = @transform_1, window_bounds = array<i64: 2, 512>}, {pipeline_mode = #tpu.pipeline_mode<synchronous>, transform_indices = @transform_2, window_bounds = array<i64: 512, 256>}, {transform_indices = @transform_3, window_bounds = array<i64: 256, 256>}, {pipeline_mode = #tpu.pipeline_mode<synchronous>, transform_indices = @transform_4, window_bounds = array<i64: 2, 256>}]} {
    %c0 = arith.constant 0 : index
    %c0_0 = arith.constant 0 : index
    %0 = vector.load %arg1[%c0, %c0_0] : memref<256x512xf32, #tpu.memory_space<vmem>>, vector<256x512xf32>
    %c0_1 = arith.constant 0 : index
    %c0_2 = arith.constant 0 : index
    %1 = vector.load %arg2[%c0_1, %c0_2] : memref<2x512xf32, #tpu.memory_space<vmem>>, vector<1x512xf32>
    %2 = vector.broadcast %1 : vector<1x512xf32> to vector<256x512xf32>
    %3 = arith.mulf %0, %2 : vector<256x512xf32>
    %c1 = arith.constant 1 : index
    %c0_3 = arith.constant 0 : index
    %4 = vector.load %arg2[%c1, %c0_3] : memref<2x512xf32, #tpu.memory_space<vmem>>, vector<1x512xf32>
    %5 = vector.broadcast %4 : vector<1x512xf32> to vector<256x512xf32>
    %6 = arith.addf %3, %5 : vector<256x512xf32>
    %cst = arith.constant 0.000000e+00 : f32
    %7 = vector.broadcast %cst : f32 to vector<256x512xf32>
    %8 = arith.maximumf %6, %7 : vector<256x512xf32>
    %c0_i32 = arith.constant 0 : i32
    %9 = arith.cmpi eq, %arg0, %c0_i32 : i32
    %10 = arith.extui %9 : i1 to i32
    %c0_i32_4 = arith.constant 0 : i32
    %11 = arith.cmpi ne, %10, %c0_i32_4 : i32
    scf.if %11 {
      %cst_21 = arith.constant 0.000000e+00 : f32
      %25 = vector.broadcast %cst_21 : f32 to vector<2x256xf32>
      %c0_22 = arith.constant 0 : index
      %c0_23 = arith.constant 0 : index
      %26 = vector.load %arg5[%c0_22, %c0_23] : memref<2x256xf32, #tpu.memory_space<vmem>>, vector<2x256xf32>
      tpu.vector_store %arg5[%c0_22, %c0_23], %25 {strides = array<i32>} : memref<2x256xf32, #tpu.memory_space<vmem>>, vector<2x256xf32>,
    } else {
    }
    %c0_5 = arith.constant 0 : index
    %c0_6 = arith.constant 0 : index
    %12 = vector.load %arg3[%c0_5, %c0_6] : memref<512x256xf32, #tpu.memory_space<vmem>>, vector<512x256xf32>
    %cst_7 = arith.constant dense<0.000000e+00> : vector<256x256xf32>
    %13 = tpu.matmul %8, %12, %cst_7 {dimension_numbers = #tpu.dot_dimension_numbers<[1], [0], [0], [1], [0, 0, 1, 1], [], []>} : vector<256x512xf32>, vector<512x256xf32>, vector<256x256xf32> -> vector<256x256xf32>
    %c0_8 = arith.constant 0 : index
    %c0_9 = arith.constant 0 : index
    %14 = vector.load %arg4[%c0_8, %c0_9] : memref<256x256xf32, #tpu.memory_space<vmem>>, vector<256x256xf32>
    tpu.vector_store %arg4[%c0_8, %c0_9], %13 {strides = array<i32>} : memref<256x256xf32, #tpu.memory_space<vmem>>, vector<256x256xf32>,
    %cst_10 = arith.constant 1.000000e+00 : f32
    %15 = vector.broadcast %cst_10 : f32 to vector<1x256xf32>
    %c0_11 = arith.constant 0 : index
    %c0_12 = arith.constant 0 : index
    %16 = vector.load %arg5[%c0_11, %c0_12] : memref<2x256xf32, #tpu.memory_space<vmem>>, vector<1x256xf32>
    %cst_13 = arith.constant dense<0.000000e+00> : vector<1x256xf32>
    %17 = tpu.matmul %15, %13, %cst_13 {dimension_numbers = #tpu.dot_dimension_numbers<[1], [0], [0], [1], [0, 0, 1, 1], [], []>} : vector<1x256xf32>, vector<256x256xf32>, vector<1x256xf32> -> vector<1x256xf32>
    %18 = arith.addf %16, %17 : vector<1x256xf32>
    %c0_14 = arith.constant 0 : index
    %c0_15 = arith.constant 0 : index
    %19 = vector.load %arg5[%c0_14, %c0_15] : memref<2x256xf32, #tpu.memory_space<vmem>>, vector<1x256xf32>
    tpu.vector_store %arg5[%c0_14, %c0_15], %18 {strides = array<i32>} : memref<2x256xf32, #tpu.memory_space<vmem>>, vector<1x256xf32>,
    %c1_16 = arith.constant 1 : index
    %c0_17 = arith.constant 0 : index
    %20 = vector.load %arg5[%c1_16, %c0_17] : memref<2x256xf32, #tpu.memory_space<vmem>>, vector<1x256xf32>
    %21 = arith.mulf %13, %13 : vector<256x256xf32>
    %cst_18 = arith.constant dense<0.000000e+00> : vector<1x256xf32>
    %22 = tpu.matmul %15, %21, %cst_18 {dimension_numbers = #tpu.dot_dimension_numbers<[1], [0], [0], [1], [0, 0, 1, 1], [], []>} : vector<1x256xf32>, vector<256x256xf32>, vector<1x256xf32> -> vector<1x256xf32>
    %23 = arith.addf %20, %22 : vector<1x256xf32>
    %c1_19 = arith.constant 1 : index
    %c0_20 = arith.constant 0 : index
    %24 = vector.load %arg5[%c1_19, %c0_20] : memref<2x256xf32, #tpu.memory_space<vmem>>, vector<1x256xf32>
    tpu.vector_store %arg5[%c1_19, %c0_20], %23 {strides = array<i32>} : memref<2x256xf32, #tpu.memory_space<vmem>>, vector<1x256xf32>,
    return
  }
  func.func @transform_0(%arg0: i32) -> (i32, i32) {
    %c0_i32 = arith.constant 0 : i32
    %c0_i32_0 = arith.constant 0 : i32
    return %arg0, %c0_i32 : i32, i32
  }
  func.func @transform_1(%arg0: i32) -> (i32, i32) {
    %c0_i32 = arith.constant 0 : i32
    %c0_i32_0 = arith.constant 0 : i32
    %c0_i32_1 = arith.constant 0 : i32
    return %c0_i32, %c0_i32_0 : i32, i32
  }
  func.func @transform_2(%arg0: i32) -> (i32, i32) {
    %c0_i32 = arith.constant 0 : i32
    %c0_i32_0 = arith.constant 0 : i32
    %c0_i32_1 = arith.constant 0 : i32
    return %c0_i32, %c0_i32_0 : i32, i32
  }
  func.func @transform_3(%arg0: i32) -> (i32, i32) {
    %c0_i32 = arith.constant 0 : i32
    %c0_i32_0 = arith.constant 0 : i32
    return %arg0, %c0_i32 : i32, i32
  }
  func.func @transform_4(%arg0: i32) -> (i32, i32) {
    %c0_i32 = arith.constant 0 : i32
    %c0_i32_0 = arith.constant 0 : i32
    %c0_i32_1 = arith.constant 0 : i32
    return %c0_i32, %c0_i32_0 : i32, i32
  }
}

module attributes {stable_mosaic.version = 11 : i64} {
  func.func @_mid_layer_kernel(%arg0: i32, %arg1: memref<256x256xf32, #tpu.memory_space<vmem>>, %arg2: memref<2x256xf32, #tpu.memory_space<vmem>>, %arg3: memref<256x128xf32, #tpu.memory_space<vmem>>, %arg4: memref<256x128xf32, #tpu.memory_space<vmem>>, %arg5: memref<2x128xf32, #tpu.memory_space<vmem>>) attributes {dimension_semantics = [#tpu.dimension_semantics<arbitrary>], iteration_bounds = array<i64: 2>, scalar_prefetch = 0 : i64, scratch_operands = 0 : i64, tpu.core_type = #tpu.core_type<tc>, window_params = [{transform_indices = @transform_0, window_bounds = array<i64: 256, 256>}, {pipeline_mode = #tpu.pipeline_mode<synchronous>, transform_indices = @transform_1, window_bounds = array<i64: 2, 256>}, {pipeline_mode = #tpu.pipeline_mode<synchronous>, transform_indices = @transform_2, window_bounds = array<i64: 256, 128>}, {transform_indices = @transform_3, window_bounds = array<i64: 256, 128>}, {pipeline_mode = #tpu.pipeline_mode<synchronous>, transform_indices = @transform_4, window_bounds = array<i64: 2, 128>}]} {
    %c0 = arith.constant 0 : index
    %c0_0 = arith.constant 0 : index
    %0 = vector.load %arg1[%c0, %c0_0] : memref<256x256xf32, #tpu.memory_space<vmem>>, vector<256x256xf32>
    %c0_1 = arith.constant 0 : index
    %c0_2 = arith.constant 0 : index
    %1 = vector.load %arg2[%c0_1, %c0_2] : memref<2x256xf32, #tpu.memory_space<vmem>>, vector<1x256xf32>
    %2 = vector.broadcast %1 : vector<1x256xf32> to vector<256x256xf32>
    %3 = arith.mulf %0, %2 : vector<256x256xf32>
    %c1 = arith.constant 1 : index
    %c0_3 = arith.constant 0 : index
    %4 = vector.load %arg2[%c1, %c0_3] : memref<2x256xf32, #tpu.memory_space<vmem>>, vector<1x256xf32>
    %5 = vector.broadcast %4 : vector<1x256xf32> to vector<256x256xf32>
    %6 = arith.addf %3, %5 : vector<256x256xf32>
    %cst = arith.constant 0.000000e+00 : f32
    %7 = vector.broadcast %cst : f32 to vector<256x256xf32>
    %8 = arith.maximumf %6, %7 : vector<256x256xf32>
    %c0_i32 = arith.constant 0 : i32
    %9 = arith.cmpi eq, %arg0, %c0_i32 : i32
    %10 = arith.extui %9 : i1 to i32
    %c0_i32_4 = arith.constant 0 : i32
    %11 = arith.cmpi ne, %10, %c0_i32_4 : i32
    scf.if %11 {
      %cst_21 = arith.constant 0.000000e+00 : f32
      %25 = vector.broadcast %cst_21 : f32 to vector<2x128xf32>
      %c0_22 = arith.constant 0 : index
      %c0_23 = arith.constant 0 : index
      %26 = vector.load %arg5[%c0_22, %c0_23] : memref<2x128xf32, #tpu.memory_space<vmem>>, vector<2x128xf32>
      tpu.vector_store %arg5[%c0_22, %c0_23], %25 {strides = array<i32>} : memref<2x128xf32, #tpu.memory_space<vmem>>, vector<2x128xf32>,
    } else {
    }
    %c0_5 = arith.constant 0 : index
    %c0_6 = arith.constant 0 : index
    %12 = vector.load %arg3[%c0_5, %c0_6] : memref<256x128xf32, #tpu.memory_space<vmem>>, vector<256x128xf32>
    %cst_7 = arith.constant dense<0.000000e+00> : vector<256x128xf32>
    %13 = tpu.matmul %8, %12, %cst_7 {dimension_numbers = #tpu.dot_dimension_numbers<[1], [0], [0], [1], [0, 0, 1, 1], [], []>} : vector<256x256xf32>, vector<256x128xf32>, vector<256x128xf32> -> vector<256x128xf32>
    %c0_8 = arith.constant 0 : index
    %c0_9 = arith.constant 0 : index
    %14 = vector.load %arg4[%c0_8, %c0_9] : memref<256x128xf32, #tpu.memory_space<vmem>>, vector<256x128xf32>
    tpu.vector_store %arg4[%c0_8, %c0_9], %13 {strides = array<i32>} : memref<256x128xf32, #tpu.memory_space<vmem>>, vector<256x128xf32>,
    %cst_10 = arith.constant 1.000000e+00 : f32
    %15 = vector.broadcast %cst_10 : f32 to vector<1x256xf32>
    %c0_11 = arith.constant 0 : index
    %c0_12 = arith.constant 0 : index
    %16 = vector.load %arg5[%c0_11, %c0_12] : memref<2x128xf32, #tpu.memory_space<vmem>>, vector<1x128xf32>
    %cst_13 = arith.constant dense<0.000000e+00> : vector<1x128xf32>
    %17 = tpu.matmul %15, %13, %cst_13 {dimension_numbers = #tpu.dot_dimension_numbers<[1], [0], [0], [1], [0, 0, 1, 1], [], []>} : vector<1x256xf32>, vector<256x128xf32>, vector<1x128xf32> -> vector<1x128xf32>
    %18 = arith.addf %16, %17 : vector<1x128xf32>
    %c0_14 = arith.constant 0 : index
    %c0_15 = arith.constant 0 : index
    %19 = vector.load %arg5[%c0_14, %c0_15] : memref<2x128xf32, #tpu.memory_space<vmem>>, vector<1x128xf32>
    tpu.vector_store %arg5[%c0_14, %c0_15], %18 {strides = array<i32>} : memref<2x128xf32, #tpu.memory_space<vmem>>, vector<1x128xf32>,
    %c1_16 = arith.constant 1 : index
    %c0_17 = arith.constant 0 : index
    %20 = vector.load %arg5[%c1_16, %c0_17] : memref<2x128xf32, #tpu.memory_space<vmem>>, vector<1x128xf32>
    %21 = arith.mulf %13, %13 : vector<256x128xf32>
    %cst_18 = arith.constant dense<0.000000e+00> : vector<1x128xf32>
    %22 = tpu.matmul %15, %21, %cst_18 {dimension_numbers = #tpu.dot_dimension_numbers<[1], [0], [0], [1], [0, 0, 1, 1], [], []>} : vector<1x256xf32>, vector<256x128xf32>, vector<1x128xf32> -> vector<1x128xf32>
    %23 = arith.addf %20, %22 : vector<1x128xf32>
    %c1_19 = arith.constant 1 : index
    %c0_20 = arith.constant 0 : index
    %24 = vector.load %arg5[%c1_19, %c0_20] : memref<2x128xf32, #tpu.memory_space<vmem>>, vector<1x128xf32>
    tpu.vector_store %arg5[%c1_19, %c0_20], %23 {strides = array<i32>} : memref<2x128xf32, #tpu.memory_space<vmem>>, vector<1x128xf32>,
    return
  }
  func.func @transform_0(%arg0: i32) -> (i32, i32) {
    %c0_i32 = arith.constant 0 : i32
    %c0_i32_0 = arith.constant 0 : i32
    return %arg0, %c0_i32 : i32, i32
  }
  func.func @transform_1(%arg0: i32) -> (i32, i32) {
    %c0_i32 = arith.constant 0 : i32
    %c0_i32_0 = arith.constant 0 : i32
    %c0_i32_1 = arith.constant 0 : i32
    return %c0_i32, %c0_i32_0 : i32, i32
  }
  func.func @transform_2(%arg0: i32) -> (i32, i32) {
    %c0_i32 = arith.constant 0 : i32
    %c0_i32_0 = arith.constant 0 : i32
    %c0_i32_1 = arith.constant 0 : i32
    return %c0_i32, %c0_i32_0 : i32, i32
  }
  func.func @transform_3(%arg0: i32) -> (i32, i32) {
    %c0_i32 = arith.constant 0 : i32
    %c0_i32_0 = arith.constant 0 : i32
    return %arg0, %c0_i32 : i32, i32
  }
  func.func @transform_4(%arg0: i32) -> (i32, i32) {
    %c0_i32 = arith.constant 0 : i32
    %c0_i32_0 = arith.constant 0 : i32
    %c0_i32_1 = arith.constant 0 : i32
    return %c0_i32, %c0_i32_0 : i32, i32
  }
}

module attributes {stable_mosaic.version = 11 : i64} {
  func.func @_mid_layer_kernel(%arg0: i32, %arg1: memref<256x128xf32, #tpu.memory_space<vmem>>, %arg2: memref<2x128xf32, #tpu.memory_space<vmem>>, %arg3: memref<128x256xf32, #tpu.memory_space<vmem>>, %arg4: memref<256x256xf32, #tpu.memory_space<vmem>>, %arg5: memref<2x256xf32, #tpu.memory_space<vmem>>) attributes {dimension_semantics = [#tpu.dimension_semantics<arbitrary>], iteration_bounds = array<i64: 2>, scalar_prefetch = 0 : i64, scratch_operands = 0 : i64, tpu.core_type = #tpu.core_type<tc>, window_params = [{transform_indices = @transform_0, window_bounds = array<i64: 256, 128>}, {pipeline_mode = #tpu.pipeline_mode<synchronous>, transform_indices = @transform_1, window_bounds = array<i64: 2, 128>}, {pipeline_mode = #tpu.pipeline_mode<synchronous>, transform_indices = @transform_2, window_bounds = array<i64: 128, 256>}, {transform_indices = @transform_3, window_bounds = array<i64: 256, 256>}, {pipeline_mode = #tpu.pipeline_mode<synchronous>, transform_indices = @transform_4, window_bounds = array<i64: 2, 256>}]} {
    %c0 = arith.constant 0 : index
    %c0_0 = arith.constant 0 : index
    %0 = vector.load %arg1[%c0, %c0_0] : memref<256x128xf32, #tpu.memory_space<vmem>>, vector<256x128xf32>
    %c0_1 = arith.constant 0 : index
    %c0_2 = arith.constant 0 : index
    %1 = vector.load %arg2[%c0_1, %c0_2] : memref<2x128xf32, #tpu.memory_space<vmem>>, vector<1x128xf32>
    %2 = vector.broadcast %1 : vector<1x128xf32> to vector<256x128xf32>
    %3 = arith.mulf %0, %2 : vector<256x128xf32>
    %c1 = arith.constant 1 : index
    %c0_3 = arith.constant 0 : index
    %4 = vector.load %arg2[%c1, %c0_3] : memref<2x128xf32, #tpu.memory_space<vmem>>, vector<1x128xf32>
    %5 = vector.broadcast %4 : vector<1x128xf32> to vector<256x128xf32>
    %6 = arith.addf %3, %5 : vector<256x128xf32>
    %cst = arith.constant 0.000000e+00 : f32
    %7 = vector.broadcast %cst : f32 to vector<256x128xf32>
    %8 = arith.maximumf %6, %7 : vector<256x128xf32>
    %c0_i32 = arith.constant 0 : i32
    %9 = arith.cmpi eq, %arg0, %c0_i32 : i32
    %10 = arith.extui %9 : i1 to i32
    %c0_i32_4 = arith.constant 0 : i32
    %11 = arith.cmpi ne, %10, %c0_i32_4 : i32
    scf.if %11 {
      %cst_21 = arith.constant 0.000000e+00 : f32
      %25 = vector.broadcast %cst_21 : f32 to vector<2x256xf32>
      %c0_22 = arith.constant 0 : index
      %c0_23 = arith.constant 0 : index
      %26 = vector.load %arg5[%c0_22, %c0_23] : memref<2x256xf32, #tpu.memory_space<vmem>>, vector<2x256xf32>
      tpu.vector_store %arg5[%c0_22, %c0_23], %25 {strides = array<i32>} : memref<2x256xf32, #tpu.memory_space<vmem>>, vector<2x256xf32>,
    } else {
    }
    %c0_5 = arith.constant 0 : index
    %c0_6 = arith.constant 0 : index
    %12 = vector.load %arg3[%c0_5, %c0_6] : memref<128x256xf32, #tpu.memory_space<vmem>>, vector<128x256xf32>
    %cst_7 = arith.constant dense<0.000000e+00> : vector<256x256xf32>
    %13 = tpu.matmul %8, %12, %cst_7 {dimension_numbers = #tpu.dot_dimension_numbers<[1], [0], [0], [1], [0, 0, 1, 1], [], []>} : vector<256x128xf32>, vector<128x256xf32>, vector<256x256xf32> -> vector<256x256xf32>
    %c0_8 = arith.constant 0 : index
    %c0_9 = arith.constant 0 : index
    %14 = vector.load %arg4[%c0_8, %c0_9] : memref<256x256xf32, #tpu.memory_space<vmem>>, vector<256x256xf32>
    tpu.vector_store %arg4[%c0_8, %c0_9], %13 {strides = array<i32>} : memref<256x256xf32, #tpu.memory_space<vmem>>, vector<256x256xf32>,
    %cst_10 = arith.constant 1.000000e+00 : f32
    %15 = vector.broadcast %cst_10 : f32 to vector<1x256xf32>
    %c0_11 = arith.constant 0 : index
    %c0_12 = arith.constant 0 : index
    %16 = vector.load %arg5[%c0_11, %c0_12] : memref<2x256xf32, #tpu.memory_space<vmem>>, vector<1x256xf32>
    %cst_13 = arith.constant dense<0.000000e+00> : vector<1x256xf32>
    %17 = tpu.matmul %15, %13, %cst_13 {dimension_numbers = #tpu.dot_dimension_numbers<[1], [0], [0], [1], [0, 0, 1, 1], [], []>} : vector<1x256xf32>, vector<256x256xf32>, vector<1x256xf32> -> vector<1x256xf32>
    %18 = arith.addf %16, %17 : vector<1x256xf32>
    %c0_14 = arith.constant 0 : index
    %c0_15 = arith.constant 0 : index
    %19 = vector.load %arg5[%c0_14, %c0_15] : memref<2x256xf32, #tpu.memory_space<vmem>>, vector<1x256xf32>
    tpu.vector_store %arg5[%c0_14, %c0_15], %18 {strides = array<i32>} : memref<2x256xf32, #tpu.memory_space<vmem>>, vector<1x256xf32>,
    %c1_16 = arith.constant 1 : index
    %c0_17 = arith.constant 0 : index
    %20 = vector.load %arg5[%c1_16, %c0_17] : memref<2x256xf32, #tpu.memory_space<vmem>>, vector<1x256xf32>
    %21 = arith.mulf %13, %13 : vector<256x256xf32>
    %cst_18 = arith.constant dense<0.000000e+00> : vector<1x256xf32>
    %22 = tpu.matmul %15, %21, %cst_18 {dimension_numbers = #tpu.dot_dimension_numbers<[1], [0], [0], [1], [0, 0, 1, 1], [], []>} : vector<1x256xf32>, vector<256x256xf32>, vector<1x256xf32> -> vector<1x256xf32>
    %23 = arith.addf %20, %22 : vector<1x256xf32>
    %c1_19 = arith.constant 1 : index
    %c0_20 = arith.constant 0 : index
    %24 = vector.load %arg5[%c1_19, %c0_20] : memref<2x256xf32, #tpu.memory_space<vmem>>, vector<1x256xf32>
    tpu.vector_store %arg5[%c1_19, %c0_20], %23 {strides = array<i32>} : memref<2x256xf32, #tpu.memory_space<vmem>>, vector<1x256xf32>,
    return
  }
  func.func @transform_0(%arg0: i32) -> (i32, i32) {
    %c0_i32 = arith.constant 0 : i32
    %c0_i32_0 = arith.constant 0 : i32
    return %arg0, %c0_i32 : i32, i32
  }
  func.func @transform_1(%arg0: i32) -> (i32, i32) {
    %c0_i32 = arith.constant 0 : i32
    %c0_i32_0 = arith.constant 0 : i32
    %c0_i32_1 = arith.constant 0 : i32
    return %c0_i32, %c0_i32_0 : i32, i32
  }
  func.func @transform_2(%arg0: i32) -> (i32, i32) {
    %c0_i32 = arith.constant 0 : i32
    %c0_i32_0 = arith.constant 0 : i32
    %c0_i32_1 = arith.constant 0 : i32
    return %c0_i32, %c0_i32_0 : i32, i32
  }
  func.func @transform_3(%arg0: i32) -> (i32, i32) {
    %c0_i32 = arith.constant 0 : i32
    %c0_i32_0 = arith.constant 0 : i32
    return %arg0, %c0_i32 : i32, i32
  }
  func.func @transform_4(%arg0: i32) -> (i32, i32) {
    %c0_i32 = arith.constant 0 : i32
    %c0_i32_0 = arith.constant 0 : i32
    %c0_i32_1 = arith.constant 0 : i32
    return %c0_i32, %c0_i32_0 : i32, i32
  }
}

module attributes {stable_mosaic.version = 11 : i64} {
  func.func @_final_apply_kernel(%arg0: i32, %arg1: memref<256x256xf32, #tpu.memory_space<vmem>>, %arg2: memref<2x256xf32, #tpu.memory_space<vmem>>, %arg3: memref<256x256xf32, #tpu.memory_space<vmem>>) attributes {dimension_semantics = [#tpu.dimension_semantics<parallel>], iteration_bounds = array<i64: 2>, scalar_prefetch = 0 : i64, scratch_operands = 0 : i64, tpu.core_type = #tpu.core_type<tc>, window_params = [{transform_indices = @transform_0, window_bounds = array<i64: 256, 256>}, {pipeline_mode = #tpu.pipeline_mode<synchronous>, transform_indices = @transform_1, window_bounds = array<i64: 2, 256>}, {transform_indices = @transform_2, window_bounds = array<i64: 256, 256>}]} {
    %c0 = arith.constant 0 : index
    %c0_0 = arith.constant 0 : index
    %0 = vector.load %arg1[%c0, %c0_0] : memref<256x256xf32, #tpu.memory_space<vmem>>, vector<256x256xf32>
    %c0_1 = arith.constant 0 : index
    %c0_2 = arith.constant 0 : index
    %1 = vector.load %arg2[%c0_1, %c0_2] : memref<2x256xf32, #tpu.memory_space<vmem>>, vector<1x256xf32>
    %2 = vector.broadcast %1 : vector<1x256xf32> to vector<256x256xf32>
    %3 = arith.mulf %0, %2 : vector<256x256xf32>
    %c1 = arith.constant 1 : index
    %c0_3 = arith.constant 0 : index
    %4 = vector.load %arg2[%c1, %c0_3] : memref<2x256xf32, #tpu.memory_space<vmem>>, vector<1x256xf32>
    %5 = vector.broadcast %4 : vector<1x256xf32> to vector<256x256xf32>
    %6 = arith.addf %3, %5 : vector<256x256xf32>
    %c0_4 = arith.constant 0 : index
    %c0_5 = arith.constant 0 : index
    %7 = vector.load %arg3[%c0_4, %c0_5] : memref<256x256xf32, #tpu.memory_space<vmem>>, vector<256x256xf32>
    tpu.vector_store %arg3[%c0_4, %c0_5], %6 {strides = array<i32>} : memref<256x256xf32, #tpu.memory_space<vmem>>, vector<256x256xf32>,
    return
  }
  func.func @transform_0(%arg0: i32) -> (i32, i32) {
    %c0_i32 = arith.constant 0 : i32
    %c0_i32_0 = arith.constant 0 : i32
    return %arg0, %c0_i32 : i32, i32
  }
  func.func @transform_1(%arg0: i32) -> (i32, i32) {
    %c0_i32 = arith.constant 0 : i32
    %c0_i32_0 = arith.constant 0 : i32
    %c0_i32_1 = arith.constant 0 : i32
    return %c0_i32, %c0_i32_0 : i32, i32
  }
  func.func @transform_2(%arg0: i32) -> (i32, i32) {
    %c0_i32 = arith.constant 0 : i32
    %c0_i32_0 = arith.constant 0 : i32
    return %arg0, %c0_i32 : i32, i32
  }
}

</mosaic_0001>

<bundles_post_ra>
// kernel: recover_channel.7
= control target key start
LH: loop header
LB: loop body
LE: loop exit
PB: predicated region body
PF: predicated region fallthrough
CT: control target
= control target key end

     0   :  { %s1293_s15 = smov 0   ;;  %s2417_s0 = inlined_call_operand.vmem [shape: f32[512,256], index: 0, kind: input, shape index: {}]   ;;  %s2418_s1 = inlined_call_operand.vmem [shape: f32[2,256], index: 1, kind: input, shape index: {}]   ;;  %s2419_s2 = inlined_call_operand.vmem [shape: f32[256,128], index: 2, kind: input, shape index: {}]   ;;  %s2420_s3 = inlined_call_operand.vmem [shape: f32[512,128], index: 3, kind: output, shape index: {0}]   ;;  %s2421_s4 = inlined_call_operand.vmem [shape: f32[2,128], index: 4, kind: output, shape index: {1}]  }
   0x1 LB: > { %s1017_s16 = sadd.s32 4294967295, %s1263_s15   ;;  %p1021_p0 = scmp.ge.s32.totalorder %s1263_s15, 1  ;;  %s1263_s15 = sphi %s1293_s15, %s15_s15  }
   0x2   : > { %p162_p1 = scmp.lt.s32.totalorder %s1263_s15, 3 }
   0x4   : > { %p163_p2 = pnand %p1021_p0, %p162_p1 }
   0x6   : > { %166 = sbr.rel (%p163_p2) target bundleno = 692 (0x2b4), region = 32 }
   0xd   : > { %s1022_s17 = sshll.u32 %s1017_s16, 5  ;;  %v268_v0 = vlaneseq  ;;  %v266_v1 = vld [vmem:[%s2418_s1] ss:$2 sm:$0x3]  ;;  %p1028_p4 = scmp.ne.s32.totalorder %s1017_s16, 0 }
   0xe   : > { %p190_p3 = scmp.lt.s32.totalorder %s1022_s17, 63  ;;  %v1027_v3 = vld [vmem:[%s2418_s1 + $0x1] ss:$2 sm:$0x3] }
   0xf   : > { %v269_v2 = vshrl.u32 %v268_v0, 7 }
  0x10   : > { %s2561_s17 = smov (!%p190_p3, %s1022_s17), 63 }
  0x11   : > { %v270_v4 = vsub.s32 0, %v269_v2  ;;  %v274_v5 = vsub.s32 1, %v269_v2  ;;  %s1031_s22 = sshll.u32 %s2561_s17, 4  ;;  %s1026_s23 = sshll.u32 %s2561_s17, 3 }
  0x12   : > { %s1312_s26 = scalar_lea.vmem %s2417_s0, %s1031_s22  ;;  %s1317_s29 = scalar_lea.vmem %s2420_s3, %s1026_s23 }
  0x13   : > { %v1319_v6 = vrot.slane %v266_v1, %v270_v4  ;;  %v1321_v7 = vrot.slane %v266_v1, %v274_v5  ;;  %v1323_v8 = vrot.slane %v1027_v3, %v270_v4  ;;  %v202_v9 = vld [vmem:[%s1312_s26] sm:$0xff]  ;;  %v203_v10 = vld [vmem:[%s1312_s26 + $0x8] sm:$0xff]  ;;  %v204_v11 = vld [vmem:[%s1312_s26 + $0x10] sm:$0xff]  ;;  %v1328_v12 = vrot.slane %v1027_v3, %v274_v5 }
  0x14   : > { %v205_v13 = vld [vmem:[%s1312_s26 + $0x18] sm:$0xff]  ;;  %v206_v14 = vld [vmem:[%s1312_s26 + $0x20] sm:$0xff]  ;;  %v207_v15 = vld [vmem:[%s1312_s26 + $0x28] sm:$0xff] }
  0x15   : > { %v278_v16 = vmul.f32 %v1319_v6, %v202_v9  ;;  %v279_v17 = vmul.f32 %v1321_v7, %v203_v10  ;;  %v280_v18 = vmul.f32 %v1319_v6, %v204_v11  ;;  %v208_v19 = vld [vmem:[%s1312_s26 + $0x30] sm:$0xff]  ;;  %v209_v20 = vld [vmem:[%s1312_s26 + $0x38] sm:$0xff]  ;;  %v210_v21 = vld [vmem:[%s1312_s26 + $0x40] sm:$0xff]  ;;  %v281_v22 = vmul.f32 %v1321_v7, %v205_v13 }
  0x16   : > { %v282_v23 = vmul.f32 %v1319_v6, %v206_v14  ;;  %v283_v24 = vmul.f32 %v1321_v7, %v207_v15  ;;  %v211_v25 = vld [vmem:[%s1312_s26 + $0x48] sm:$0xff]  ;;  %v212_v26 = vld [vmem:[%s1312_s26 + $0x50] sm:$0xff]  ;;  %v213_v27 = vld [vmem:[%s1312_s26 + $0x58] sm:$0xff]  ;;  %v284_v28 = vmul.f32 %v1319_v6, %v208_v19  ;;  %v285_v29 = vmul.f32 %v1321_v7, %v209_v20 }
  0x17   : > { %v286_v30 = vmul.f32 %v1319_v6, %v210_v21  ;;  %v1349_v31 = vadd.f32 %v1323_v8, %v278_v16  ;;  %v214_v32 = vld [vmem:[%s1312_s26 + $0x60] sm:$0xff]  ;;  %v215_v33 = vld [vmem:[%s1312_s26 + $0x68] sm:$0xff]  ;;  %v216_v34 = vld [vmem:[%s1312_s26 + $0x70] sm:$0xff]  ;;  %v287_v35 = vmul.f32 %v1321_v7, %v211_v25  ;;  %v1356_v36 = vmul.f32 %v1319_v6, %v212_v26 }
  0x18   : > { %v1359_v37 = vmul.f32 %v1321_v7, %v213_v27  ;;  %v1362_v38 = vadd.f32 %v1328_v12, %v279_v17  ;;  %v217_v39 = vld [vmem:[%s1312_s26 + $0x78] sm:$0xff]  ;;  %v218_v40 = vld [vmem:[%s1312_s26 + $0x80] sm:$0xff]  ;;  %v219_v41 = vld [vmem:[%s1312_s26 + $0x88] sm:$0xff]  ;;  %v1368_v42 = vmul.f32 %v1319_v6, %v214_v32  ;;  %v1371_v43 = vmul.f32 %v1321_v7, %v215_v33 }
  0x19   : > { %2429 = vst [vmem:[#allocation2_spill] sm:$0xff] %v1349_v31  ;;  %v1374_v44 = vmul.f32 %v1319_v6, %v216_v34  ;;  %v1377_v45 = vadd.f32 %v1323_v8, %v280_v18  ;;  %v220_v46 = vld [vmem:[%s1312_s26 + $0x90] sm:$0xff]  ;;  %v221_v47 = vld [vmem:[%s1312_s26 + $0x98] sm:$0xff]  ;;  %v222_v48 = vld [vmem:[%s1312_s26 + $0xa0] sm:$0xff]  ;;  %v1383_v49 = vmul.f32 %v1321_v7, %v217_v39  ;;  %v1386_v50 = vmul.f32 %v1319_v6, %v218_v40 }
  0x1a   : > { %2430 = vst [vmem:[#allocation3_spill] sm:$0xff] %v1362_v38  ;;  %v1389_v51 = vmul.f32 %v1321_v7, %v219_v41  ;;  %v1392_v52 = vadd.f32 %v1328_v12, %v281_v22  ;;  %v223_v53 = vld [vmem:[%s1312_s26 + $0xa8] sm:$0xff]  ;;  %v224_v54 = vld [vmem:[%s1312_s26 + $0xb0] sm:$0xff]  ;;  %v225_v55 = vld [vmem:[%s1312_s26 + $0xb8] sm:$0xff]  ;;  %v1398_v56 = vmul.f32 %v1319_v6, %v220_v46  ;;  %v1401_v57 = vmul.f32 %v1321_v7, %v221_v47 }
  0x1b   : > { %2431 = vst [vmem:[#allocation4_spill] sm:$0xff] %v1377_v45  ;;  %v1404_v58 = vmul.f32 %v1319_v6, %v222_v48  ;;  %v1407_v59 = vadd.f32 %v1323_v8, %v282_v23  ;;  %v226_v60 = vld [vmem:[%s1312_s26 + $0xc0] sm:$0xff]  ;;  %v227_v61 = vld [vmem:[%s1312_s26 + $0xc8] sm:$0xff]  ;;  %v228_v62 = vld [vmem:[%s1312_s26 + $0xd0] sm:$0xff]  ;;  %v1413_v63 = vmul.f32 %v1321_v7, %v223_v53  ;;  %v1416_v0 = vmul.f32 %v1319_v6, %v224_v54 }
  0x1c   : > { %2432 = vst [vmem:[#allocation5_spill] sm:$0xff] %v1392_v52  ;;  %v1419_v1 = vmul.f32 %v1321_v7, %v225_v55  ;;  %v1422_v2 = vadd.f32 %v1328_v12, %v283_v24  ;;  %v229_v3 = vld [vmem:[%s1312_s26 + $0xd8] sm:$0xff]  ;;  %v230_v4 = vld [vmem:[%s1312_s26 + $0xe0] sm:$0xff]  ;;  %v231_v5 = vld [vmem:[%s1312_s26 + $0xe8] sm:$0xff]  ;;  %v1428_v9 = vmul.f32 %v1319_v6, %v226_v60  ;;  %v1431_v10 = vmul.f32 %v1321_v7, %v227_v61 }
  0x1d   : > { %2433 = vst [vmem:[#allocation6_spill] sm:$0xff] %v1407_v59  ;;  %v1434_v11 = vmul.f32 %v1319_v6, %v228_v62  ;;  %v1437_v13 = vadd.f32 %v1323_v8, %v284_v28  ;;  %v232_v14 = vld [vmem:[%s1312_s26 + $0xf0] sm:$0xff]  ;;  %v233_v15 = vld [vmem:[%s1312_s26 + $0xf8] sm:$0xff]  ;;  %v234_v16 = vld [vmem:[%s1312_s26 + $0x100] sm:$0xff]  ;;  %v1443_v17 = vmul.f32 %v1321_v7, %v229_v3  ;;  %v1446_v18 = vmul.f32 %v1319_v6, %v230_v4 }
  0x1e   : > { %2434 = vst [vmem:[#allocation7_spill] sm:$0xff] %v1422_v2  ;;  %v1449_v19 = vmul.f32 %v1321_v7, %v231_v5  ;;  %v1452_v20 = vadd.f32 %v1328_v12, %v285_v29  ;;  %v235_v21 = vld [vmem:[%s1312_s26 + $0x108] sm:$0xff]  ;;  %v236_v22 = vld [vmem:[%s1312_s26 + $0x110] sm:$0xff]  ;;  %v237_v23 = vld [vmem:[%s1312_s26 + $0x118] sm:$0xff]  ;;  %v1458_v24 = vmul.f32 %v1319_v6, %v232_v14  ;;  %v1461_v25 = vmul.f32 %v1321_v7, %v233_v15 }
  0x1f   : > { %2435 = vst [vmem:[#allocation8_spill] sm:$0xff] %v1437_v13  ;;  %v1464_v26 = vmul.f32 %v1319_v6, %v234_v16  ;;  %v1467_v27 = vadd.f32 %v1323_v8, %v286_v30  ;;  %v238_v28 = vld [vmem:[%s1312_s26 + $0x120] sm:$0xff]  ;;  %v239_v29 = vld [vmem:[%s1312_s26 + $0x128] sm:$0xff]  ;;  %v240_v32 = vld [vmem:[%s1312_s26 + $0x130] sm:$0xff]  ;;  %v1473_v33 = vmul.f32 %v1321_v7, %v235_v21  ;;  %v1476_v34 = vmul.f32 %v1319_v6, %v236_v22 }
  0x20   : > { %2436 = vst [vmem:[#allocation9_spill] sm:$0xff] %v1452_v20  ;;  %v1479_v39 = vmul.f32 %v1321_v7, %v237_v23  ;;  %v1482_v40 = vadd.f32 %v1328_v12, %v287_v35  ;;  %v241_v30 = vld [vmem:[%s1312_s26 + $0x138] sm:$0xff]  ;;  %v242_v41 = vld [vmem:[%s1312_s26 + $0x140] sm:$0xff]  ;;  %v243_v46 = vld [vmem:[%s1312_s26 + $0x148] sm:$0xff]  ;;  %v1488_v47 = vmul.f32 %v1319_v6, %v238_v28  ;;  %v1491_v48 = vmul.f32 %v1321_v7, %v239_v29 }
  0x21   : > { %2437 = vst [vmem:[#allocation10_spill] sm:$0xff] %v1467_v27  ;;  %v1494_v53 = vmul.f32 %v1319_v6, %v240_v32  ;;  %v1498_v54 = vadd.f32 %v1323_v8, %v1356_v36  ;;  %v244_v35 = vld [vmem:[%s1312_s26 + $0x150] sm:$0xff]  ;;  %v245_v55 = vld [vmem:[%s1312_s26 + $0x158] sm:$0xff]  ;;  %v246_v60 = vld [vmem:[%s1312_s26 + $0x160] sm:$0xff]  ;;  %v1504_v61 = vmul.f32 %v1321_v7, %v241_v30  ;;  %v1507_v62 = vmul.f32 %v1319_v6, %v242_v41 }
  0x22   : > { %2438 = vst [vmem:[#allocation11_spill] sm:$0xff] %v1482_v40  ;;  %v1510_v3 = vmul.f32 %v1321_v7, %v243_v46  ;;  %v1514_v4 = vadd.f32 %v1328_v12, %v1359_v37  ;;  %v247_v36 = vld [vmem:[%s1312_s26 + $0x168] sm:$0xff]  ;;  %v248_v5 = vld [vmem:[%s1312_s26 + $0x170] sm:$0xff]  ;;  %v249_v14 = vld [vmem:[%s1312_s26 + $0x178] sm:$0xff]  ;;  %v1520_v15 = vmul.f32 %v1319_v6, %v244_v35  ;;  %v1523_v16 = vmul.f32 %v1321_v7, %v245_v55 }
  0x23   : > { %2439 = vst [vmem:[#allocation12_spill] sm:$0xff] %v1498_v54  ;;  %v1526_v21 = vmul.f32 %v1319_v6, %v246_v60  ;;  %v1530_v22 = vadd.f32 %v1323_v8, %v1368_v42  ;;  %v250_v37 = vld [vmem:[%s1312_s26 + $0x180] sm:$0xff]  ;;  %v251_v23 = vld [vmem:[%s1312_s26 + $0x188] sm:$0xff]  ;;  %v252_v28 = vld [vmem:[%s1312_s26 + $0x190] sm:$0xff]  ;;  %v1536_v29 = vmul.f32 %v1321_v7, %v247_v36  ;;  %v1539_v32 = vmul.f32 %v1319_v6, %v248_v5 }
  0x24   : > { %2440 = vst [vmem:[#allocation13_spill] sm:$0xff] %v1514_v4  ;;  %v1542_v30 = vmul.f32 %v1321_v7, %v249_v14  ;;  %v1546_v41 = vadd.f32 %v1328_v12, %v1371_v43  ;;  %v253_v42 = vld [vmem:[%s1312_s26 + $0x198] sm:$0xff]  ;;  %v254_v46 = vld [vmem:[%s1312_s26 + $0x1a0] sm:$0xff]  ;;  %v255_v35 = vld [vmem:[%s1312_s26 + $0x1a8] sm:$0xff]  ;;  %v326_v55 = vmul.f32 %v1319_v6, %v250_v37  ;;  %v327_v60 = vmul.f32 %v1321_v7, %v251_v23 }
  0x25   : > { %2441 = vst [vmem:[#allocation14_spill] sm:$0xff] %v1530_v22  ;;  %v328_v36 = vmul.f32 %v1319_v6, %v252_v28  ;;  %v1556_v5 = vadd.f32 %v1323_v8, %v1374_v44  ;;  %v256_v14 = vld [vmem:[%s1312_s26 + $0x1b0] sm:$0xff]  ;;  %v257_v43 = vld [vmem:[%s1312_s26 + $0x1b8] sm:$0xff]  ;;  %v329_v22 = vmul.f32 %v1321_v7, %v253_v42  ;;  %v330_v4 = vmul.f32 %v1319_v6, %v254_v46  ;;  %v259_v28 = vld [vmem:[%s1312_s26 + $0x1c8] sm:$0xff] }
  0x26   : > { %2442 = vst [vmem:[#allocation15_spill] sm:$0xff] %v1546_v41  ;;  %v258_v41 = vld [vmem:[%s1312_s26 + $0x1c0] sm:$0xff]  ;;  %v331_v37 = vmul.f32 %v1321_v7, %v255_v35  ;;  %v1566_v23 = vadd.f32 %v1328_v12, %v1383_v49  ;;  %v260_v54 = vld [vmem:[%s1312_s26 + $0x1d0] sm:$0xff]  ;;  %v261_v44 = vld [vmem:[%s1312_s26 + $0x1d8] sm:$0xff]  ;;  %v333_v40 = vmul.f32 %v1321_v7, %v257_v43  ;;  %v1576_v42 = vadd.f32 %v1323_v8, %v1386_v50 }
  0x27   : > { %2443 = vst [vmem:[#allocation16_spill] sm:$0xff] %v1556_v5  ;;  %v332_v5 = vmul.f32 %v1319_v6, %v256_v14  ;;  %v334_v27 = vmul.f32 %v1319_v6, %v258_v41  ;;  %v262_v46 = vld [vmem:[%s1312_s26 + $0x1e0] sm:$0xff]  ;;  %v263_v35 = vld [vmem:[%s1312_s26 + $0x1e8] sm:$0xff]  ;;  %v264_v20 = vld [vmem:[%s1312_s26 + $0x1f0] sm:$0xff]  ;;  %v335_v13 = vmul.f32 %v1321_v7, %v259_v28  ;;  %v336_v49 = vmul.f32 %v1319_v6, %v260_v54 }
  0x28   : > { %2444 = vst [vmem:[#allocation17_spill] sm:$0xff] %v1566_v23  ;;  %2445 = vst [vmem:[#allocation18_spill] sm:$0xff] %v1576_v42  ;;  %v337_v23 = vmul.f32 %v1321_v7, %v261_v44  ;;  %v1586_v14 = vadd.f32 %v1328_v12, %v1389_v51  ;;  %v265_v43 = vld [vmem:[%s1312_s26 + $0x1f8] sm:$0xff]  ;;  %v338_v41 = vmul.f32 %v1319_v6, %v262_v46 }
  0x29   : > { %v339_v2 = vmul.f32 %v1321_v7, %v263_v35  ;;  %v340_v50 = vmul.f32 %v1319_v6, %v264_v20  ;;  %v1594_v42 = vadd.f32 %v1323_v8, %v1398_v56  ;;  %v341_v28 = vmul.f32 %v1321_v7, %v265_v43 }
  0x2a   : > { %v1599_v54 = vadd.f32 %v1328_v12, %v1401_v57  ;;  %v1603_v51 = vadd.f32 %v1323_v8, %v1404_v58  ;;  %v1607_v44 = vadd.f32 %v1328_v12, %v1413_v63  ;;  %v1611_v6 = vadd.f32 %v1323_v8, %v1416_v0 }
  0x2b   : > { %v1615_v56 = vadd.f32 %v1328_v12, %v1419_v1  ;;  %v1619_v7 = vadd.f32 %v1323_v8, %v1428_v9  ;;  %v1623_v57 = vadd.f32 %v1328_v12, %v1431_v10  ;;  %v1627_v58 = vadd.f32 %v1323_v8, %v1434_v11 }
  0x2c   : > { %v1631_v63 = vadd.f32 %v1328_v12, %v1443_v17  ;;  %v1635_v0 = vadd.f32 %v1323_v8, %v1446_v18  ;;  %v1639_v1 = vadd.f32 %v1328_v12, %v1449_v19  ;;  %v1643_v9 = vadd.f32 %v1323_v8, %v1458_v24 }
  0x2d   : > { %v1647_v10 = vadd.f32 %v1328_v12, %v1461_v25  ;;  %v1651_v11 = vadd.f32 %v1323_v8, %v1464_v26  ;;  %v1655_v17 = vadd.f32 %v1328_v12, %v1473_v33  ;;  %v1659_v18 = vadd.f32 %v1323_v8, %v1476_v34 }
  0x2e   : > { %v1663_v19 = vadd.f32 %v1328_v12, %v1479_v39  ;;  %v1667_v20 = vadd.f32 %v1323_v8, %v1488_v47  ;;  %v1671_v24 = vadd.f32 %v1328_v12, %v1491_v48  ;;  %v1675_v25 = vadd.f32 %v1323_v8, %v1494_v53 }
  0x2f   : > { %v1679_v26 = vadd.f32 %v1328_v12, %v1504_v61  ;;  %v1683_v33 = vadd.f32 %v1323_v8, %v1507_v62  ;;  %v1687_v34 = vadd.f32 %v1328_v12, %v1510_v3  ;;  %v1691_v39 = vadd.f32 %v1323_v8, %v1520_v15 }
  0x30   : > { %v1695_v47 = vadd.f32 %v1328_v12, %v1523_v16  ;;  %v1699_v48 = vadd.f32 %v1323_v8, %v1526_v21  ;;  %v1703_v53 = vadd.f32 %v1328_v12, %v1536_v29  ;;  %v1707_v61 = vadd.f32 %v1323_v8, %v1539_v32 }
  0x31   : > { %v1711_v62 = vadd.f32 %v1328_v12, %v1542_v30  ;;  %v1714_v3 = vadd.f32 %v1323_v8, %v326_v55  ;;  %v1717_v15 = vadd.f32 %v1328_v12, %v327_v60  ;;  %v1720_v16 = vadd.f32 %v1323_v8, %v328_v36 }
  0x32   : > { %v1723_v21 = vadd.f32 %v1328_v12, %v329_v22  ;;  %v1726_v29 = vadd.f32 %v1323_v8, %v330_v4  ;;  %v1729_v32 = vadd.f32 %v1328_v12, %v331_v37  ;;  %v1732_v30 = vadd.f32 %v1323_v8, %v332_v5  ;;  %486 = sbr.rel (%p1028_p4) target bundleno = 58 (0x3a), region = 36 }
  0x33   : > { %v1735_v55 = vadd.f32 %v1328_v12, %v333_v40  ;;  %v1738_v60 = vadd.f32 %v1323_v8, %v334_v27  ;;  %v1741_v36 = vadd.f32 %v1328_v12, %v335_v13  ;;  %v1744_v22 = vadd.f32 %v1323_v8, %v336_v49 }
  0x34   : > { %v1747_v4 = vadd.f32 %v1328_v12, %v337_v23  ;;  %v1750_v37 = vadd.f32 %v1323_v8, %v338_v41  ;;  %v1753_v5 = vadd.f32 %v1328_v12, %v339_v2  ;;  %v1756_v40 = vadd.f32 %v1323_v8, %v340_v50 }
  0x35   : > { %v1759_v27 = vadd.f32 %v1328_v12, %v341_v28  ;;  %v461_v38 = vmax.f32 %v1691_v39, 0.0  ;;  %v462_v45 = vmax.f32 %v1695_v47, 0.0  ;;  %v463_v52 = vmax.f32 %v1699_v48, 0.0 }
  0x36   : > { %2446 = vst [vmem:[#allocation19_spill] sm:$0xff] %v1750_v37  ;;  %2447 = vst [vmem:[#allocation20_spill] sm:$0xff] %v1753_v5  ;;  %v2452_v37 = vld [vmem:[#allocation9_spill] sm:$0xff]  ;;  %v464_v59 = vmax.f32 %v1703_v53, 0.0  ;;  %v465_v41 = vmax.f32 %v1707_v61, 0.0  ;;  %v466_v2 = vmax.f32 %v1711_v62, 0.0 }
  0x37   : > { %2448 = vst [vmem:[#allocation21_spill] sm:$0xff] %v1756_v40  ;;  %2449 = vst [vmem:[#allocation22_spill] sm:$0xff] %v1759_v27  ;;  %v426_v8 = vmax.f32 %v2452_v37, 0.0  ;;  %v468_v12 = vmax.f32 %v1717_v15, 0.0  ;;  %v474_v43 = vmax.f32 %v1735_v55, 0.0  ;;  %v475_v35 = vmax.f32 %v1738_v60, 0.0 }
  0x38   : > { %v476_v23 = vmax.f32 %v1741_v36, 0.0  ;;  %v477_v13 = vmax.f32 %v1744_v22, 0.0  ;;  %v478_v46 = vmax.f32 %v1747_v4, 0.0  ;;  %v1265_v49 = vmov (!%p1028_p4), 0.0  }
  0x39   : > { %487 = vst [vmem:[%s2421_s4] sm:$0x3] %v1265_v49 }
  0x3a PF: > { %v488_v40 = vld [vmem:[%s2419_s2] sm:$0xff]  ;;  %v489_v28 = vld [vmem:[%s2419_s2 + $0x8] sm:$0xff]  ;;  %v490_v5 = vld [vmem:[%s2419_s2 + $0x10] sm:$0xff]  ;;  %689 = vmatprep.mubr.f32.mxu1 %v462_v45  ;;  %v1266_v47 = vmov 0.0|0.0   ;;  %v2503_v55 = vmax.f32 %v1586_v14, 0.0  ;;  %v2506_v36 = vmax.f32 %v1599_v54, 0.0 }
  0x3b   : > { %v2466_v50 = vld [vmem:[#allocation3_spill] sm:$0xff]  ;;  %1102 = vmatprep.subr.bf16.mxu0 %v1266_v47  ;;  %v1103_v49 = vpack.c.bf16 %v489_v28, %v488_v40  ;;  %v491_v27 = vld [vmem:[%s2419_s2 + $0x18] sm:$0xff]  ;;  %1214 = vmatprep.subr.bf16.mxu1 %v1266_v47  ;;  %v2476_v39 = vld [vmem:[#allocation6_spill] sm:$0xff]  ;;  %v2509_v60 = vmax.f32 %v1594_v42, 0.0  ;;  %v2512_v4 = vmax.f32 %v1607_v44, 0.0  ;;  %v2515_v22 = vmax.f32 %v1603_v51, 0.0 }
  0x3c   : > { %v2467_v37 = vmax.f32 %v2466_v50, 0.0  ;;  %v1106_v31 = vpack.c.bf16 %v491_v27, %v490_v5  ;;  %v493_v45 = vld [vmem:[%s2419_s2 + $0x28] sm:$0xff]  ;;  %v494_v27 = vld [vmem:[%s2419_s2 + $0x30] sm:$0xff]  ;;  %v495_v28 = vld [vmem:[%s2419_s2 + $0x38] sm:$0xff]  ;;  %v2519_v42 = vmax.f32 %v1611_v6, 0.0  ;;  %v2520_v53 = vmax.f32 %v1623_v57, 0.0 }
  0x3d   : > { %1104 = vmatpush1.bf16.msra.mxu0 %v1103_v49  ;;  %1230 = vmatpush1.bf16.msra.mxu1 %v1103_v49  ;;  %v1112_v5 = vpack.c.bf16 %v495_v28, %v494_v27  ;;  %v497_v50 = vld [vmem:[%s2419_s2 + $0x48] sm:$0xff]  ;;  %v500_v27 = vld [vmem:[%s2419_s2 + $0x60] sm:$0xff]  ;;  %v2479_v48 = vld [vmem:[#allocation8_spill] sm:$0xff]  ;;  %v2521_v44 = vmax.f32 %v1619_v7, 0.0  ;;  %v2523_v51 = vmax.f32 %v1627_v58, 0.0  ;;  %v2526_v6 = vmax.f32 %v1647_v10, 0.0 }
  0x3e   : > { %584 = vmatprep.mubr.f32.mxu0 %v2467_v37  ;;  %1105 = vmatprep.subr.bf16.mxu0 %v1266_v47  ;;  %v492_v37 = vld [vmem:[%s2419_s2 + $0x20] sm:$0xff]  ;;  %v501_v28 = vld [vmem:[%s2419_s2 + $0x68] sm:$0xff]  ;;  %v2488_v15 = vld [vmem:[#allocation13_spill] sm:$0xff]  ;;  %v2527_v57 = vmax.f32 %v1643_v9, 0.0  ;;  %v2528_v7 = vmax.f32 %v1655_v17, 0.0  ;;  %v2530_v58 = vmax.f32 %v1663_v19, 0.0 }
  0x3f   : > { %1215 = vmatprep.subr.bf16.mxu1 %v1266_v47  ;;  %v1109_v40 = vpack.c.bf16 %v493_v45, %v492_v37  ;;  %v498_v37 = vld [vmem:[%s2419_s2 + $0x50] sm:$0xff]  ;;  %v499_v45 = vld [vmem:[%s2419_s2 + $0x58] sm:$0xff]  ;;  %v2482_v62 = vld [vmem:[#allocation11_spill] sm:$0xff]  ;;  %v2533_v9 = vmax.f32 %v1667_v20, 0.0  ;;  %v2534_v10 = vmax.f32 %v1679_v26, 0.0  ;;  %v2536_v17 = vmax.f32 %v1687_v34, 0.0 }
  0x40   : > { %v2485_v61 = vld [vmem:[#allocation10_spill] sm:$0xff]  ;;  %v2510_v14 = vld [vmem:[#allocation19_spill] sm:$0xff]  ;;  %v2516_v54 = vld [vmem:[#allocation21_spill] sm:$0xff]  ;;  %v2537_v19 = vmax.f32 %v1683_v33, 0.0 }
  0x41   : > { %1107 = vmatpush1.bf16.msra.mxu0 %v1106_v31  ;;  %1231 = vmatpush1.bf16.msra.mxu1 %v1106_v31  ;;  %v496_v31 = vld [vmem:[%s2419_s2 + $0x40] sm:$0xff] }
  0x42   : > { %1108 = vmatprep.subr.bf16.mxu0 %v1266_v47  ;;  %1216 = vmatprep.subr.bf16.mxu1 %v1266_v47  ;;  %v1115_v49 = vpack.c.bf16 %v497_v50, %v496_v31  ;;  %v502_v31 = vld [vmem:[%s2419_s2 + $0x70] sm:$0xff]  ;;  %v503_v50 = vld [vmem:[%s2419_s2 + $0x78] sm:$0xff] }
  0x45   : > { %1110 = vmatpush1.bf16.msra.mxu0 %v1109_v40  ;;  %1232 = vmatpush1.bf16.msra.mxu1 %v1109_v40  ;;  %v1118_v40 = vpack.c.bf16 %v499_v45, %v498_v37  ;;  %v504_v37 = vld [vmem:[%s2419_s2 + $0x80] sm:$0xff]  ;;  %v505_v45 = vld [vmem:[%s2419_s2 + $0x88] sm:$0xff] }
  0x46   : > { %1111 = vmatprep.subr.bf16.mxu0 %v1266_v47  ;;  %1217 = vmatprep.subr.bf16.mxu1 %v1266_v47 }
  0x49   : > { %1113 = vmatpush1.bf16.msra.mxu0 %v1112_v5  ;;  %1233 = vmatpush1.bf16.msra.mxu1 %v1112_v5  ;;  %v1121_v5 = vpack.c.bf16 %v501_v28, %v500_v27  ;;  %v506_v27 = vld [vmem:[%s2419_s2 + $0x90] sm:$0xff]  ;;  %v507_v28 = vld [vmem:[%s2419_s2 + $0x98] sm:$0xff] }
  0x4a   : > { %1114 = vmatprep.subr.bf16.mxu0 %v1266_v47  ;;  %1218 = vmatprep.subr.bf16.mxu1 %v1266_v47 }
  0x4d   : > { %1116 = vmatpush1.bf16.msra.mxu0 %v1115_v49  ;;  %1234 = vmatpush1.bf16.msra.mxu1 %v1115_v49  ;;  %v1124_v49 = vpack.c.bf16 %v503_v50, %v502_v31  ;;  %v508_v31 = vld [vmem:[%s2419_s2 + $0xa0] sm:$0xff]  ;;  %v509_v50 = vld [vmem:[%s2419_s2 + $0xa8] sm:$0xff] }
  0x4e   : > { %1117 = vmatprep.subr.bf16.mxu0 %v1266_v47  ;;  %1219 = vmatprep.subr.bf16.mxu1 %v1266_v47 }
  0x51   : > { %1119 = vmatpush1.bf16.msra.mxu0 %v1118_v40  ;;  %1235 = vmatpush1.bf16.msra.mxu1 %v1118_v40  ;;  %v1127_v40 = vpack.c.bf16 %v505_v45, %v504_v37  ;;  %v510_v37 = vld [vmem:[%s2419_s2 + $0xb0] sm:$0xff]  ;;  %v511_v45 = vld [vmem:[%s2419_s2 + $0xb8] sm:$0xff] }
  0x52   : > { %1120 = vmatprep.subr.bf16.mxu0 %v1266_v47  ;;  %1220 = vmatprep.subr.bf16.mxu1 %v1266_v47 }
  0x55   : > { %1122 = vmatpush1.bf16.msra.mxu0 %v1121_v5  ;;  %1236 = vmatpush1.bf16.msra.mxu1 %v1121_v5  ;;  %v1130_v5 = vpack.c.bf16 %v507_v28, %v506_v27  ;;  %v512_v27 = vld [vmem:[%s2419_s2 + $0xc0] sm:$0xff]  ;;  %v513_v28 = vld [vmem:[%s2419_s2 + $0xc8] sm:$0xff] }
  0x56   : > { %1123 = vmatprep.subr.bf16.mxu0 %v1266_v47  ;;  %1221 = vmatprep.subr.bf16.mxu1 %v1266_v47 }
  0x59   : > { %1125 = vmatpush1.bf16.msra.mxu0 %v1124_v49  ;;  %1237 = vmatpush1.bf16.msra.mxu1 %v1124_v49  ;;  %v1133_v49 = vpack.c.bf16 %v509_v50, %v508_v31  ;;  %v514_v31 = vld [vmem:[%s2419_s2 + $0xd0] sm:$0xff]  ;;  %v515_v50 = vld [vmem:[%s2419_s2 + $0xd8] sm:$0xff] }
  0x5a   : > { %1126 = vmatprep.subr.bf16.mxu0 %v1266_v47  ;;  %1222 = vmatprep.subr.bf16.mxu1 %v1266_v47 }
  0x5d   : > { %1128 = vmatpush1.bf16.msra.mxu0 %v1127_v40  ;;  %1238 = vmatpush1.bf16.msra.mxu1 %v1127_v40  ;;  %v1136_v40 = vpack.c.bf16 %v511_v45, %v510_v37  ;;  %v516_v37 = vld [vmem:[%s2419_s2 + $0xe0] sm:$0xff]  ;;  %v517_v45 = vld [vmem:[%s2419_s2 + $0xe8] sm:$0xff] }
  0x5e   : > { %1129 = vmatprep.subr.bf16.mxu0 %v1266_v47  ;;  %1223 = vmatprep.subr.bf16.mxu1 %v1266_v47 }
  0x61   : > { %1131 = vmatpush1.bf16.msra.mxu0 %v1130_v5  ;;  %1239 = vmatpush1.bf16.msra.mxu1 %v1130_v5  ;;  %v1139_v5 = vpack.c.bf16 %v513_v28, %v512_v27  ;;  %v518_v27 = vld [vmem:[%s2419_s2 + $0xf0] sm:$0xff]  ;;  %v519_v28 = vld [vmem:[%s2419_s2 + $0xf8] sm:$0xff] }
  0x62   : > { %1132 = vmatprep.subr.bf16.mxu0 %v1266_v47  ;;  %1224 = vmatprep.subr.bf16.mxu1 %v1266_v47 }
  0x65   : > { %1134 = vmatpush1.bf16.msra.mxu0 %v1133_v49  ;;  %1240 = vmatpush1.bf16.msra.mxu1 %v1133_v49  ;;  %v1142_v49 = vpack.c.bf16 %v515_v50, %v514_v31  ;;  %v2468_v31 = vld [vmem:[#allocation2_spill] sm:$0xff] }
  0x66   : > { %1135 = vmatprep.subr.bf16.mxu0 %v1266_v47  ;;  %1225 = vmatprep.subr.bf16.mxu1 %v1266_v47  ;;  %v2469_v50 = vmax.f32 %v2468_v31, 0.0 }
  0x69   : > { %1137 = vmatpush1.bf16.msra.mxu0 %v1136_v40  ;;  %1241 = vmatpush1.bf16.msra.mxu1 %v1136_v40  ;;  %v1145_v40 = vpack.c.bf16 %v517_v45, %v516_v37  ;;  %v2472_v45 = vld [vmem:[#allocation4_spill] sm:$0xff] }
  0x6a   : > { %1138 = vmatprep.subr.bf16.mxu0 %v1266_v47  ;;  %1226 = vmatprep.subr.bf16.mxu1 %v1266_v47 }
  0x6d   : > { %1140 = vmatpush1.bf16.msra.mxu0 %v1139_v5  ;;  %1242 = vmatpush1.bf16.msra.mxu1 %v1139_v5  ;;  %v1148_v5 = vpack.c.bf16 %v519_v28, %v518_v27  ;;  %v2484_v28 = vmax.f32 %v1723_v21, 0.0  ;;  %v2494_v21 = vld [vmem:[#allocation15_spill] sm:$0xff] }
  0x6e   : > { %1141 = vmatprep.subr.bf16.mxu0 %v1266_v47  ;;  %1227 = vmatprep.subr.bf16.mxu1 %v1266_v47 }
  0x71   : > { %1143 = vmatpush1.bf16.msra.mxu0 %v1142_v49  ;;  %1243 = vmatpush1.bf16.msra.mxu1 %v1142_v49  ;;  %v2470_v49 = vld [vmem:[#allocation5_spill] sm:$0xff] }
  0x72   : > { %1144 = vmatprep.subr.bf16.mxu0 %v1266_v47  ;;  %1228 = vmatprep.subr.bf16.mxu1 %v1266_v47  ;;  %v2471_v37 = vmax.f32 %v2470_v49, 0.0  ;;  %v2495_v49 = vmax.f32 %v2494_v21, 0.0 }
  0x75   : > { %1146 = vmatpush1.bf16.msra.mxu0 %v1145_v40  ;;  %1244 = vmatpush1.bf16.msra.mxu1 %v1145_v40  ;;  %v2473_v40 = vmax.f32 %v2472_v45, 0.0  ;;  %v2498_v45 = vmax.f32 %v1732_v30, 0.0  ;;  %v2504_v30 = vld [vmem:[#allocation18_spill] sm:$0xff] }
  0x76   : > { %1147 = vmatprep.subr.bf16.mxu0 %v1266_v47  ;;  %1229 = vmatprep.subr.bf16.mxu1 %v1266_v47  ;;  %v2474_v47 = vld [vmem:[#allocation7_spill] sm:$0xff] }
  0x77   : > { %v2475_v27 = vmax.f32 %v2474_v47, 0.0 }
  0x79   : > { %1149 = vmatpush1.bf16.msra.mxu0 %v1148_v5  ;;  %1245 = vmatpush1.bf16.msra.mxu1 %v1148_v5  ;;  %v2490_v5 = vmax.f32 %v1729_v32, 0.0  ;;  %v2499_v32 = vld [vmem:[#allocation17_spill] sm:$0xff] }
  0x7c   : > { %585 = vmatmul.mubr.f32.vlgmr.msra.gmra.mrb[0].mxu0 %v2469_v50  ;;  %690 = vmatmul.mubr.f32.vlgmr.msra.gmra.mrb[0].mxu1 %v461_v38  ;;  %v2477_v38 = vmax.f32 %v2476_v39, 0.0  ;;  %v2493_v50 = vmax.f32 %v1726_v29, 0.0  ;;  %v2501_v29 = vld [vmem:[#allocation16_spill] sm:$0xff] }
  0x7d   : > { %589 = vmatprep.mubr.f32.mxu0 %v2471_v37  ;;  %694 = vmatprep.mubr.f32.mxu1 %v464_v59  ;;  %v2481_v59 = vmax.f32 %v1714_v3, 0.0  ;;  %v2491_v3 = vld [vmem:[#allocation12_spill] sm:$0xff]  ;;  %v2502_v47 = vmax.f32 %v2501_v29, 0.0 }
  0x7e   : > { %v2492_v31 = vmax.f32 %v2491_v3, 0.0 }
  0x80   : > { %590 = vmatmul.mubr.f32.gmra.mrb[2].mxu0 %v2473_v40  ;;  %695 = vmatmul.mubr.f32.gmra.mrb[2].mxu1 %v463_v52  ;;  %v2480_v52 = vmax.f32 %v2479_v48, 0.0  ;;  %v2500_v40 = vmax.f32 %v2499_v32, 0.0  ;;  %v2522_v48 = vmax.f32 %v1631_v63, 0.0  ;;  %v2529_v63 = vmax.f32 %v1651_v11, 0.0 }
  0x81   : > { %594 = vmatprep.mubr.f32.mxu0 %v2475_v27  ;;  %699 = vmatprep.mubr.f32.mxu1 %v466_v2  ;;  %v2483_v2 = vmax.f32 %v2482_v62, 0.0  ;;  %v2535_v11 = vmax.f32 %v1675_v25, 0.0 }
  0x84   : > { %595 = vmatmul.mubr.f32.gmra.mrb[4].mxu0 %v2477_v38  ;;  %700 = vmatmul.mubr.f32.gmra.mrb[4].mxu1 %v465_v41  ;;  %v2486_v41 = vmax.f32 %v2485_v61, 0.0  ;;  %v2518_v38 = vmax.f32 %v1615_v56, 0.0  ;;  %v2525_v56 = vmax.f32 %v1635_v0, 0.0  ;;  %v2531_v0 = vmax.f32 %v1659_v18, 0.0 }
  0x85   : > { %599 = vmatprep.mubr.f32.mxu0 %v426_v8  ;;  %704 = vmatprep.mubr.f32.mxu1 %v468_v12  ;;  %v2487_v8 = vmax.f32 %v1720_v16, 0.0  ;;  %v2489_v12 = vmax.f32 %v2488_v15, 0.0  ;;  %v2496_v16 = vld [vmem:[#allocation14_spill] sm:$0xff]  ;;  %v2427_v18 = vmov 1.0  }
  0x86   : > { %v2497_v37 = vmax.f32 %v2496_v16, 0.0 }
  0x88   : > { %600 = vmatmul.mubr.f32.gmra.mrb[6].mxu0 %v2480_v52  ;;  %705 = vmatmul.mubr.f32.gmra.mrb[6].mxu1 %v2481_v59  ;;  %v2524_v52 = vmax.f32 %v1639_v1, 0.0  ;;  %v2532_v1 = vmax.f32 %v1671_v24, 0.0 }
  0x89   : > { %604 = vmatprep.mubr.f32.mxu0 %v2483_v2  ;;  %709 = vmatprep.mubr.f32.mxu1 %v2484_v28 }
  0x8c   : > { %605 = vmatmul.mubr.f32.gmra.mrb[8].mxu0 %v2486_v41  ;;  %710 = vmatmul.mubr.f32.gmra.mrb[8].mxu1 %v2487_v8 }
  0x8d   : > { %609 = vmatprep.mubr.f32.mxu0 %v2489_v12  ;;  %714 = vmatprep.mubr.f32.mxu1 %v2490_v5 }
  0x90   : > { %610 = vmatmul.mubr.f32.gmra.mrb[10].mxu0 %v2492_v31  ;;  %715 = vmatmul.mubr.f32.gmra.mrb[10].mxu1 %v2493_v50 }
  0x91   : > { %614 = vmatprep.mubr.f32.mxu0 %v2495_v49  ;;  %719 = vmatprep.mubr.f32.mxu1 %v474_v43  ;;  %v2505_v43 = vmax.f32 %v2504_v30, 0.0 }
  0x94   : > { %615 = vmatmul.mubr.f32.gmra.mrb[12].mxu0 %v2497_v37  ;;  %720 = vmatmul.mubr.f32.gmra.mrb[12].mxu1 %v2498_v45 }
  0x95   : > { %619 = vmatprep.mubr.f32.mxu0 %v2500_v40  ;;  %724 = vmatprep.mubr.f32.mxu1 %v476_v23  ;;  %v2507_v23 = vld [vmem:[#allocation20_spill] sm:$0xff] }
  0x96   : > { %v2508_v27 = vmax.f32 %v2507_v23, 0.0 }
  0x98   : > { %620 = vmatmul.mubr.f32.gmra.mrb[14].mxu0 %v2502_v47  ;;  %725 = vmatmul.mubr.f32.gmra.mrb[14].mxu1 %v475_v35  ;;  %v2511_v35 = vmax.f32 %v2510_v14, 0.0 }
  0x99   : > { %624 = vmatprep.mubr.f32.mxu0 %v2503_v55  ;;  %729 = vmatprep.mubr.f32.mxu1 %v478_v46  ;;  %v2513_v46 = vld [vmem:[#allocation22_spill] sm:$0xff] }
  0x9a   : > { %v2514_v39 = vmax.f32 %v2513_v46, 0.0 }
  0x9c   : > { %625 = vmatmul.mubr.f32.gmra.mrb[16].mxu0 %v2505_v43  ;;  %730 = vmatmul.mubr.f32.gmra.mrb[16].mxu1 %v477_v13  ;;  %v2517_v13 = vmax.f32 %v2516_v54, 0.0 }
  0x9d   : > { %629 = vmatprep.mubr.f32.mxu0 %v2506_v36  ;;  %734 = vmatprep.mubr.f32.mxu1 %v2508_v27 }
  0xa0   : > { %630 = vmatmul.mubr.f32.gmra.mrb[18].mxu0 %v2509_v60  ;;  %735 = vmatmul.mubr.f32.gmra.mrb[18].mxu1 %v2511_v35 }
  0xa1   : > { %634 = vmatprep.mubr.f32.mxu0 %v2512_v4  ;;  %739 = vmatprep.mubr.f32.mxu1 %v2514_v39 }
  0xa4   : > { %635 = vmatmul.mubr.f32.gmra.mrb[20].mxu0 %v2515_v22  ;;  %740 = vmatmul.mubr.f32.gmra.mrb[20].mxu1 %v2517_v13 }
  0xa5   : > { %639 = vmatprep.mubr.f32.mxu0 %v2518_v38  ;;  %842 = vmatprep.mubr.f32.mxu1 %v2427_v18 }
  0xa8   : > { %640 = vmatmul.mubr.f32.gmra.mrb[22].mxu0 %v2519_v42 }
  0xa9   : > { %644 = vmatprep.mubr.f32.mxu0 %v2520_v53 }
  0xac   : > { %645 = vmatmul.mubr.f32.gmra.mrb[24].mxu0 %v2521_v44 }
  0xad   : > { %649 = vmatprep.mubr.f32.mxu0 %v2522_v48 }
  0xb0   : > { %650 = vmatmul.mubr.f32.gmra.mrb[26].mxu0 %v2523_v51 }
  0xb1   : > { %654 = vmatprep.mubr.f32.mxu0 %v2524_v52 }
  0xb4   : > { %655 = vmatmul.mubr.f32.gmra.mrb[28].mxu0 %v2525_v56 }
  0xb5   : > { %659 = vmatprep.mubr.f32.mxu0 %v2526_v6 }
  0xb8   : > { %660 = vmatmul.mubr.f32.gmra.mrb[30].mxu0 %v2527_v57 }
  0xb9   : > { %664 = vmatprep.mubr.f32.mxu0 %v2528_v7 }
  0xbc   : > { %665 = vmatmul.mubr.f32.gmra.mrb[32].mxu0 %v2529_v63 }
  0xbd   : > { %669 = vmatprep.mubr.f32.mxu0 %v2530_v58 }
  0xc0   : > { %670 = vmatmul.mubr.f32.gmra.mrb[34].mxu0 %v2531_v0 }
  0xc1   : > { %674 = vmatprep.mubr.f32.mxu0 %v2532_v1 }
  0xc4   : > { %675 = vmatmul.mubr.f32.gmra.mrb[36].mxu0 %v2533_v9 }
  0xc5   : > { %679 = vmatprep.mubr.f32.mxu0 %v2534_v10 }
  0xc8   : > { %680 = vmatmul.mubr.f32.gmra.mrb[38].mxu0 %v2535_v11 }
  0xc9   : > { %684 = vmatprep.mubr.f32.mxu0 %v2536_v17 }
  0xcc   : > { %685 = vmatmul.mubr.f32.gmra.mrb[40].mxu0 %v2537_v19 }
 0x14f   : > { %v2085_v24 = vpop.f32.mrb[0].mxu0  ;;  %v2087_v20 = vpop.f32.mrb[0].mxu1 }
 0x150   : > { %745 = vst [vmem:[%s1317_s29] sm:$0xff] %v2085_v24  ;;  %v588_v26 = vpop.f32.mrb[1].mxu0  ;;  %766 = vst [vmem:[%s1317_s29 + $0xa8] sm:$0xff] %v2087_v20  ;;  %v693_v25 = vpop.f32.mrb[1].mxu1  ;;  %v2099_v59 = vmul.f32 %v2085_v24, %v2085_v24 }
 0x153   : > { %v2093_v34 = vpop.f32.mrb[2].mxu0  ;;  %v2095_v33 = vpop.f32.mrb[2].mxu1 }
 0x154   : > { %746 = vst [vmem:[%s1317_s29 + $0x8] sm:$0xff] %v2093_v34  ;;  %v1152_v62 = vpack.c.bf16 %v2093_v34, %v2085_v24  ;;  %v2107_v2 = vmul.f32 %v2093_v34, %v2093_v34  ;;  %v593_v28 = vpop.f32.mrb[3].mxu0  ;;  %767 = vst [vmem:[%s1317_s29 + $0xb0] sm:$0xff] %v2095_v33  ;;  %v698_v61 = vpop.f32.mrb[3].mxu1  ;;  %v2115_v8 = vmul.f32 %v2095_v33, %v2095_v33 }
 0x157   : > { %v2117_v15 = vpop.f32.mrb[4].mxu0  ;;  %v2119_v12 = vpop.f32.mrb[4].mxu1 }
 0x158   : > { %747 = vst [vmem:[%s1317_s29 + $0x10] sm:$0xff] %v2117_v15  ;;  %v598_v5 = vpop.f32.mrb[5].mxu0  ;;  %768 = vst [vmem:[%s1317_s29 + $0xb8] sm:$0xff] %v2119_v12  ;;  %v2129_v31 = vmul.f32 %v2119_v12, %v2119_v12  ;;  %v703_v50 = vpop.f32.mrb[5].mxu1  ;;  %v2139_v37 = vmul.f32 %v2117_v15, %v2117_v15 }
 0x15b   : > { %v2133_v49 = vpop.f32.mrb[6].mxu0  ;;  %v2135_v16 = vpop.f32.mrb[6].mxu1 }
 0x15c   : > { %748 = vst [vmem:[%s1317_s29 + $0x18] sm:$0xff] %v2133_v49  ;;  %v2147_v32 = vmul.f32 %v2133_v49, %v2133_v49  ;;  %v603_v40 = vpop.f32.mrb[7].mxu0  ;;  %769 = vst [vmem:[%s1317_s29 + $0xc0] sm:$0xff] %v2135_v16  ;;  %v708_v29 = vpop.f32.mrb[7].mxu1  ;;  %v2155_v55 = vmul.f32 %v2135_v16, %v2135_v16 }
 0x15f   : > { %v2157_v30 = vpop.f32.mrb[8].mxu0  ;;  %v2159_v43 = vpop.f32.mrb[8].mxu1 }
 0x160   : > { %749 = vst [vmem:[%s1317_s29 + $0x20] sm:$0xff] %v2157_v30  ;;  %v608_v36 = vpop.f32.mrb[9].mxu0  ;;  %770 = vst [vmem:[%s1317_s29 + $0xc8] sm:$0xff] %v2159_v43  ;;  %v2169_v27 = vmul.f32 %v2159_v43, %v2159_v43  ;;  %v713_v60 = vpop.f32.mrb[9].mxu1  ;;  %v2179_v46 = vmul.f32 %v2157_v30, %v2157_v30 }
 0x163   : > { %v2173_v35 = vpop.f32.mrb[10].mxu0  ;;  %v2175_v4 = vpop.f32.mrb[10].mxu1 }
 0x164   : > { %750 = vst [vmem:[%s1317_s29 + $0x28] sm:$0xff] %v2173_v35  ;;  %v2187_v22 = vmul.f32 %v2173_v35, %v2173_v35  ;;  %v613_v54 = vpop.f32.mrb[11].mxu0  ;;  %771 = vst [vmem:[%s1317_s29 + $0xd0] sm:$0xff] %v2175_v4  ;;  %v718_v13 = vpop.f32.mrb[11].mxu1  ;;  %v2195_v42 = vmul.f32 %v2175_v4, %v2175_v4 }
 0x167   : > { %v2197_v53 = vpop.f32.mrb[12].mxu0  ;;  %v2199_v44 = vpop.f32.mrb[12].mxu1 }
 0x168   : > { %751 = vst [vmem:[%s1317_s29 + $0x30] sm:$0xff] %v2197_v53  ;;  %v618_v48 = vpop.f32.mrb[13].mxu0  ;;  %772 = vst [vmem:[%s1317_s29 + $0xd8] sm:$0xff] %v2199_v44  ;;  %v2209_v52 = vmul.f32 %v2199_v44, %v2199_v44  ;;  %v723_v56 = vpop.f32.mrb[13].mxu1  ;;  %v2219_v63 = vmul.f32 %v2197_v53, %v2197_v53 }
 0x16b   : > { %v2213_v57 = vpop.f32.mrb[14].mxu0  ;;  %v2215_v7 = vpop.f32.mrb[14].mxu1 }
 0x16c   : > { %752 = vst [vmem:[%s1317_s29 + $0x38] sm:$0xff] %v2213_v57  ;;  %v2227_v0 = vmul.f32 %v2213_v57, %v2213_v57  ;;  %v623_v1 = vpop.f32.mrb[15].mxu0  ;;  %773 = vst [vmem:[%s1317_s29 + $0xe0] sm:$0xff] %v2215_v7  ;;  %v728_v9 = vpop.f32.mrb[15].mxu1  ;;  %v2235_v11 = vmul.f32 %v2215_v7, %v2215_v7 }
 0x16f   : > { %v2237_v17 = vpop.f32.mrb[16].mxu0  ;;  %v2239_v19 = vpop.f32.mrb[16].mxu1 }
 0x170   : > { %753 = vst [vmem:[%s1317_s29 + $0x40] sm:$0xff] %v2237_v17  ;;  %v628_v26 = vpop.f32.mrb[17].mxu0  ;;  %774 = vst [vmem:[%s1317_s29 + $0xe8] sm:$0xff] %v2239_v19  ;;  %v2249_v28 = vmul.f32 %v2239_v19, %v2239_v19  ;;  %v733_v61 = vpop.f32.mrb[17].mxu1  ;;  %v2259_v29 = vmul.f32 %v2237_v17, %v2237_v17 }
 0x173   : > { %v2253_v50 = vpop.f32.mrb[18].mxu0  ;;  %v2255_v40 = vpop.f32.mrb[18].mxu1 }
 0x174   : > { %754 = vst [vmem:[%s1317_s29 + $0x48] sm:$0xff] %v2253_v50  ;;  %v2267_v60 = vmul.f32 %v2253_v50, %v2253_v50  ;;  %v633_v54 = vpop.f32.mrb[19].mxu0  ;;  %775 = vst [vmem:[%s1317_s29 + $0xf0] sm:$0xff] %v2255_v40  ;;  %v738_v13 = vpop.f32.mrb[19].mxu1  ;;  %v2275_v56 = vmul.f32 %v2255_v40, %v2255_v40 }
 0x177   : > { %v2277_v1 = vpop.f32.mrb[20].mxu0  ;;  %v2279_v9 = vpop.f32.mrb[20].mxu1 }
 0x178   : > { %755 = vst [vmem:[%s1317_s29 + $0x50] sm:$0xff] %v2277_v1  ;;  %v638_v26 = vpop.f32.mrb[21].mxu0  ;;  %776 = vst [vmem:[%s1317_s29 + $0xf8] sm:$0xff] %v2279_v9  ;;  %v2289_v54 = vmul.f32 %v2279_v9, %v2279_v9  ;;  %v743_v13 = vpop.f32.mrb[21].mxu1  ;;  %v2297_v48 = vmul.f32 %v2277_v1, %v2277_v1 }
 0x17b   : > { %v2293_v6 = vpop.f32.mrb[22].mxu0 }
 0x17c   : > { %756 = vst [vmem:[%s1317_s29 + $0x58] sm:$0xff] %v2293_v6  ;;  %v1172_v26 = vpack.c.bf16 %v2293_v6, %v2277_v1  ;;  %v2305_v14 = vmul.f32 %v2293_v6, %v2293_v6  ;;  %v643_v13 = vpop.f32.mrb[23].mxu0 }
 0x17f   : > { %v646_v10 = vpop.f32.mrb[24].mxu0 }
 0x180   : > { %757 = vst [vmem:[%s1317_s29 + $0x60] sm:$0xff] %v646_v10  ;;  %v648_v21 = vpop.f32.mrb[25].mxu0  ;;  %v2310_v47 = vmul.f32 %v646_v10, %v646_v10 }
 0x183   : > { %v651_v38 = vpop.f32.mrb[26].mxu0 }
 0x184   : > { %758 = vst [vmem:[%s1317_s29 + $0x68] sm:$0xff] %v651_v38  ;;  %v1176_v41 = vpack.c.bf16 %v651_v38, %v646_v10  ;;  %v2313_v18 = vmul.f32 %v651_v38, %v651_v38  ;;  %v653_v1 = vpop.f32.mrb[27].mxu0 }
 0x187   : > { %v656_v13 = vpop.f32.mrb[28].mxu0 }
 0x188   : > { %759 = vst [vmem:[%s1317_s29 + $0x70] sm:$0xff] %v656_v13  ;;  %v658_v5 = vpop.f32.mrb[29].mxu0  ;;  %v2318_v25 = vmul.f32 %v656_v13, %v656_v13 }
 0x18b   : > { %v661_v61 = vpop.f32.mrb[30].mxu0 }
 0x18c   : > { %760 = vst [vmem:[%s1317_s29 + $0x78] sm:$0xff] %v661_v61  ;;  %v1180_v21 = vpack.c.bf16 %v661_v61, %v656_v13  ;;  %v2321_v51 = vmul.f32 %v661_v61, %v661_v61  ;;  %v663_v36 = vpop.f32.mrb[31].mxu0 }
 0x18e   : > { %v1212_v38 = vpack.c.bf16 %v2321_v51, %v2318_v25 }
 0x18f   : > { %v666_v10 = vpop.f32.mrb[32].mxu0 }
 0x190   : > { %761 = vst [vmem:[%s1317_s29 + $0x80] sm:$0xff] %v666_v10  ;;  %v668_v1 = vpop.f32.mrb[33].mxu0  ;;  %v867_v23 = vmul.f32 %v666_v10, %v666_v10 }
 0x193   : > { %v671_v6 = vpop.f32.mrb[34].mxu0 }
 0x194   : > { %762 = vst [vmem:[%s1317_s29 + $0x88] sm:$0xff] %v671_v6  ;;  %v1150_v5 = vpack.c.bf16 %v671_v6, %v666_v10  ;;  %v868_v58 = vmul.f32 %v671_v6, %v671_v6  ;;  %v673_v3 = vpop.f32.mrb[35].mxu0 }
 0x195   : > { %v2538_v3 = vpack.c.bf16 %v2133_v49, %v2117_v15  ;;  %v2541_v15 = vpack.c.bf16 %v2213_v57, %v2197_v53  ;;  %v2542_v49 = vpack.c.bf16 %v2159_v43, %v2135_v16  ;;  %v2547_v16 = vmov 1.0  }
 0x196   : > { %1151 = vmatprep.subr.bf16.mxu1 %v1150_v5  ;;  %v1182_v39 = vpack.c.bf16 %v868_v58, %v867_v23  ;;  %v872_v23 = vmul.f32 %v2087_v20, %v2087_v20  ;;  %v2540_v5 = vpack.c.bf16 %v2119_v12, %v2095_v33  ;;  %v2545_v33 = vpack.c.bf16 %v2239_v19, %v2215_v7 }
 0x197   : > { %v676_v61 = vpop.f32.mrb[36].mxu0  ;;  %1153 = vmatpush3.bf16.msra.mxu1 %v1152_v62  ;;  %v2546_v12 = vpack.c.bf16 %v2279_v9, %v2255_v40  ;;  %v2548_v43 = vpack.c.bf16 %v2107_v2, %v2099_v59  ;;  %v2552_v59 = vpack.c.bf16 %v2227_v0, %v2219_v63  ;;  %v2553_v2 = vpack.c.bf16 %v2169_v27, %v2155_v55 }
 0x198   : > { %763 = vst [vmem:[%s1317_s29 + $0x90] sm:$0xff] %v676_v61  ;;  %v678_v51 = vpop.f32.mrb[37].mxu0  ;;  %v869_v36 = vmul.f32 %v676_v61, %v676_v61  ;;  %v2558_v55 = vpack.c.bf16 %v2313_v18, %v2310_v47  ;;  %v2559_v27 = vpack.c.bf16 %v2289_v54, %v2275_v56  ;;  %v850_v47 = vld [vmem:[%s2421_s4 + $0x1] sm:$0x1] }
 0x19b   : > { %v681_v25 = vpop.f32.mrb[38].mxu0 }
 0x19c   : > { %764 = vst [vmem:[%s1317_s29 + $0x98] sm:$0xff] %v681_v25  ;;  %v1154_v13 = vpack.c.bf16 %v681_v25, %v676_v61  ;;  %v870_v1 = vmul.f32 %v681_v25, %v681_v25  ;;  %v683_v45 = vpop.f32.mrb[39].mxu0 }
 0x19d   : > { %v2539_v45 = vpack.c.bf16 %v2173_v35, %v2157_v30  ;;  %v2544_v30 = vpack.c.bf16 %v2199_v44, %v2175_v4  ;;  %v2549_v35 = vpack.c.bf16 %v2147_v32, %v2139_v37  ;;  %v2551_v4 = vpack.c.bf16 %v2129_v31, %v2115_v8 }
 0x19e   : > { %1155 = vmatprep.subr.bf16.mxu1 %v1154_v13  ;;  %v1186_v10 = vpack.c.bf16 %v870_v1, %v869_v36  ;;  %v2554_v37 = vpack.c.bf16 %v2267_v60, %v2259_v29  ;;  %v2555_v32 = vpack.c.bf16 %v2209_v52, %v2195_v42  ;;  %v2556_v8 = vpack.c.bf16 %v2305_v14, %v2297_v48  ;;  %v777_v14 = vld [vmem:[%s2421_s4] sm:$0x1] }
 0x19f   : > { %v686_v6 = vpop.f32.mrb[40].mxu0  ;;  %1157 = vmatpush3.bf16.msra.mxu1 %v2538_v3  ;;  %v2557_v31 = vpack.c.bf16 %v2249_v28, %v2235_v11 }
 0x1a0   : > { %765 = vst [vmem:[%s1317_s29 + $0xa0] sm:$0xff] %v686_v6  ;;  %v1158_v24 = vpack.c.bf16 %v2087_v20, %v686_v6  ;;  %v871_v34 = vmul.f32 %v686_v6, %v686_v6  ;;  %v688_v62 = vpop.f32.mrb[41].mxu0  ;;  %v2543_v20 = vpack.c.bf16 %v2253_v50, %v2237_v17 }
 0x1a2   : > { %1159 = vmatprep.subr.bf16.mxu1 %v1158_v24  ;;  %v1190_v58 = vpack.c.bf16 %v872_v23, %v871_v34 }
 0x1a3   : > { %1161 = vmatpush3.bf16.msra.mxu1 %v2539_v45 }
 0x1a4   : > { %1163 = vmatprep.subr.bf16.mxu1 %v2540_v5 }
 0x1a7   : > { %1165 = vmatpush3.bf16.msra.mxu1 %v2541_v15 }
 0x1a8   : > { %1167 = vmatprep.subr.bf16.mxu1 %v2542_v49 }
 0x1ab   : > { %1169 = vmatpush3.bf16.msra.mxu1 %v2543_v20 }
 0x1ac   : > { %1171 = vmatprep.subr.bf16.mxu1 %v2544_v30 }
 0x1af   : > { %1173 = vmatpush3.bf16.msra.mxu1 %v1172_v26 }
 0x1b0   : > { %1175 = vmatprep.subr.bf16.mxu1 %v2545_v33 }
 0x1b3   : > { %1177 = vmatpush3.bf16.msra.mxu1 %v1176_v41  ;;  %v2550_v41 = vpack.c.bf16 %v2187_v22, %v2179_v46 }
 0x1b4   : > { %1179 = vmatprep.subr.bf16.mxu1 %v2546_v12 }
 0x1b7   : > { %1181 = vmatpush3.bf16.msra.mxu1 %v1180_v21 }
 0x1b8   : > { %1183 = vmatprep.subr.bf16.mxu1 %v1182_v39 }
 0x1ba   : > { %843 = vmatmul.mubr.f32.vlgmr.msra.gmra.mrb[22].mxu1 %v2547_v16 }
 0x1bb   : > { %1185 = vmatpush3.bf16.msra.mxu1 %v2548_v43  ;;  %947 = vmatprep.mubr.f32.mxu1 %v2547_v16 }
 0x1bc   : > { %1187 = vmatprep.subr.bf16.mxu1 %v1186_v10 }
 0x1bf   : > { %1189 = vmatpush3.bf16.msra.mxu1 %v2549_v35 }
 0x1c0   : > { %1191 = vmatprep.subr.bf16.mxu1 %v1190_v58 }
 0x1c3   : > { %1193 = vmatpush3.bf16.msra.mxu1 %v2550_v41 }
 0x1c4   : > { %1195 = vmatprep.subr.bf16.mxu1 %v2551_v4 }
 0x1c7   : > { %1197 = vmatpush3.bf16.msra.mxu1 %v2552_v59 }
 0x1c8   : > { %1199 = vmatprep.subr.bf16.mxu1 %v2553_v2 }
 0x1cb   : > { %1201 = vmatpush3.bf16.msra.mxu1 %v2554_v37 }
 0x1cc   : > { %1203 = vmatprep.subr.bf16.mxu1 %v2555_v32 }
 0x1cf   : > { %1205 = vmatpush3.bf16.msra.mxu1 %v2556_v8 }
 0x1d0   : > { %1207 = vmatprep.subr.bf16.mxu1 %v2557_v31 }
 0x1d3   : > { %1209 = vmatpush3.bf16.msra.mxu1 %v2558_v55 }
 0x1d4   : > { %1211 = vmatprep.subr.bf16.mxu1 %v2559_v27 }
 0x1d7   : > { %1213 = vmatpush3.bf16.msra.mxu1 %v1212_v38 }
 0x1da   : > { %948 = vmatmul.mubr.f32.vlgmr.msra.gmra.mrb[24].mxu1 %v2547_v16 }
 0x28d   : > { %v1064_v46 = vpop.f32.mrb[22].mxu1 }
 0x28e   : > { %v1065_v39 = vpop.f32.mrb[23].mxu1 }
 0x28f   : > { %v1066_v22 = vadd.f32 %v1065_v39, %v1064_v46 }
 0x291   : > { %v848_v42 = vadd.f32 %v1066_v22, %v777_v14 }
 0x293   : > { %849 = vst [vmem:[%s2421_s4] sm:$0x1] %v848_v42 }
 0x2ad   : > { %v1099_v18 = vpop.f32.mrb[24].mxu1 }
 0x2ae   : > { %v1100_v53 = vpop.f32.mrb[25].mxu1 }
 0x2af   : > { %v1101_v44 = vadd.f32 %v1100_v53, %v1099_v18 }
 0x2b1   : > { %v953_v52 = vadd.f32 %v1101_v44, %v850_v47 }
 0x2b3   : > { %954 = vst [vmem:[%s2421_s4 + $0x1] sm:$0x1] %v953_v52 }
 0x2b4 PF: > { %s15_s15 = sadd.s32 1, %s1263_s15  }
 0x2b5   : > { %p12_p5 = scmp.ge.s32.totalorder %s15_s15, 4  }
 0x2b7   :  { %14 = sbr.rel (!%p12_p5) target bundleno = 1 (0x1), region = 75 }

// kernel: recover_channel.8
= control target key start
LH: loop header
LB: loop body
LE: loop exit
PB: predicated region body
PF: predicated region fallthrough
CT: control target
= control target key end

     0   :  { %s1241_s15 = smov 0   ;;  %s1995_s0 = inlined_call_operand.vmem [shape: f32[512,128], index: 0, kind: input, shape index: {}]   ;;  %s1996_s1 = inlined_call_operand.vmem [shape: f32[2,128], index: 1, kind: input, shape index: {}]   ;;  %s1997_s2 = inlined_call_operand.vmem [shape: f32[128,256], index: 2, kind: input, shape index: {}]   ;;  %s1998_s3 = inlined_call_operand.vmem [shape: f32[512,256], index: 3, kind: output, shape index: {0}]   ;;  %s1999_s4 = inlined_call_operand.vmem [shape: f32[2,256], index: 4, kind: output, shape index: {1}]  }
   0x1 LB: > { %s1014_s16 = sadd.s32 4294967295, %s1210_s15   ;;  %p1018_p0 = scmp.ge.s32.totalorder %s1210_s15, 1  ;;  %s1210_s15 = sphi %s1241_s15, %s15_s15  }
   0x2   : > { %p161_p1 = scmp.lt.s32.totalorder %s1210_s15, 3 }
   0x4   : > { %p162_p2 = pnand %p1018_p0, %p161_p1 }
   0x6   : > { %165 = sbr.rel (%p162_p2) target bundleno = 707 (0x2c3), region = 32 }
   0xd   : > { %s1019_s17 = sshll.u32 %s1014_s16, 5  ;;  %v1254_v0 = vld [vmem:[%s1996_s1] ss:$0 sm:$0xff]  ;;  %v1269_v1 = vld [vmem:[%s1996_s1 + $0x1] ss:$0 sm:$0xff]  ;;  %p1026_p4 = scmp.ne.s32.totalorder %s1014_s16, 0 }
   0xe   : > { %p189_p3 = scmp.lt.s32.totalorder %s1019_s17, 63 }
  0x10   : > { %s2081_s17 = smov (!%p189_p3, %s1019_s17), 63 }
  0x11   : > { %s1020_s18 = sshll.u32 %s2081_s17, 3  ;;  %s1031_s19 = sshll.u32 %s2081_s17, 4 }
  0x12   : > { %s1259_s24 = scalar_lea.vmem %s1995_s0, %s1020_s18  ;;  %s1264_s27 = scalar_lea.vmem %s1998_s3, %s1031_s19 }
  0x13   : > { %v201_v2 = vld [vmem:[%s1259_s24] sm:$0xff]  ;;  %v202_v3 = vld [vmem:[%s1259_s24 + $0x8] sm:$0xff]  ;;  %v203_v4 = vld [vmem:[%s1259_s24 + $0x10] sm:$0xff] }
  0x14   : > { %v204_v5 = vld [vmem:[%s1259_s24 + $0x18] sm:$0xff]  ;;  %v205_v6 = vld [vmem:[%s1259_s24 + $0x20] sm:$0xff]  ;;  %v206_v7 = vld [vmem:[%s1259_s24 + $0x28] sm:$0xff]  ;;  %v238_v8 = vmul.f32 %v1254_v0, %v201_v2  ;;  %v239_v9 = vmul.f32 %v1254_v0, %v202_v3  ;;  %v240_v10 = vmul.f32 %v1254_v0, %v203_v4 }
  0x15   : > { %v207_v11 = vld [vmem:[%s1259_s24 + $0x30] sm:$0xff]  ;;  %v208_v12 = vld [vmem:[%s1259_s24 + $0x38] sm:$0xff]  ;;  %v209_v13 = vld [vmem:[%s1259_s24 + $0x40] sm:$0xff]  ;;  %v241_v14 = vmul.f32 %v1254_v0, %v204_v5  ;;  %v242_v15 = vmul.f32 %v1254_v0, %v205_v6  ;;  %v243_v16 = vmul.f32 %v1254_v0, %v206_v7 }
  0x16   : > { %v210_v17 = vld [vmem:[%s1259_s24 + $0x48] sm:$0xff]  ;;  %v211_v18 = vld [vmem:[%s1259_s24 + $0x50] sm:$0xff]  ;;  %v212_v19 = vld [vmem:[%s1259_s24 + $0x58] sm:$0xff]  ;;  %v244_v20 = vmul.f32 %v1254_v0, %v207_v11  ;;  %v245_v21 = vmul.f32 %v1254_v0, %v208_v12  ;;  %v246_v22 = vmul.f32 %v1254_v0, %v209_v13  ;;  %v1293_v23 = vadd.f32 %v1269_v1, %v238_v8 }
  0x17   : > { %v213_v24 = vld [vmem:[%s1259_s24 + $0x60] sm:$0xff]  ;;  %v214_v25 = vld [vmem:[%s1259_s24 + $0x68] sm:$0xff]  ;;  %v215_v26 = vld [vmem:[%s1259_s24 + $0x70] sm:$0xff]  ;;  %v247_v27 = vmul.f32 %v1254_v0, %v210_v17  ;;  %v248_v28 = vmul.f32 %v1254_v0, %v211_v18  ;;  %v249_v29 = vmul.f32 %v1254_v0, %v212_v19  ;;  %v1302_v30 = vadd.f32 %v1269_v1, %v239_v9 }
  0x18   : > { %v216_v31 = vld [vmem:[%s1259_s24 + $0x78] sm:$0xff]  ;;  %v217_v32 = vld [vmem:[%s1259_s24 + $0x80] sm:$0xff]  ;;  %v218_v33 = vld [vmem:[%s1259_s24 + $0x88] sm:$0xff]  ;;  %v250_v34 = vmul.f32 %v1254_v0, %v213_v24  ;;  %v251_v35 = vmul.f32 %v1254_v0, %v214_v25  ;;  %v252_v36 = vmul.f32 %v1254_v0, %v215_v26  ;;  %v1311_v37 = vadd.f32 %v1269_v1, %v240_v10 }
  0x19   : > { %v219_v38 = vld [vmem:[%s1259_s24 + $0x90] sm:$0xff]  ;;  %v220_v39 = vld [vmem:[%s1259_s24 + $0x98] sm:$0xff]  ;;  %v221_v40 = vld [vmem:[%s1259_s24 + $0xa0] sm:$0xff]  ;;  %v253_v41 = vmul.f32 %v1254_v0, %v216_v31  ;;  %v254_v42 = vmul.f32 %v1254_v0, %v217_v32  ;;  %v255_v43 = vmul.f32 %v1254_v0, %v218_v33  ;;  %v1320_v44 = vadd.f32 %v1269_v1, %v241_v14 }
  0x1a   : > { %v222_v45 = vld [vmem:[%s1259_s24 + $0xa8] sm:$0xff]  ;;  %v223_v46 = vld [vmem:[%s1259_s24 + $0xb0] sm:$0xff]  ;;  %v224_v47 = vld [vmem:[%s1259_s24 + $0xb8] sm:$0xff]  ;;  %v256_v48 = vmul.f32 %v1254_v0, %v219_v38  ;;  %v257_v49 = vmul.f32 %v1254_v0, %v220_v39  ;;  %v258_v50 = vmul.f32 %v1254_v0, %v221_v40  ;;  %v1329_v51 = vadd.f32 %v1269_v1, %v242_v15 }
  0x1b   : > { %v225_v52 = vld [vmem:[%s1259_s24 + $0xc0] sm:$0xff]  ;;  %v226_v53 = vld [vmem:[%s1259_s24 + $0xc8] sm:$0xff]  ;;  %v227_v54 = vld [vmem:[%s1259_s24 + $0xd0] sm:$0xff]  ;;  %v259_v55 = vmul.f32 %v1254_v0, %v222_v45  ;;  %v260_v56 = vmul.f32 %v1254_v0, %v223_v46  ;;  %v261_v57 = vmul.f32 %v1254_v0, %v224_v47  ;;  %v1338_v58 = vadd.f32 %v1269_v1, %v243_v16 }
  0x1c   : > { %v228_v59 = vld [vmem:[%s1259_s24 + $0xd8] sm:$0xff]  ;;  %v229_v60 = vld [vmem:[%s1259_s24 + $0xe0] sm:$0xff]  ;;  %v230_v61 = vld [vmem:[%s1259_s24 + $0xe8] sm:$0xff]  ;;  %v262_v62 = vmul.f32 %v1254_v0, %v225_v52  ;;  %v263_v63 = vmul.f32 %v1254_v0, %v226_v53  ;;  %v264_v2 = vmul.f32 %v1254_v0, %v227_v54  ;;  %v1347_v3 = vadd.f32 %v1269_v1, %v244_v20 }
  0x1d   : > { %v231_v4 = vld [vmem:[%s1259_s24 + $0xf0] sm:$0xff]  ;;  %v232_v5 = vld [vmem:[%s1259_s24 + $0xf8] sm:$0xff]  ;;  %v265_v6 = vmul.f32 %v1254_v0, %v228_v59  ;;  %v266_v7 = vmul.f32 %v1254_v0, %v229_v60  ;;  %v267_v8 = vmul.f32 %v1254_v0, %v230_v61  ;;  %v1355_v9 = vadd.f32 %v1269_v1, %v245_v21 }
  0x1e   : > { %v268_v10 = vmul.f32 %v1254_v0, %v231_v4  ;;  %v269_v11 = vmul.f32 %v1254_v0, %v232_v5  ;;  %v1360_v12 = vadd.f32 %v1269_v1, %v246_v22  ;;  %v1363_v13 = vadd.f32 %v1269_v1, %v247_v27 }
  0x1f   : > { %v1366_v14 = vadd.f32 %v1269_v1, %v248_v28  ;;  %v1369_v15 = vadd.f32 %v1269_v1, %v249_v29  ;;  %v1372_v16 = vadd.f32 %v1269_v1, %v250_v34  ;;  %v1375_v17 = vadd.f32 %v1269_v1, %v251_v35 }
  0x20   : > { %v1378_v0 = vadd.f32 %v1269_v1, %v252_v36  ;;  %v1381_v18 = vadd.f32 %v1269_v1, %v253_v41  ;;  %v1384_v19 = vadd.f32 %v1269_v1, %v254_v42  ;;  %v1387_v20 = vadd.f32 %v1269_v1, %v255_v43 }
  0x21   : > { %v1390_v21 = vadd.f32 %v1269_v1, %v256_v48  ;;  %v1393_v22 = vadd.f32 %v1269_v1, %v257_v49  ;;  %v1396_v24 = vadd.f32 %v1269_v1, %v258_v50  ;;  %v1399_v25 = vadd.f32 %v1269_v1, %v259_v55 }
  0x22   : > { %v1402_v26 = vadd.f32 %v1269_v1, %v260_v56  ;;  %v1405_v27 = vadd.f32 %v1269_v1, %v261_v57  ;;  %v1408_v28 = vadd.f32 %v1269_v1, %v262_v62  ;;  %v1411_v29 = vadd.f32 %v1269_v1, %v263_v63 }
  0x23   : > { %v1414_v31 = vadd.f32 %v1269_v1, %v264_v2  ;;  %v1417_v32 = vadd.f32 %v1269_v1, %v265_v6  ;;  %v1420_v33 = vadd.f32 %v1269_v1, %v266_v7  ;;  %v1423_v34 = vadd.f32 %v1269_v1, %v267_v8  ;;  %342 = sbr.rel (%p1026_p4) target bundleno = 43 (0x2b), region = 36 }
  0x24   : > { %v1426_v35 = vadd.f32 %v1269_v1, %v268_v10  ;;  %v1429_v36 = vadd.f32 %v1269_v1, %v269_v11  ;;  %v307_v38 = vmax.f32 %v1293_v23, 0.0  ;;  %v308_v39 = vmax.f32 %v1302_v30, 0.0 }
  0x25   : > { %v309_v40 = vmax.f32 %v1311_v37, 0.0  ;;  %v310_v41 = vmax.f32 %v1320_v44, 0.0  ;;  %v311_v42 = vmax.f32 %v1329_v51, 0.0  ;;  %v312_v43 = vmax.f32 %v1338_v58, 0.0 }
  0x26   : > { %v313_v45 = vmax.f32 %v1347_v3, 0.0  ;;  %v314_v46 = vmax.f32 %v1355_v9, 0.0  ;;  %v315_v47 = vmax.f32 %v1360_v12, 0.0  ;;  %v316_v1 = vmax.f32 %v1363_v13, 0.0 }
  0x27   : > { %v317_v48 = vmax.f32 %v1366_v14, 0.0  ;;  %v318_v49 = vmax.f32 %v1369_v15, 0.0  ;;  %v319_v50 = vmax.f32 %v1372_v16, 0.0  ;;  %v320_v52 = vmax.f32 %v1375_v17, 0.0 }
  0x28   : > { %v321_v53 = vmax.f32 %v1378_v0, 0.0  ;;  %v322_v54 = vmax.f32 %v1381_v18, 0.0  ;;  %v323_v55 = vmax.f32 %v1384_v19, 0.0  ;;  %v324_v56 = vmax.f32 %v1387_v20, 0.0 }
  0x29   : > { %v325_v57 = vmax.f32 %v1390_v21, 0.0  ;;  %v1212_v63 = vmov (!%p1026_p4), 0.0  }
  0x2a   : > { %343 = vst [vmem:[%s1999_s4] sm:$0xf] %v1212_v63 }
  0x2b PF: > { %v345_v7 = vld [vmem:[%s1997_s2 + $0x8] sm:$0xff]  ;;  %v347_v10 = vld [vmem:[%s1997_s2 + $0x18] sm:$0xff]  ;;  %v344_v11 = vld [vmem:[%s1997_s2] sm:$0xff]  ;;  %v1213_v4 = vmov 0.0   ;;  %v2014_v23 = vmax.f32 %v1393_v22, 0.0  ;;  %v2015_v30 = vmax.f32 %v1396_v24, 0.0 }
  0x2c   : > { %v1032_v8 = vpack.c.bf16 %v347_v10, %v345_v7  ;;  %v346_v6 = vld [vmem:[%s1997_s2 + $0x10] sm:$0xff]  ;;  %v349_v63 = vld [vmem:[%s1997_s2 + $0x28] sm:$0xff]  ;;  %v351_v5 = vld [vmem:[%s1997_s2 + $0x38] sm:$0xff]  ;;  %440 = vmatprep.mubr.f32.mxu0 %v1213_v4  ;;  %v2016_v37 = vmax.f32 %v1399_v25, 0.0  ;;  %v2017_v44 = vmax.f32 %v1402_v26, 0.0  ;;  %v2018_v51 = vmax.f32 %v1405_v27, 0.0 }
  0x2d   : > { %v1034_v2 = vpack.c.bf16 %v346_v6, %v344_v11  ;;  %v1036_v62 = vpack.c.bf16 %v351_v5, %v349_v63  ;;  %v348_v7 = vld [vmem:[%s1997_s2 + $0x20] sm:$0xff]  ;;  %v350_v10 = vld [vmem:[%s1997_s2 + $0x30] sm:$0xff]  ;;  %v353_v61 = vld [vmem:[%s1997_s2 + $0x48] sm:$0xff]  ;;  %v2019_v58 = vmax.f32 %v1408_v28, 0.0  ;;  %v2020_v3 = vmax.f32 %v1411_v29, 0.0 }
  0x2e   : > { %1033 = vmatprep.subr.bf16.mxu0 %v1032_v8  ;;  %v355_v60 = vld [vmem:[%s1997_s2 + $0x58] sm:$0xff]  ;;  %v1038_v6 = vpack.c.bf16 %v350_v10, %v348_v7  ;;  %v352_v11 = vld [vmem:[%s1997_s2 + $0x40] sm:$0xff]  ;;  %v354_v63 = vld [vmem:[%s1997_s2 + $0x50] sm:$0xff]  ;;  %v2021_v9 = vmax.f32 %v1414_v31, 0.0  ;;  %v2022_v12 = vmax.f32 %v1417_v32, 0.0  ;;  %v2023_v13 = vmax.f32 %v1420_v33, 0.0 }
  0x2f   : > { %1035 = vmatpush1.bf16.msra.mxu0 %v1034_v2  ;;  %v1040_v5 = vpack.c.bf16 %v355_v60, %v353_v61  ;;  %v357_v8 = vld [vmem:[%s1997_s2 + $0x68] sm:$0xff]  ;;  %v359_v59 = vld [vmem:[%s1997_s2 + $0x78] sm:$0xff]  ;;  %v1042_v2 = vpack.c.bf16 %v354_v63, %v352_v11  ;;  %v356_v61 = vld [vmem:[%s1997_s2 + $0x60] sm:$0xff]  ;;  %v2024_v14 = vmax.f32 %v1423_v34, 0.0  ;;  %v2025_v15 = vmax.f32 %v1426_v35, 0.0 }
  0x30   : > { %1037 = vmatprep.subr.bf16.mxu0 %v1036_v62  ;;  %v1044_v60 = vpack.c.bf16 %v359_v59, %v357_v8  ;;  %v358_v62 = vld [vmem:[%s1997_s2 + $0x70] sm:$0xff]  ;;  %v361_v7 = vld [vmem:[%s1997_s2 + $0x88] sm:$0xff]  ;;  %v363_v10 = vld [vmem:[%s1997_s2 + $0x98] sm:$0xff]  ;;  %v2026_v16 = vmax.f32 %v1429_v36, 0.0  ;;  %v2000_v18 = vmov 1.0  }
  0x31   : > { %v1048_v59 = vpack.c.bf16 %v363_v10, %v361_v7  ;;  %v362_v11 = vld [vmem:[%s1997_s2 + $0x90] sm:$0xff]  ;;  %v365_v63 = vld [vmem:[%s1997_s2 + $0xa8] sm:$0xff]  ;;  %v367_v8 = vld [vmem:[%s1997_s2 + $0xb8] sm:$0xff]  ;;  %762 = vmatprep.mubr.f32.mxu1 %v2000_v18 }
  0x32   : > { %v369_v7 = vld [vmem:[%s1997_s2 + $0xc8] sm:$0xff]  ;;  %v371_v10 = vld [vmem:[%s1997_s2 + $0xd8] sm:$0xff] }
  0x33   : > { %1039 = vmatpush1.bf16.msra.mxu0 %v1038_v6  ;;  %v1046_v6 = vpack.c.bf16 %v358_v62, %v356_v61  ;;  %v364_v61 = vld [vmem:[%s1997_s2 + $0xa0] sm:$0xff]  ;;  %v366_v62 = vld [vmem:[%s1997_s2 + $0xb0] sm:$0xff] }
  0x34   : > { %1041 = vmatprep.subr.bf16.mxu0 %v1040_v5  ;;  %v360_v5 = vld [vmem:[%s1997_s2 + $0x80] sm:$0xff] }
  0x37   : > { %1043 = vmatpush1.bf16.msra.mxu0 %v1042_v2  ;;  %v1050_v2 = vpack.c.bf16 %v362_v11, %v360_v5  ;;  %v368_v5 = vld [vmem:[%s1997_s2 + $0xc0] sm:$0xff]  ;;  %v370_v11 = vld [vmem:[%s1997_s2 + $0xd0] sm:$0xff] }
  0x38   : > { %1045 = vmatprep.subr.bf16.mxu0 %v1044_v60  ;;  %v1052_v60 = vpack.c.bf16 %v367_v8, %v365_v63  ;;  %v373_v63 = vld [vmem:[%s1997_s2 + $0xe8] sm:$0xff]  ;;  %v375_v8 = vld [vmem:[%s1997_s2 + $0xf8] sm:$0xff] }
  0x3b   : > { %1047 = vmatpush1.bf16.msra.mxu0 %v1046_v6  ;;  %v1054_v6 = vpack.c.bf16 %v366_v62, %v364_v61  ;;  %v372_v61 = vld [vmem:[%s1997_s2 + $0xe0] sm:$0xff]  ;;  %v374_v62 = vld [vmem:[%s1997_s2 + $0xf0] sm:$0xff] }
  0x3c   : > { %1049 = vmatprep.subr.bf16.mxu0 %v1048_v59  ;;  %v1056_v59 = vpack.c.bf16 %v371_v10, %v369_v7  ;;  %v1062_v7 = vpack.c.bf16 %v374_v62, %v372_v61 }
  0x3f   : > { %1051 = vmatpush1.bf16.msra.mxu0 %v1050_v2  ;;  %v1058_v2 = vpack.c.bf16 %v370_v11, %v368_v5 }
  0x40   : > { %1053 = vmatprep.subr.bf16.mxu0 %v1052_v60  ;;  %v1060_v60 = vpack.c.bf16 %v375_v8, %v373_v63 }
  0x43   : > { %1055 = vmatpush1.bf16.msra.mxu0 %v1054_v6 }
  0x44   : > { %1057 = vmatprep.subr.bf16.mxu0 %v1056_v59 }
  0x47   : > { %1059 = vmatpush1.bf16.msra.mxu0 %v1058_v2 }
  0x48   : > { %1061 = vmatprep.subr.bf16.mxu0 %v1060_v60 }
  0x4b   : > { %1063 = vmatpush1.bf16.msra.mxu0 %v1062_v7 }
  0x4e   : > { %441 = vmatmul.mubr.f32.vlgmr.msra.gmra.mrb[0].mxu0 %v307_v38 }
  0x4f   : > { %446 = vmatprep.mubr.f32.mxu0 %v1213_v4 }
  0x52   : > { %447 = vmatmul.mubr.f32.gmra.mrb[2].mxu0 %v308_v39 }
  0x53   : > { %452 = vmatprep.mubr.f32.mxu0 %v1213_v4 }
  0x56   : > { %453 = vmatmul.mubr.f32.gmra.mrb[4].mxu0 %v309_v40 }
  0x57   : > { %458 = vmatprep.mubr.f32.mxu0 %v1213_v4 }
  0x5a   : > { %459 = vmatmul.mubr.f32.gmra.mrb[6].mxu0 %v310_v41 }
  0x5b   : > { %464 = vmatprep.mubr.f32.mxu0 %v1213_v4 }
  0x5e   : > { %465 = vmatmul.mubr.f32.gmra.mrb[8].mxu0 %v311_v42 }
  0x5f   : > { %470 = vmatprep.mubr.f32.mxu0 %v1213_v4 }
  0x62   : > { %471 = vmatmul.mubr.f32.gmra.mrb[10].mxu0 %v312_v43 }
  0x63   : > { %476 = vmatprep.mubr.f32.mxu0 %v1213_v4 }
  0x66   : > { %477 = vmatmul.mubr.f32.gmra.mrb[12].mxu0 %v313_v45 }
  0x67   : > { %482 = vmatprep.mubr.f32.mxu0 %v1213_v4 }
  0x6a   : > { %483 = vmatmul.mubr.f32.gmra.mrb[14].mxu0 %v314_v46 }
  0x6b   : > { %488 = vmatprep.mubr.f32.mxu0 %v1213_v4 }
  0x6e   : > { %489 = vmatmul.mubr.f32.gmra.mrb[16].mxu0 %v315_v47 }
  0x6f   : > { %494 = vmatprep.mubr.f32.mxu0 %v1213_v4 }
  0x72   : > { %495 = vmatmul.mubr.f32.gmra.mrb[18].mxu0 %v316_v1 }
  0x73   : > { %500 = vmatprep.mubr.f32.mxu0 %v1213_v4 }
  0x76   : > { %501 = vmatmul.mubr.f32.gmra.mrb[20].mxu0 %v317_v48 }
  0x77   : > { %506 = vmatprep.mubr.f32.mxu0 %v1213_v4 }
  0x7a   : > { %507 = vmatmul.mubr.f32.gmra.mrb[22].mxu0 %v318_v49 }
  0x7b   : > { %512 = vmatprep.mubr.f32.mxu0 %v1213_v4 }
  0x7e   : > { %513 = vmatmul.mubr.f32.gmra.mrb[24].mxu0 %v319_v50 }
  0x7f   : > { %518 = vmatprep.mubr.f32.mxu0 %v1213_v4 }
  0x82   : > { %519 = vmatmul.mubr.f32.gmra.mrb[26].mxu0 %v320_v52 }
  0x83   : > { %524 = vmatprep.mubr.f32.mxu0 %v1213_v4 }
  0x86   : > { %525 = vmatmul.mubr.f32.gmra.mrb[28].mxu0 %v321_v53 }
  0x87   : > { %530 = vmatprep.mubr.f32.mxu0 %v1213_v4 }
  0x8a   : > { %531 = vmatmul.mubr.f32.gmra.mrb[30].mxu0 %v322_v54 }
  0x8b   : > { %536 = vmatprep.mubr.f32.mxu0 %v1213_v4 }
  0x8e   : > { %537 = vmatmul.mubr.f32.gmra.mrb[32].mxu0 %v323_v55 }
  0x8f   : > { %542 = vmatprep.mubr.f32.mxu0 %v1213_v4 }
  0x92   : > { %543 = vmatmul.mubr.f32.gmra.mrb[34].mxu0 %v324_v56 }
  0x93   : > { %548 = vmatprep.mubr.f32.mxu0 %v1213_v4 }
  0x96   : > { %549 = vmatmul.mubr.f32.gmra.mrb[36].mxu0 %v325_v57 }
  0x97   : > { %554 = vmatprep.mubr.f32.mxu0 %v1213_v4 }
  0x9a   : > { %555 = vmatmul.mubr.f32.gmra.mrb[38].mxu0 %v2014_v23 }
  0x9b   : > { %560 = vmatprep.mubr.f32.mxu0 %v1213_v4 }
  0x9e   : > { %561 = vmatmul.mubr.f32.gmra.mrb[40].mxu0 %v2015_v30 }
  0x9f   : > { %566 = vmatprep.mubr.f32.mxu0 %v1213_v4 }
  0xa2   : > { %567 = vmatmul.mubr.f32.gmra.mrb[42].mxu0 %v2016_v37 }
  0xa3   : > { %572 = vmatprep.mubr.f32.mxu0 %v1213_v4 }
  0xa6   : > { %573 = vmatmul.mubr.f32.gmra.mrb[44].mxu0 %v2017_v44 }
  0xa7   : > { %578 = vmatprep.mubr.f32.mxu0 %v1213_v4 }
  0xaa   : > { %579 = vmatmul.mubr.f32.gmra.mrb[46].mxu0 %v2018_v51 }
  0xab   : > { %584 = vmatprep.mubr.f32.mxu0 %v1213_v4 }
  0xae   : > { %585 = vmatmul.mubr.f32.gmra.mrb[48].mxu0 %v2019_v58 }
  0xaf   : > { %590 = vmatprep.mubr.f32.mxu0 %v1213_v4 }
  0xb2   : > { %591 = vmatmul.mubr.f32.gmra.mrb[50].mxu0 %v2020_v3 }
  0xb3   : > { %596 = vmatprep.mubr.f32.mxu0 %v1213_v4 }
  0xb6   : > { %597 = vmatmul.mubr.f32.gmra.mrb[52].mxu0 %v2021_v9 }
  0xb7   : > { %602 = vmatprep.mubr.f32.mxu0 %v1213_v4 }
  0xba   : > { %603 = vmatmul.mubr.f32.gmra.mrb[54].mxu0 %v2022_v12 }
  0xbb   : > { %608 = vmatprep.mubr.f32.mxu0 %v1213_v4 }
  0xbe   : > { %609 = vmatmul.mubr.f32.gmra.mrb[56].mxu0 %v2023_v13 }
  0xbf   : > { %614 = vmatprep.mubr.f32.mxu0 %v1213_v4 }
  0xc2   : > { %615 = vmatmul.mubr.f32.gmra.mrb[58].mxu0 %v2024_v14 }
  0xc3   : > { %620 = vmatprep.mubr.f32.mxu0 %v1213_v4 }
  0xc6   : > { %621 = vmatmul.mubr.f32.gmra.mrb[60].mxu0 %v2025_v15 }
  0xc7   : > { %626 = vmatprep.mubr.f32.mxu0 %v1213_v4 }
  0xca   : > { %627 = vmatmul.mubr.f32.gmra.mrb[62].mxu0 %v2026_v16 }
 0x121   : > { %v442_v17 = vpop.f32.mrb[0].mxu0 }
 0x122   : > { %633 = vst [vmem:[%s1264_s27] sm:$0xff] %v442_v17  ;;  %v444_v0 = vpop.f32.mrb[1].mxu0  ;;  %v1663_v20 = vmul.f32 %v442_v17, %v442_v17 }
 0x123   : > { %634 = vst [vmem:[%s1264_s27 + $0x8] sm:$0xff] %v444_v0  ;;  %v1668_v25 = vmul.f32 %v444_v0, %v444_v0 }
 0x125   : > { %v448_v19 = vpop.f32.mrb[2].mxu0 }
 0x126   : > { %635 = vst [vmem:[%s1264_s27 + $0x10] sm:$0xff] %v448_v19  ;;  %v1666_v21 = vmul.f32 %v448_v19, %v448_v19  ;;  %v450_v22 = vpop.f32.mrb[3].mxu0  ;;  %v1066_v24 = vpack.c.bf16 %v448_v19, %v442_v17 }
 0x127   : > { %636 = vst [vmem:[%s1264_s27 + $0x18] sm:$0xff] %v450_v22  ;;  %v1671_v26 = vmul.f32 %v450_v22, %v450_v22  ;;  %v1064_v27 = vpack.c.bf16 %v450_v22, %v444_v0 }
 0x129   : > { %v454_v29 = vpop.f32.mrb[4].mxu0  ;;  %1065 = vmatprep.subr.bf16.mxu1 %v1064_v27 }
 0x12a   : > { %637 = vst [vmem:[%s1264_s27 + $0x20] sm:$0xff] %v454_v29  ;;  %v456_v32 = vpop.f32.mrb[5].mxu0  ;;  %1067 = vmatpush1.bf16.msra.mxu1 %v1066_v24  ;;  %v1679_v34 = vmul.f32 %v454_v29, %v454_v29 }
 0x12b   : > { %638 = vst [vmem:[%s1264_s27 + $0x28] sm:$0xff] %v456_v32  ;;  %v1684_v39 = vmul.f32 %v456_v32, %v456_v32 }
 0x12d   : > { %v460_v33 = vpop.f32.mrb[6].mxu0 }
 0x12e   : > { %639 = vst [vmem:[%s1264_s27 + $0x30] sm:$0xff] %v460_v33  ;;  %v1070_v35 = vpack.c.bf16 %v460_v33, %v454_v29  ;;  %v1682_v36 = vmul.f32 %v460_v33, %v460_v33  ;;  %v462_v38 = vpop.f32.mrb[7].mxu0 }
 0x12f   : > { %640 = vst [vmem:[%s1264_s27 + $0x38] sm:$0xff] %v462_v38  ;;  %v1068_v40 = vpack.c.bf16 %v462_v38, %v456_v32  ;;  %v1687_v41 = vmul.f32 %v462_v38, %v462_v38 }
 0x131   : > { %v466_v43 = vpop.f32.mrb[8].mxu0  ;;  %1069 = vmatprep.subr.bf16.mxu1 %v1068_v40 }
 0x132   : > { %641 = vst [vmem:[%s1264_s27 + $0x40] sm:$0xff] %v466_v43  ;;  %v468_v46 = vpop.f32.mrb[9].mxu0  ;;  %1071 = vmatpush1.bf16.msra.mxu1 %v1070_v35  ;;  %v1695_v1 = vmul.f32 %v466_v43, %v466_v43 }
 0x133   : > { %642 = vst [vmem:[%s1264_s27 + $0x48] sm:$0xff] %v468_v46  ;;  %v1700_v52 = vmul.f32 %v468_v46, %v468_v46 }
 0x135   : > { %v472_v47 = vpop.f32.mrb[10].mxu0 }
 0x136   : > { %643 = vst [vmem:[%s1264_s27 + $0x50] sm:$0xff] %v472_v47  ;;  %v1074_v48 = vpack.c.bf16 %v472_v47, %v466_v43  ;;  %v1698_v49 = vmul.f32 %v472_v47, %v472_v47  ;;  %v474_v50 = vpop.f32.mrb[11].mxu0 }
 0x137   : > { %644 = vst [vmem:[%s1264_s27 + $0x58] sm:$0xff] %v474_v50  ;;  %v1072_v53 = vpack.c.bf16 %v474_v50, %v468_v46  ;;  %v1703_v54 = vmul.f32 %v474_v50, %v474_v50 }
 0x139   : > { %v478_v56 = vpop.f32.mrb[12].mxu0  ;;  %1073 = vmatprep.subr.bf16.mxu1 %v1072_v53 }
 0x13a   : > { %645 = vst [vmem:[%s1264_s27 + $0x60] sm:$0xff] %v478_v56  ;;  %v480_v4 = vpop.f32.mrb[13].mxu0  ;;  %1075 = vmatpush1.bf16.msra.mxu1 %v1074_v48  ;;  %v1711_v6 = vmul.f32 %v478_v56, %v478_v56 }
 0x13b   : > { %646 = vst [vmem:[%s1264_s27 + $0x68] sm:$0xff] %v480_v4  ;;  %v1716_v63 = vmul.f32 %v480_v4, %v480_v4 }
 0x13d   : > { %v484_v10 = vpop.f32.mrb[14].mxu0 }
 0x13e   : > { %647 = vst [vmem:[%s1264_s27 + $0x70] sm:$0xff] %v484_v10  ;;  %v1078_v59 = vpack.c.bf16 %v484_v10, %v478_v56  ;;  %v1714_v5 = vmul.f32 %v484_v10, %v484_v10  ;;  %v486_v11 = vpop.f32.mrb[15].mxu0 }
 0x13f   : > { %648 = vst [vmem:[%s1264_s27 + $0x78] sm:$0xff] %v486_v11  ;;  %v1076_v8 = vpack.c.bf16 %v486_v11, %v480_v4  ;;  %v1719_v2 = vmul.f32 %v486_v11, %v486_v11 }
 0x141   : > { %v490_v61 = vpop.f32.mrb[16].mxu0  ;;  %1077 = vmatprep.subr.bf16.mxu1 %v1076_v8 }
 0x142   : > { %649 = vst [vmem:[%s1264_s27 + $0x80] sm:$0xff] %v490_v61  ;;  %v492_v7 = vpop.f32.mrb[17].mxu0  ;;  %1079 = vmatpush1.bf16.msra.mxu1 %v1078_v59  ;;  %v1727_v30 = vmul.f32 %v490_v61, %v490_v61 }
 0x143   : > { %650 = vst [vmem:[%s1264_s27 + $0x88] sm:$0xff] %v492_v7  ;;  %v1732_v58 = vmul.f32 %v492_v7, %v492_v7 }
 0x145   : > { %v496_v23 = vpop.f32.mrb[18].mxu0 }
 0x146   : > { %651 = vst [vmem:[%s1264_s27 + $0x90] sm:$0xff] %v496_v23  ;;  %v1082_v37 = vpack.c.bf16 %v496_v23, %v490_v61  ;;  %v1730_v44 = vmul.f32 %v496_v23, %v496_v23  ;;  %v498_v51 = vpop.f32.mrb[19].mxu0 }
 0x147   : > { %652 = vst [vmem:[%s1264_s27 + $0x98] sm:$0xff] %v498_v51  ;;  %v1080_v3 = vpack.c.bf16 %v498_v51, %v492_v7  ;;  %v1735_v9 = vmul.f32 %v498_v51, %v498_v51 }
 0x149   : > { %v502_v13 = vpop.f32.mrb[20].mxu0  ;;  %1081 = vmatprep.subr.bf16.mxu1 %v1080_v3 }
 0x14a   : > { %653 = vst [vmem:[%s1264_s27 + $0xa0] sm:$0xff] %v502_v13  ;;  %v504_v15 = vpop.f32.mrb[21].mxu0  ;;  %1083 = vmatpush1.bf16.msra.mxu1 %v1082_v37  ;;  %v1743_v17 = vmul.f32 %v502_v13, %v502_v13 }
 0x14b   : > { %654 = vst [vmem:[%s1264_s27 + $0xa8] sm:$0xff] %v504_v15  ;;  %v1748_v24 = vmul.f32 %v504_v15, %v504_v15 }
 0x14d   : > { %v508_v16 = vpop.f32.mrb[22].mxu0 }
 0x14e   : > { %655 = vst [vmem:[%s1264_s27 + $0xb0] sm:$0xff] %v508_v16  ;;  %v1086_v0 = vpack.c.bf16 %v508_v16, %v502_v13  ;;  %v1746_v19 = vmul.f32 %v508_v16, %v508_v16  ;;  %v510_v22 = vpop.f32.mrb[23].mxu0 }
 0x14f   : > { %656 = vst [vmem:[%s1264_s27 + $0xb8] sm:$0xff] %v510_v22  ;;  %v1084_v27 = vpack.c.bf16 %v510_v22, %v504_v15  ;;  %v1751_v29 = vmul.f32 %v510_v22, %v510_v22 }
 0x151   : > { %v514_v33 = vpop.f32.mrb[24].mxu0  ;;  %1085 = vmatprep.subr.bf16.mxu1 %v1084_v27 }
 0x152   : > { %657 = vst [vmem:[%s1264_s27 + $0xc0] sm:$0xff] %v514_v33  ;;  %v516_v38 = vpop.f32.mrb[25].mxu0  ;;  %1087 = vmatpush1.bf16.msra.mxu1 %v1086_v0  ;;  %v1759_v43 = vmul.f32 %v514_v33, %v514_v33 }
 0x153   : > { %658 = vst [vmem:[%s1264_s27 + $0xc8] sm:$0xff] %v516_v38  ;;  %v1764_v50 = vmul.f32 %v516_v38, %v516_v38 }
 0x155   : > { %v520_v40 = vpop.f32.mrb[26].mxu0 }
 0x156   : > { %659 = vst [vmem:[%s1264_s27 + $0xd0] sm:$0xff] %v520_v40  ;;  %v1090_v46 = vpack.c.bf16 %v520_v40, %v514_v33  ;;  %v1762_v47 = vmul.f32 %v520_v40, %v520_v40  ;;  %v522_v48 = vpop.f32.mrb[27].mxu0 }
 0x157   : > { %660 = vst [vmem:[%s1264_s27 + $0xd8] sm:$0xff] %v522_v48  ;;  %v1088_v53 = vpack.c.bf16 %v522_v48, %v516_v38  ;;  %v1767_v56 = vmul.f32 %v522_v48, %v522_v48 }
 0x159   : > { %v526_v10 = vpop.f32.mrb[28].mxu0  ;;  %1089 = vmatprep.subr.bf16.mxu1 %v1088_v53 }
 0x15a   : > { %661 = vst [vmem:[%s1264_s27 + $0xe0] sm:$0xff] %v526_v10  ;;  %v528_v11 = vpop.f32.mrb[29].mxu0  ;;  %1091 = vmatpush1.bf16.msra.mxu1 %v1090_v46  ;;  %v1775_v61 = vmul.f32 %v526_v10, %v526_v10 }
 0x15b   : > { %662 = vst [vmem:[%s1264_s27 + $0xe8] sm:$0xff] %v528_v11  ;;  %v1780_v51 = vmul.f32 %v528_v11, %v528_v11 }
 0x15d   : > { %v532_v8 = vpop.f32.mrb[30].mxu0 }
 0x15e   : > { %663 = vst [vmem:[%s1264_s27 + $0xf0] sm:$0xff] %v532_v8  ;;  %v1094_v7 = vpack.c.bf16 %v532_v8, %v526_v10  ;;  %v1778_v23 = vmul.f32 %v532_v8, %v532_v8  ;;  %v534_v37 = vpop.f32.mrb[31].mxu0 }
 0x15f   : > { %664 = vst [vmem:[%s1264_s27 + $0xf8] sm:$0xff] %v534_v37  ;;  %v1092_v3 = vpack.c.bf16 %v534_v37, %v528_v11  ;;  %v1783_v13 = vmul.f32 %v534_v37, %v534_v37 }
 0x161   : > { %v538_v16 = vpop.f32.mrb[32].mxu0  ;;  %1093 = vmatprep.subr.bf16.mxu1 %v1092_v3 }
 0x162   : > { %665 = vst [vmem:[%s1264_s27 + $0x100] sm:$0xff] %v538_v16  ;;  %v540_v22 = vpop.f32.mrb[33].mxu0  ;;  %1095 = vmatpush1.bf16.msra.mxu1 %v1094_v7  ;;  %v1791_v33 = vmul.f32 %v538_v16, %v538_v16 }
 0x163   : > { %666 = vst [vmem:[%s1264_s27 + $0x108] sm:$0xff] %v540_v22  ;;  %v1796_v48 = vmul.f32 %v540_v22, %v540_v22 }
 0x165   : > { %v544_v27 = vpop.f32.mrb[34].mxu0 }
 0x166   : > { %667 = vst [vmem:[%s1264_s27 + $0x110] sm:$0xff] %v544_v27  ;;  %v1098_v38 = vpack.c.bf16 %v544_v27, %v538_v16  ;;  %v1794_v40 = vmul.f32 %v544_v27, %v544_v27  ;;  %v546_v46 = vpop.f32.mrb[35].mxu0 }
 0x167   : > { %668 = vst [vmem:[%s1264_s27 + $0x118] sm:$0xff] %v546_v46  ;;  %v1096_v53 = vpack.c.bf16 %v546_v46, %v540_v22  ;;  %v1799_v10 = vmul.f32 %v546_v46, %v546_v46 }
 0x169   : > { %v550_v8 = vpop.f32.mrb[36].mxu0  ;;  %1097 = vmatprep.subr.bf16.mxu1 %v1096_v53 }
 0x16a   : > { %669 = vst [vmem:[%s1264_s27 + $0x120] sm:$0xff] %v550_v8  ;;  %v552_v37 = vpop.f32.mrb[37].mxu0  ;;  %1099 = vmatpush1.bf16.msra.mxu1 %v1098_v38  ;;  %v1807_v16 = vmul.f32 %v550_v8, %v550_v8 }
 0x16b   : > { %670 = vst [vmem:[%s1264_s27 + $0x128] sm:$0xff] %v552_v37  ;;  %v1812_v11 = vmul.f32 %v552_v37, %v552_v37 }
 0x16d   : > { %v556_v3 = vpop.f32.mrb[38].mxu0 }
 0x16e   : > { %671 = vst [vmem:[%s1264_s27 + $0x130] sm:$0xff] %v556_v3  ;;  %v1102_v22 = vpack.c.bf16 %v556_v3, %v550_v8  ;;  %v1810_v27 = vmul.f32 %v556_v3, %v556_v3  ;;  %v558_v46 = vpop.f32.mrb[39].mxu0 }
 0x16f   : > { %672 = vst [vmem:[%s1264_s27 + $0x138] sm:$0xff] %v558_v46  ;;  %v1100_v53 = vpack.c.bf16 %v558_v46, %v552_v37  ;;  %v1815_v7 = vmul.f32 %v558_v46, %v558_v46 }
 0x171   : > { %v562_v15 = vpop.f32.mrb[40].mxu0  ;;  %1101 = vmatprep.subr.bf16.mxu1 %v1100_v53 }
 0x172   : > { %673 = vst [vmem:[%s1264_s27 + $0x140] sm:$0xff] %v562_v15  ;;  %v564_v8 = vpop.f32.mrb[41].mxu0  ;;  %1103 = vmatpush1.bf16.msra.mxu1 %v1102_v22  ;;  %v1823_v4 = vmul.f32 %v562_v15, %v562_v15 }
 0x173   : > { %674 = vst [vmem:[%s1264_s27 + $0x148] sm:$0xff] %v564_v8  ;;  %v1828_v59 = vmul.f32 %v564_v8, %v564_v8 }
 0x175   : > { %v568_v3 = vpop.f32.mrb[42].mxu0 }
 0x176   : > { %675 = vst [vmem:[%s1264_s27 + $0x150] sm:$0xff] %v568_v3  ;;  %v1106_v37 = vpack.c.bf16 %v568_v3, %v562_v15  ;;  %v1826_v46 = vmul.f32 %v568_v3, %v568_v3  ;;  %v570_v38 = vpop.f32.mrb[43].mxu0 }
 0x177   : > { %676 = vst [vmem:[%s1264_s27 + $0x158] sm:$0xff] %v570_v38  ;;  %v1104_v53 = vpack.c.bf16 %v570_v38, %v564_v8  ;;  %v1831_v0 = vmul.f32 %v570_v38, %v570_v38 }
 0x179   : > { %v574_v32 = vpop.f32.mrb[44].mxu0  ;;  %1105 = vmatprep.subr.bf16.mxu1 %v1104_v53 }
 0x17a   : > { %677 = vst [vmem:[%s1264_s27 + $0x160] sm:$0xff] %v574_v32  ;;  %v576_v15 = vpop.f32.mrb[45].mxu0  ;;  %1107 = vmatpush1.bf16.msra.mxu1 %v1106_v37  ;;  %v1839_v12 = vmul.f32 %v574_v32, %v574_v32 }
 0x17b   : > { %678 = vst [vmem:[%s1264_s27 + $0x168] sm:$0xff] %v576_v15  ;;  %v1844_v14 = vmul.f32 %v576_v15, %v576_v15 }
 0x17c   : > { %2027 = vst [vmem:[#allocation2_spill] sm:$0xff] %v1839_v12 }
 0x17d   : > { %v580_v3 = vpop.f32.mrb[46].mxu0  ;;  %2029 = vst [vmem:[#allocation4_spill] sm:$0xff] %v1844_v14 }
 0x17e   : > { %679 = vst [vmem:[%s1264_s27 + $0x170] sm:$0xff] %v580_v3  ;;  %v1110_v38 = vpack.c.bf16 %v580_v3, %v574_v32  ;;  %v1842_v8 = vmul.f32 %v580_v3, %v580_v3  ;;  %v582_v22 = vpop.f32.mrb[47].mxu0 }
 0x17f   : > { %680 = vst [vmem:[%s1264_s27 + $0x178] sm:$0xff] %v582_v22  ;;  %v1108_v53 = vpack.c.bf16 %v582_v22, %v576_v15  ;;  %v1847_v35 = vmul.f32 %v582_v22, %v582_v22 }
 0x180   : > { %2028 = vst [vmem:[#allocation3_spill] sm:$0xff] %v1842_v8 }
 0x181   : > { %2030 = vst [vmem:[#allocation5_spill] sm:$0xff] %v1847_v35  ;;  %v586_v60 = vpop.f32.mrb[48].mxu0  ;;  %1109 = vmatprep.subr.bf16.mxu1 %v1108_v53 }
 0x182   : > { %681 = vst [vmem:[%s1264_s27 + $0x180] sm:$0xff] %v586_v60  ;;  %v588_v32 = vpop.f32.mrb[49].mxu0  ;;  %1111 = vmatpush1.bf16.msra.mxu1 %v1110_v38  ;;  %v1855_v55 = vmul.f32 %v586_v60, %v586_v60 }
 0x183   : > { %682 = vst [vmem:[%s1264_s27 + $0x188] sm:$0xff] %v588_v32  ;;  %v1860_v57 = vmul.f32 %v588_v32, %v588_v32 }
 0x184   : > { %2031 = vst [vmem:[#allocation6_spill] sm:$0xff] %v1855_v55 }
 0x185   : > { %v592_v3 = vpop.f32.mrb[50].mxu0  ;;  %2033 = vst [vmem:[#allocation8_spill] sm:$0xff] %v1860_v57 }
 0x186   : > { %683 = vst [vmem:[%s1264_s27 + $0x190] sm:$0xff] %v592_v3  ;;  %v1114_v22 = vpack.c.bf16 %v592_v3, %v586_v60  ;;  %v1858_v15 = vmul.f32 %v592_v3, %v592_v3  ;;  %v594_v37 = vpop.f32.mrb[51].mxu0 }
 0x187   : > { %684 = vst [vmem:[%s1264_s27 + $0x198] sm:$0xff] %v594_v37  ;;  %v1112_v53 = vpack.c.bf16 %v594_v37, %v588_v32  ;;  %v1863_v62 = vmul.f32 %v594_v37, %v594_v37 }
 0x188   : > { %2032 = vst [vmem:[#allocation7_spill] sm:$0xff] %v1858_v15 }
 0x189   : > { %2034 = vst [vmem:[#allocation9_spill] sm:$0xff] %v1863_v62  ;;  %v598_v42 = vpop.f32.mrb[52].mxu0  ;;  %1113 = vmatprep.subr.bf16.mxu1 %v1112_v53 }
 0x18a   : > { %685 = vst [vmem:[%s1264_s27 + $0x1a0] sm:$0xff] %v598_v42  ;;  %v600_v60 = vpop.f32.mrb[53].mxu0  ;;  %1115 = vmatpush1.bf16.msra.mxu1 %v1114_v22  ;;  %v1871_v28 = vmul.f32 %v598_v42, %v598_v42 }
 0x18b   : > { %686 = vst [vmem:[%s1264_s27 + $0x1a8] sm:$0xff] %v600_v60  ;;  %v1876_v18 = vmul.f32 %v600_v60, %v600_v60 }
 0x18c   : > { %2035 = vst [vmem:[#allocation10_spill] sm:$0xff] %v1871_v28 }
 0x18d   : > { %v604_v3 = vpop.f32.mrb[54].mxu0  ;;  %2037 = vst [vmem:[#allocation12_spill] sm:$0xff] %v1876_v18 }
 0x18e   : > { %687 = vst [vmem:[%s1264_s27 + $0x1b0] sm:$0xff] %v604_v3  ;;  %v1118_v37 = vpack.c.bf16 %v604_v3, %v598_v42  ;;  %v1874_v32 = vmul.f32 %v604_v3, %v604_v3  ;;  %v606_v38 = vpop.f32.mrb[55].mxu0 }
 0x18f   : > { %688 = vst [vmem:[%s1264_s27 + $0x1b8] sm:$0xff] %v606_v38  ;;  %v1116_v53 = vpack.c.bf16 %v606_v38, %v600_v60  ;;  %v1879_v45 = vmul.f32 %v606_v38, %v606_v38 }
 0x190   : > { %2036 = vst [vmem:[#allocation11_spill] sm:$0xff] %v1874_v32 }
 0x191   : > { %2038 = vst [vmem:[#allocation13_spill] sm:$0xff] %v1879_v45  ;;  %v610_v31 = vpop.f32.mrb[56].mxu0  ;;  %1117 = vmatprep.subr.bf16.mxu1 %v1116_v53 }
 0x192   : > { %689 = vst [vmem:[%s1264_s27 + $0x1c0] sm:$0xff] %v610_v31  ;;  %v612_v42 = vpop.f32.mrb[57].mxu0  ;;  %1119 = vmatpush1.bf16.msra.mxu1 %v1118_v37  ;;  %v851_v15 = vmul.f32 %v610_v31, %v610_v31 }
 0x193   : > { %690 = vst [vmem:[%s1264_s27 + $0x1c8] sm:$0xff] %v612_v42  ;;  %v852_v62 = vmul.f32 %v612_v42, %v612_v42 }
 0x195   : > { %v616_v3 = vpop.f32.mrb[58].mxu0 }
 0x196   : > { %691 = vst [vmem:[%s1264_s27 + $0x1d0] sm:$0xff] %v616_v3  ;;  %v1122_v38 = vpack.c.bf16 %v616_v3, %v610_v31  ;;  %v853_v60 = vmul.f32 %v616_v3, %v616_v3  ;;  %v618_v57 = vpop.f32.mrb[59].mxu0 }
 0x197   : > { %692 = vst [vmem:[%s1264_s27 + $0x1d8] sm:$0xff] %v618_v57  ;;  %v1120_v22 = vpack.c.bf16 %v618_v57, %v612_v42  ;;  %v854_v53 = vmul.f32 %v618_v57, %v618_v57 }
 0x198   : > { %v1186_v28 = vpack.c.bf16 %v853_v60, %v851_v15  ;;  %v2040_v15 = vmov 1.0  }
 0x199   : > { %v622_v55 = vpop.f32.mrb[60].mxu0  ;;  %1121 = vmatprep.subr.bf16.mxu1 %v1120_v22  ;;  %v1184_v32 = vpack.c.bf16 %v854_v53, %v852_v62  ;;  %v2039_v62 = vpack.c.bf16 %v1671_v26, %v1668_v25  ;;  %v2041_v22 = vpack.c.bf16 %v1666_v21, %v1663_v20  ;;  %v2044_v25 = vpack.c.bf16 %v1703_v54, %v1700_v52  ;;  %v1027_v53 = vld [vmem:[%s1999_s4 + $0x1] ss:$2 sm:$0x3] }
 0x19a   : > { %693 = vst [vmem:[%s1264_s27 + $0x1e0] sm:$0xff] %v622_v55  ;;  %v624_v37 = vpop.f32.mrb[61].mxu0  ;;  %1123 = vmatpush1.bf16.msra.mxu1 %v1122_v38  ;;  %v855_v45 = vmul.f32 %v622_v55, %v622_v55  ;;  %v2045_v26 = vpack.c.bf16 %v1698_v49, %v1695_v1  ;;  %v2046_v20 = vpack.c.bf16 %v1719_v2, %v1716_v63 }
 0x19b   : > { %694 = vst [vmem:[%s1264_s27 + $0x1e8] sm:$0xff] %v624_v37  ;;  %v856_v8 = vmul.f32 %v624_v37, %v624_v37  ;;  %v2047_v21 = vpack.c.bf16 %v1714_v5, %v1711_v6  ;;  %v2052_v1 = vpack.c.bf16 %v1767_v56, %v1764_v50  ;;  %v2053_v49 = vpack.c.bf16 %v1762_v47, %v1759_v43  ;;  %v2071_v43 = vld [vmem:[#allocation7_spill] sm:$0xff]  ;;  %v2072_v47 = vld [vmem:[#allocation6_spill] sm:$0xff]  ;;  %v2074_v56 = vld [vmem:[#allocation13_spill] sm:$0xff] }
 0x19c   : > { %v2054_v52 = vpack.c.bf16 %v1783_v13, %v1780_v51  ;;  %v2055_v54 = vpack.c.bf16 %v1778_v23, %v1775_v61  ;;  %v2057_v6 = vpack.c.bf16 %v1794_v40, %v1791_v33  ;;  %v2058_v5 = vpack.c.bf16 %v1815_v7, %v1812_v11  ;;  %v2077_v61 = vld [vmem:[#allocation11_spill] sm:$0xff]  ;;  %v2078_v23 = vld [vmem:[#allocation10_spill] sm:$0xff] }
 0x19d   : > { %v628_v18 = vpop.f32.mrb[62].mxu0  ;;  %v2059_v63 = vpack.c.bf16 %v1810_v27, %v1807_v16  ;;  %v2060_v2 = vpack.c.bf16 %v1831_v0, %v1828_v59  ;;  %v2073_v50 = vpack.c.bf16 %v2071_v43, %v2072_v47  ;;  %v2075_v59 = vld [vmem:[#allocation12_spill] sm:$0xff]  ;;  %v2079_v51 = vpack.c.bf16 %v2077_v61, %v2078_v23 }
 0x19e   : > { %695 = vst [vmem:[%s1264_s27 + $0x1f0] sm:$0xff] %v628_v18  ;;  %v1126_v31 = vpack.c.bf16 %v628_v18, %v622_v55  ;;  %v857_v3 = vmul.f32 %v628_v18, %v628_v18  ;;  %v630_v12 = vpop.f32.mrb[63].mxu0  ;;  %v2042_v18 = vpack.c.bf16 %v1687_v41, %v1684_v39  ;;  %v2050_v39 = vpack.c.bf16 %v1751_v29, %v1748_v24  ;;  %v2069_v24 = vld [vmem:[#allocation8_spill] sm:$0xff] }
 0x19f   : > { %696 = vst [vmem:[%s1264_s27 + $0x1f8] sm:$0xff] %v630_v12  ;;  %v1124_v14 = vpack.c.bf16 %v630_v12, %v624_v37  ;;  %v858_v42 = vmul.f32 %v630_v12, %v630_v12  ;;  %v2051_v41 = vpack.c.bf16 %v1746_v19, %v1743_v17  ;;  %v2056_v55 = vpack.c.bf16 %v1799_v10, %v1796_v48  ;;  %v2065_v12 = vld [vmem:[#allocation3_spill] sm:$0xff]  ;;  %v2068_v19 = vld [vmem:[#allocation9_spill] sm:$0xff] }
 0x1a0   : > { %v1190_v57 = vpack.c.bf16 %v857_v3, %v855_v45  ;;  %v2043_v45 = vpack.c.bf16 %v1682_v36, %v1679_v34  ;;  %v2048_v34 = vpack.c.bf16 %v1735_v9, %v1732_v58  ;;  %v2049_v36 = vpack.c.bf16 %v1730_v44, %v1727_v30  ;;  %v2062_v44 = vld [vmem:[#allocation5_spill] sm:$0xff]  ;;  %v2063_v58 = vld [vmem:[#allocation4_spill] sm:$0xff] }
 0x1a1   : > { %v1188_v35 = vpack.c.bf16 %v858_v42, %v856_v8  ;;  %1125 = vmatprep.subr.bf16.mxu1 %v1124_v14  ;;  %v2061_v30 = vpack.c.bf16 %v1826_v46, %v1823_v4  ;;  %v2064_v9 = vpack.c.bf16 %v2062_v44, %v2063_v58  ;;  %v2066_v14 = vld [vmem:[#allocation2_spill] sm:$0xff]  ;;  %v2070_v29 = vpack.c.bf16 %v2068_v19, %v2069_v24 }
 0x1a2   : > { %1127 = vmatpush1.bf16.msra.mxu1 %v1126_v31  ;;  %v2067_v17 = vpack.c.bf16 %v2065_v12, %v2066_v14  ;;  %v2076_v4 = vpack.c.bf16 %v2074_v56, %v2075_v59  ;;  %v1215_v13 = vmov 1966171168   ;;  %v775_v33 = vlaneseq  ;;  %v697_v46 = vld [vmem:[%s1999_s4] ss:$2 sm:$0x3] }
 0x1a3   : > { %1129 = vmatprep.subr.bf16.mxu1 %v2039_v62  ;;  %v773_v0 = vunpack.c.l.s4 %v1215_v13 }
 0x1a4   : > { %v776_v48 = vshrl.u32 %v775_v33, 7  ;;  %vm790_vm0 = vcmp.lt.s32.totalorder %v775_v33, 256 }
 0x1a5   : > { %763 = vmatmul.mubr.f32.vlgmr.msra.gmra.mrb[0].mxu1 %v2040_v15  ;;  %v774_v40 = vunpack.c.0.s8 %v773_v0 }
 0x1a6   : > { %1131 = vmatpush1.bf16.msra.mxu1 %v2041_v22  ;;  %923 = vmatprep.mubr.f32.mxu1 %v2040_v15 }
 0x1a7   : > { %1133 = vmatprep.subr.bf16.mxu1 %v2042_v18  ;;  %v777_v11 = vsub.s32 %v774_v40, %v776_v48 }
 0x1aa   : > { %1135 = vmatpush1.bf16.msra.mxu1 %v2043_v45 }
 0x1ab   : > { %1137 = vmatprep.subr.bf16.mxu1 %v2044_v25 }
 0x1ae   : > { %1139 = vmatpush1.bf16.msra.mxu1 %v2045_v26 }
 0x1af   : > { %1141 = vmatprep.subr.bf16.mxu1 %v2046_v20 }
 0x1b2   : > { %1143 = vmatpush1.bf16.msra.mxu1 %v2047_v21 }
 0x1b3   : > { %1145 = vmatprep.subr.bf16.mxu1 %v2048_v34 }
 0x1b6   : > { %1147 = vmatpush1.bf16.msra.mxu1 %v2049_v36 }
 0x1b7   : > { %1149 = vmatprep.subr.bf16.mxu1 %v2050_v39 }
 0x1ba   : > { %1151 = vmatpush1.bf16.msra.mxu1 %v2051_v41 }
 0x1bb   : > { %1153 = vmatprep.subr.bf16.mxu1 %v2052_v1 }
 0x1be   : > { %1155 = vmatpush1.bf16.msra.mxu1 %v2053_v49 }
 0x1bf   : > { %1157 = vmatprep.subr.bf16.mxu1 %v2054_v52 }
 0x1c2   : > { %1159 = vmatpush1.bf16.msra.mxu1 %v2055_v54 }
 0x1c3   : > { %1161 = vmatprep.subr.bf16.mxu1 %v2056_v55 }
 0x1c6   : > { %1163 = vmatpush1.bf16.msra.mxu1 %v2057_v6 }
 0x1c7   : > { %1165 = vmatprep.subr.bf16.mxu1 %v2058_v5 }
 0x1ca   : > { %1167 = vmatpush1.bf16.msra.mxu1 %v2059_v63 }
 0x1cb   : > { %1169 = vmatprep.subr.bf16.mxu1 %v2060_v2 }
 0x1ce   : > { %1171 = vmatpush1.bf16.msra.mxu1 %v2061_v30 }
 0x1cf   : > { %1173 = vmatprep.subr.bf16.mxu1 %v2064_v9 }
 0x1d2   : > { %1175 = vmatpush1.bf16.msra.mxu1 %v2067_v17 }
 0x1d3   : > { %1177 = vmatprep.subr.bf16.mxu1 %v2070_v29 }
 0x1d6   : > { %1179 = vmatpush1.bf16.msra.mxu1 %v2073_v50 }
 0x1d7   : > { %1181 = vmatprep.subr.bf16.mxu1 %v2076_v4 }
 0x1da   : > { %1183 = vmatpush1.bf16.msra.mxu1 %v2079_v51 }
 0x1db   : > { %1185 = vmatprep.subr.bf16.mxu1 %v1184_v32 }
 0x1de   : > { %1187 = vmatpush1.bf16.msra.mxu1 %v1186_v28 }
 0x1df   : > { %1189 = vmatprep.subr.bf16.mxu1 %v1188_v35 }
 0x1e2   : > { %1191 = vmatpush1.bf16.msra.mxu1 %v1190_v57 }
 0x1e5   : > { %924 = vmatmul.mubr.f32.vlgmr.msra.gmra.mrb[2].mxu1 %v2040_v15 }
 0x278   : > { %v764_v10 = vpop.f32.mrb[0].mxu1 }
 0x279   : > { %v766_v7 = vpop.f32.mrb[1].mxu1 }
 0x27a   : > { %v771_v16 = vcombine.low %v764_v10, %v766_v7 }
 0x27c   : > { %v778_v27 = vrot.slane %v771_v16, %v777_v11 }
 0x27e   : > { %v785_v8 = vrot.slane %v778_v27, %v777_v11 }
 0x280   : > { %v787_v28 = vadd.f32 %v785_v8, %v697_v46 }
 0x282   : > { %792 = vst.msk [vmem:[%s1999_s4] ss:$2 sm:$0x3] %vm790_vm0, %v787_v28 }
 0x2b8   : > { %v925_v35 = vpop.f32.mrb[2].mxu1 }
 0x2b9   : > { %v927_v32 = vpop.f32.mrb[3].mxu1 }
 0x2ba   : > { %v932_v38 = vcombine.low %v925_v35, %v927_v32 }
 0x2bc   : > { %v939_v60 = vrot.slane %v932_v38, %v777_v11 }
 0x2be   : > { %v946_v37 = vrot.slane %v939_v60, %v777_v11 }
 0x2c0   : > { %v948_v31 = vadd.f32 %v1027_v53, %v946_v37 }
 0x2c2   : > { %1028 = vst.msk [vmem:[%s1999_s4 + $0x1] ss:$2 sm:$0x3] %vm790_vm0, %v948_v31 }
 0x2c3 PF: > { %s15_s15 = sadd.s32 1, %s1210_s15  }
 0x2c4   : > { %p12_p5 = scmp.ge.s32.totalorder %s15_s15, 4  }
 0x2c6   :  { %14 = sbr.rel (!%p12_p5) target bundleno = 1 (0x1), region = 75 }

// kernel: recover_channel.5
= control target key start
LH: loop header
LB: loop body
LE: loop exit
PB: predicated region body
PF: predicated region fallthrough
CT: control target
= control target key end

     0   :  { %9 = vsyncpa [#allocation3], 0  ;;  %s2016_s12 = smov 0   ;;  %s3093_s0 = inlined_call_operand.vmem [shape: f32[512,64], index: 0, kind: input, shape index: {}]   ;;  %s3094_s1 = inlined_call_operand.hbm [shape: f32[64,512], index: 1, kind: input, shape index: {}]   ;;  %s3095_s2 = inlined_call_operand.vmem [shape: f32[512,512], index: 2, kind: output, shape index: {0}]   ;;  %s3096_s3 = inlined_call_operand.vmem [shape: f32[2,512], index: 3, kind: output, shape index: {1}]  }
   0x1 LB: > { %s2022_s13 = sadd.s32 4294967295, %s1987_s12   ;;  %p1556_p0 = scmp.ge.s32.totalorder %s1987_s12, 1  ;;  %s1987_s12 = sphi %s2016_s12, %s15_s12  }
   0x2   : > { %p114_p1 = scmp.lt.s32.totalorder %s1987_s12, 3  ;;  %s1989_s14 = smov [#allocation2]  }
   0x3   : > { %s126_s15 = sshll.u32 %s1989_s14, 4  ;;  %p3097_p4 = scmp.eq.s32.totalorder %s2022_s13, 0  ;;  %s127_s15 = int_to_ptr.vmem [resolvable:$true] %s126_s15 }
   0x4   : > { %p2027_p3 = pnand %p1556_p0, %p114_p1  ;;  %s1949_s20 = scalar_lea.hbm %s3094_s1, 4096 }
   0x5   : > { %p1950_p7 = scmp.ne.s32.totalorder %s3094_s1, %s1949_s20  ;;  %p1956_p11 = scmp.lt.u32.totalorder %s1949_s20, %s3094_s1 }
   0x6   : > { %s3177_s16 = scalar_select %p2027_p3, 1, 0 }
   0x7   : > { %p1928_p5 = pneg %p2027_p3 }
   0x9   : > { %p2036_p6 = pnand %p3097_p4, %p1928_p5 }
   0xb   : > { %p1951_p8 = pneg %p2036_p6 }
   0xd   : > { %p1952_p9 = pnand %p1951_p8, %p1950_p7 }
   0xf   : > { %p1953_p10 = pneg %p1952_p9 }
  0x11   : > { %p1958_p12 = pnand %p1956_p11, %p1953_p10 }
  0x13   : > { %1961 = shalt.err (!%p1958_p12)
}
  0x14   : > { %s1962_s25 = scalar_lea.vmem %s127_s15, 4096  ;;  %p1970_p5 = scmp.lt.s32.totalorder %s127_s15, %s127_s15 }
  0x15   : > { %p1963_p13 = scmp.ne.s32.totalorder %s127_s15, %s1962_s25  ;;  %p1971_p2 = scmp.lt.s32.totalorder %s1962_s25, %s1962_s25 }
  0x17   : > { %p1965_p0 = pnand %p1963_p13, %p1951_p8  ;;  %p1972_p4 = por %p1971_p2, %p1970_p5 }
  0x19   : > { %p1966_p1 = pneg %p1965_p0 }
  0x1b   : > { %p1973_p3 = pnand %p1972_p4, %p1966_p1 }
  0x1d   : > { %1976 = shalt.err (!%p1973_p3)
}
  0x1e   : > { %s1990_s26 = smov 512   ;;  %s1991_s27 = smov 32  }
  0x1f   : > { %1931 = dma.hbm_to_vmem [thread:$0]  (!%p2036_p6), %s3094_s1, 4096, %s127_s15, [#allocation3], %s1990_s26, %s1990_s26, %s1991_s27  }
  0x20   : > { %p3179_p7 = scmp.ne.s32.totalorder %s3177_s16, 0 }
  0x22   : > { %151 = sbr.rel (%p3179_p7) target bundleno = 713 (0x2c9), region = 28 }
  0x29   : > { %p3180_p9 = scmp.eq.s32.totalorder %s2022_s13, 0 }
  0x2b   : > { %1982 = dma.done.wait (%p3180_p9), [#allocation3], 4096   ;;  %p3181_p8 = pmov %p3180_p9 }
  0x2c   : > { %s1561_s30 = sshll.u32 %s2022_s13, 5  ;;  %p3182_p3 = scmp.ne.s32.totalorder %s2022_s13, 0 }
  0x2d   : > { %1984 = vsyncadd (%p3181_p8), [#allocation3], 4294963200  ;;  %p177_p2 = scmp.lt.s32.totalorder %s1561_s30, 63  ;;  %v1992_v32 = vmov (!%p3182_p3), 0.0  }
  0x2e   : > { %225 = vst [vmem:[%s3096_s3] sm:$0xff] (!%p3182_p3), %v1992_v32 }
  0x2f   : > { %s3397_s30 = smov (!%p177_p2, %s1561_s30), 63 }
  0x30   : > { %s1562_s4 = sshll.u32 %s3397_s30, 3  ;;  %s1635_s5 = sshll.u32 %s3397_s30, 5 }
  0x31   : > { %s2066_s8 = scalar_lea.vmem %s3093_s0, %s1562_s4  ;;  %s2071_s11 = scalar_lea.vmem %s3095_s2, %s1635_s5 }
  0x32   : > { %v2074_v0 = vld [vmem:[%s2066_s8] sm:$0xff]  ;;  %v2077_v1 = vld [vmem:[%s2066_s8 + $0x8] sm:$0xff]  ;;  %v2080_v2 = vld [vmem:[%s2066_s8 + $0x10] sm:$0xff] }
  0x33   : > { %v2083_v3 = vld [vmem:[%s2066_s8 + $0x18] sm:$0xff]  ;;  %v2086_v4 = vld [vmem:[%s2066_s8 + $0x20] sm:$0xff]  ;;  %v2089_v5 = vld [vmem:[%s2066_s8 + $0x28] sm:$0xff] }
  0x34   : > { %v2092_v6 = vld [vmem:[%s2066_s8 + $0x30] sm:$0xff]  ;;  %v2095_v7 = vld [vmem:[%s2066_s8 + $0x38] sm:$0xff]  ;;  %v2098_v8 = vld [vmem:[%s2066_s8 + $0x40] sm:$0xff] }
  0x35   : > { %v2101_v9 = vld [vmem:[%s2066_s8 + $0x48] sm:$0xff]  ;;  %v2104_v10 = vld [vmem:[%s2066_s8 + $0x50] sm:$0xff]  ;;  %v2107_v11 = vld [vmem:[%s2066_s8 + $0x58] sm:$0xff] }
  0x36   : > { %v2110_v12 = vld [vmem:[%s2066_s8 + $0x60] sm:$0xff]  ;;  %v2113_v13 = vld [vmem:[%s2066_s8 + $0x68] sm:$0xff]  ;;  %v2116_v14 = vld [vmem:[%s2066_s8 + $0x70] sm:$0xff]  ;;  %224 = sbr.rel (%p3182_p3) target bundleno = 61 (0x3d), region = 36 }
  0x37   : > { %v2119_v15 = vld [vmem:[%s2066_s8 + $0x78] sm:$0xff]  ;;  %v2122_v16 = vld [vmem:[%s2066_s8 + $0x80] sm:$0xff]  ;;  %v2125_v17 = vld [vmem:[%s2066_s8 + $0x88] sm:$0xff] }
  0x38   : > { %v2128_v18 = vld [vmem:[%s2066_s8 + $0x90] sm:$0xff]  ;;  %v2131_v19 = vld [vmem:[%s2066_s8 + $0x98] sm:$0xff]  ;;  %v2134_v20 = vld [vmem:[%s2066_s8 + $0xa0] sm:$0xff] }
  0x39   : > { %v2137_v21 = vld [vmem:[%s2066_s8 + $0xa8] sm:$0xff]  ;;  %v2140_v22 = vld [vmem:[%s2066_s8 + $0xb0] sm:$0xff]  ;;  %v2143_v23 = vld [vmem:[%s2066_s8 + $0xb8] sm:$0xff] }
  0x3a   : > { %v2146_v24 = vld [vmem:[%s2066_s8 + $0xc0] sm:$0xff]  ;;  %v2149_v25 = vld [vmem:[%s2066_s8 + $0xc8] sm:$0xff]  ;;  %v2152_v26 = vld [vmem:[%s2066_s8 + $0xd0] sm:$0xff] }
  0x3b   : > { %v2155_v27 = vld [vmem:[%s2066_s8 + $0xd8] sm:$0xff]  ;;  %v2158_v28 = vld [vmem:[%s2066_s8 + $0xe0] sm:$0xff]  ;;  %v2161_v29 = vld [vmem:[%s2066_s8 + $0xe8] sm:$0xff] }
  0x3c   : > { %v2164_v30 = vld [vmem:[%s2066_s8 + $0xf0] sm:$0xff]  ;;  %v2167_v31 = vld [vmem:[%s2066_s8 + $0xf8] sm:$0xff] }
  0x3d PF: > { %v227_v33 = vld [vmem:[#allocation2 + $0x8] sm:$0xff]  ;;  %v229_v35 = vld [vmem:[#allocation2 + $0x18] sm:$0xff]  ;;  %v226_v38 = vld [vmem:[#allocation2] sm:$0xff]  ;;  %v1993_v40 = vmov 0.0   ;;  %vm258_vm0 = vcmask 523264  }
  0x3e   : > { %v231_v34 = vld [vmem:[#allocation2 + $0x28] sm:$0xff]  ;;  %v233_v37 = vld [vmem:[#allocation2 + $0x38] sm:$0xff]  ;;  %v230_v39 = vld [vmem:[#allocation2 + $0x20] sm:$0xff]  ;;  %419 = vmatprep.mubr.f32.mxu0 %v1993_v40  ;;  %676 = vmatprep.mubr.f32.mxu1 %v1993_v40 }
  0x3f   : > { %v1636_v36 = vpack.c.bf16 %v231_v34, %v227_v33  ;;  %v1652_v41 = vpack.c.bf16 %v233_v37, %v229_v35  ;;  %v1638_v42 = vpack.c.bf16 %v230_v39, %v226_v38  ;;  %v228_v43 = vld [vmem:[#allocation2 + $0x10] sm:$0xff]  ;;  %v235_v45 = vld [vmem:[#allocation2 + $0x48] sm:$0xff]  ;;  %v237_v48 = vld [vmem:[#allocation2 + $0x58] sm:$0xff] }
  0x40   : > { %v232_v44 = vld [vmem:[#allocation2 + $0x30] sm:$0xff]  ;;  %v239_v47 = vld [vmem:[#allocation2 + $0x68] sm:$0xff]  ;;  %v241_v49 = vld [vmem:[#allocation2 + $0x78] sm:$0xff] }
  0x41   : > { %1637 = vmatprep.subr.bf16.mxu0 %v1636_v36  ;;  %v1654_v46 = vpack.c.bf16 %v232_v44, %v228_v43  ;;  %1653 = vmatprep.subr.bf16.mxu1 %v1652_v41  ;;  %v1640_v50 = vpack.c.bf16 %v239_v47, %v235_v45  ;;  %v1656_v51 = vpack.c.bf16 %v241_v49, %v237_v48  ;;  %v234_v52 = vld [vmem:[#allocation2 + $0x40] sm:$0xff]  ;;  %v236_v54 = vld [vmem:[#allocation2 + $0x50] sm:$0xff]  ;;  %v243_v57 = vld [vmem:[#allocation2 + $0x88] sm:$0xff] }
  0x42   : > { %1639 = vmatpush1.bf16.msra.mxu0 %v1638_v42  ;;  %v238_v53 = vld [vmem:[#allocation2 + $0x60] sm:$0xff]  ;;  %v240_v56 = vld [vmem:[#allocation2 + $0x70] sm:$0xff]  ;;  %v247_v58 = vld [vmem:[#allocation2 + $0xa8] sm:$0xff] }
  0x43   : > { %1655 = vmatpush1.bf16.msra.mxu1 %v1654_v46  ;;  %v1642_v55 = vpack.c.bf16 %v238_v53, %v234_v52  ;;  %1641 = vmatprep.subr.bf16.mxu0 %v1640_v50  ;;  %v1658_v59 = vpack.c.bf16 %v240_v56, %v236_v54  ;;  %v1644_v60 = vpack.c.bf16 %v247_v58, %v243_v57  ;;  %v245_v61 = vld [vmem:[#allocation2 + $0x98] sm:$0xff]  ;;  %v242_v63 = vld [vmem:[#allocation2 + $0x80] sm:$0xff]  ;;  %v244_v34 = vld [vmem:[#allocation2 + $0x90] sm:$0xff] }
  0x44   : > { %1657 = vmatprep.subr.bf16.mxu1 %v1656_v51  ;;  %v249_v62 = vld [vmem:[#allocation2 + $0xb8] sm:$0xff]  ;;  %v246_v33 = vld [vmem:[#allocation2 + $0xa0] sm:$0xff]  ;;  %v248_v35 = vld [vmem:[#allocation2 + $0xb0] sm:$0xff] }
  0x45   : > { %v1660_v32 = vpack.c.bf16 %v249_v62, %v245_v61  ;;  %v1646_v36 = vpack.c.bf16 %v246_v33, %v242_v63  ;;  %v251_v37 = vld [vmem:[#allocation2 + $0xc8] sm:$0xff]  ;;  %v253_v39 = vld [vmem:[#allocation2 + $0xd8] sm:$0xff]  ;;  %v1662_v41 = vpack.c.bf16 %v248_v35, %v244_v34  ;;  %v250_v44 = vld [vmem:[#allocation2 + $0xc0] sm:$0xff] }
  0x46   : > { %1643 = vmatpush1.bf16.msra.mxu0 %v1642_v55  ;;  %v255_v38 = vld [vmem:[#allocation2 + $0xe8] sm:$0xff]  ;;  %v257_v43 = vld [vmem:[#allocation2 + $0xf8] sm:$0xff]  ;;  %v254_v45 = vld [vmem:[#allocation2 + $0xe0] sm:$0xff] }
  0x47   : > { %1659 = vmatpush1.bf16.msra.mxu1 %v1658_v59  ;;  %1645 = vmatprep.subr.bf16.mxu0 %v1644_v60  ;;  %v1648_v42 = vpack.c.bf16 %v255_v38, %v251_v37  ;;  %v1664_v46 = vpack.c.bf16 %v257_v43, %v253_v39  ;;  %v252_v47 = vld [vmem:[#allocation2 + $0xd0] sm:$0xff]  ;;  %v1650_v49 = vpack.c.bf16 %v254_v45, %v250_v44 }
  0x48   : > { %1661 = vmatprep.subr.bf16.mxu1 %v1660_v32  ;;  %v256_v48 = vld [vmem:[#allocation2 + $0xf0] sm:$0xff] }
  0x49   : > { %v1666_v50 = vpack.c.bf16 %v256_v48, %v252_v47 }
  0x4a   : > { %1647 = vmatpush1.bf16.msra.mxu0 %v1646_v36 }
  0x4b   : > { %1663 = vmatpush1.bf16.msra.mxu1 %v1662_v41  ;;  %1649 = vmatprep.subr.bf16.mxu0 %v1648_v42 }
  0x4c   : > { %1665 = vmatprep.subr.bf16.mxu1 %v1664_v46 }
  0x4e   : > { %1651 = vmatpush1.bf16.msra.mxu0 %v1650_v49 }
  0x4f   : > { %1667 = vmatpush1.bf16.msra.mxu1 %v1666_v50 }
  0x51   : > { %1567 = vmatmul.mubr.msk.f32.vlgmr.msra.gmra.mrb[0].mxu0 %vm258_vm0, %v2074_v0 }
  0x52   : > { %1599 = vmatmul.mubr.msk.f32.vlgmr.msra.gmra.mrb[0].mxu1 %vm258_vm0, %v2074_v0  ;;  %425 = vmatprep.mubr.f32.mxu0 %v1993_v40 }
  0x53   : > { %682 = vmatprep.mubr.f32.mxu1 %v1993_v40 }
  0x55   : > { %1568 = vmatmul.mubr.msk.f32.gmra.mrb[2].mxu0 %vm258_vm0, %v2077_v1 }
  0x56   : > { %1600 = vmatmul.mubr.msk.f32.gmra.mrb[2].mxu1 %vm258_vm0, %v2077_v1  ;;  %431 = vmatprep.mubr.f32.mxu0 %v1993_v40 }
  0x57   : > { %688 = vmatprep.mubr.f32.mxu1 %v1993_v40 }
  0x59   : > { %1569 = vmatmul.mubr.msk.f32.gmra.mrb[4].mxu0 %vm258_vm0, %v2080_v2 }
  0x5a   : > { %1601 = vmatmul.mubr.msk.f32.gmra.mrb[4].mxu1 %vm258_vm0, %v2080_v2  ;;  %437 = vmatprep.mubr.f32.mxu0 %v1993_v40 }
  0x5b   : > { %694 = vmatprep.mubr.f32.mxu1 %v1993_v40 }
  0x5d   : > { %1570 = vmatmul.mubr.msk.f32.gmra.mrb[6].mxu0 %vm258_vm0, %v2083_v3 }
  0x5e   : > { %1602 = vmatmul.mubr.msk.f32.gmra.mrb[6].mxu1 %vm258_vm0, %v2083_v3  ;;  %443 = vmatprep.mubr.f32.mxu0 %v1993_v40 }
  0x5f   : > { %700 = vmatprep.mubr.f32.mxu1 %v1993_v40 }
  0x61   : > { %1571 = vmatmul.mubr.msk.f32.gmra.mrb[8].mxu0 %vm258_vm0, %v2086_v4 }
  0x62   : > { %1603 = vmatmul.mubr.msk.f32.gmra.mrb[8].mxu1 %vm258_vm0, %v2086_v4  ;;  %449 = vmatprep.mubr.f32.mxu0 %v1993_v40 }
  0x63   : > { %706 = vmatprep.mubr.f32.mxu1 %v1993_v40 }
  0x65   : > { %1572 = vmatmul.mubr.msk.f32.gmra.mrb[10].mxu0 %vm258_vm0, %v2089_v5 }
  0x66   : > { %1604 = vmatmul.mubr.msk.f32.gmra.mrb[10].mxu1 %vm258_vm0, %v2089_v5  ;;  %455 = vmatprep.mubr.f32.mxu0 %v1993_v40 }
  0x67   : > { %712 = vmatprep.mubr.f32.mxu1 %v1993_v40 }
  0x69   : > { %1573 = vmatmul.mubr.msk.f32.gmra.mrb[12].mxu0 %vm258_vm0, %v2092_v6 }
  0x6a   : > { %1605 = vmatmul.mubr.msk.f32.gmra.mrb[12].mxu1 %vm258_vm0, %v2092_v6  ;;  %461 = vmatprep.mubr.f32.mxu0 %v1993_v40  ;;  %v3099_v6 = vmov 1.0  }
  0x6b   : > { %718 = vmatprep.mubr.f32.mxu1 %v1993_v40 }
  0x6d   : > { %1574 = vmatmul.mubr.msk.f32.gmra.mrb[14].mxu0 %vm258_vm0, %v2095_v7 }
  0x6e   : > { %1606 = vmatmul.mubr.msk.f32.gmra.mrb[14].mxu1 %vm258_vm0, %v2095_v7  ;;  %467 = vmatprep.mubr.f32.mxu0 %v1993_v40 }
  0x6f   : > { %724 = vmatprep.mubr.f32.mxu1 %v1993_v40 }
  0x71   : > { %1575 = vmatmul.mubr.msk.f32.gmra.mrb[16].mxu0 %vm258_vm0, %v2098_v8 }
  0x72   : > { %1607 = vmatmul.mubr.msk.f32.gmra.mrb[16].mxu1 %vm258_vm0, %v2098_v8  ;;  %473 = vmatprep.mubr.f32.mxu0 %v1993_v40 }
  0x73   : > { %730 = vmatprep.mubr.f32.mxu1 %v1993_v40 }
  0x75   : > { %1576 = vmatmul.mubr.msk.f32.gmra.mrb[18].mxu0 %vm258_vm0, %v2101_v9 }
  0x76   : > { %1608 = vmatmul.mubr.msk.f32.gmra.mrb[18].mxu1 %vm258_vm0, %v2101_v9  ;;  %479 = vmatprep.mubr.f32.mxu0 %v1993_v40 }
  0x77   : > { %736 = vmatprep.mubr.f32.mxu1 %v1993_v40 }
  0x79   : > { %1577 = vmatmul.mubr.msk.f32.gmra.mrb[20].mxu0 %vm258_vm0, %v2104_v10 }
  0x7a   : > { %1609 = vmatmul.mubr.msk.f32.gmra.mrb[20].mxu1 %vm258_vm0, %v2104_v10  ;;  %485 = vmatprep.mubr.f32.mxu0 %v1993_v40 }
  0x7b   : > { %742 = vmatprep.mubr.f32.mxu1 %v1993_v40 }
  0x7d   : > { %1578 = vmatmul.mubr.msk.f32.gmra.mrb[22].mxu0 %vm258_vm0, %v2107_v11 }
  0x7e   : > { %1610 = vmatmul.mubr.msk.f32.gmra.mrb[22].mxu1 %vm258_vm0, %v2107_v11  ;;  %491 = vmatprep.mubr.f32.mxu0 %v1993_v40 }
  0x7f   : > { %748 = vmatprep.mubr.f32.mxu1 %v1993_v40 }
  0x81   : > { %1579 = vmatmul.mubr.msk.f32.gmra.mrb[24].mxu0 %vm258_vm0, %v2110_v12 }
  0x82   : > { %1611 = vmatmul.mubr.msk.f32.gmra.mrb[24].mxu1 %vm258_vm0, %v2110_v12  ;;  %497 = vmatprep.mubr.f32.mxu0 %v1993_v40 }
  0x83   : > { %754 = vmatprep.mubr.f32.mxu1 %v1993_v40 }
  0x85   : > { %1580 = vmatmul.mubr.msk.f32.gmra.mrb[26].mxu0 %vm258_vm0, %v2113_v13 }
  0x86   : > { %1612 = vmatmul.mubr.msk.f32.gmra.mrb[26].mxu1 %vm258_vm0, %v2113_v13  ;;  %503 = vmatprep.mubr.f32.mxu0 %v1993_v40 }
  0x87   : > { %760 = vmatprep.mubr.f32.mxu1 %v1993_v40 }
  0x89   : > { %1581 = vmatmul.mubr.msk.f32.gmra.mrb[28].mxu0 %vm258_vm0, %v2116_v14 }
  0x8a   : > { %1613 = vmatmul.mubr.msk.f32.gmra.mrb[28].mxu1 %vm258_vm0, %v2116_v14  ;;  %509 = vmatprep.mubr.f32.mxu0 %v1993_v40 }
  0x8b   : > { %766 = vmatprep.mubr.f32.mxu1 %v1993_v40 }
  0x8d   : > { %1582 = vmatmul.mubr.msk.f32.gmra.mrb[30].mxu0 %vm258_vm0, %v2119_v15 }
  0x8e   : > { %1614 = vmatmul.mubr.msk.f32.gmra.mrb[30].mxu1 %vm258_vm0, %v2119_v15  ;;  %515 = vmatprep.mubr.f32.mxu0 %v1993_v40 }
  0x8f   : > { %772 = vmatprep.mubr.f32.mxu1 %v1993_v40 }
  0x91   : > { %1583 = vmatmul.mubr.msk.f32.gmra.mrb[32].mxu0 %vm258_vm0, %v2122_v16 }
  0x92   : > { %1615 = vmatmul.mubr.msk.f32.gmra.mrb[32].mxu1 %vm258_vm0, %v2122_v16  ;;  %521 = vmatprep.mubr.f32.mxu0 %v1993_v40 }
  0x93   : > { %778 = vmatprep.mubr.f32.mxu1 %v1993_v40 }
  0x95   : > { %1584 = vmatmul.mubr.msk.f32.gmra.mrb[34].mxu0 %vm258_vm0, %v2125_v17 }
  0x96   : > { %1616 = vmatmul.mubr.msk.f32.gmra.mrb[34].mxu1 %vm258_vm0, %v2125_v17  ;;  %527 = vmatprep.mubr.f32.mxu0 %v1993_v40 }
  0x97   : > { %784 = vmatprep.mubr.f32.mxu1 %v1993_v40 }
  0x99   : > { %1585 = vmatmul.mubr.msk.f32.gmra.mrb[36].mxu0 %vm258_vm0, %v2128_v18 }
  0x9a   : > { %1617 = vmatmul.mubr.msk.f32.gmra.mrb[36].mxu1 %vm258_vm0, %v2128_v18  ;;  %533 = vmatprep.mubr.f32.mxu0 %v1993_v40 }
  0x9b   : > { %790 = vmatprep.mubr.f32.mxu1 %v1993_v40 }
  0x9d   : > { %1586 = vmatmul.mubr.msk.f32.gmra.mrb[38].mxu0 %vm258_vm0, %v2131_v19 }
  0x9e   : > { %1618 = vmatmul.mubr.msk.f32.gmra.mrb[38].mxu1 %vm258_vm0, %v2131_v19  ;;  %539 = vmatprep.mubr.f32.mxu0 %v1993_v40 }
  0x9f   : > { %796 = vmatprep.mubr.f32.mxu1 %v1993_v40 }
  0xa1   : > { %1587 = vmatmul.mubr.msk.f32.gmra.mrb[40].mxu0 %vm258_vm0, %v2134_v20 }
  0xa2   : > { %1619 = vmatmul.mubr.msk.f32.gmra.mrb[40].mxu1 %vm258_vm0, %v2134_v20  ;;  %545 = vmatprep.mubr.f32.mxu0 %v1993_v40 }
  0xa3   : > { %802 = vmatprep.mubr.f32.mxu1 %v1993_v40 }
  0xa5   : > { %1588 = vmatmul.mubr.msk.f32.gmra.mrb[42].mxu0 %vm258_vm0, %v2137_v21 }
  0xa6   : > { %1620 = vmatmul.mubr.msk.f32.gmra.mrb[42].mxu1 %vm258_vm0, %v2137_v21  ;;  %551 = vmatprep.mubr.f32.mxu0 %v1993_v40 }
  0xa7   : > { %808 = vmatprep.mubr.f32.mxu1 %v1993_v40 }
  0xa9   : > { %1589 = vmatmul.mubr.msk.f32.gmra.mrb[44].mxu0 %vm258_vm0, %v2140_v22 }
  0xaa   : > { %1621 = vmatmul.mubr.msk.f32.gmra.mrb[44].mxu1 %vm258_vm0, %v2140_v22  ;;  %557 = vmatprep.mubr.f32.mxu0 %v1993_v40 }
  0xab   : > { %814 = vmatprep.mubr.f32.mxu1 %v1993_v40 }
  0xad   : > { %1590 = vmatmul.mubr.msk.f32.gmra.mrb[46].mxu0 %vm258_vm0, %v2143_v23 }
  0xae   : > { %1622 = vmatmul.mubr.msk.f32.gmra.mrb[46].mxu1 %vm258_vm0, %v2143_v23  ;;  %563 = vmatprep.mubr.f32.mxu0 %v1993_v40 }
  0xaf   : > { %820 = vmatprep.mubr.f32.mxu1 %v1993_v40 }
  0xb1   : > { %1591 = vmatmul.mubr.msk.f32.gmra.mrb[48].mxu0 %vm258_vm0, %v2146_v24 }
  0xb2   : > { %1623 = vmatmul.mubr.msk.f32.gmra.mrb[48].mxu1 %vm258_vm0, %v2146_v24  ;;  %569 = vmatprep.mubr.f32.mxu0 %v1993_v40 }
  0xb3   : > { %826 = vmatprep.mubr.f32.mxu1 %v1993_v40 }
  0xb5   : > { %1592 = vmatmul.mubr.msk.f32.gmra.mrb[50].mxu0 %vm258_vm0, %v2149_v25 }
  0xb6   : > { %1624 = vmatmul.mubr.msk.f32.gmra.mrb[50].mxu1 %vm258_vm0, %v2149_v25  ;;  %575 = vmatprep.mubr.f32.mxu0 %v1993_v40 }
  0xb7   : > { %832 = vmatprep.mubr.f32.mxu1 %v1993_v40 }
  0xb9   : > { %1593 = vmatmul.mubr.msk.f32.gmra.mrb[52].mxu0 %vm258_vm0, %v2152_v26 }
  0xba   : > { %1625 = vmatmul.mubr.msk.f32.gmra.mrb[52].mxu1 %vm258_vm0, %v2152_v26  ;;  %581 = vmatprep.mubr.f32.mxu0 %v1993_v40 }
  0xbb   : > { %838 = vmatprep.mubr.f32.mxu1 %v1993_v40 }
  0xbd   : > { %1594 = vmatmul.mubr.msk.f32.gmra.mrb[54].mxu0 %vm258_vm0, %v2155_v27 }
  0xbe   : > { %1626 = vmatmul.mubr.msk.f32.gmra.mrb[54].mxu1 %vm258_vm0, %v2155_v27  ;;  %587 = vmatprep.mubr.f32.mxu0 %v1993_v40 }
  0xbf   : > { %844 = vmatprep.mubr.f32.mxu1 %v1993_v40 }
  0xc1   : > { %1595 = vmatmul.mubr.msk.f32.gmra.mrb[56].mxu0 %vm258_vm0, %v2158_v28 }
  0xc2   : > { %1627 = vmatmul.mubr.msk.f32.gmra.mrb[56].mxu1 %vm258_vm0, %v2158_v28  ;;  %593 = vmatprep.mubr.f32.mxu0 %v1993_v40 }
  0xc3   : > { %850 = vmatprep.mubr.f32.mxu1 %v1993_v40 }
  0xc5   : > { %1596 = vmatmul.mubr.msk.f32.gmra.mrb[58].mxu0 %vm258_vm0, %v2161_v29 }
  0xc6   : > { %1628 = vmatmul.mubr.msk.f32.gmra.mrb[58].mxu1 %vm258_vm0, %v2161_v29  ;;  %599 = vmatprep.mubr.f32.mxu0 %v1993_v40 }
  0xc7   : > { %856 = vmatprep.mubr.f32.mxu1 %v1993_v40 }
  0xc9   : > { %1597 = vmatmul.mubr.msk.f32.gmra.mrb[60].mxu0 %vm258_vm0, %v2164_v30 }
  0xca   : > { %1629 = vmatmul.mubr.msk.f32.gmra.mrb[60].mxu1 %vm258_vm0, %v2164_v30  ;;  %605 = vmatprep.mubr.f32.mxu0 %v1993_v40 }
  0xcb   : > { %862 = vmatprep.mubr.f32.mxu1 %v1993_v40 }
  0xcd   : > { %1598 = vmatmul.mubr.msk.f32.gmra.mrb[62].mxu0 %vm258_vm0, %v2167_v31 }
  0xce   : > { %1630 = vmatmul.mubr.msk.f32.gmra.mrb[62].mxu1 %vm258_vm0, %v2167_v31  ;;  %1062 = vmatprep.mubr.f32.mxu0 %v3099_v6 }
  0xcf   : > { %1133 = vmatprep.mubr.f32.mxu1 %v3099_v6 }
 0x124   : > { %v421_v0 = vpop.f32.mrb[0].mxu0 }
 0x125   : > { %869 = vst [vmem:[%s2071_s11] sm:$0xff] %v421_v0  ;;  %v678_v1 = vpop.f32.mrb[0].mxu1  ;;  %v423_v2 = vpop.f32.mrb[1].mxu0  ;;  %v2370_v4 = vmul.f32 %v421_v0, %v421_v0 }
 0x126   : > { %871 = vst [vmem:[%s2071_s11 + $0x10] sm:$0xff] %v678_v1  ;;  %870 = vst [vmem:[%s2071_s11 + $0x8] sm:$0xff] %v423_v2  ;;  %v680_v3 = vpop.f32.mrb[1].mxu1  ;;  %v2374_v7 = vmul.f32 %v678_v1, %v678_v1  ;;  %v2376_v8 = vmul.f32 %v423_v2, %v423_v2 }
 0x127   : > { %872 = vst [vmem:[%s2071_s11 + $0x18] sm:$0xff] %v680_v3  ;;  %v2387_v18 = vmul.f32 %v680_v3, %v680_v3 }
 0x128   : > { %v427_v5 = vpop.f32.mrb[2].mxu0 }
 0x129   : > { %873 = vst [vmem:[%s2071_s11 + $0x20] sm:$0xff] %v427_v5  ;;  %v1670_v9 = vpack.c.bf16 %v427_v5, %v421_v0  ;;  %v2379_v10 = vmul.f32 %v427_v5, %v427_v5  ;;  %v684_v11 = vpop.f32.mrb[2].mxu1  ;;  %v429_v12 = vpop.f32.mrb[3].mxu0 }
 0x12a   : > { %875 = vst [vmem:[%s2071_s11 + $0x30] sm:$0xff] %v684_v11  ;;  %v1734_v13 = vpack.c.bf16 %v684_v11, %v678_v1  ;;  %v2382_v14 = vmul.f32 %v684_v11, %v684_v11  ;;  %874 = vst [vmem:[%s2071_s11 + $0x28] sm:$0xff] %v429_v12  ;;  %v1668_v15 = vpack.c.bf16 %v429_v12, %v423_v2  ;;  %v686_v17 = vpop.f32.mrb[3].mxu1 }
 0x12b   : > { %v2385_v16 = vmul.f32 %v429_v12, %v429_v12  ;;  %876 = vst [vmem:[%s2071_s11 + $0x38] sm:$0xff] %v686_v17  ;;  %v1732_v20 = vpack.c.bf16 %v686_v17, %v680_v3  ;;  %v2392_v21 = vmul.f32 %v686_v17, %v686_v17 }
 0x12c   : > { %v433_v23 = vpop.f32.mrb[4].mxu0  ;;  %1669 = vmatprep.subr.bf16.mxu0 %v1668_v15 }
 0x12d   : > { %877 = vst [vmem:[%s2071_s11 + $0x40] sm:$0xff] %v433_v23  ;;  %v690_v25 = vpop.f32.mrb[4].mxu1  ;;  %1733 = vmatprep.subr.bf16.mxu1 %v1732_v20  ;;  %v435_v26 = vpop.f32.mrb[5].mxu0  ;;  %1671 = vmatpush1.bf16.msra.mxu0 %v1670_v9  ;;  %v2404_v29 = vmul.f32 %v433_v23, %v433_v23 }
 0x12e   : > { %879 = vst [vmem:[%s2071_s11 + $0x50] sm:$0xff] %v690_v25  ;;  %878 = vst [vmem:[%s2071_s11 + $0x48] sm:$0xff] %v435_v26  ;;  %v692_v28 = vpop.f32.mrb[5].mxu1  ;;  %1735 = vmatpush1.bf16.msra.mxu1 %v1734_v13  ;;  %v2406_v31 = vmul.f32 %v690_v25, %v690_v25  ;;  %v2408_v40 = vmul.f32 %v435_v26, %v435_v26 }
 0x12f   : > { %880 = vst [vmem:[%s2071_s11 + $0x58] sm:$0xff] %v692_v28  ;;  %v2419_v60 = vmul.f32 %v692_v28, %v692_v28 }
 0x130   : > { %v439_v30 = vpop.f32.mrb[6].mxu0 }
 0x131   : > { %881 = vst [vmem:[%s2071_s11 + $0x60] sm:$0xff] %v439_v30  ;;  %v1674_v51 = vpack.c.bf16 %v439_v30, %v433_v23  ;;  %v2411_v52 = vmul.f32 %v439_v30, %v439_v30  ;;  %v696_v53 = vpop.f32.mrb[6].mxu1  ;;  %v441_v54 = vpop.f32.mrb[7].mxu0 }
 0x132   : > { %883 = vst [vmem:[%s2071_s11 + $0x70] sm:$0xff] %v696_v53  ;;  %v1738_v55 = vpack.c.bf16 %v696_v53, %v690_v25  ;;  %v2414_v56 = vmul.f32 %v696_v53, %v696_v53  ;;  %882 = vst [vmem:[%s2071_s11 + $0x68] sm:$0xff] %v441_v54  ;;  %v1672_v57 = vpack.c.bf16 %v441_v54, %v435_v26  ;;  %v698_v59 = vpop.f32.mrb[7].mxu1 }
 0x133   : > { %v2417_v58 = vmul.f32 %v441_v54, %v441_v54  ;;  %884 = vst [vmem:[%s2071_s11 + $0x78] sm:$0xff] %v698_v59  ;;  %v1736_v62 = vpack.c.bf16 %v698_v59, %v692_v28  ;;  %v2424_v63 = vmul.f32 %v698_v59, %v698_v59 }
 0x134   : > { %v445_v33 = vpop.f32.mrb[8].mxu0  ;;  %1673 = vmatprep.subr.bf16.mxu0 %v1672_v57 }
 0x135   : > { %885 = vst [vmem:[%s2071_s11 + $0x80] sm:$0xff] %v445_v33  ;;  %v702_v35 = vpop.f32.mrb[8].mxu1  ;;  %1737 = vmatprep.subr.bf16.mxu1 %v1736_v62  ;;  %v447_v36 = vpop.f32.mrb[9].mxu0  ;;  %1675 = vmatpush1.bf16.msra.mxu0 %v1674_v51  ;;  %v2436_v39 = vmul.f32 %v445_v33, %v445_v33 }
 0x136   : > { %887 = vst [vmem:[%s2071_s11 + $0x90] sm:$0xff] %v702_v35  ;;  %886 = vst [vmem:[%s2071_s11 + $0x88] sm:$0xff] %v447_v36  ;;  %v704_v38 = vpop.f32.mrb[9].mxu1  ;;  %1739 = vmatpush1.bf16.msra.mxu1 %v1738_v55  ;;  %v2438_v42 = vmul.f32 %v702_v35, %v702_v35  ;;  %v2440_v43 = vmul.f32 %v447_v36, %v447_v36 }
 0x137   : > { %888 = vst [vmem:[%s2071_s11 + $0x98] sm:$0xff] %v704_v38  ;;  %v2451_v2 = vmul.f32 %v704_v38, %v704_v38 }
 0x138   : > { %v451_v41 = vpop.f32.mrb[10].mxu0 }
 0x139   : > { %889 = vst [vmem:[%s2071_s11 + $0xa0] sm:$0xff] %v451_v41  ;;  %v1678_v44 = vpack.c.bf16 %v451_v41, %v445_v33  ;;  %v2443_v45 = vmul.f32 %v451_v41, %v451_v41  ;;  %v708_v46 = vpop.f32.mrb[10].mxu1  ;;  %v453_v47 = vpop.f32.mrb[11].mxu0 }
 0x13a   : > { %891 = vst [vmem:[%s2071_s11 + $0xb0] sm:$0xff] %v708_v46  ;;  %v1742_v48 = vpack.c.bf16 %v708_v46, %v702_v35  ;;  %v2446_v49 = vmul.f32 %v708_v46, %v708_v46  ;;  %890 = vst [vmem:[%s2071_s11 + $0xa8] sm:$0xff] %v453_v47  ;;  %v1676_v50 = vpack.c.bf16 %v453_v47, %v447_v36  ;;  %v710_v1 = vpop.f32.mrb[11].mxu1 }
 0x13b   : > { %v2449_v0 = vmul.f32 %v453_v47, %v453_v47  ;;  %892 = vst [vmem:[%s2071_s11 + $0xb8] sm:$0xff] %v710_v1  ;;  %v1740_v5 = vpack.c.bf16 %v710_v1, %v704_v38  ;;  %v2456_v9 = vmul.f32 %v710_v1, %v710_v1 }
 0x13c   : > { %v457_v12 = vpop.f32.mrb[12].mxu0  ;;  %1677 = vmatprep.subr.bf16.mxu0 %v1676_v50 }
 0x13d   : > { %893 = vst [vmem:[%s2071_s11 + $0xc0] sm:$0xff] %v457_v12  ;;  %v714_v15 = vpop.f32.mrb[12].mxu1  ;;  %1741 = vmatprep.subr.bf16.mxu1 %v1740_v5  ;;  %v459_v17 = vpop.f32.mrb[13].mxu0  ;;  %1679 = vmatpush1.bf16.msra.mxu0 %v1678_v44  ;;  %v2468_v25 = vmul.f32 %v457_v12, %v457_v12 }
 0x13e   : > { %895 = vst [vmem:[%s2071_s11 + $0xd0] sm:$0xff] %v714_v15  ;;  %894 = vst [vmem:[%s2071_s11 + $0xc8] sm:$0xff] %v459_v17  ;;  %v716_v23 = vpop.f32.mrb[13].mxu1  ;;  %1743 = vmatpush1.bf16.msra.mxu1 %v1742_v48  ;;  %v2470_v28 = vmul.f32 %v714_v15, %v714_v15  ;;  %v2472_v30 = vmul.f32 %v459_v17, %v459_v17 }
 0x13f   : > { %896 = vst [vmem:[%s2071_s11 + $0xd8] sm:$0xff] %v716_v23  ;;  %v2483_v36 = vmul.f32 %v716_v23, %v716_v23 }
 0x140   : > { %v463_v26 = vpop.f32.mrb[14].mxu0 }
 0x141   : > { %897 = vst [vmem:[%s2071_s11 + $0xe0] sm:$0xff] %v463_v26  ;;  %v1682_v51 = vpack.c.bf16 %v463_v26, %v457_v12  ;;  %v2475_v53 = vmul.f32 %v463_v26, %v463_v26  ;;  %v720_v54 = vpop.f32.mrb[14].mxu1  ;;  %v465_v55 = vpop.f32.mrb[15].mxu0 }
 0x142   : > { %899 = vst [vmem:[%s2071_s11 + $0xf0] sm:$0xff] %v720_v54  ;;  %v1746_v57 = vpack.c.bf16 %v720_v54, %v714_v15  ;;  %v2478_v59 = vmul.f32 %v720_v54, %v720_v54  ;;  %898 = vst [vmem:[%s2071_s11 + $0xe8] sm:$0xff] %v465_v55  ;;  %v1680_v62 = vpack.c.bf16 %v465_v55, %v459_v17  ;;  %v722_v35 = vpop.f32.mrb[15].mxu1 }
 0x143   : > { %v2481_v33 = vmul.f32 %v465_v55, %v465_v55  ;;  %900 = vst [vmem:[%s2071_s11 + $0xf8] sm:$0xff] %v722_v35  ;;  %v1744_v41 = vpack.c.bf16 %v722_v35, %v716_v23  ;;  %v2488_v44 = vmul.f32 %v722_v35, %v722_v35 }
 0x144   : > { %v469_v47 = vpop.f32.mrb[16].mxu0  ;;  %1681 = vmatprep.subr.bf16.mxu0 %v1680_v62 }
 0x145   : > { %901 = vst [vmem:[%s2071_s11 + $0x100] sm:$0xff] %v469_v47  ;;  %v726_v50 = vpop.f32.mrb[16].mxu1  ;;  %1745 = vmatprep.subr.bf16.mxu1 %v1744_v41  ;;  %v471_v1 = vpop.f32.mrb[17].mxu0  ;;  %1683 = vmatpush1.bf16.msra.mxu0 %v1682_v51  ;;  %v2500_v15 = vmul.f32 %v469_v47, %v469_v47 }
 0x146   : > { %903 = vst [vmem:[%s2071_s11 + $0x110] sm:$0xff] %v726_v50  ;;  %902 = vst [vmem:[%s2071_s11 + $0x108] sm:$0xff] %v471_v1  ;;  %v728_v12 = vpop.f32.mrb[17].mxu1  ;;  %1747 = vmatpush1.bf16.msra.mxu1 %v1746_v57  ;;  %v2502_v23 = vmul.f32 %v726_v50, %v726_v50  ;;  %v2504_v26 = vmul.f32 %v471_v1, %v471_v1 }
 0x147   : > { %904 = vst [vmem:[%s2071_s11 + $0x118] sm:$0xff] %v728_v12  ;;  %v2515_v5 = vmul.f32 %v728_v12, %v728_v12 }
 0x148   : > { %v475_v17 = vpop.f32.mrb[18].mxu0 }
 0x149   : > { %905 = vst [vmem:[%s2071_s11 + $0x120] sm:$0xff] %v475_v17  ;;  %v1686_v51 = vpack.c.bf16 %v475_v17, %v469_v47  ;;  %v2507_v54 = vmul.f32 %v475_v17, %v475_v17  ;;  %v732_v55 = vpop.f32.mrb[18].mxu1  ;;  %v477_v62 = vpop.f32.mrb[19].mxu0 }
 0x14a   : > { %907 = vst [vmem:[%s2071_s11 + $0x130] sm:$0xff] %v732_v55  ;;  %v1750_v35 = vpack.c.bf16 %v732_v55, %v726_v50  ;;  %v2510_v41 = vmul.f32 %v732_v55, %v732_v55  ;;  %906 = vst [vmem:[%s2071_s11 + $0x128] sm:$0xff] %v477_v62  ;;  %v1684_v57 = vpack.c.bf16 %v477_v62, %v471_v1  ;;  %v734_v38 = vpop.f32.mrb[19].mxu1 }
 0x14b   : > { %v2513_v46 = vmul.f32 %v477_v62, %v477_v62  ;;  %908 = vst [vmem:[%s2071_s11 + $0x138] sm:$0xff] %v734_v38  ;;  %v1748_v17 = vpack.c.bf16 %v734_v38, %v728_v12  ;;  %v2520_v48 = vmul.f32 %v734_v38, %v734_v38 }
 0x14c   : > { %v481_v55 = vpop.f32.mrb[20].mxu0  ;;  %1685 = vmatprep.subr.bf16.mxu0 %v1684_v57 }
 0x14d   : > { %909 = vst [vmem:[%s2071_s11 + $0x140] sm:$0xff] %v481_v55  ;;  %v738_v62 = vpop.f32.mrb[20].mxu1  ;;  %1749 = vmatprep.subr.bf16.mxu1 %v1748_v17  ;;  %v483_v11 = vpop.f32.mrb[21].mxu0  ;;  %1687 = vmatpush1.bf16.msra.mxu0 %v1686_v51  ;;  %v2532_v57 = vmul.f32 %v481_v55, %v481_v55 }
 0x14e   : > { %911 = vst [vmem:[%s2071_s11 + $0x150] sm:$0xff] %v738_v62  ;;  %910 = vst [vmem:[%s2071_s11 + $0x148] sm:$0xff] %v483_v11  ;;  %v740_v38 = vpop.f32.mrb[21].mxu1  ;;  %1751 = vmatpush1.bf16.msra.mxu1 %v1750_v35  ;;  %v2534_v47 = vmul.f32 %v738_v62, %v738_v62  ;;  %v2536_v1 = vmul.f32 %v483_v11, %v483_v11 }
 0x14f   : > { %912 = vst [vmem:[%s2071_s11 + $0x158] sm:$0xff] %v740_v38  ;;  %3183 = vst [vmem:[#allocation5_spill] sm:$0xff] %v2532_v57  ;;  %v2547_v37 = vmul.f32 %v740_v38, %v740_v38 }
 0x150   : > { %v487_v50 = vpop.f32.mrb[22].mxu0  ;;  %3184 = vst [vmem:[#allocation6_spill] sm:$0xff] %v2534_v47 }
 0x151   : > { %913 = vst [vmem:[%s2071_s11 + $0x160] sm:$0xff] %v487_v50  ;;  %v1690_v51 = vpack.c.bf16 %v487_v50, %v481_v55  ;;  %v2539_v17 = vmul.f32 %v487_v50, %v487_v50  ;;  %v744_v3 = vpop.f32.mrb[22].mxu1  ;;  %v489_v12 = vpop.f32.mrb[23].mxu0 }
 0x152   : > { %915 = vst [vmem:[%s2071_s11 + $0x170] sm:$0xff] %v744_v3  ;;  %v1754_v20 = vpack.c.bf16 %v744_v3, %v738_v62  ;;  %v2542_v13 = vmul.f32 %v744_v3, %v744_v3  ;;  %914 = vst [vmem:[%s2071_s11 + $0x168] sm:$0xff] %v489_v12  ;;  %v1688_v35 = vpack.c.bf16 %v489_v12, %v483_v11  ;;  %v746_v61 = vpop.f32.mrb[23].mxu1 }
 0x153   : > { %3185 = vst [vmem:[#allocation7_spill] sm:$0xff] %v2539_v17  ;;  %v2545_v32 = vmul.f32 %v489_v12, %v489_v12  ;;  %916 = vst [vmem:[%s2071_s11 + $0x178] sm:$0xff] %v746_v61  ;;  %v1752_v55 = vpack.c.bf16 %v746_v61, %v740_v38  ;;  %v2552_v34 = vmul.f32 %v746_v61, %v746_v61 }
 0x154   : > { %3186 = vst [vmem:[#allocation8_spill] sm:$0xff] %v2542_v13  ;;  %v493_v62 = vpop.f32.mrb[24].mxu0  ;;  %1689 = vmatprep.subr.bf16.mxu0 %v1688_v35 }
 0x155   : > { %917 = vst [vmem:[%s2071_s11 + $0x180] sm:$0xff] %v493_v62  ;;  %v750_v12 = vpop.f32.mrb[24].mxu1  ;;  %1753 = vmatprep.subr.bf16.mxu1 %v1752_v55  ;;  %v495_v22 = vpop.f32.mrb[25].mxu0  ;;  %1691 = vmatpush1.bf16.msra.mxu0 %v1690_v51  ;;  %v2564_v35 = vmul.f32 %v493_v62, %v493_v62 }
 0x156   : > { %919 = vst [vmem:[%s2071_s11 + $0x190] sm:$0xff] %v750_v12  ;;  %918 = vst [vmem:[%s2071_s11 + $0x188] sm:$0xff] %v495_v22  ;;  %v752_v61 = vpop.f32.mrb[25].mxu1  ;;  %1755 = vmatpush1.bf16.msra.mxu1 %v1754_v20  ;;  %v2566_v50 = vmul.f32 %v750_v12, %v750_v12  ;;  %v2568_v11 = vmul.f32 %v495_v22, %v495_v22 }
 0x157   : > { %920 = vst [vmem:[%s2071_s11 + $0x198] sm:$0xff] %v752_v61  ;;  %3187 = vst [vmem:[#allocation9_spill] sm:$0xff] %v2564_v35  ;;  %v2579_v13 = vmul.f32 %v752_v61, %v752_v61 }
 0x158   : > { %v499_v3 = vpop.f32.mrb[26].mxu0  ;;  %3188 = vst [vmem:[#allocation10_spill] sm:$0xff] %v2566_v50  ;;  %3189 = vst [vmem:[#allocation11_spill] sm:$0xff] %v2568_v11 }
 0x159   : > { %921 = vst [vmem:[%s2071_s11 + $0x1a0] sm:$0xff] %v499_v3  ;;  %v1694_v51 = vpack.c.bf16 %v499_v3, %v493_v62  ;;  %v2571_v55 = vmul.f32 %v499_v3, %v499_v3  ;;  %v756_v19 = vpop.f32.mrb[26].mxu1  ;;  %v501_v38 = vpop.f32.mrb[27].mxu0  ;;  %3193 = vst [vmem:[#allocation15_spill] sm:$0xff] %v2579_v13 }
 0x15a   : > { %923 = vst [vmem:[%s2071_s11 + $0x1b0] sm:$0xff] %v756_v19  ;;  %v1758_v6 = vpack.c.bf16 %v756_v19, %v750_v12  ;;  %v2574_v27 = vmul.f32 %v756_v19, %v756_v19  ;;  %922 = vst [vmem:[%s2071_s11 + $0x1a8] sm:$0xff] %v501_v38  ;;  %v1692_v20 = vpack.c.bf16 %v501_v38, %v495_v22  ;;  %v758_v47 = vpop.f32.mrb[27].mxu1 }
 0x15b   : > { %3190 = vst [vmem:[#allocation12_spill] sm:$0xff] %v2571_v55  ;;  %v2577_v24 = vmul.f32 %v501_v38, %v501_v38  ;;  %924 = vst [vmem:[%s2071_s11 + $0x1b8] sm:$0xff] %v758_v47  ;;  %v1756_v62 = vpack.c.bf16 %v758_v47, %v752_v61  ;;  %v2584_v57 = vmul.f32 %v758_v47, %v758_v47 }
 0x15c   : > { %3191 = vst [vmem:[#allocation13_spill] sm:$0xff] %v2574_v27  ;;  %v505_v12 = vpop.f32.mrb[28].mxu0  ;;  %1693 = vmatprep.subr.bf16.mxu0 %v1692_v20 }
 0x15d   : > { %3192 = vst [vmem:[#allocation14_spill] sm:$0xff] %v2577_v24  ;;  %3194 = vst [vmem:[#allocation16_spill] sm:$0xff] %v2584_v57  ;;  %v762_v38 = vpop.f32.mrb[28].mxu1  ;;  %1757 = vmatprep.subr.bf16.mxu1 %v1756_v62  ;;  %v507_v17 = vpop.f32.mrb[29].mxu0  ;;  %1695 = vmatpush1.bf16.msra.mxu0 %v1694_v51  ;;  %v2596_v20 = vmul.f32 %v505_v12, %v505_v12 }
 0x15e   : > { %925 = vst [vmem:[%s2071_s11 + $0x1c0] sm:$0xff] %v505_v12  ;;  %927 = vst [vmem:[%s2071_s11 + $0x1d0] sm:$0xff] %v762_v38  ;;  %v764_v47 = vpop.f32.mrb[29].mxu1  ;;  %1759 = vmatpush1.bf16.msra.mxu1 %v1758_v6  ;;  %v2598_v3 = vmul.f32 %v762_v38, %v762_v38  ;;  %v2600_v22 = vmul.f32 %v507_v17, %v507_v17 }
 0x15f   : > { %926 = vst [vmem:[%s2071_s11 + $0x1c8] sm:$0xff] %v507_v17  ;;  %928 = vst [vmem:[%s2071_s11 + $0x1d8] sm:$0xff] %v764_v47  ;;  %v2611_v57 = vmul.f32 %v764_v47, %v764_v47 }
 0x160   : > { %3195 = vst [vmem:[#allocation17_spill] sm:$0xff] %v2596_v20  ;;  %v511_v19 = vpop.f32.mrb[30].mxu0  ;;  %3196 = vst [vmem:[#allocation18_spill] sm:$0xff] %v2598_v3 }
 0x161   : > { %3197 = vst [vmem:[#allocation19_spill] sm:$0xff] %v2600_v22  ;;  %929 = vst [vmem:[%s2071_s11 + $0x1e0] sm:$0xff] %v511_v19  ;;  %v1698_v51 = vpack.c.bf16 %v511_v19, %v505_v12  ;;  %v2603_v62 = vmul.f32 %v511_v19, %v511_v19  ;;  %v768_v50 = vpop.f32.mrb[30].mxu1  ;;  %v513_v61 = vpop.f32.mrb[31].mxu0 }
 0x162   : > { %931 = vst [vmem:[%s2071_s11 + $0x1f0] sm:$0xff] %v768_v50  ;;  %v1762_v27 = vpack.c.bf16 %v768_v50, %v762_v38  ;;  %v2606_v35 = vmul.f32 %v768_v50, %v768_v50  ;;  %930 = vst [vmem:[%s2071_s11 + $0x1e8] sm:$0xff] %v513_v61  ;;  %v1696_v6 = vpack.c.bf16 %v513_v61, %v507_v17  ;;  %v770_v13 = vpop.f32.mrb[31].mxu1 }
 0x163   : > { %3198 = vst [vmem:[#allocation20_spill] sm:$0xff] %v2603_v62  ;;  %v2609_v55 = vmul.f32 %v513_v61, %v513_v61  ;;  %3201 = vst [vmem:[#allocation23_spill] sm:$0xff] %v2611_v57  ;;  %v1760_v12 = vpack.c.bf16 %v770_v13, %v764_v47  ;;  %v2616_v11 = vmul.f32 %v770_v13, %v770_v13 }
 0x164   : > { %3199 = vst [vmem:[#allocation21_spill] sm:$0xff] %v2606_v35  ;;  %932 = vst [vmem:[%s2071_s11 + $0x1f8] sm:$0xff] %v770_v13  ;;  %v517_v38 = vpop.f32.mrb[32].mxu0  ;;  %1697 = vmatprep.subr.bf16.mxu0 %v1696_v6 }
 0x165   : > { %3200 = vst [vmem:[#allocation22_spill] sm:$0xff] %v2609_v55  ;;  %3202 = vst [vmem:[#allocation24_spill] sm:$0xff] %v2616_v11  ;;  %v774_v61 = vpop.f32.mrb[32].mxu1  ;;  %1761 = vmatprep.subr.bf16.mxu1 %v1760_v12  ;;  %v519_v24 = vpop.f32.mrb[33].mxu0  ;;  %1699 = vmatpush1.bf16.msra.mxu0 %v1698_v51  ;;  %v2628_v6 = vmul.f32 %v517_v38, %v517_v38 }
 0x166   : > { %933 = vst [vmem:[%s2071_s11 + $0x200] sm:$0xff] %v517_v38  ;;  %935 = vst [vmem:[%s2071_s11 + $0x210] sm:$0xff] %v774_v61  ;;  %v776_v13 = vpop.f32.mrb[33].mxu1  ;;  %1763 = vmatpush1.bf16.msra.mxu1 %v1762_v27  ;;  %v2630_v19 = vmul.f32 %v774_v61, %v774_v61  ;;  %v2632_v17 = vmul.f32 %v519_v24, %v519_v24 }
 0x167   : > { %934 = vst [vmem:[%s2071_s11 + $0x208] sm:$0xff] %v519_v24  ;;  %936 = vst [vmem:[%s2071_s11 + $0x218] sm:$0xff] %v776_v13  ;;  %v2643_v11 = vmul.f32 %v776_v13, %v776_v13 }
 0x168   : > { %3203 = vst [vmem:[#allocation25_spill] sm:$0xff] %v2628_v6  ;;  %v523_v50 = vpop.f32.mrb[34].mxu0  ;;  %3204 = vst [vmem:[#allocation26_spill] sm:$0xff] %v2630_v19 }
 0x169   : > { %3205 = vst [vmem:[#allocation27_spill] sm:$0xff] %v2632_v17  ;;  %937 = vst [vmem:[%s2071_s11 + $0x220] sm:$0xff] %v523_v50  ;;  %v1702_v51 = vpack.c.bf16 %v523_v50, %v517_v38  ;;  %v2635_v12 = vmul.f32 %v523_v50, %v523_v50  ;;  %v780_v3 = vpop.f32.mrb[34].mxu1  ;;  %v525_v47 = vpop.f32.mrb[35].mxu0 }
 0x16a   : > { %939 = vst [vmem:[%s2071_s11 + $0x230] sm:$0xff] %v780_v3  ;;  %v1766_v35 = vpack.c.bf16 %v780_v3, %v774_v61  ;;  %v2638_v20 = vmul.f32 %v780_v3, %v780_v3  ;;  %938 = vst [vmem:[%s2071_s11 + $0x228] sm:$0xff] %v525_v47  ;;  %v1700_v27 = vpack.c.bf16 %v525_v47, %v519_v24  ;;  %v782_v57 = vpop.f32.mrb[35].mxu1 }
 0x16b   : > { %3206 = vst [vmem:[#allocation28_spill] sm:$0xff] %v2635_v12  ;;  %v2641_v62 = vmul.f32 %v525_v47, %v525_v47  ;;  %3209 = vst [vmem:[#allocation31_spill] sm:$0xff] %v2643_v11  ;;  %v1764_v38 = vpack.c.bf16 %v782_v57, %v776_v13  ;;  %v2648_v22 = vmul.f32 %v782_v57, %v782_v57 }
 0x16c   : > { %3207 = vst [vmem:[#allocation29_spill] sm:$0xff] %v2638_v20  ;;  %940 = vst [vmem:[%s2071_s11 + $0x238] sm:$0xff] %v782_v57  ;;  %v529_v61 = vpop.f32.mrb[36].mxu0  ;;  %1701 = vmatprep.subr.bf16.mxu0 %v1700_v27 }
 0x16d   : > { %3208 = vst [vmem:[#allocation30_spill] sm:$0xff] %v2641_v62  ;;  %3210 = vst [vmem:[#allocation32_spill] sm:$0xff] %v2648_v22  ;;  %v786_v47 = vpop.f32.mrb[36].mxu1  ;;  %1765 = vmatprep.subr.bf16.mxu1 %v1764_v38  ;;  %v531_v55 = vpop.f32.mrb[37].mxu0  ;;  %1703 = vmatpush1.bf16.msra.mxu0 %v1702_v51  ;;  %v2660_v27 = vmul.f32 %v529_v61, %v529_v61 }
 0x16e   : > { %941 = vst [vmem:[%s2071_s11 + $0x240] sm:$0xff] %v529_v61  ;;  %943 = vst [vmem:[%s2071_s11 + $0x250] sm:$0xff] %v786_v47  ;;  %v788_v57 = vpop.f32.mrb[37].mxu1  ;;  %1767 = vmatpush1.bf16.msra.mxu1 %v1766_v35  ;;  %v2662_v50 = vmul.f32 %v786_v47, %v786_v47  ;;  %v2664_v24 = vmul.f32 %v531_v55, %v531_v55 }
 0x16f   : > { %942 = vst [vmem:[%s2071_s11 + $0x248] sm:$0xff] %v531_v55  ;;  %944 = vst [vmem:[%s2071_s11 + $0x258] sm:$0xff] %v788_v57  ;;  %v2675_v22 = vmul.f32 %v788_v57, %v788_v57 }
 0x170   : > { %3211 = vst [vmem:[#allocation33_spill] sm:$0xff] %v2660_v27  ;;  %v535_v3 = vpop.f32.mrb[38].mxu0  ;;  %3212 = vst [vmem:[#allocation34_spill] sm:$0xff] %v2662_v50 }
 0x171   : > { %3213 = vst [vmem:[#allocation35_spill] sm:$0xff] %v2664_v24  ;;  %945 = vst [vmem:[%s2071_s11 + $0x260] sm:$0xff] %v535_v3  ;;  %v1706_v51 = vpack.c.bf16 %v535_v3, %v529_v61  ;;  %v2667_v38 = vmul.f32 %v535_v3, %v535_v3  ;;  %v792_v19 = vpop.f32.mrb[38].mxu1  ;;  %v537_v13 = vpop.f32.mrb[39].mxu0 }
 0x172   : > { %947 = vst [vmem:[%s2071_s11 + $0x270] sm:$0xff] %v792_v19  ;;  %v1770_v20 = vpack.c.bf16 %v792_v19, %v786_v47  ;;  %v2670_v6 = vmul.f32 %v792_v19, %v792_v19  ;;  %946 = vst [vmem:[%s2071_s11 + $0x268] sm:$0xff] %v537_v13  ;;  %v1704_v35 = vpack.c.bf16 %v537_v13, %v531_v55  ;;  %v794_v11 = vpop.f32.mrb[39].mxu1 }
 0x173   : > { %3214 = vst [vmem:[#allocation36_spill] sm:$0xff] %v2667_v38  ;;  %v2673_v12 = vmul.f32 %v537_v13, %v537_v13  ;;  %3217 = vst [vmem:[#allocation39_spill] sm:$0xff] %v2675_v22  ;;  %v1768_v61 = vpack.c.bf16 %v794_v11, %v788_v57  ;;  %v2680_v17 = vmul.f32 %v794_v11, %v794_v11 }
 0x174   : > { %3215 = vst [vmem:[#allocation37_spill] sm:$0xff] %v2670_v6  ;;  %948 = vst [vmem:[%s2071_s11 + $0x278] sm:$0xff] %v794_v11  ;;  %v541_v47 = vpop.f32.mrb[40].mxu0  ;;  %1705 = vmatprep.subr.bf16.mxu0 %v1704_v35 }
 0x175   : > { %3216 = vst [vmem:[#allocation38_spill] sm:$0xff] %v2673_v12  ;;  %3218 = vst [vmem:[#allocation40_spill] sm:$0xff] %v2680_v17  ;;  %v798_v13 = vpop.f32.mrb[40].mxu1  ;;  %1769 = vmatprep.subr.bf16.mxu1 %v1768_v61  ;;  %v543_v62 = vpop.f32.mrb[41].mxu0  ;;  %1707 = vmatpush1.bf16.msra.mxu0 %v1706_v51  ;;  %v2692_v35 = vmul.f32 %v541_v47, %v541_v47 }
 0x176   : > { %949 = vst [vmem:[%s2071_s11 + $0x280] sm:$0xff] %v541_v47  ;;  %951 = vst [vmem:[%s2071_s11 + $0x290] sm:$0xff] %v798_v13  ;;  %v800_v11 = vpop.f32.mrb[41].mxu1  ;;  %1771 = vmatpush1.bf16.msra.mxu1 %v1770_v20  ;;  %v2694_v3 = vmul.f32 %v798_v13, %v798_v13  ;;  %v2696_v55 = vmul.f32 %v543_v62, %v543_v62 }
 0x177   : > { %950 = vst [vmem:[%s2071_s11 + $0x288] sm:$0xff] %v543_v62  ;;  %952 = vst [vmem:[%s2071_s11 + $0x298] sm:$0xff] %v800_v11  ;;  %v2707_v17 = vmul.f32 %v800_v11, %v800_v11 }
 0x178   : > { %3219 = vst [vmem:[#allocation41_spill] sm:$0xff] %v2692_v35  ;;  %v547_v19 = vpop.f32.mrb[42].mxu0  ;;  %3220 = vst [vmem:[#allocation42_spill] sm:$0xff] %v2694_v3 }
 0x179   : > { %3221 = vst [vmem:[#allocation43_spill] sm:$0xff] %v2696_v55  ;;  %953 = vst [vmem:[%s2071_s11 + $0x2a0] sm:$0xff] %v547_v19  ;;  %v1710_v51 = vpack.c.bf16 %v547_v19, %v541_v47  ;;  %v2699_v61 = vmul.f32 %v547_v19, %v547_v19  ;;  %v804_v50 = vpop.f32.mrb[42].mxu1  ;;  %v549_v57 = vpop.f32.mrb[43].mxu0 }
 0x17a   : > { %955 = vst [vmem:[%s2071_s11 + $0x2b0] sm:$0xff] %v804_v50  ;;  %v1774_v6 = vpack.c.bf16 %v804_v50, %v798_v13  ;;  %v2702_v27 = vmul.f32 %v804_v50, %v804_v50  ;;  %954 = vst [vmem:[%s2071_s11 + $0x2a8] sm:$0xff] %v549_v57  ;;  %v1708_v20 = vpack.c.bf16 %v549_v57, %v543_v62  ;;  %v806_v22 = vpop.f32.mrb[43].mxu1 }
 0x17b   : > { %3222 = vst [vmem:[#allocation44_spill] sm:$0xff] %v2699_v61  ;;  %v2705_v38 = vmul.f32 %v549_v57, %v549_v57  ;;  %3225 = vst [vmem:[#allocation47_spill] sm:$0xff] %v2707_v17  ;;  %v1772_v47 = vpack.c.bf16 %v806_v22, %v800_v11  ;;  %v2712_v24 = vmul.f32 %v806_v22, %v806_v22 }
 0x17c   : > { %3223 = vst [vmem:[#allocation45_spill] sm:$0xff] %v2702_v27  ;;  %956 = vst [vmem:[%s2071_s11 + $0x2b8] sm:$0xff] %v806_v22  ;;  %v553_v13 = vpop.f32.mrb[44].mxu0  ;;  %1709 = vmatprep.subr.bf16.mxu0 %v1708_v20 }
 0x17d   : > { %3224 = vst [vmem:[#allocation46_spill] sm:$0xff] %v2705_v38  ;;  %3226 = vst [vmem:[#allocation48_spill] sm:$0xff] %v2712_v24  ;;  %v810_v57 = vpop.f32.mrb[44].mxu1  ;;  %1773 = vmatprep.subr.bf16.mxu1 %v1772_v47  ;;  %v555_v12 = vpop.f32.mrb[45].mxu0  ;;  %1711 = vmatpush1.bf16.msra.mxu0 %v1710_v51  ;;  %v2724_v20 = vmul.f32 %v553_v13, %v553_v13 }
 0x17e   : > { %957 = vst [vmem:[%s2071_s11 + $0x2c0] sm:$0xff] %v553_v13  ;;  %959 = vst [vmem:[%s2071_s11 + $0x2d0] sm:$0xff] %v810_v57  ;;  %v812_v22 = vpop.f32.mrb[45].mxu1  ;;  %1775 = vmatpush1.bf16.msra.mxu1 %v1774_v6  ;;  %v2726_v19 = vmul.f32 %v810_v57, %v810_v57  ;;  %v2728_v62 = vmul.f32 %v555_v12, %v555_v12 }
 0x17f   : > { %958 = vst [vmem:[%s2071_s11 + $0x2c8] sm:$0xff] %v555_v12  ;;  %960 = vst [vmem:[%s2071_s11 + $0x2d8] sm:$0xff] %v812_v22  ;;  %v2739_v24 = vmul.f32 %v812_v22, %v812_v22 }
 0x180   : > { %3227 = vst [vmem:[#allocation49_spill] sm:$0xff] %v2724_v20  ;;  %v559_v50 = vpop.f32.mrb[46].mxu0  ;;  %3228 = vst [vmem:[#allocation50_spill] sm:$0xff] %v2726_v19 }
 0x181   : > { %3229 = vst [vmem:[#allocation51_spill] sm:$0xff] %v2728_v62  ;;  %961 = vst [vmem:[%s2071_s11 + $0x2e0] sm:$0xff] %v559_v50  ;;  %v1714_v51 = vpack.c.bf16 %v559_v50, %v553_v13  ;;  %v2731_v47 = vmul.f32 %v559_v50, %v559_v50  ;;  %v816_v3 = vpop.f32.mrb[46].mxu1  ;;  %v561_v11 = vpop.f32.mrb[47].mxu0 }
 0x182   : > { %963 = vst [vmem:[%s2071_s11 + $0x2f0] sm:$0xff] %v816_v3  ;;  %v1778_v27 = vpack.c.bf16 %v816_v3, %v810_v57  ;;  %v2734_v35 = vmul.f32 %v816_v3, %v816_v3  ;;  %962 = vst [vmem:[%s2071_s11 + $0x2e8] sm:$0xff] %v561_v11  ;;  %v1712_v6 = vpack.c.bf16 %v561_v11, %v555_v12  ;;  %v818_v17 = vpop.f32.mrb[47].mxu1 }
 0x183   : > { %3230 = vst [vmem:[#allocation52_spill] sm:$0xff] %v2731_v47  ;;  %v2737_v61 = vmul.f32 %v561_v11, %v561_v11  ;;  %3233 = vst [vmem:[#allocation55_spill] sm:$0xff] %v2739_v24  ;;  %v1776_v13 = vpack.c.bf16 %v818_v17, %v812_v22  ;;  %v2744_v55 = vmul.f32 %v818_v17, %v818_v17 }
 0x184   : > { %3231 = vst [vmem:[#allocation53_spill] sm:$0xff] %v2734_v35  ;;  %964 = vst [vmem:[%s2071_s11 + $0x2f8] sm:$0xff] %v818_v17  ;;  %v565_v57 = vpop.f32.mrb[48].mxu0  ;;  %1713 = vmatprep.subr.bf16.mxu0 %v1712_v6 }
 0x185   : > { %3232 = vst [vmem:[#allocation54_spill] sm:$0xff] %v2737_v61  ;;  %3234 = vst [vmem:[#allocation56_spill] sm:$0xff] %v2744_v55  ;;  %v822_v11 = vpop.f32.mrb[48].mxu1  ;;  %1777 = vmatprep.subr.bf16.mxu1 %v1776_v13  ;;  %v567_v38 = vpop.f32.mrb[49].mxu0  ;;  %1715 = vmatpush1.bf16.msra.mxu0 %v1714_v51  ;;  %v2756_v6 = vmul.f32 %v565_v57, %v565_v57 }
 0x186   : > { %965 = vst [vmem:[%s2071_s11 + $0x300] sm:$0xff] %v565_v57  ;;  %967 = vst [vmem:[%s2071_s11 + $0x310] sm:$0xff] %v822_v11  ;;  %v824_v17 = vpop.f32.mrb[49].mxu1  ;;  %1779 = vmatpush1.bf16.msra.mxu1 %v1778_v27  ;;  %v2758_v50 = vmul.f32 %v822_v11, %v822_v11  ;;  %v2760_v12 = vmul.f32 %v567_v38, %v567_v38 }
 0x187   : > { %966 = vst [vmem:[%s2071_s11 + $0x308] sm:$0xff] %v567_v38  ;;  %968 = vst [vmem:[%s2071_s11 + $0x318] sm:$0xff] %v824_v17  ;;  %v2771_v55 = vmul.f32 %v824_v17, %v824_v17 }
 0x188   : > { %3235 = vst [vmem:[#allocation57_spill] sm:$0xff] %v2756_v6  ;;  %v571_v3 = vpop.f32.mrb[50].mxu0  ;;  %3236 = vst [vmem:[#allocation58_spill] sm:$0xff] %v2758_v50 }
 0x189   : > { %3237 = vst [vmem:[#allocation59_spill] sm:$0xff] %v2760_v12  ;;  %969 = vst [vmem:[%s2071_s11 + $0x320] sm:$0xff] %v571_v3  ;;  %v1718_v51 = vpack.c.bf16 %v571_v3, %v565_v57  ;;  %v2763_v13 = vmul.f32 %v571_v3, %v571_v3  ;;  %v828_v19 = vpop.f32.mrb[50].mxu1  ;;  %v573_v22 = vpop.f32.mrb[51].mxu0 }
 0x18a   : > { %971 = vst [vmem:[%s2071_s11 + $0x330] sm:$0xff] %v828_v19  ;;  %v1782_v35 = vpack.c.bf16 %v828_v19, %v822_v11  ;;  %v2766_v20 = vmul.f32 %v828_v19, %v828_v19  ;;  %970 = vst [vmem:[%s2071_s11 + $0x328] sm:$0xff] %v573_v22  ;;  %v1716_v27 = vpack.c.bf16 %v573_v22, %v567_v38  ;;  %v830_v24 = vpop.f32.mrb[51].mxu1 }
 0x18b   : > { %3238 = vst [vmem:[#allocation60_spill] sm:$0xff] %v2763_v13  ;;  %v2769_v47 = vmul.f32 %v573_v22, %v573_v22  ;;  %3241 = vst [vmem:[#allocation63_spill] sm:$0xff] %v2771_v55  ;;  %v1780_v57 = vpack.c.bf16 %v830_v24, %v824_v17  ;;  %v2776_v62 = vmul.f32 %v830_v24, %v830_v24 }
 0x18c   : > { %3239 = vst [vmem:[#allocation61_spill] sm:$0xff] %v2766_v20  ;;  %972 = vst [vmem:[%s2071_s11 + $0x338] sm:$0xff] %v830_v24  ;;  %v577_v11 = vpop.f32.mrb[52].mxu0  ;;  %1717 = vmatprep.subr.bf16.mxu0 %v1716_v27 }
 0x18d   : > { %3240 = vst [vmem:[#allocation62_spill] sm:$0xff] %v2769_v47  ;;  %3242 = vst [vmem:[#allocation64_spill] sm:$0xff] %v2776_v62  ;;  %v834_v22 = vpop.f32.mrb[52].mxu1  ;;  %1781 = vmatprep.subr.bf16.mxu1 %v1780_v57  ;;  %v579_v61 = vpop.f32.mrb[53].mxu0  ;;  %1719 = vmatpush1.bf16.msra.mxu0 %v1718_v51  ;;  %v2788_v27 = vmul.f32 %v577_v11, %v577_v11 }
 0x18e   : > { %973 = vst [vmem:[%s2071_s11 + $0x340] sm:$0xff] %v577_v11  ;;  %975 = vst [vmem:[%s2071_s11 + $0x350] sm:$0xff] %v834_v22  ;;  %v836_v24 = vpop.f32.mrb[53].mxu1  ;;  %1783 = vmatpush1.bf16.msra.mxu1 %v1782_v35  ;;  %v2790_v3 = vmul.f32 %v834_v22, %v834_v22  ;;  %v2792_v38 = vmul.f32 %v579_v61, %v579_v61 }
 0x18f   : > { %974 = vst [vmem:[%s2071_s11 + $0x348] sm:$0xff] %v579_v61  ;;  %976 = vst [vmem:[%s2071_s11 + $0x358] sm:$0xff] %v836_v24  ;;  %v2803_v62 = vmul.f32 %v836_v24, %v836_v24 }
 0x190   : > { %3243 = vst [vmem:[#allocation65_spill] sm:$0xff] %v2788_v27  ;;  %v583_v19 = vpop.f32.mrb[54].mxu0  ;;  %3244 = vst [vmem:[#allocation66_spill] sm:$0xff] %v2790_v3 }
 0x191   : > { %3245 = vst [vmem:[#allocation67_spill] sm:$0xff] %v2792_v38  ;;  %977 = vst [vmem:[%s2071_s11 + $0x360] sm:$0xff] %v583_v19  ;;  %v1722_v51 = vpack.c.bf16 %v583_v19, %v577_v11  ;;  %v2795_v57 = vmul.f32 %v583_v19, %v583_v19  ;;  %v840_v50 = vpop.f32.mrb[54].mxu1  ;;  %v585_v17 = vpop.f32.mrb[55].mxu0 }
 0x192   : > { %979 = vst [vmem:[%s2071_s11 + $0x370] sm:$0xff] %v840_v50  ;;  %v1786_v20 = vpack.c.bf16 %v840_v50, %v834_v22  ;;  %v2798_v6 = vmul.f32 %v840_v50, %v840_v50  ;;  %978 = vst [vmem:[%s2071_s11 + $0x368] sm:$0xff] %v585_v17  ;;  %v1720_v35 = vpack.c.bf16 %v585_v17, %v579_v61  ;;  %v842_v55 = vpop.f32.mrb[55].mxu1 }
 0x193   : > { %3246 = vst [vmem:[#allocation68_spill] sm:$0xff] %v2795_v57  ;;  %v2801_v13 = vmul.f32 %v585_v17, %v585_v17  ;;  %3249 = vst [vmem:[#allocation71_spill] sm:$0xff] %v2803_v62  ;;  %v1784_v11 = vpack.c.bf16 %v842_v55, %v836_v24  ;;  %v2808_v12 = vmul.f32 %v842_v55, %v842_v55 }
 0x194   : > { %3247 = vst [vmem:[#allocation69_spill] sm:$0xff] %v2798_v6  ;;  %980 = vst [vmem:[%s2071_s11 + $0x378] sm:$0xff] %v842_v55  ;;  %v589_v22 = vpop.f32.mrb[56].mxu0  ;;  %1721 = vmatprep.subr.bf16.mxu0 %v1720_v35 }
 0x195   : > { %3248 = vst [vmem:[#allocation70_spill] sm:$0xff] %v2801_v13  ;;  %3250 = vst [vmem:[#allocation72_spill] sm:$0xff] %v2808_v12  ;;  %v846_v17 = vpop.f32.mrb[56].mxu1  ;;  %1785 = vmatprep.subr.bf16.mxu1 %v1784_v11  ;;  %v591_v47 = vpop.f32.mrb[57].mxu0  ;;  %1723 = vmatpush1.bf16.msra.mxu0 %v1722_v51  ;;  %v2820_v35 = vmul.f32 %v589_v22, %v589_v22 }
 0x196   : > { %981 = vst [vmem:[%s2071_s11 + $0x380] sm:$0xff] %v589_v22  ;;  %983 = vst [vmem:[%s2071_s11 + $0x390] sm:$0xff] %v846_v17  ;;  %v848_v55 = vpop.f32.mrb[57].mxu1  ;;  %1787 = vmatpush1.bf16.msra.mxu1 %v1786_v20  ;;  %v2822_v19 = vmul.f32 %v846_v17, %v846_v17  ;;  %v2824_v61 = vmul.f32 %v591_v47, %v591_v47 }
 0x197   : > { %982 = vst [vmem:[%s2071_s11 + $0x388] sm:$0xff] %v591_v47  ;;  %984 = vst [vmem:[%s2071_s11 + $0x398] sm:$0xff] %v848_v55  ;;  %v2835_v12 = vmul.f32 %v848_v55, %v848_v55 }
 0x198   : > { %3251 = vst [vmem:[#allocation73_spill] sm:$0xff] %v2820_v35  ;;  %v595_v50 = vpop.f32.mrb[58].mxu0  ;;  %3252 = vst [vmem:[#allocation74_spill] sm:$0xff] %v2822_v19 }
 0x199   : > { %3253 = vst [vmem:[#allocation75_spill] sm:$0xff] %v2824_v61  ;;  %985 = vst [vmem:[%s2071_s11 + $0x3a0] sm:$0xff] %v595_v50  ;;  %v1726_v51 = vpack.c.bf16 %v595_v50, %v589_v22  ;;  %v2827_v11 = vmul.f32 %v595_v50, %v595_v50  ;;  %v852_v3 = vpop.f32.mrb[58].mxu1  ;;  %v597_v24 = vpop.f32.mrb[59].mxu0 }
 0x19a   : > { %987 = vst [vmem:[%s2071_s11 + $0x3b0] sm:$0xff] %v852_v3  ;;  %v1790_v6 = vpack.c.bf16 %v852_v3, %v846_v17  ;;  %v2830_v27 = vmul.f32 %v852_v3, %v852_v3  ;;  %986 = vst [vmem:[%s2071_s11 + $0x3a8] sm:$0xff] %v597_v24  ;;  %v1724_v20 = vpack.c.bf16 %v597_v24, %v591_v47  ;;  %v854_v62 = vpop.f32.mrb[59].mxu1 }
 0x19b   : > { %3254 = vst [vmem:[#allocation76_spill] sm:$0xff] %v2827_v11  ;;  %v2833_v57 = vmul.f32 %v597_v24, %v597_v24  ;;  %3257 = vst [vmem:[#allocation79_spill] sm:$0xff] %v2835_v12  ;;  %v1788_v22 = vpack.c.bf16 %v854_v62, %v848_v55  ;;  %v2840_v38 = vmul.f32 %v854_v62, %v854_v62 }
 0x19c   : > { %3255 = vst [vmem:[#allocation77_spill] sm:$0xff] %v2830_v27  ;;  %988 = vst [vmem:[%s2071_s11 + $0x3b8] sm:$0xff] %v854_v62  ;;  %v601_v17 = vpop.f32.mrb[60].mxu0  ;;  %1725 = vmatprep.subr.bf16.mxu0 %v1724_v20 }
 0x19d   : > { %3256 = vst [vmem:[#allocation78_spill] sm:$0xff] %v2833_v57  ;;  %3258 = vst [vmem:[#allocation80_spill] sm:$0xff] %v2840_v38  ;;  %v858_v24 = vpop.f32.mrb[60].mxu1  ;;  %1789 = vmatprep.subr.bf16.mxu1 %v1788_v22  ;;  %v603_v13 = vpop.f32.mrb[61].mxu0  ;;  %1727 = vmatpush1.bf16.msra.mxu0 %v1726_v51  ;;  %v2852_v20 = vmul.f32 %v601_v17, %v601_v17 }
 0x19e   : > { %989 = vst [vmem:[%s2071_s11 + $0x3c0] sm:$0xff] %v601_v17  ;;  %991 = vst [vmem:[%s2071_s11 + $0x3d0] sm:$0xff] %v858_v24  ;;  %v860_v62 = vpop.f32.mrb[61].mxu1  ;;  %1791 = vmatpush1.bf16.msra.mxu1 %v1790_v6  ;;  %v2854_v50 = vmul.f32 %v858_v24, %v858_v24  ;;  %v2856_v47 = vmul.f32 %v603_v13, %v603_v13 }
 0x19f   : > { %990 = vst [vmem:[%s2071_s11 + $0x3c8] sm:$0xff] %v603_v13  ;;  %992 = vst [vmem:[%s2071_s11 + $0x3d8] sm:$0xff] %v860_v62  ;;  %v2867_v38 = vmul.f32 %v860_v62, %v860_v62 }
 0x1a0   : > { %v607_v3 = vpop.f32.mrb[62].mxu0 }
 0x1a1   : > { %993 = vst [vmem:[%s2071_s11 + $0x3e0] sm:$0xff] %v607_v3  ;;  %v1730_v51 = vpack.c.bf16 %v607_v3, %v601_v17  ;;  %v2859_v22 = vmul.f32 %v607_v3, %v607_v3  ;;  %v864_v19 = vpop.f32.mrb[62].mxu1  ;;  %v609_v55 = vpop.f32.mrb[63].mxu0 }
 0x1a2   : > { %995 = vst [vmem:[%s2071_s11 + $0x3f0] sm:$0xff] %v864_v19  ;;  %v1794_v27 = vpack.c.bf16 %v864_v19, %v858_v24  ;;  %v2862_v35 = vmul.f32 %v864_v19, %v864_v19  ;;  %994 = vst [vmem:[%s2071_s11 + $0x3e8] sm:$0xff] %v609_v55  ;;  %v1728_v6 = vpack.c.bf16 %v609_v55, %v603_v13  ;;  %v866_v12 = vpop.f32.mrb[63].mxu1 }
 0x1a3   : > { %v2865_v11 = vmul.f32 %v609_v55, %v609_v55  ;;  %v1858_v61 = vpack.c.bf16 %v2859_v22, %v2852_v20  ;;  %996 = vst [vmem:[%s2071_s11 + $0x3f8] sm:$0xff] %v866_v12  ;;  %v1792_v17 = vpack.c.bf16 %v866_v12, %v860_v62  ;;  %v2872_v3 = vmul.f32 %v866_v12, %v866_v12 }
 0x1a4   : > { %v1922_v57 = vpack.c.bf16 %v2862_v35, %v2854_v50  ;;  %1729 = vmatprep.subr.bf16.mxu0 %v1728_v6  ;;  %v3259_v24 = vpack.c.bf16 %v2385_v16, %v2376_v8  ;;  %v3260_v12 = vpack.c.bf16 %v2392_v21, %v2387_v18  ;;  %v3261_v55 = vmov 1.0   ;;  %v3309_v6 = vld [vmem:[#allocation21_spill] sm:$0xff] }
 0x1a5   : > { %v1856_v19 = vpack.c.bf16 %v2865_v11, %v2856_v47  ;;  %1793 = vmatprep.subr.bf16.mxu1 %v1792_v17  ;;  %1731 = vmatpush1.bf16.msra.mxu0 %v1730_v51  ;;  %v1920_v13 = vpack.c.bf16 %v2872_v3, %v2867_v38  ;;  %v3262_v62 = vpack.c.bf16 %v2379_v10, %v2370_v4  ;;  %v3310_v17 = vld [vmem:[#allocation18_spill] sm:$0xff]  ;;  %v1149_v11 = vlaneseq }
 0x1a6   : > { %1795 = vmatpush1.bf16.msra.mxu1 %v1794_v27  ;;  %1797 = vmatprep.subr.bf16.mxu0 %v3259_v24  ;;  %v3263_v51 = vpack.c.bf16 %v2382_v14, %v2374_v7  ;;  %v3264_v8 = vpack.c.bf16 %v2417_v58, %v2408_v40  ;;  %v3265_v16 = vpack.c.bf16 %v2424_v63, %v2419_v60 }
 0x1a7   : > { %1861 = vmatprep.subr.bf16.mxu1 %v3260_v12  ;;  %v3266_v4 = vpack.c.bf16 %v2411_v52, %v2404_v29  ;;  %v3267_v7 = vpack.c.bf16 %v2414_v56, %v2406_v31  ;;  %v3268_v10 = vpack.c.bf16 %v2449_v0, %v2440_v43  ;;  %v3269_v14 = vpack.c.bf16 %v2456_v9, %v2451_v2  ;;  %v3282_v43 = vld [vmem:[#allocation7_spill] sm:$0xff]  ;;  %v3285_v0 = vld [vmem:[#allocation8_spill] sm:$0xff]  ;;  %v3286_v2 = vld [vmem:[#allocation6_spill] sm:$0xff] }
 0x1a8   : > { %1063 = vmatmul.mubr.f32.vlgmr.msra.gmra.mrb[64].mxu0 %v3261_v55  ;;  %v3270_v18 = vpack.c.bf16 %v2443_v45, %v2436_v39  ;;  %v3271_v21 = vpack.c.bf16 %v2446_v49, %v2438_v42  ;;  %v3272_v29 = vpack.c.bf16 %v2481_v33, %v2472_v30  ;;  %v3273_v31 = vpack.c.bf16 %v2488_v44, %v2483_v36  ;;  %v3283_v45 = vld [vmem:[#allocation5_spill] sm:$0xff]  ;;  %v3294_v33 = vld [vmem:[#allocation12_spill] sm:$0xff]  ;;  %v3298_v44 = vld [vmem:[#allocation10_spill] sm:$0xff] }
 0x1a9   : > { %1134 = vmatmul.mubr.f32.vlgmr.msra.gmra.mrb[64].mxu1 %v3261_v55  ;;  %1799 = vmatpush1.bf16.msra.mxu0 %v3262_v62  ;;  %v3274_v40 = vpack.c.bf16 %v2475_v53, %v2468_v25  ;;  %v3275_v52 = vpack.c.bf16 %v2478_v59, %v2470_v28  ;;  %v3276_v56 = vpack.c.bf16 %v2513_v46, %v2504_v26  ;;  %v3288_v25 = vld [vmem:[#allocation14_spill] sm:$0xff]  ;;  %v3289_v28 = vld [vmem:[#allocation11_spill] sm:$0xff]  ;;  %v3291_v53 = vld [vmem:[#allocation16_spill] sm:$0xff]  ;;  %vm1172_vm1 = vcmp.lt.s32.totalorder %v1149_v11, 512 }
 0x1aa   : > { %1863 = vmatpush1.bf16.msra.mxu1 %v3263_v51  ;;  %1801 = vmatprep.subr.bf16.mxu0 %v3264_v8  ;;  %v3277_v58 = vpack.c.bf16 %v2520_v48, %v2515_v5  ;;  %v3278_v60 = vpack.c.bf16 %v2507_v54, %v2500_v15  ;;  %v3279_v63 = vpack.c.bf16 %v2510_v41, %v2502_v23  ;;  %v3292_v59 = vld [vmem:[#allocation15_spill] sm:$0xff]  ;;  %v3295_v36 = vld [vmem:[#allocation9_spill] sm:$0xff]  ;;  %v3300_v48 = vld [vmem:[#allocation22_spill] sm:$0xff] }
 0x1ab   : > { %1865 = vmatprep.subr.bf16.mxu1 %v3265_v16  ;;  %1369 = vmatprep.mubr.f32.mxu0 %v3261_v55  ;;  %v3280_v39 = vpack.c.bf16 %v2545_v32, %v2536_v1  ;;  %v3281_v42 = vpack.c.bf16 %v2552_v34, %v2547_v37  ;;  %v3284_v49 = vpack.c.bf16 %v3282_v43, %v3283_v45  ;;  %v3297_v37 = vld [vmem:[#allocation13_spill] sm:$0xff]  ;;  %v3301_v5 = vld [vmem:[#allocation19_spill] sm:$0xff]  ;;  %v3303_v23 = vld [vmem:[#allocation24_spill] sm:$0xff] }
 0x1ac   : > { %1440 = vmatprep.mubr.f32.mxu1 %v3261_v55  ;;  %v3287_v9 = vpack.c.bf16 %v3285_v0, %v3286_v2  ;;  %v3290_v30 = vpack.c.bf16 %v3288_v25, %v3289_v28  ;;  %v3293_v32 = vpack.c.bf16 %v3291_v53, %v3292_v59  ;;  %v3296_v34 = vpack.c.bf16 %v3294_v33, %v3295_v36  ;;  %v3304_v26 = vld [vmem:[#allocation23_spill] sm:$0xff]  ;;  %v3306_v41 = vld [vmem:[#allocation20_spill] sm:$0xff]  ;;  %v3307_v1 = vld [vmem:[#allocation17_spill] sm:$0xff] }
 0x1ad   : > { %1803 = vmatpush1.bf16.msra.mxu0 %v3266_v4  ;;  %v3299_v46 = vpack.c.bf16 %v3297_v37, %v3298_v44  ;;  %v3302_v15 = vpack.c.bf16 %v3300_v48, %v3301_v5  ;;  %v3305_v54 = vpack.c.bf16 %v3303_v23, %v3304_v26  ;;  %v3308_v27 = vpack.c.bf16 %v3306_v41, %v3307_v1  ;;  %v3312_v12 = vld [vmem:[#allocation30_spill] sm:$0xff]  ;;  %v3313_v62 = vld [vmem:[#allocation27_spill] sm:$0xff]  ;;  %v3315_v8 = vld [vmem:[#allocation32_spill] sm:$0xff] }
 0x1ae   : > { %1867 = vmatpush1.bf16.msra.mxu1 %v3267_v7  ;;  %1805 = vmatprep.subr.bf16.mxu0 %v3268_v10  ;;  %v3311_v24 = vpack.c.bf16 %v3309_v6, %v3310_v17  ;;  %v3314_v51 = vpack.c.bf16 %v3312_v12, %v3313_v62  ;;  %v3316_v16 = vld [vmem:[#allocation31_spill] sm:$0xff]  ;;  %v3318_v7 = vld [vmem:[#allocation28_spill] sm:$0xff]  ;;  %v3319_v10 = vld [vmem:[#allocation25_spill] sm:$0xff] }
 0x1af   : > { %1869 = vmatprep.subr.bf16.mxu1 %v3269_v14  ;;  %v3317_v4 = vpack.c.bf16 %v3315_v8, %v3316_v16  ;;  %v3320_v14 = vpack.c.bf16 %v3318_v7, %v3319_v10  ;;  %v3333_v43 = vld [vmem:[#allocation37_spill] sm:$0xff]  ;;  %v3334_v45 = vld [vmem:[#allocation34_spill] sm:$0xff]  ;;  %v3337_v2 = vld [vmem:[#allocation43_spill] sm:$0xff] }
 0x1b0   : > { %v3336_v0 = vld [vmem:[#allocation46_spill] sm:$0xff]  ;;  %v3339_v25 = vld [vmem:[#allocation48_spill] sm:$0xff]  ;;  %v3340_v28 = vld [vmem:[#allocation47_spill] sm:$0xff] }
 0x1b1   : > { %1807 = vmatpush1.bf16.msra.mxu0 %v3270_v18  ;;  %v3321_v18 = vld [vmem:[#allocation29_spill] sm:$0xff]  ;;  %v3342_v53 = vld [vmem:[#allocation44_spill] sm:$0xff]  ;;  %v3346_v36 = vld [vmem:[#allocation42_spill] sm:$0xff] }
 0x1b2   : > { %1871 = vmatpush1.bf16.msra.mxu1 %v3271_v21  ;;  %1809 = vmatprep.subr.bf16.mxu0 %v3272_v29  ;;  %v3322_v21 = vld [vmem:[#allocation26_spill] sm:$0xff]  ;;  %v3343_v59 = vld [vmem:[#allocation41_spill] sm:$0xff]  ;;  %v3349_v44 = vld [vmem:[#allocation51_spill] sm:$0xff] }
 0x1b3   : > { %1873 = vmatprep.subr.bf16.mxu1 %v3273_v31  ;;  %v3323_v29 = vpack.c.bf16 %v3321_v18, %v3322_v21  ;;  %v3324_v31 = vld [vmem:[#allocation38_spill] sm:$0xff]  ;;  %v3345_v33 = vld [vmem:[#allocation45_spill] sm:$0xff]  ;;  %v3351_v48 = vld [vmem:[#allocation56_spill] sm:$0xff] }
 0x1b4   : > { %v3348_v37 = vld [vmem:[#allocation54_spill] sm:$0xff]  ;;  %v3352_v5 = vld [vmem:[#allocation55_spill] sm:$0xff]  ;;  %v3354_v23 = vld [vmem:[#allocation52_spill] sm:$0xff] }
 0x1b5   : > { %1811 = vmatpush1.bf16.msra.mxu0 %v3274_v40  ;;  %v3325_v40 = vld [vmem:[#allocation35_spill] sm:$0xff]  ;;  %v3355_v26 = vld [vmem:[#allocation49_spill] sm:$0xff]  ;;  %v3358_v1 = vld [vmem:[#allocation50_spill] sm:$0xff] }
 0x1b6   : > { %1875 = vmatpush1.bf16.msra.mxu1 %v3275_v52  ;;  %1813 = vmatprep.subr.bf16.mxu0 %v3276_v56  ;;  %v3326_v52 = vpack.c.bf16 %v3324_v31, %v3325_v40  ;;  %v3327_v56 = vld [vmem:[#allocation40_spill] sm:$0xff]  ;;  %v3357_v41 = vld [vmem:[#allocation53_spill] sm:$0xff]  ;;  %v3360_v6 = vld [vmem:[#allocation62_spill] sm:$0xff] }
 0x1b7   : > { %1877 = vmatprep.subr.bf16.mxu1 %v3277_v58  ;;  %v3328_v58 = vld [vmem:[#allocation39_spill] sm:$0xff]  ;;  %v3363_v12 = vld [vmem:[#allocation64_spill] sm:$0xff]  ;;  %v3367_v16 = vld [vmem:[#allocation57_spill] sm:$0xff] }
 0x1b8   : > { %v3361_v17 = vld [vmem:[#allocation59_spill] sm:$0xff]  ;;  %v3366_v8 = vld [vmem:[#allocation60_spill] sm:$0xff]  ;;  %v3369_v7 = vld [vmem:[#allocation61_spill] sm:$0xff] }
 0x1b9   : > { %1815 = vmatpush1.bf16.msra.mxu0 %v3278_v60  ;;  %v3329_v60 = vpack.c.bf16 %v3327_v56, %v3328_v58  ;;  %v3364_v62 = vld [vmem:[#allocation63_spill] sm:$0xff]  ;;  %v3370_v10 = vld [vmem:[#allocation58_spill] sm:$0xff]  ;;  %v3375_v31 = vld [vmem:[#allocation72_spill] sm:$0xff] }
 0x1ba   : > { %1879 = vmatpush1.bf16.msra.mxu1 %v3279_v63  ;;  %1817 = vmatprep.subr.bf16.mxu0 %v3280_v39  ;;  %v3330_v63 = vld [vmem:[#allocation36_spill] sm:$0xff]  ;;  %v3331_v39 = vld [vmem:[#allocation33_spill] sm:$0xff]  ;;  %v3372_v18 = vld [vmem:[#allocation70_spill] sm:$0xff] }
 0x1bb   : > { %1881 = vmatprep.subr.bf16.mxu1 %v3281_v42  ;;  %v3332_v42 = vpack.c.bf16 %v3330_v63, %v3331_v39  ;;  %v3373_v21 = vld [vmem:[#allocation67_spill] sm:$0xff]  ;;  %v3378_v56 = vld [vmem:[#allocation68_spill] sm:$0xff]  ;;  %v3379_v58 = vld [vmem:[#allocation65_spill] sm:$0xff] }
 0x1bc   : > { %v3376_v40 = vld [vmem:[#allocation71_spill] sm:$0xff]  ;;  %v3381_v63 = vld [vmem:[#allocation69_spill] sm:$0xff]  ;;  %v3382_v39 = vld [vmem:[#allocation66_spill] sm:$0xff] }
 0x1bd   : > { %1819 = vmatpush1.bf16.msra.mxu0 %v3284_v49  ;;  %v3335_v49 = vpack.c.bf16 %v3333_v43, %v3334_v45  ;;  %v3384_v43 = vld [vmem:[#allocation78_spill] sm:$0xff]  ;;  %v3385_v45 = vld [vmem:[#allocation75_spill] sm:$0xff] }
 0x1be   : > { %1883 = vmatpush1.bf16.msra.mxu1 %v3287_v9  ;;  %1821 = vmatprep.subr.bf16.mxu0 %v3290_v30  ;;  %v3338_v9 = vpack.c.bf16 %v3336_v0, %v3337_v2  ;;  %v3341_v30 = vpack.c.bf16 %v3339_v25, %v3340_v28  ;;  %v3387_v0 = vld [vmem:[#allocation80_spill] sm:$0xff]  ;;  %v3388_v2 = vld [vmem:[#allocation79_spill] sm:$0xff]  ;;  %v3391_v28 = vld [vmem:[#allocation73_spill] sm:$0xff] }
 0x1bf   : > { %1885 = vmatprep.subr.bf16.mxu1 %v3293_v32  ;;  %v3344_v32 = vpack.c.bf16 %v3342_v53, %v3343_v59  ;;  %v3390_v25 = vld [vmem:[#allocation76_spill] sm:$0xff]  ;;  %v3393_v53 = vld [vmem:[#allocation77_spill] sm:$0xff]  ;;  %v3394_v59 = vld [vmem:[#allocation74_spill] sm:$0xff] }
 0x1c1   : > { %1823 = vmatpush1.bf16.msra.mxu0 %v3296_v34  ;;  %v3347_v34 = vpack.c.bf16 %v3345_v33, %v3346_v36  ;;  %v1995_v33 = vmov 1966171168  }
 0x1c2   : > { %1887 = vmatpush1.bf16.msra.mxu1 %v3299_v46  ;;  %1825 = vmatprep.subr.bf16.mxu0 %v3302_v15  ;;  %v3350_v46 = vpack.c.bf16 %v3348_v37, %v3349_v44  ;;  %v3353_v15 = vpack.c.bf16 %v3351_v48, %v3352_v5  ;;  %v1147_v36 = vunpack.c.l.s4 %v1995_v33 }
 0x1c3   : > { %1889 = vmatprep.subr.bf16.mxu1 %v3305_v54  ;;  %v3356_v54 = vpack.c.bf16 %v3354_v23, %v3355_v26 }
 0x1c4   : > { %v1148_v47 = vunpack.c.0.s8 %v1147_v36 }
 0x1c5   : > { %1827 = vmatpush1.bf16.msra.mxu0 %v3308_v27  ;;  %v3359_v27 = vpack.c.bf16 %v3357_v41, %v3358_v1 }
 0x1c6   : > { %1891 = vmatpush1.bf16.msra.mxu1 %v3311_v24  ;;  %1829 = vmatprep.subr.bf16.mxu0 %v3314_v51  ;;  %v3362_v24 = vpack.c.bf16 %v3360_v6, %v3361_v17  ;;  %v3365_v51 = vpack.c.bf16 %v3363_v12, %v3364_v62 }
 0x1c7   : > { %1893 = vmatprep.subr.bf16.mxu1 %v3317_v4  ;;  %v3368_v4 = vpack.c.bf16 %v3366_v8, %v3367_v16 }
 0x1c9   : > { %1831 = vmatpush1.bf16.msra.mxu0 %v3320_v14  ;;  %v3371_v14 = vpack.c.bf16 %v3369_v7, %v3370_v10 }
 0x1ca   : > { %1895 = vmatpush1.bf16.msra.mxu1 %v3323_v29  ;;  %1833 = vmatprep.subr.bf16.mxu0 %v3326_v52  ;;  %v3374_v29 = vpack.c.bf16 %v3372_v18, %v3373_v21  ;;  %v3377_v52 = vpack.c.bf16 %v3375_v31, %v3376_v40 }
 0x1cb   : > { %1897 = vmatprep.subr.bf16.mxu1 %v3329_v60  ;;  %v3380_v60 = vpack.c.bf16 %v3378_v56, %v3379_v58 }
 0x1cd   : > { %1835 = vmatpush1.bf16.msra.mxu0 %v3332_v42  ;;  %v3383_v42 = vpack.c.bf16 %v3381_v63, %v3382_v39 }
 0x1ce   : > { %1899 = vmatpush1.bf16.msra.mxu1 %v3335_v49  ;;  %1837 = vmatprep.subr.bf16.mxu0 %v3338_v9  ;;  %v3386_v49 = vpack.c.bf16 %v3384_v43, %v3385_v45  ;;  %v3389_v9 = vpack.c.bf16 %v3387_v0, %v3388_v2 }
 0x1cf   : > { %1901 = vmatprep.subr.bf16.mxu1 %v3341_v30  ;;  %v3392_v30 = vpack.c.bf16 %v3390_v25, %v3391_v28 }
 0x1d1   : > { %1839 = vmatpush1.bf16.msra.mxu0 %v3344_v32  ;;  %v3395_v32 = vpack.c.bf16 %v3393_v53, %v3394_v59 }
 0x1d2   : > { %1903 = vmatpush1.bf16.msra.mxu1 %v3347_v34  ;;  %1841 = vmatprep.subr.bf16.mxu0 %v3350_v46 }
 0x1d3   : > { %1905 = vmatprep.subr.bf16.mxu1 %v3353_v15 }
 0x1d5   : > { %1843 = vmatpush1.bf16.msra.mxu0 %v3356_v54 }
 0x1d6   : > { %1907 = vmatpush1.bf16.msra.mxu1 %v3359_v27  ;;  %1845 = vmatprep.subr.bf16.mxu0 %v3362_v24  ;;  %v1631_v27 = vld [vmem:[%s3096_s3 + $0x1] ss:$2 sm:$0xf] }
 0x1d7   : > { %1909 = vmatprep.subr.bf16.mxu1 %v3365_v51 }
 0x1d9   : > { %1847 = vmatpush1.bf16.msra.mxu0 %v3368_v4 }
 0x1da   : > { %1911 = vmatpush1.bf16.msra.mxu1 %v3371_v14  ;;  %1849 = vmatprep.subr.bf16.mxu0 %v3374_v29 }
 0x1db   : > { %1913 = vmatprep.subr.bf16.mxu1 %v3377_v52 }
 0x1dd   : > { %1851 = vmatpush1.bf16.msra.mxu0 %v3380_v60 }
 0x1de   : > { %1915 = vmatpush1.bf16.msra.mxu1 %v3383_v42  ;;  %1853 = vmatprep.subr.bf16.mxu0 %v3386_v49 }
 0x1df   : > { %1917 = vmatprep.subr.bf16.mxu1 %v3389_v9 }
 0x1e1   : > { %1855 = vmatpush1.bf16.msra.mxu0 %v3392_v30 }
 0x1e2   : > { %1919 = vmatpush1.bf16.msra.mxu1 %v3395_v32  ;;  %1857 = vmatprep.subr.bf16.mxu0 %v1856_v19  ;;  %v1150_v19 = vshrl.u32 %v1149_v11, 7 }
 0x1e3   : > { %1921 = vmatprep.subr.bf16.mxu1 %v1920_v13 }
 0x1e4   : > { %v1151_v38 = vsub.s32 %v1148_v47, %v1150_v19 }
 0x1e5   : > { %1859 = vmatpush1.bf16.msra.mxu0 %v1858_v61 }
 0x1e6   : > { %1923 = vmatpush1.bf16.msra.mxu1 %v1922_v57  ;;  %v997_v57 = vld [vmem:[%s3096_s3] ss:$2 sm:$0xf] }
 0x1e8   : > { %1370 = vmatmul.mubr.f32.vlgmr.msra.gmra.mrb[66].mxu0 %v3261_v55 }
 0x1e9   : > { %1441 = vmatmul.mubr.f32.vlgmr.msra.gmra.mrb[66].mxu1 %v3261_v55 }
 0x27b   : > { %v1064_v34 = vpop.f32.mrb[64].mxu0 }
 0x27c   : > { %v1135_v3 = vpop.f32.mrb[64].mxu1  ;;  %v1066_v13 = vpop.f32.mrb[65].mxu0 }
 0x27d   : > { %v1144_v37 = vcombine.low %v1064_v34, %v1066_v13  ;;  %v1137_v20 = vpop.f32.mrb[65].mxu1 }
 0x27e   : > { %v1145_v61 = vcombine.low %v1135_v3, %v1137_v20 }
 0x27f   : > { %v1152_v22 = vrot.slane %v1144_v37, %v1151_v38 }
 0x280   : > { %v1159_v44 = vrot.slane %v1145_v61, %v1151_v38 }
 0x282   : > { %v1160_v35 = vcombine.low %v1152_v22, %v1159_v44 }
 0x284   : > { %v1167_v50 = vrot.slane %v1160_v35, %v1151_v38 }
 0x286   : > { %v1169_v55 = vadd.f32 %v1167_v50, %v997_v57 }
 0x288   : > { %1174 = vst.msk [vmem:[%s3096_s3] ss:$2 sm:$0xf] %vm1172_vm1, %v1169_v55 }
 0x2bb   : > { %v1371_v46 = vpop.f32.mrb[66].mxu0 }
 0x2bc   : > { %v1442_v48 = vpop.f32.mrb[66].mxu1  ;;  %v1373_v5 = vpop.f32.mrb[67].mxu0 }
 0x2bd   : > { %v1451_v15 = vcombine.low %v1371_v46, %v1373_v5  ;;  %v1444_v23 = vpop.f32.mrb[67].mxu1 }
 0x2be   : > { %v1452_v26 = vcombine.low %v1442_v48, %v1444_v23 }
 0x2bf   : > { %v1459_v54 = vrot.slane %v1451_v15, %v1151_v38 }
 0x2c0   : > { %v1466_v41 = vrot.slane %v1452_v26, %v1151_v38 }
 0x2c2   : > { %v1467_v1 = vcombine.low %v1459_v54, %v1466_v41 }
 0x2c4   : > { %v1474_v6 = vrot.slane %v1467_v1, %v1151_v38 }
 0x2c6   : > { %v1476_v17 = vadd.f32 %v1631_v27, %v1474_v6 }
 0x2c8   : > { %1632 = vst.msk [vmem:[%s3096_s3 + $0x1] ss:$2 sm:$0xf] %vm1172_vm1, %v1476_v17 }
 0x2c9 PF: > { %s15_s12 = sadd.s32 1, %s1987_s12  }
 0x2ca   : > { %p12_p4 = scmp.ge.s32.totalorder %s15_s12, 4  }
 0x2cc   :  { %14 = sbr.rel (!%p12_p4) target bundleno = 1 (0x1), region = 76 }
 0x2d3   :  { %1508 = vsyncpa [#allocation3], 1 }
 0x2d4   :  { %1510 = vsyncpa [#allocation3 + $0x1], 1 }

// kernel: recover_channel.6
= control target key start
LH: loop header
LB: loop body
LE: loop exit
PB: predicated region body
PF: predicated region fallthrough
CT: control target
= control target key end

     0   :  { %s2207_s15 = smov 0   ;;  %s4905_s0 = inlined_call_operand.vmem [shape: f32[512,512], index: 0, kind: input, shape index: {}]   ;;  %s4906_s1 = inlined_call_operand.vmem [shape: f32[2,512], index: 1, kind: input, shape index: {}]   ;;  %s4907_s2 = inlined_call_operand.vmem [shape: f32[512,256], index: 2, kind: input, shape index: {}]   ;;  %s4908_s3 = inlined_call_operand.vmem [shape: f32[512,256], index: 3, kind: output, shape index: {0}]   ;;  %s4909_s4 = inlined_call_operand.vmem [shape: f32[2,256], index: 4, kind: output, shape index: {1}]  }
   0x1 LB: > { %s1789_s16 = sadd.s32 4294967295, %s2177_s15   ;;  %p1793_p0 = scmp.ge.s32.totalorder %s2177_s15, 1  ;;  %s2177_s15 = sphi %s2207_s15, %s15_s15  }
   0x2   : > { %p162_p1 = scmp.lt.s32.totalorder %s2177_s15, 3 }
   0x4   : > { %p163_p2 = pnand %p1793_p0, %p162_p1 }
   0x6   : > { %166 = sbr.rel (%p163_p2) target bundleno = 891 (0x37b), region = 32 }
   0xd   : > { %s1794_s17 = sshll.u32 %s1789_s16, 5  ;;  %v4910_v0 = vlaneseq  ;;  %v332_v1 = vld [vmem:[%s4906_s1] ss:$2 sm:$0xf]  ;;  %p1801_p4 = scmp.ne.s32.totalorder %s1789_s16, 0 }
   0xe   : > { %p191_p3 = scmp.lt.s32.totalorder %s1794_s17, 63  ;;  %v1800_v3 = vld [vmem:[%s4906_s1 + $0x1] ss:$2 sm:$0xf] }
   0xf   : > { %v2221_v2 = vshrl.u32 %v4910_v0, 7 }
  0x10   : > { %s5637_s17 = smov (!%p191_p3, %s1794_s17), 63 }
  0x11   : > { %4983 = vst [vmem:[#allocation2_spill] sm:$0xff] %v2221_v2  ;;  %v336_v4 = vsub.s32 0, %v2221_v2  ;;  %v340_v5 = vsub.s32 1, %v2221_v2  ;;  %v344_v6 = vsub.s32 2, %v2221_v2  ;;  %v348_v7 = vsub.s32 3, %v2221_v2  ;;  %s1806_s22 = sshll.u32 %s5637_s17, 5 }
  0x12   : > { %s1807_s23 = sshll.u32 %s5637_s17, 4  ;;  %s2233_s26 = scalar_lea.vmem %s4905_s0, %s1806_s22 }
  0x13   : > { %s2238_s29 = scalar_lea.vmem %s4908_s3, %s1807_s23  ;;  %v2240_v8 = vrot.slane %v332_v1, %v336_v4  ;;  %v2242_v9 = vrot.slane %v332_v1, %v340_v5  ;;  %v2244_v10 = vrot.slane %v332_v1, %v344_v6  ;;  %v2246_v11 = vrot.slane %v332_v1, %v348_v7  ;;  %v204_v12 = vld [vmem:[%s2233_s26] sm:$0xff]  ;;  %v205_v13 = vld [vmem:[%s2233_s26 + $0x8] sm:$0xff]  ;;  %v206_v14 = vld [vmem:[%s2233_s26 + $0x10] sm:$0xff] }
  0x14   : > { %v2251_v15 = vrot.slane %v1800_v3, %v336_v4  ;;  %v2253_v16 = vrot.slane %v1800_v3, %v340_v5  ;;  %v207_v17 = vld [vmem:[%s2233_s26 + $0x18] sm:$0xff]  ;;  %v208_v18 = vld [vmem:[%s2233_s26 + $0x20] sm:$0xff]  ;;  %v209_v19 = vld [vmem:[%s2233_s26 + $0x28] sm:$0xff]  ;;  %v2261_v23 = vrot.slane %v1800_v3, %v344_v6  ;;  %v2269_v30 = vrot.slane %v1800_v3, %v348_v7 }
  0x15   : > { %v354_v20 = vmul.f32 %v2240_v8, %v204_v12  ;;  %v355_v21 = vmul.f32 %v2242_v9, %v205_v13  ;;  %v356_v22 = vmul.f32 %v2244_v10, %v206_v14  ;;  %v210_v24 = vld [vmem:[%s2233_s26 + $0x30] sm:$0xff]  ;;  %v211_v25 = vld [vmem:[%s2233_s26 + $0x38] sm:$0xff]  ;;  %v212_v26 = vld [vmem:[%s2233_s26 + $0x40] sm:$0xff]  ;;  %v357_v27 = vmul.f32 %v2246_v11, %v207_v17 }
  0x16   : > { %v358_v28 = vmul.f32 %v2240_v8, %v208_v18  ;;  %v359_v29 = vmul.f32 %v2242_v9, %v209_v19  ;;  %v213_v31 = vld [vmem:[%s2233_s26 + $0x48] sm:$0xff]  ;;  %v214_v32 = vld [vmem:[%s2233_s26 + $0x50] sm:$0xff]  ;;  %v215_v33 = vld [vmem:[%s2233_s26 + $0x58] sm:$0xff]  ;;  %v360_v34 = vmul.f32 %v2244_v10, %v210_v24  ;;  %v361_v35 = vmul.f32 %v2246_v11, %v211_v25 }
  0x17   : > { %v362_v36 = vmul.f32 %v2240_v8, %v212_v26  ;;  %v2278_v37 = vadd.f32 %v2251_v15, %v354_v20  ;;  %v216_v38 = vld [vmem:[%s2233_s26 + $0x60] sm:$0xff]  ;;  %v217_v39 = vld [vmem:[%s2233_s26 + $0x68] sm:$0xff]  ;;  %v218_v40 = vld [vmem:[%s2233_s26 + $0x70] sm:$0xff]  ;;  %v363_v41 = vmul.f32 %v2242_v9, %v213_v31  ;;  %v2285_v42 = vmul.f32 %v2244_v10, %v214_v32 }
  0x18   : > { %v2288_v43 = vmul.f32 %v2246_v11, %v215_v33  ;;  %v2291_v44 = vadd.f32 %v2253_v16, %v355_v21  ;;  %v219_v45 = vld [vmem:[%s2233_s26 + $0x78] sm:$0xff]  ;;  %v220_v46 = vld [vmem:[%s2233_s26 + $0x80] sm:$0xff]  ;;  %v221_v47 = vld [vmem:[%s2233_s26 + $0x88] sm:$0xff]  ;;  %v2297_v48 = vmul.f32 %v2240_v8, %v216_v38  ;;  %v2300_v49 = vmul.f32 %v2242_v9, %v217_v39 }
  0x19   : > { %4984 = vst [vmem:[#allocation3_spill] sm:$0xff] %v2278_v37  ;;  %v2303_v50 = vmul.f32 %v2244_v10, %v218_v40  ;;  %v2306_v51 = vadd.f32 %v2261_v23, %v356_v22  ;;  %v222_v52 = vld [vmem:[%s2233_s26 + $0x90] sm:$0xff]  ;;  %v223_v53 = vld [vmem:[%s2233_s26 + $0x98] sm:$0xff]  ;;  %v224_v54 = vld [vmem:[%s2233_s26 + $0xa0] sm:$0xff]  ;;  %v2312_v55 = vmul.f32 %v2246_v11, %v219_v45  ;;  %v2315_v56 = vmul.f32 %v2240_v8, %v220_v46 }
  0x1a   : > { %4985 = vst [vmem:[#allocation4_spill] sm:$0xff] %v2291_v44  ;;  %v2318_v57 = vmul.f32 %v2242_v9, %v221_v47  ;;  %v2321_v58 = vadd.f32 %v2269_v30, %v357_v27  ;;  %v225_v59 = vld [vmem:[%s2233_s26 + $0xa8] sm:$0xff]  ;;  %v226_v60 = vld [vmem:[%s2233_s26 + $0xb0] sm:$0xff]  ;;  %v227_v61 = vld [vmem:[%s2233_s26 + $0xb8] sm:$0xff]  ;;  %v2327_v62 = vmul.f32 %v2244_v10, %v222_v52  ;;  %v2330_v63 = vmul.f32 %v2246_v11, %v223_v53 }
  0x1b   : > { %4986 = vst [vmem:[#allocation5_spill] sm:$0xff] %v2306_v51  ;;  %v2333_v1 = vmul.f32 %v2240_v8, %v224_v54  ;;  %v2336_v3 = vadd.f32 %v2251_v15, %v358_v28  ;;  %v228_v4 = vld [vmem:[%s2233_s26 + $0xc0] sm:$0xff]  ;;  %v229_v5 = vld [vmem:[%s2233_s26 + $0xc8] sm:$0xff]  ;;  %v230_v6 = vld [vmem:[%s2233_s26 + $0xd0] sm:$0xff]  ;;  %v2342_v7 = vmul.f32 %v2242_v9, %v225_v59  ;;  %v2345_v12 = vmul.f32 %v2244_v10, %v226_v60 }
  0x1c   : > { %4987 = vst [vmem:[#allocation6_spill] sm:$0xff] %v2321_v58  ;;  %v2348_v13 = vmul.f32 %v2246_v11, %v227_v61  ;;  %v2351_v14 = vadd.f32 %v2253_v16, %v359_v29  ;;  %v231_v17 = vld [vmem:[%s2233_s26 + $0xd8] sm:$0xff]  ;;  %v232_v18 = vld [vmem:[%s2233_s26 + $0xe0] sm:$0xff]  ;;  %v233_v19 = vld [vmem:[%s2233_s26 + $0xe8] sm:$0xff]  ;;  %v2357_v20 = vmul.f32 %v2240_v8, %v228_v4  ;;  %v2360_v21 = vmul.f32 %v2242_v9, %v229_v5 }
  0x1d   : > { %4988 = vst [vmem:[#allocation7_spill] sm:$0xff] %v2336_v3  ;;  %v2363_v22 = vmul.f32 %v2244_v10, %v230_v6  ;;  %v2366_v24 = vadd.f32 %v2261_v23, %v360_v34  ;;  %v234_v25 = vld [vmem:[%s2233_s26 + $0xf0] sm:$0xff]  ;;  %v235_v26 = vld [vmem:[%s2233_s26 + $0xf8] sm:$0xff]  ;;  %v236_v27 = vld [vmem:[%s2233_s26 + $0x100] sm:$0xff]  ;;  %v2372_v28 = vmul.f32 %v2246_v11, %v231_v17  ;;  %v2375_v29 = vmul.f32 %v2240_v8, %v232_v18 }
  0x1e   : > { %4989 = vst [vmem:[#allocation8_spill] sm:$0xff] %v2351_v14  ;;  %v2378_v31 = vmul.f32 %v2242_v9, %v233_v19  ;;  %v2381_v32 = vadd.f32 %v2269_v30, %v361_v35  ;;  %v237_v33 = vld [vmem:[%s2233_s26 + $0x108] sm:$0xff]  ;;  %v238_v34 = vld [vmem:[%s2233_s26 + $0x110] sm:$0xff]  ;;  %v239_v38 = vld [vmem:[%s2233_s26 + $0x118] sm:$0xff]  ;;  %v2387_v39 = vmul.f32 %v2244_v10, %v234_v25  ;;  %v2390_v40 = vmul.f32 %v2246_v11, %v235_v26 }
  0x1f   : > { %4990 = vst [vmem:[#allocation9_spill] sm:$0xff] %v2366_v24  ;;  %v2393_v45 = vmul.f32 %v2240_v8, %v236_v27  ;;  %v2396_v46 = vadd.f32 %v2251_v15, %v362_v36  ;;  %v240_v35 = vld [vmem:[%s2233_s26 + $0x120] sm:$0xff]  ;;  %v241_v47 = vld [vmem:[%s2233_s26 + $0x128] sm:$0xff]  ;;  %v242_v52 = vld [vmem:[%s2233_s26 + $0x130] sm:$0xff]  ;;  %v2402_v53 = vmul.f32 %v2242_v9, %v237_v33  ;;  %v2405_v54 = vmul.f32 %v2244_v10, %v238_v34 }
  0x20   : > { %4991 = vst [vmem:[#allocation10_spill] sm:$0xff] %v2381_v32  ;;  %v2408_v59 = vmul.f32 %v2246_v11, %v239_v38  ;;  %v2411_v60 = vadd.f32 %v2253_v16, %v363_v41  ;;  %v243_v36 = vld [vmem:[%s2233_s26 + $0x138] sm:$0xff]  ;;  %v244_v61 = vld [vmem:[%s2233_s26 + $0x140] sm:$0xff]  ;;  %v245_v4 = vld [vmem:[%s2233_s26 + $0x148] sm:$0xff]  ;;  %v2417_v5 = vmul.f32 %v2240_v8, %v240_v35  ;;  %v2420_v6 = vmul.f32 %v2242_v9, %v241_v47 }
  0x21   : > { %4992 = vst [vmem:[#allocation11_spill] sm:$0xff] %v2396_v46  ;;  %v2423_v17 = vmul.f32 %v2244_v10, %v242_v52  ;;  %v2427_v18 = vadd.f32 %v2261_v23, %v2285_v42  ;;  %v246_v41 = vld [vmem:[%s2233_s26 + $0x150] sm:$0xff]  ;;  %v247_v19 = vld [vmem:[%s2233_s26 + $0x158] sm:$0xff]  ;;  %v248_v25 = vld [vmem:[%s2233_s26 + $0x160] sm:$0xff]  ;;  %v2433_v26 = vmul.f32 %v2246_v11, %v243_v36  ;;  %v2436_v27 = vmul.f32 %v2240_v8, %v244_v61 }
  0x22   : > { %4993 = vst [vmem:[#allocation12_spill] sm:$0xff] %v2411_v60  ;;  %v2439_v33 = vmul.f32 %v2242_v9, %v245_v4  ;;  %v2443_v34 = vadd.f32 %v2269_v30, %v2288_v43  ;;  %v249_v42 = vld [vmem:[%s2233_s26 + $0x168] sm:$0xff]  ;;  %v250_v38 = vld [vmem:[%s2233_s26 + $0x170] sm:$0xff]  ;;  %v251_v35 = vld [vmem:[%s2233_s26 + $0x178] sm:$0xff]  ;;  %v2449_v47 = vmul.f32 %v2244_v10, %v246_v41  ;;  %v2452_v52 = vmul.f32 %v2246_v11, %v247_v19 }
  0x23   : > { %4994 = vst [vmem:[#allocation13_spill] sm:$0xff] %v2427_v18  ;;  %v2455_v36 = vmul.f32 %v2240_v8, %v248_v25  ;;  %v2459_v61 = vadd.f32 %v2251_v15, %v2297_v48  ;;  %v252_v43 = vld [vmem:[%s2233_s26 + $0x180] sm:$0xff]  ;;  %v253_v4 = vld [vmem:[%s2233_s26 + $0x188] sm:$0xff]  ;;  %v254_v0 = vld [vmem:[%s2233_s26 + $0x190] sm:$0xff]  ;;  %v2465_v2 = vmul.f32 %v2242_v9, %v249_v42  ;;  %v2468_v41 = vmul.f32 %v2244_v10, %v250_v38 }
  0x24   : > { %4995 = vst [vmem:[#allocation14_spill] sm:$0xff] %v2443_v34  ;;  %v2471_v19 = vmul.f32 %v2246_v11, %v251_v35  ;;  %v2475_v25 = vadd.f32 %v2253_v16, %v2300_v49  ;;  %v255_v48 = vld [vmem:[%s2233_s26 + $0x198] sm:$0xff]  ;;  %v257_v34 = vld [vmem:[%s2233_s26 + $0x1a8] sm:$0xff]  ;;  %v2481_v18 = vmul.f32 %v2240_v8, %v252_v43  ;;  %v2484_v42 = vmul.f32 %v2242_v9, %v253_v4  ;;  %v258_v49 = vld [vmem:[%s2233_s26 + $0x1b0] sm:$0xff] }
  0x25   : > { %4996 = vst [vmem:[#allocation15_spill] sm:$0xff] %v2459_v61  ;;  %v256_v61 = vld [vmem:[%s2233_s26 + $0x1a0] sm:$0xff]  ;;  %v2487_v38 = vmul.f32 %v2244_v10, %v254_v0  ;;  %v2491_v35 = vadd.f32 %v2261_v23, %v2303_v50  ;;  %v2497_v46 = vmul.f32 %v2246_v11, %v255_v48  ;;  %v2503_v4 = vmul.f32 %v2242_v9, %v257_v34  ;;  %v261_v50 = vld [vmem:[%s2233_s26 + $0x1c8] sm:$0xff]  ;;  %v263_v32 = vld [vmem:[%s2233_s26 + $0x1d8] sm:$0xff] }
  0x26   : > { %4997 = vst [vmem:[#allocation16_spill] sm:$0xff] %v2475_v25  ;;  %v259_v25 = vld [vmem:[%s2233_s26 + $0x1b8] sm:$0xff]  ;;  %v260_v60 = vld [vmem:[%s2233_s26 + $0x1c0] sm:$0xff]  ;;  %v2500_v43 = vmul.f32 %v2240_v8, %v256_v61  ;;  %v2507_v0 = vadd.f32 %v2269_v30, %v2312_v55  ;;  %v2513_v24 = vmul.f32 %v2244_v10, %v258_v49  ;;  %v2523_v34 = vadd.f32 %v2251_v15, %v2315_v56  ;;  %v266_v14 = vld [vmem:[%s2233_s26 + $0x1f0] sm:$0xff] }
  0x27   : > { %4998 = vst [vmem:[#allocation17_spill] sm:$0xff] %v2491_v35  ;;  %v262_v35 = vld [vmem:[%s2233_s26 + $0x1d0] sm:$0xff]  ;;  %v2516_v48 = vmul.f32 %v2246_v11, %v259_v25  ;;  %v2519_v61 = vmul.f32 %v2240_v8, %v260_v60  ;;  %v264_v55 = vld [vmem:[%s2233_s26 + $0x1e0] sm:$0xff]  ;;  %v2529_v3 = vmul.f32 %v2242_v9, %v261_v50  ;;  %v2535_v25 = vmul.f32 %v2246_v11, %v263_v32  ;;  %v267_v56 = vld [vmem:[%s2233_s26 + $0x1f8] sm:$0xff] }
  0x28   : > { %4999 = vst [vmem:[#allocation18_spill] sm:$0xff] %v2507_v0  ;;  %5000 = vst [vmem:[#allocation19_spill] sm:$0xff] %v2523_v34  ;;  %v265_v0 = vld [vmem:[%s2233_s26 + $0x1e8] sm:$0xff]  ;;  %v2532_v49 = vmul.f32 %v2244_v10, %v262_v35  ;;  %v2539_v60 = vadd.f32 %v2253_v16, %v2318_v57  ;;  %v268_v34 = vld [vmem:[%s2233_s26 + $0x200] sm:$0xff]  ;;  %v2545_v51 = vmul.f32 %v2240_v8, %v264_v55 }
  0x29   : > { %v269_v58 = vld [vmem:[%s2233_s26 + $0x208] sm:$0xff]  ;;  %v2548_v50 = vmul.f32 %v2242_v9, %v265_v0  ;;  %v2551_v35 = vmul.f32 %v2244_v10, %v266_v14  ;;  %v2555_v32 = vadd.f32 %v2261_v23, %v2327_v62  ;;  %v270_v57 = vld [vmem:[%s2233_s26 + $0x210] sm:$0xff]  ;;  %v272_v44 = vld [vmem:[%s2233_s26 + $0x220] sm:$0xff]  ;;  %v2561_v37 = vmul.f32 %v2246_v11, %v267_v56 }
  0x2a   : > { %5001 = vst [vmem:[#allocation20_spill] sm:$0xff] %v2539_v60  ;;  %v271_v60 = vld [vmem:[%s2233_s26 + $0x218] sm:$0xff]  ;;  %v2564_v55 = vmul.f32 %v2240_v8, %v268_v34  ;;  %v2567_v0 = vmul.f32 %v2242_v9, %v269_v58  ;;  %v2571_v14 = vadd.f32 %v2269_v30, %v2330_v63  ;;  %v273_v62 = vld [vmem:[%s2233_s26 + $0x228] sm:$0xff]  ;;  %v2583_v34 = vmul.f32 %v2240_v8, %v272_v44  ;;  %v276_v63 = vld [vmem:[%s2233_s26 + $0x240] sm:$0xff] }
  0x2b   : > { %5002 = vst [vmem:[#allocation21_spill] sm:$0xff] %v2548_v50  ;;  %5003 = vst [vmem:[#allocation22_spill] sm:$0xff] %v2551_v35  ;;  %v275_v35 = vld [vmem:[%s2233_s26 + $0x238] sm:$0xff]  ;;  %v2577_v50 = vmul.f32 %v2244_v10, %v270_v57  ;;  %v2580_v56 = vmul.f32 %v2246_v11, %v271_v60  ;;  %v2587_v58 = vadd.f32 %v2251_v15, %v2333_v1 }
  0x2c   : > { %5004 = vst [vmem:[#allocation23_spill] sm:$0xff] %v2555_v32  ;;  %5005 = vst [vmem:[#allocation24_spill] sm:$0xff] %v2564_v55  ;;  %v274_v32 = vld [vmem:[%s2233_s26 + $0x230] sm:$0xff]  ;;  %v2593_v55 = vmul.f32 %v2242_v9, %v273_v62  ;;  %v2599_v60 = vmul.f32 %v2246_v11, %v275_v35  ;;  %v2603_v44 = vadd.f32 %v2253_v16, %v2342_v7  ;;  %v279_v1 = vld [vmem:[%s2233_s26 + $0x258] sm:$0xff] }
  0x2d   : > { %5006 = vst [vmem:[#allocation25_spill] sm:$0xff] %v2567_v0  ;;  %5007 = vst [vmem:[#allocation26_spill] sm:$0xff] %v2571_v14  ;;  %v277_v14 = vld [vmem:[%s2233_s26 + $0x248] sm:$0xff]  ;;  %v278_v0 = vld [vmem:[%s2233_s26 + $0x250] sm:$0xff]  ;;  %v2596_v57 = vmul.f32 %v2244_v10, %v274_v32  ;;  %v2619_v35 = vadd.f32 %v2261_v23, %v2345_v12 }
  0x2e   : > { %5008 = vst [vmem:[#allocation27_spill] sm:$0xff] %v2580_v56  ;;  %5009 = vst [vmem:[#allocation28_spill] sm:$0xff] %v2583_v34  ;;  %v281_v34 = vld [vmem:[%s2233_s26 + $0x268] sm:$0xff]  ;;  %v2609_v56 = vmul.f32 %v2240_v8, %v276_v63  ;;  %v2612_v62 = vmul.f32 %v2242_v9, %v277_v14  ;;  %v2615_v32 = vmul.f32 %v2244_v10, %v278_v0  ;;  %v282_v7 = vld [vmem:[%s2233_s26 + $0x270] sm:$0xff] }
  0x2f   : > { %5010 = vst [vmem:[#allocation29_spill] sm:$0xff] %v2587_v58  ;;  %5011 = vst [vmem:[#allocation30_spill] sm:$0xff] %v2596_v57  ;;  %v280_v58 = vld [vmem:[%s2233_s26 + $0x260] sm:$0xff]  ;;  %v2625_v57 = vmul.f32 %v2246_v11, %v279_v1  ;;  %v2631_v14 = vmul.f32 %v2242_v9, %v281_v34  ;;  %v2635_v0 = vadd.f32 %v2269_v30, %v2348_v13  ;;  %v285_v12 = vld [vmem:[%s2233_s26 + $0x288] sm:$0xff] }
  0x30   : > { %5012 = vst [vmem:[#allocation31_spill] sm:$0xff] %v2599_v60  ;;  %5013 = vst [vmem:[#allocation32_spill] sm:$0xff] %v2603_v44  ;;  %v283_v44 = vld [vmem:[%s2233_s26 + $0x278] sm:$0xff]  ;;  %v284_v60 = vld [vmem:[%s2233_s26 + $0x280] sm:$0xff]  ;;  %v2628_v63 = vmul.f32 %v2240_v8, %v280_v58  ;;  %v2651_v34 = vadd.f32 %v2251_v15, %v2357_v20 }
  0x31   : > { %5014 = vst [vmem:[#allocation33_spill] sm:$0xff] %v2612_v62  ;;  %5015 = vst [vmem:[#allocation34_spill] sm:$0xff] %v2615_v32  ;;  %v287_v32 = vld [vmem:[%s2233_s26 + $0x298] sm:$0xff]  ;;  %v2641_v62 = vmul.f32 %v2244_v10, %v282_v7  ;;  %v2644_v1 = vmul.f32 %v2246_v11, %v283_v44  ;;  %v2647_v58 = vmul.f32 %v2240_v8, %v284_v60  ;;  %v288_v13 = vld [vmem:[%s2233_s26 + $0x2a0] sm:$0xff] }
  0x32   : > { %5016 = vst [vmem:[#allocation35_spill] sm:$0xff] %v2619_v35  ;;  %5017 = vst [vmem:[#allocation36_spill] sm:$0xff] %v2628_v63  ;;  %v286_v35 = vld [vmem:[%s2233_s26 + $0x290] sm:$0xff]  ;;  %v2657_v63 = vmul.f32 %v2242_v9, %v285_v12  ;;  %v2663_v44 = vmul.f32 %v2246_v11, %v287_v32  ;;  %v2667_v60 = vadd.f32 %v2253_v16, %v2360_v21  ;;  %v291_v20 = vld [vmem:[%s2233_s26 + $0x2b8] sm:$0xff] }
  0x33   : > { %5018 = vst [vmem:[#allocation37_spill] sm:$0xff] %v2631_v14  ;;  %5019 = vst [vmem:[#allocation38_spill] sm:$0xff] %v2635_v0  ;;  %v289_v0 = vld [vmem:[%s2233_s26 + $0x2a8] sm:$0xff]  ;;  %v290_v14 = vld [vmem:[%s2233_s26 + $0x2b0] sm:$0xff]  ;;  %v2660_v7 = vmul.f32 %v2244_v10, %v286_v35  ;;  %v2683_v32 = vadd.f32 %v2261_v23, %v2363_v22 }
  0x34   : > { %5020 = vst [vmem:[#allocation39_spill] sm:$0xff] %v2644_v1  ;;  %5021 = vst [vmem:[#allocation40_spill] sm:$0xff] %v2647_v58  ;;  %v293_v58 = vld [vmem:[%s2233_s26 + $0x2c8] sm:$0xff]  ;;  %v2673_v1 = vmul.f32 %v2240_v8, %v288_v13  ;;  %v2676_v12 = vmul.f32 %v2242_v9, %v289_v0  ;;  %v2679_v35 = vmul.f32 %v2244_v10, %v290_v14  ;;  %v294_v21 = vld [vmem:[%s2233_s26 + $0x2d0] sm:$0xff] }
  0x35   : > { %5022 = vst [vmem:[#allocation41_spill] sm:$0xff] %v2651_v34  ;;  %5023 = vst [vmem:[#allocation42_spill] sm:$0xff] %v2660_v7  ;;  %v292_v34 = vld [vmem:[%s2233_s26 + $0x2c0] sm:$0xff]  ;;  %v2689_v7 = vmul.f32 %v2246_v11, %v291_v20  ;;  %v2695_v0 = vmul.f32 %v2242_v9, %v293_v58  ;;  %v2699_v14 = vadd.f32 %v2269_v30, %v2372_v28  ;;  %v297_v22 = vld [vmem:[%s2233_s26 + $0x2e8] sm:$0xff] }
  0x36   : > { %5024 = vst [vmem:[#allocation43_spill] sm:$0xff] %v2663_v44  ;;  %5025 = vst [vmem:[#allocation44_spill] sm:$0xff] %v2667_v60  ;;  %v295_v60 = vld [vmem:[%s2233_s26 + $0x2d8] sm:$0xff]  ;;  %v296_v44 = vld [vmem:[%s2233_s26 + $0x2e0] sm:$0xff]  ;;  %v2692_v13 = vmul.f32 %v2240_v8, %v292_v34  ;;  %v2715_v58 = vadd.f32 %v2251_v15, %v2375_v29 }
  0x37   : > { %5026 = vst [vmem:[#allocation45_spill] sm:$0xff] %v2676_v12  ;;  %5027 = vst [vmem:[#allocation46_spill] sm:$0xff] %v2679_v35  ;;  %v299_v35 = vld [vmem:[%s2233_s26 + $0x2f8] sm:$0xff]  ;;  %v2705_v12 = vmul.f32 %v2244_v10, %v294_v21  ;;  %v2708_v20 = vmul.f32 %v2246_v11, %v295_v60  ;;  %v2711_v34 = vmul.f32 %v2240_v8, %v296_v44  ;;  %v300_v28 = vld [vmem:[%s2233_s26 + $0x300] sm:$0xff] }
  0x38   : > { %5028 = vst [vmem:[#allocation47_spill] sm:$0xff] %v2683_v32  ;;  %5029 = vst [vmem:[#allocation48_spill] sm:$0xff] %v2692_v13  ;;  %v298_v32 = vld [vmem:[%s2233_s26 + $0x2f0] sm:$0xff]  ;;  %v2721_v13 = vmul.f32 %v2242_v9, %v297_v22  ;;  %v2727_v60 = vmul.f32 %v2246_v11, %v299_v35  ;;  %v2731_v44 = vadd.f32 %v2253_v16, %v2378_v31  ;;  %v303_v29 = vld [vmem:[%s2233_s26 + $0x318] sm:$0xff] }
  0x39   : > { %5030 = vst [vmem:[#allocation49_spill] sm:$0xff] %v2695_v0  ;;  %5031 = vst [vmem:[#allocation50_spill] sm:$0xff] %v2699_v14  ;;  %v301_v14 = vld [vmem:[%s2233_s26 + $0x308] sm:$0xff]  ;;  %v302_v0 = vld [vmem:[%s2233_s26 + $0x310] sm:$0xff]  ;;  %v2724_v21 = vmul.f32 %v2244_v10, %v298_v32  ;;  %v2747_v35 = vadd.f32 %v2261_v23, %v2387_v39 }
  0x3a   : > { %5032 = vst [vmem:[#allocation51_spill] sm:$0xff] %v2708_v20  ;;  %5033 = vst [vmem:[#allocation52_spill] sm:$0xff] %v2711_v34  ;;  %v305_v34 = vld [vmem:[%s2233_s26 + $0x328] sm:$0xff]  ;;  %v2737_v20 = vmul.f32 %v2240_v8, %v300_v28  ;;  %v2740_v22 = vmul.f32 %v2242_v9, %v301_v14  ;;  %v2743_v32 = vmul.f32 %v2244_v10, %v302_v0  ;;  %v306_v31 = vld [vmem:[%s2233_s26 + $0x330] sm:$0xff] }
  0x3b   : > { %5034 = vst [vmem:[#allocation53_spill] sm:$0xff] %v2715_v58  ;;  %5035 = vst [vmem:[#allocation54_spill] sm:$0xff] %v2724_v21  ;;  %v304_v58 = vld [vmem:[%s2233_s26 + $0x320] sm:$0xff]  ;;  %v2753_v21 = vmul.f32 %v2246_v11, %v303_v29  ;;  %v2759_v14 = vmul.f32 %v2242_v9, %v305_v34  ;;  %v2763_v0 = vadd.f32 %v2269_v30, %v2390_v40  ;;  %v309_v39 = vld [vmem:[%s2233_s26 + $0x348] sm:$0xff] }
  0x3c   : > { %5036 = vst [vmem:[#allocation55_spill] sm:$0xff] %v2727_v60  ;;  %5037 = vst [vmem:[#allocation56_spill] sm:$0xff] %v2731_v44  ;;  %v307_v44 = vld [vmem:[%s2233_s26 + $0x338] sm:$0xff]  ;;  %v308_v60 = vld [vmem:[%s2233_s26 + $0x340] sm:$0xff]  ;;  %v2756_v28 = vmul.f32 %v2240_v8, %v304_v58  ;;  %v2779_v34 = vadd.f32 %v2251_v15, %v2393_v45 }
  0x3d   : > { %5038 = vst [vmem:[#allocation57_spill] sm:$0xff] %v2740_v22  ;;  %5039 = vst [vmem:[#allocation58_spill] sm:$0xff] %v2743_v32  ;;  %v311_v32 = vld [vmem:[%s2233_s26 + $0x358] sm:$0xff]  ;;  %v2769_v22 = vmul.f32 %v2244_v10, %v306_v31  ;;  %v2772_v29 = vmul.f32 %v2246_v11, %v307_v44  ;;  %v2775_v58 = vmul.f32 %v2240_v8, %v308_v60  ;;  %v312_v40 = vld [vmem:[%s2233_s26 + $0x360] sm:$0xff] }
  0x3e   : > { %5040 = vst [vmem:[#allocation59_spill] sm:$0xff] %v2747_v35  ;;  %5041 = vst [vmem:[#allocation60_spill] sm:$0xff] %v2756_v28  ;;  %v310_v35 = vld [vmem:[%s2233_s26 + $0x350] sm:$0xff]  ;;  %v2785_v28 = vmul.f32 %v2242_v9, %v309_v39  ;;  %v2791_v44 = vmul.f32 %v2246_v11, %v311_v32  ;;  %v2795_v60 = vadd.f32 %v2253_v16, %v2402_v53  ;;  %v315_v45 = vld [vmem:[%s2233_s26 + $0x378] sm:$0xff] }
  0x3f   : > { %5042 = vst [vmem:[#allocation61_spill] sm:$0xff] %v2759_v14  ;;  %5043 = vst [vmem:[#allocation62_spill] sm:$0xff] %v2763_v0  ;;  %v313_v0 = vld [vmem:[%s2233_s26 + $0x368] sm:$0xff]  ;;  %v314_v14 = vld [vmem:[%s2233_s26 + $0x370] sm:$0xff]  ;;  %v2788_v31 = vmul.f32 %v2244_v10, %v310_v35  ;;  %v2811_v32 = vadd.f32 %v2261_v23, %v2405_v54 }
  0x40   : > { %5044 = vst [vmem:[#allocation63_spill] sm:$0xff] %v2772_v29  ;;  %5045 = vst [vmem:[#allocation64_spill] sm:$0xff] %v2775_v58  ;;  %v317_v58 = vld [vmem:[%s2233_s26 + $0x388] sm:$0xff]  ;;  %v2801_v29 = vmul.f32 %v2240_v8, %v312_v40  ;;  %v2804_v39 = vmul.f32 %v2242_v9, %v313_v0  ;;  %v2807_v35 = vmul.f32 %v2244_v10, %v314_v14  ;;  %v318_v53 = vld [vmem:[%s2233_s26 + $0x390] sm:$0xff] }
  0x41   : > { %5046 = vst [vmem:[#allocation65_spill] sm:$0xff] %v2779_v34  ;;  %5047 = vst [vmem:[#allocation66_spill] sm:$0xff] %v2788_v31  ;;  %v316_v34 = vld [vmem:[%s2233_s26 + $0x380] sm:$0xff]  ;;  %v2817_v31 = vmul.f32 %v2246_v11, %v315_v45  ;;  %v2823_v0 = vmul.f32 %v2242_v9, %v317_v58  ;;  %v2827_v14 = vadd.f32 %v2269_v30, %v2408_v59  ;;  %v321_v54 = vld [vmem:[%s2233_s26 + $0x3a8] sm:$0xff] }
  0x42   : > { %5048 = vst [vmem:[#allocation67_spill] sm:$0xff] %v2791_v44  ;;  %5049 = vst [vmem:[#allocation68_spill] sm:$0xff] %v2795_v60  ;;  %v319_v60 = vld [vmem:[%s2233_s26 + $0x398] sm:$0xff]  ;;  %v320_v44 = vld [vmem:[%s2233_s26 + $0x3a0] sm:$0xff]  ;;  %v2820_v40 = vmul.f32 %v2240_v8, %v316_v34  ;;  %v2843_v58 = vadd.f32 %v2251_v15, %v2417_v5 }
  0x43   : > { %5050 = vst [vmem:[#allocation69_spill] sm:$0xff] %v2804_v39  ;;  %5051 = vst [vmem:[#allocation70_spill] sm:$0xff] %v2807_v35  ;;  %v323_v35 = vld [vmem:[%s2233_s26 + $0x3b8] sm:$0xff]  ;;  %v2833_v39 = vmul.f32 %v2244_v10, %v318_v53  ;;  %v2836_v45 = vmul.f32 %v2246_v11, %v319_v60  ;;  %v2839_v34 = vmul.f32 %v2240_v8, %v320_v44  ;;  %v324_v59 = vld [vmem:[%s2233_s26 + $0x3c0] sm:$0xff] }
  0x44   : > { %5052 = vst [vmem:[#allocation71_spill] sm:$0xff] %v2811_v32  ;;  %5053 = vst [vmem:[#allocation72_spill] sm:$0xff] %v2820_v40  ;;  %v322_v32 = vld [vmem:[%s2233_s26 + $0x3b0] sm:$0xff]  ;;  %v2849_v40 = vmul.f32 %v2242_v9, %v321_v54  ;;  %v2855_v60 = vmul.f32 %v2246_v11, %v323_v35  ;;  %v2859_v44 = vadd.f32 %v2253_v16, %v2420_v6  ;;  %v328_v5 = vld [vmem:[%s2233_s26 + $0x3e0] sm:$0xff] }
  0x45   : > { %5054 = vst [vmem:[#allocation73_spill] sm:$0xff] %v2823_v0  ;;  %5055 = vst [vmem:[#allocation74_spill] sm:$0xff] %v2827_v14  ;;  %v325_v14 = vld [vmem:[%s2233_s26 + $0x3c8] sm:$0xff]  ;;  %v326_v0 = vld [vmem:[%s2233_s26 + $0x3d0] sm:$0xff]  ;;  %v2852_v53 = vmul.f32 %v2244_v10, %v322_v32  ;;  %v2875_v35 = vadd.f32 %v2261_v23, %v2423_v17 }
  0x46   : > { %5056 = vst [vmem:[#allocation75_spill] sm:$0xff] %v2833_v39  ;;  %5057 = vst [vmem:[#allocation76_spill] sm:$0xff] %v2836_v45  ;;  %v2865_v45 = vmul.f32 %v2240_v8, %v324_v59  ;;  %v2868_v39 = vmul.f32 %v2242_v9, %v325_v14  ;;  %v2871_v54 = vmul.f32 %v2244_v10, %v326_v0  ;;  %v330_v32 = vld [vmem:[%s2233_s26 + $0x3f0] sm:$0xff] }
  0x47   : > { %5058 = vst [vmem:[#allocation77_spill] sm:$0xff] %v2839_v34  ;;  %5059 = vst [vmem:[#allocation78_spill] sm:$0xff] %v2843_v58  ;;  %v327_v34 = vld [vmem:[%s2233_s26 + $0x3d8] sm:$0xff]  ;;  %v329_v58 = vld [vmem:[%s2233_s26 + $0x3e8] sm:$0xff]  ;;  %v2890_v14 = vadd.f32 %v2269_v30, %v2433_v26  ;;  %v2893_v0 = vmul.f32 %v2244_v10, %v330_v32  ;;  %v2912_v26 = vadd.f32 %v2269_v30, %v2452_v52 }
  0x48   : > { %5060 = vst [vmem:[#allocation79_spill] sm:$0xff] %v2855_v60  ;;  %5061 = vst [vmem:[#allocation80_spill] sm:$0xff] %v2859_v44  ;;  %v331_v60 = vld [vmem:[%s2233_s26 + $0x3f8] sm:$0xff]  ;;  %v2880_v6 = vmul.f32 %v2246_v11, %v327_v34  ;;  %v2883_v44 = vmul.f32 %v2240_v8, %v328_v5  ;;  %v2886_v59 = vmul.f32 %v2242_v9, %v329_v58  ;;  %v5065_v58 = vld [vmem:[#allocation22_spill] sm:$0xff] }
  0x49   : > { %v2896_v17 = vmul.f32 %v2246_v11, %v331_v60  ;;  %v2900_v34 = vadd.f32 %v2251_v15, %v2436_v27  ;;  %v2904_v8 = vadd.f32 %v2253_v16, %v2439_v33  ;;  %v2908_v9 = vadd.f32 %v2261_v23, %v2449_v47  ;;  %v5067_v60 = vld [vmem:[#allocation24_spill] sm:$0xff]  ;;  %v5069_v5 = vld [vmem:[#allocation25_spill] sm:$0xff] }
  0x4a   : > { %v2916_v10 = vadd.f32 %v2251_v15, %v2455_v36  ;;  %v2920_v11 = vadd.f32 %v2253_v16, %v2465_v2  ;;  %v2924_v27 = vadd.f32 %v2261_v23, %v2468_v41  ;;  %v2928_v33 = vadd.f32 %v2269_v30, %v2471_v19 }
  0x4b   : > { %v2932_v47 = vadd.f32 %v2251_v15, %v2481_v18  ;;  %v2936_v52 = vadd.f32 %v2253_v16, %v2484_v42  ;;  %v2940_v2 = vadd.f32 %v2261_v23, %v2487_v38  ;;  %v2944_v36 = vadd.f32 %v2269_v30, %v2497_v46 }
  0x4c   : > { %v2948_v41 = vadd.f32 %v2251_v15, %v2500_v43  ;;  %v2952_v18 = vadd.f32 %v2253_v16, %v2503_v4  ;;  %v2956_v19 = vadd.f32 %v2261_v23, %v2513_v24  ;;  %v2960_v42 = vadd.f32 %v2269_v30, %v2516_v48  ;;  %v5063_v48 = vld [vmem:[#allocation21_spill] sm:$0xff] }
  0x4d   : > { %v2964_v46 = vadd.f32 %v2251_v15, %v2519_v61  ;;  %v2968_v38 = vadd.f32 %v2253_v16, %v2529_v3  ;;  %v2972_v43 = vadd.f32 %v2261_v23, %v2532_v49  ;;  %v2976_v24 = vadd.f32 %v2269_v30, %v2535_v25 }
  0x4e   : > { %v2980_v4 = vadd.f32 %v2251_v15, %v2545_v51  ;;  %v2984_v61 = vadd.f32 %v2253_v16, %v5063_v48  ;;  %v2988_v3 = vadd.f32 %v2261_v23, %v5065_v58  ;;  %v2992_v49 = vadd.f32 %v2269_v30, %v2561_v37  ;;  %v5071_v48 = vld [vmem:[#allocation27_spill] sm:$0xff] }
  0x4f   : > { %v2996_v25 = vadd.f32 %v2251_v15, %v5067_v60  ;;  %v3000_v51 = vadd.f32 %v2253_v16, %v5069_v5  ;;  %v3004_v32 = vadd.f32 %v2261_v23, %v2577_v50  ;;  %v3008_v58 = vadd.f32 %v2269_v30, %v5071_v48 }
  0x50   : > { %5062 = vst [vmem:[#allocation81_spill] sm:$0xff] %v2980_v4  ;;  %5064 = vst [vmem:[#allocation21_spill] sm:$0xff] %v2984_v61  ;;  %v3016_v60 = vadd.f32 %v2253_v16, %v2593_v55  ;;  %v3028_v48 = vadd.f32 %v2251_v15, %v2609_v56 }
  0x51   : > { %5066 = vst [vmem:[#allocation22_spill] sm:$0xff] %v2988_v3  ;;  %5068 = vst [vmem:[#allocation24_spill] sm:$0xff] %v2996_v25  ;;  %v5073_v3 = vld [vmem:[#allocation28_spill] sm:$0xff]  ;;  %v5076_v25 = vld [vmem:[#allocation30_spill] sm:$0xff] }
  0x52   : > { %5070 = vst [vmem:[#allocation25_spill] sm:$0xff] %v3000_v51  ;;  %5072 = vst [vmem:[#allocation27_spill] sm:$0xff] %v3008_v58  ;;  %v3012_v37 = vadd.f32 %v2251_v15, %v5073_v3  ;;  %v3020_v5 = vadd.f32 %v2261_v23, %v5076_v25  ;;  %v5078_v51 = vld [vmem:[#allocation31_spill] sm:$0xff]  ;;  %v5081_v58 = vld [vmem:[#allocation33_spill] sm:$0xff]  ;;  %v3040_v25 = vadd.f32 %v2269_v30, %v2625_v57 }
  0x53   : > { %5075 = vst [vmem:[#allocation82_spill] sm:$0xff] %v3016_v60  ;;  %v3024_v50 = vadd.f32 %v2269_v30, %v5078_v51  ;;  %5080 = vst [vmem:[#allocation83_spill] sm:$0xff] %v3028_v48  ;;  %v3032_v3 = vadd.f32 %v2253_v16, %v5081_v58  ;;  %v3052_v58 = vadd.f32 %v2261_v23, %v2641_v62 }
  0x54   : > { %5074 = vst [vmem:[#allocation28_spill] sm:$0xff] %v3012_v37  ;;  %5077 = vst [vmem:[#allocation30_spill] sm:$0xff] %v3020_v5  ;;  %v5083_v37 = vld [vmem:[#allocation34_spill] sm:$0xff]  ;;  %v5085_v5 = vld [vmem:[#allocation36_spill] sm:$0xff] }
  0x55   : > { %5079 = vst [vmem:[#allocation31_spill] sm:$0xff] %v3024_v50  ;;  %5082 = vst [vmem:[#allocation33_spill] sm:$0xff] %v3032_v3  ;;  %v3036_v55 = vadd.f32 %v2261_v23, %v5083_v37  ;;  %v3044_v51 = vadd.f32 %v2251_v15, %v5085_v5  ;;  %v5087_v50 = vld [vmem:[#allocation37_spill] sm:$0xff]  ;;  %v5089_v3 = vld [vmem:[#allocation39_spill] sm:$0xff]  ;;  %v3064_v5 = vadd.f32 %v2253_v16, %v2657_v63 }
  0x56   : > { %v3048_v56 = vadd.f32 %v2253_v16, %v5087_v50  ;;  %v3056_v37 = vadd.f32 %v2269_v30, %v5089_v3  ;;  %v3076_v3 = vadd.f32 %v2251_v15, %v2673_v1 }
  0x57   : > { %5084 = vst [vmem:[#allocation34_spill] sm:$0xff] %v3036_v55  ;;  %5086 = vst [vmem:[#allocation36_spill] sm:$0xff] %v3044_v51  ;;  %v5091_v55 = vld [vmem:[#allocation40_spill] sm:$0xff]  ;;  %v5094_v51 = vld [vmem:[#allocation42_spill] sm:$0xff] }
  0x58   : > { %5088 = vst [vmem:[#allocation37_spill] sm:$0xff] %v3048_v56  ;;  %5090 = vst [vmem:[#allocation39_spill] sm:$0xff] %v3056_v37  ;;  %v3060_v57 = vadd.f32 %v2251_v15, %v5091_v55  ;;  %v3068_v50 = vadd.f32 %v2261_v23, %v5094_v51  ;;  %v5096_v56 = vld [vmem:[#allocation43_spill] sm:$0xff]  ;;  %v5099_v37 = vld [vmem:[#allocation45_spill] sm:$0xff]  ;;  %v3088_v51 = vadd.f32 %v2269_v30, %v2689_v7 }
  0x59   : > { %5093 = vst [vmem:[#allocation84_spill] sm:$0xff] %v3064_v5  ;;  %v3072_v62 = vadd.f32 %v2269_v30, %v5096_v56  ;;  %5098 = vst [vmem:[#allocation85_spill] sm:$0xff] %v3076_v3  ;;  %v3080_v55 = vadd.f32 %v2253_v16, %v5099_v37  ;;  %v3100_v37 = vadd.f32 %v2261_v23, %v2705_v12 }
  0x5a   : > { %5092 = vst [vmem:[#allocation40_spill] sm:$0xff] %v3060_v57  ;;  %5095 = vst [vmem:[#allocation42_spill] sm:$0xff] %v3068_v50  ;;  %v5101_v57 = vld [vmem:[#allocation46_spill] sm:$0xff]  ;;  %v5104_v50 = vld [vmem:[#allocation48_spill] sm:$0xff] }
  0x5b   : > { %5097 = vst [vmem:[#allocation43_spill] sm:$0xff] %v3072_v62  ;;  %5100 = vst [vmem:[#allocation45_spill] sm:$0xff] %v3080_v55  ;;  %v3084_v63 = vadd.f32 %v2261_v23, %v5101_v57  ;;  %v3092_v56 = vadd.f32 %v2251_v15, %v5104_v50  ;;  %v5106_v62 = vld [vmem:[#allocation49_spill] sm:$0xff]  ;;  %v5109_v55 = vld [vmem:[#allocation51_spill] sm:$0xff]  ;;  %v3112_v50 = vadd.f32 %v2253_v16, %v2721_v13 }
  0x5c   : > { %5103 = vst [vmem:[#allocation86_spill] sm:$0xff] %v3088_v51  ;;  %v3096_v1 = vadd.f32 %v2253_v16, %v5106_v62  ;;  %5108 = vst [vmem:[#allocation87_spill] sm:$0xff] %v3100_v37  ;;  %v3104_v57 = vadd.f32 %v2269_v30, %v5109_v55  ;;  %v3124_v55 = vadd.f32 %v2251_v15, %v2737_v20 }
  0x5d   : > { %5102 = vst [vmem:[#allocation46_spill] sm:$0xff] %v3084_v63  ;;  %5105 = vst [vmem:[#allocation48_spill] sm:$0xff] %v3092_v56  ;;  %v5111_v63 = vld [vmem:[#allocation52_spill] sm:$0xff]  ;;  %v5114_v56 = vld [vmem:[#allocation54_spill] sm:$0xff] }
  0x5e   : > { %5107 = vst [vmem:[#allocation49_spill] sm:$0xff] %v3096_v1  ;;  %5110 = vst [vmem:[#allocation51_spill] sm:$0xff] %v3104_v57  ;;  %v3108_v7 = vadd.f32 %v2251_v15, %v5111_v63  ;;  %v3116_v62 = vadd.f32 %v2261_v23, %v5114_v56  ;;  %v5116_v1 = vld [vmem:[#allocation55_spill] sm:$0xff]  ;;  %v5119_v57 = vld [vmem:[#allocation57_spill] sm:$0xff]  ;;  %v3136_v56 = vadd.f32 %v2269_v30, %v2753_v21 }
  0x5f   : > { %5113 = vst [vmem:[#allocation88_spill] sm:$0xff] %v3112_v50  ;;  %v3120_v12 = vadd.f32 %v2269_v30, %v5116_v1  ;;  %5118 = vst [vmem:[#allocation89_spill] sm:$0xff] %v3124_v55  ;;  %v3128_v63 = vadd.f32 %v2253_v16, %v5119_v57  ;;  %v3148_v57 = vadd.f32 %v2261_v23, %v2769_v22 }
  0x60   : > { %5112 = vst [vmem:[#allocation52_spill] sm:$0xff] %v3108_v7  ;;  %5115 = vst [vmem:[#allocation54_spill] sm:$0xff] %v3116_v62  ;;  %v5121_v7 = vld [vmem:[#allocation58_spill] sm:$0xff]  ;;  %v5124_v62 = vld [vmem:[#allocation60_spill] sm:$0xff] }
  0x61   : > { %5117 = vst [vmem:[#allocation55_spill] sm:$0xff] %v3120_v12  ;;  %5120 = vst [vmem:[#allocation57_spill] sm:$0xff] %v3128_v63  ;;  %v3132_v13 = vadd.f32 %v2261_v23, %v5121_v7  ;;  %v3140_v1 = vadd.f32 %v2251_v15, %v5124_v62  ;;  %v5126_v12 = vld [vmem:[#allocation61_spill] sm:$0xff]  ;;  %v5129_v63 = vld [vmem:[#allocation63_spill] sm:$0xff]  ;;  %v3160_v62 = vadd.f32 %v2253_v16, %v2785_v28 }
  0x62   : > { %5123 = vst [vmem:[#allocation90_spill] sm:$0xff] %v3136_v56  ;;  %v3144_v20 = vadd.f32 %v2253_v16, %v5126_v12  ;;  %5128 = vst [vmem:[#allocation91_spill] sm:$0xff] %v3148_v57  ;;  %v3152_v7 = vadd.f32 %v2269_v30, %v5129_v63  ;;  %v3172_v63 = vadd.f32 %v2251_v15, %v2801_v29 }
  0x63   : > { %5122 = vst [vmem:[#allocation58_spill] sm:$0xff] %v3132_v13  ;;  %5125 = vst [vmem:[#allocation60_spill] sm:$0xff] %v3140_v1  ;;  %v5131_v13 = vld [vmem:[#allocation64_spill] sm:$0xff]  ;;  %v5134_v1 = vld [vmem:[#allocation66_spill] sm:$0xff] }
  0x64   : > { %5127 = vst [vmem:[#allocation61_spill] sm:$0xff] %v3144_v20  ;;  %5130 = vst [vmem:[#allocation63_spill] sm:$0xff] %v3152_v7  ;;  %v3156_v21 = vadd.f32 %v2251_v15, %v5131_v13  ;;  %v3164_v12 = vadd.f32 %v2261_v23, %v5134_v1  ;;  %v5136_v20 = vld [vmem:[#allocation67_spill] sm:$0xff]  ;;  %v5139_v7 = vld [vmem:[#allocation69_spill] sm:$0xff]  ;;  %v3184_v1 = vadd.f32 %v2269_v30, %v2817_v31 }
  0x65   : > { %5133 = vst [vmem:[#allocation92_spill] sm:$0xff] %v3160_v62  ;;  %v3168_v22 = vadd.f32 %v2269_v30, %v5136_v20  ;;  %5138 = vst [vmem:[#allocation93_spill] sm:$0xff] %v3172_v63  ;;  %v3176_v13 = vadd.f32 %v2253_v16, %v5139_v7  ;;  %v5148_v63 = vld [vmem:[#allocation75_spill] sm:$0xff] }
  0x66   : > { %5132 = vst [vmem:[#allocation64_spill] sm:$0xff] %v3156_v21  ;;  %5135 = vst [vmem:[#allocation66_spill] sm:$0xff] %v3164_v12  ;;  %v5141_v21 = vld [vmem:[#allocation70_spill] sm:$0xff]  ;;  %v5144_v12 = vld [vmem:[#allocation72_spill] sm:$0xff]  ;;  %v3196_v7 = vadd.f32 %v2261_v23, %v5148_v63 }
  0x67   : > { %5137 = vst [vmem:[#allocation67_spill] sm:$0xff] %v3168_v22  ;;  %5140 = vst [vmem:[#allocation69_spill] sm:$0xff] %v3176_v13  ;;  %v3180_v28 = vadd.f32 %v2261_v23, %v5141_v21  ;;  %v3188_v20 = vadd.f32 %v2251_v15, %v5144_v12  ;;  %v5146_v22 = vld [vmem:[#allocation73_spill] sm:$0xff]  ;;  %v5150_v13 = vld [vmem:[#allocation76_spill] sm:$0xff]  ;;  %v3208_v12 = vadd.f32 %v2253_v16, %v2849_v40 }
  0x68   : > { %5143 = vst [vmem:[#allocation94_spill] sm:$0xff] %v3184_v1  ;;  %v3192_v29 = vadd.f32 %v2253_v16, %v5146_v22  ;;  %5149 = vst [vmem:[#allocation75_spill] sm:$0xff] %v3196_v7  ;;  %v3200_v21 = vadd.f32 %v2269_v30, %v5150_v13  ;;  %v3212_v22 = vadd.f32 %v2261_v23, %v2852_v53 }
  0x69   : > { %5142 = vst [vmem:[#allocation70_spill] sm:$0xff] %v3180_v28  ;;  %5145 = vst [vmem:[#allocation72_spill] sm:$0xff] %v3188_v20  ;;  %v5152_v28 = vld [vmem:[#allocation77_spill] sm:$0xff]  ;;  %v3220_v13 = vadd.f32 %v2251_v15, %v2865_v45  ;;  %v3228_v40 = vadd.f32 %v2261_v23, %v2871_v54  ;;  %v3232_v53 = vadd.f32 %v2269_v30, %v2880_v6 }
  0x6a   : > { %5147 = vst [vmem:[#allocation73_spill] sm:$0xff] %v3192_v29  ;;  %5151 = vst [vmem:[#allocation76_spill] sm:$0xff] %v3200_v21  ;;  %v3204_v31 = vadd.f32 %v2251_v15, %v5152_v28  ;;  %v5156_v29 = vld [vmem:[#allocation79_spill] sm:$0xff]  ;;  %v3224_v28 = vadd.f32 %v2253_v16, %v2868_v39  ;;  %v3240_v45 = vadd.f32 %v2253_v16, %v2886_v59  ;;  %764 = sbr.rel (%p1801_p4) target bundleno = 114 (0x72), region = 36 }
  0x6b   : > { %5154 = vst [vmem:[#allocation95_spill] sm:$0xff] %v3208_v12  ;;  %5155 = vst [vmem:[#allocation96_spill] sm:$0xff] %v3212_v22  ;;  %v3216_v63 = vadd.f32 %v2269_v30, %v5156_v29  ;;  %v3236_v29 = vadd.f32 %v2251_v15, %v2883_v44  ;;  %v3244_v39 = vadd.f32 %v2261_v23, %v2893_v0  ;;  %v2179_v0 = vmov (!%p1801_p4), 0.0  }
  0x6c   : > { %5153 = vst [vmem:[#allocation77_spill] sm:$0xff] %v3204_v31  ;;  %5158 = vst [vmem:[#allocation97_spill] sm:$0xff] %v3220_v13  ;;  %v3248_v54 = vadd.f32 %v2269_v30, %v2896_v17 }
  0x6d   : > { %5157 = vst [vmem:[#allocation79_spill] sm:$0xff] %v3216_v63  ;;  %5159 = vst [vmem:[#allocation98_spill] sm:$0xff] %v3224_v28 }
  0x6e   : > { %5160 = vst [vmem:[#allocation99_spill] sm:$0xff] %v3228_v40  ;;  %5161 = vst [vmem:[#allocation100_spill] sm:$0xff] %v3232_v53 }
  0x6f   : > { %5162 = vst [vmem:[#allocation101_spill] sm:$0xff] %v3236_v29  ;;  %5163 = vst [vmem:[#allocation102_spill] sm:$0xff] %v3240_v45 }
  0x70   : > { %5164 = vst [vmem:[#allocation103_spill] sm:$0xff] %v3244_v39  ;;  %5165 = vst [vmem:[#allocation104_spill] sm:$0xff] %v3248_v54 }
  0x71   : > { %765 = vst [vmem:[%s4909_s4] sm:$0xf] %v2179_v0 }
  0x72 PF: > { %v767_v6 = vld [vmem:[%s4907_s2 + $0x8] sm:$0xff]  ;;  %v769_v23 = vld [vmem:[%s4907_s2 + $0x18] sm:$0xff]  ;;  %v766_v39 = vld [vmem:[%s4907_s2] sm:$0xff]  ;;  %v5253_v54 = vmax.f32 %v2890_v14, 0.0 }
  0x73   : > { %v5251_v40 = vld [vmem:[#allocation4_spill] sm:$0xff]  ;;  %v1808_v31 = vpack.c.bf16 %v769_v23, %v767_v6  ;;  %v771_v28 = vld [vmem:[%s4907_s2 + $0x28] sm:$0xff]  ;;  %v773_v0 = vld [vmem:[%s4907_s2 + $0x38] sm:$0xff] }
  0x74   : > { %v5252_v29 = vmax.f32 %v5251_v40, 0.0  ;;  %1269 = vmatprep.mubr.f32.mxu1 %v5253_v54  ;;  %v768_v45 = vld [vmem:[%s4907_s2 + $0x10] sm:$0xff]  ;;  %v1812_v13 = vpack.c.bf16 %v773_v0, %v771_v28  ;;  %v770_v14 = vld [vmem:[%s4907_s2 + $0x20] sm:$0xff]  ;;  %v775_v23 = vld [vmem:[%s4907_s2 + $0x48] sm:$0xff] }
  0x75   : > { %v1810_v59 = vpack.c.bf16 %v768_v45, %v766_v39  ;;  %v772_v6 = vld [vmem:[%s4907_s2 + $0x30] sm:$0xff]  ;;  %1809 = vmatprep.subr.bf16.mxu0 %v1808_v31  ;;  %v777_v40 = vld [vmem:[%s4907_s2 + $0x58] sm:$0xff]  ;;  %v774_v54 = vld [vmem:[%s4907_s2 + $0x40] sm:$0xff] }
  0x76   : > { %958 = vmatprep.mubr.f32.mxu0 %v5252_v29  ;;  %v1814_v39 = vpack.c.bf16 %v772_v6, %v770_v14  ;;  %v1816_v29 = vpack.c.bf16 %v777_v40, %v775_v23  ;;  %v776_v45 = vld [vmem:[%s4907_s2 + $0x50] sm:$0xff]  ;;  %v779_v31 = vld [vmem:[%s4907_s2 + $0x68] sm:$0xff]  ;;  %v781_v28 = vld [vmem:[%s4907_s2 + $0x78] sm:$0xff] }
  0x77   : > { %1811 = vmatpush1.bf16.msra.mxu0 %v1810_v59  ;;  %v1818_v59 = vpack.c.bf16 %v776_v45, %v774_v54  ;;  %v778_v0 = vld [vmem:[%s4907_s2 + $0x60] sm:$0xff]  ;;  %v780_v14 = vld [vmem:[%s4907_s2 + $0x70] sm:$0xff]  ;;  %v783_v6 = vld [vmem:[%s4907_s2 + $0x88] sm:$0xff] }
  0x78   : > { %1813 = vmatprep.subr.bf16.mxu0 %v1812_v13  ;;  %v1820_v13 = vpack.c.bf16 %v781_v28, %v779_v31  ;;  %v785_v23 = vld [vmem:[%s4907_s2 + $0x98] sm:$0xff]  ;;  %v1822_v40 = vpack.c.bf16 %v780_v14, %v778_v0  ;;  %v784_v45 = vld [vmem:[%s4907_s2 + $0x90] sm:$0xff]  ;;  %v787_v31 = vld [vmem:[%s4907_s2 + $0xa8] sm:$0xff] }
  0x79   : > { %v1824_v54 = vpack.c.bf16 %v785_v23, %v783_v6  ;;  %v833_v28 = vld [vmem:[%s4907_s2 + $0x218] sm:$0xff]  ;;  %v832_v14 = vld [vmem:[%s4907_s2 + $0x210] sm:$0xff]  ;;  %v835_v23 = vld [vmem:[%s4907_s2 + $0x228] sm:$0xff] }
  0x7a   : > { %v837_v53 = vld [vmem:[%s4907_s2 + $0x238] sm:$0xff]  ;;  %v788_v30 = vld [vmem:[%s4907_s2 + $0xb0] sm:$0xff]  ;;  %v843_v17 = vld [vmem:[%s4907_s2 + $0x268] sm:$0xff] }
  0x7b   : > { %1815 = vmatpush1.bf16.msra.mxu0 %v1814_v39  ;;  %v782_v39 = vld [vmem:[%s4907_s2 + $0x80] sm:$0xff]  ;;  %v3479_v16 = vpack.c.bf16 %v837_v53, %v835_v23  ;;  %v836_v53 = vld [vmem:[%s4907_s2 + $0x230] sm:$0xff]  ;;  %v795_v15 = vld [vmem:[%s4907_s2 + $0xe8] sm:$0xff] }
  0x7c   : > { %1817 = vmatprep.subr.bf16.mxu0 %v1816_v29  ;;  %v831_v29 = vld [vmem:[%s4907_s2 + $0x208] sm:$0xff]  ;;  %v838_v23 = vld [vmem:[%s4907_s2 + $0x240] sm:$0xff]  ;;  %v840_v12 = vld [vmem:[%s4907_s2 + $0x250] sm:$0xff] }
  0x7d   : > { %v3459_v0 = vpack.c.bf16 %v833_v28, %v831_v29  ;;  %v1826_v29 = vpack.c.bf16 %v784_v45, %v782_v39  ;;  %v786_v28 = vld [vmem:[%s4907_s2 + $0xa0] sm:$0xff]  ;;  %v793_v39 = vld [vmem:[%s4907_s2 + $0xd8] sm:$0xff]  ;;  %v839_v45 = vld [vmem:[%s4907_s2 + $0x248] sm:$0xff] }
  0x7e   : > { %v796_v63 = vld [vmem:[%s4907_s2 + $0xf0] sm:$0xff]  ;;  %v799_v44 = vld [vmem:[%s4907_s2 + $0x108] sm:$0xff] }
  0x7f   : > { %1819 = vmatpush1.bf16.msra.mxu0 %v1818_v59  ;;  %v789_v59 = vld [vmem:[%s4907_s2 + $0xb8] sm:$0xff]  ;;  %2064 = vmatprep.subr.bf16.mxu1 %v3459_v0  ;;  %v803_v62 = vld [vmem:[%s4907_s2 + $0x128] sm:$0xff] }
  0x80   : > { %1821 = vmatprep.subr.bf16.mxu0 %v1820_v13  ;;  %v830_v13 = vld [vmem:[%s4907_s2 + $0x200] sm:$0xff]  ;;  %v807_v7 = vld [vmem:[%s4907_s2 + $0x148] sm:$0xff] }
  0x81   : > { %v3467_v6 = vpack.c.bf16 %v832_v14, %v830_v13  ;;  %v834_v13 = vld [vmem:[%s4907_s2 + $0x220] sm:$0xff]  ;;  %v1828_v14 = vpack.c.bf16 %v789_v59, %v787_v31  ;;  %v841_v31 = vld [vmem:[%s4907_s2 + $0x258] sm:$0xff]  ;;  %v811_v21 = vld [vmem:[%s4907_s2 + $0x168] sm:$0xff] }
  0x82   : > { %v3506_v59 = vpack.c.bf16 %v841_v31, %v839_v45  ;;  %v792_v31 = vld [vmem:[%s4907_s2 + $0xd0] sm:$0xff]  ;;  %v815_v1 = vld [vmem:[%s4907_s2 + $0x188] sm:$0xff] }
  0x83   : > { %1823 = vmatpush1.bf16.msra.mxu0 %v1822_v40  ;;  %v791_v40 = vld [vmem:[%s4907_s2 + $0xc8] sm:$0xff]  ;;  %2080 = vmatpush1.bf16.msra.mxu1 %v3467_v6 }
  0x84   : > { %1825 = vmatprep.subr.bf16.mxu0 %v1824_v54  ;;  %2065 = vmatprep.subr.bf16.mxu1 %v3479_v16  ;;  %v3498_v54 = vpack.c.bf16 %v836_v53, %v834_v13  ;;  %v1830_v13 = vpack.c.bf16 %v788_v30, %v786_v28  ;;  %v790_v53 = vld [vmem:[%s4907_s2 + $0xc0] sm:$0xff]  ;;  %v1832_v45 = vpack.c.bf16 %v793_v39, %v791_v40  ;;  %v797_v28 = vld [vmem:[%s4907_s2 + $0xf8] sm:$0xff]  ;;  %v847_v39 = vld [vmem:[%s4907_s2 + $0x288] sm:$0xff] }
  0x85   : > { %v3527_v30 = vpack.c.bf16 %v840_v12, %v838_v23  ;;  %v842_v40 = vld [vmem:[%s4907_s2 + $0x260] sm:$0xff]  ;;  %v844_v12 = vld [vmem:[%s4907_s2 + $0x270] sm:$0xff]  ;;  %v849_v23 = vld [vmem:[%s4907_s2 + $0x298] sm:$0xff]  ;;  %v1834_v22 = vpack.c.bf16 %v792_v31, %v790_v53 }
  0x86   : > { %v3560_v20 = vpack.c.bf16 %v844_v12, %v842_v40  ;;  %v846_v53 = vld [vmem:[%s4907_s2 + $0x280] sm:$0xff]  ;;  %v851_v31 = vld [vmem:[%s4907_s2 + $0x2a8] sm:$0xff] }
  0x87   : > { %1827 = vmatpush1.bf16.msra.mxu0 %v1826_v29  ;;  %2081 = vmatpush1.bf16.msra.mxu1 %v3498_v54  ;;  %v845_v29 = vld [vmem:[%s4907_s2 + $0x278] sm:$0xff]  ;;  %v819_v5 = vld [vmem:[%s4907_s2 + $0x1a8] sm:$0xff] }
  0x88   : > { %1829 = vmatprep.subr.bf16.mxu0 %v1828_v14  ;;  %2066 = vmatprep.subr.bf16.mxu1 %v3506_v59  ;;  %v3536_v14 = vpack.c.bf16 %v845_v29, %v843_v17  ;;  %v1836_v17 = vpack.c.bf16 %v797_v28, %v795_v15  ;;  %v794_v29 = vld [vmem:[%s4907_s2 + $0xe0] sm:$0xff]  ;;  %v801_v15 = vld [vmem:[%s4907_s2 + $0x118] sm:$0xff]  ;;  %v823_v56 = vld [vmem:[%s4907_s2 + $0x1c8] sm:$0xff] }
  0x89   : > { %v853_v28 = vld [vmem:[%s4907_s2 + $0x2b8] sm:$0xff]  ;;  %v1838_v40 = vpack.c.bf16 %v796_v63, %v794_v29  ;;  %v1840_v12 = vpack.c.bf16 %v801_v15, %v799_v44  ;;  %v855_v29 = vld [vmem:[%s4907_s2 + $0x2c8] sm:$0xff] }
  0x8a   : > { %v805_v63 = vld [vmem:[%s4907_s2 + $0x138] sm:$0xff]  ;;  %v3596_v44 = vpack.c.bf16 %v853_v28, %v851_v31  ;;  %v802_v31 = vld [vmem:[%s4907_s2 + $0x120] sm:$0xff]  ;;  %v804_v28 = vld [vmem:[%s4907_s2 + $0x130] sm:$0xff] }
  0x8b   : > { %1831 = vmatpush1.bf16.msra.mxu0 %v1830_v13  ;;  %2082 = vmatpush1.bf16.msra.mxu1 %v3527_v30  ;;  %v3566_v13 = vpack.c.bf16 %v849_v23, %v847_v39  ;;  %v798_v39 = vld [vmem:[%s4907_s2 + $0x100] sm:$0xff]  ;;  %v800_v23 = vld [vmem:[%s4907_s2 + $0x110] sm:$0xff]  ;;  %v857_v15 = vld [vmem:[%s4907_s2 + $0x2d8] sm:$0xff] }
  0x8c   : > { %1833 = vmatprep.subr.bf16.mxu0 %v1832_v45  ;;  %2067 = vmatprep.subr.bf16.mxu1 %v3536_v14  ;;  %v848_v45 = vld [vmem:[%s4907_s2 + $0x290] sm:$0xff]  ;;  %v827_v60 = vld [vmem:[%s4907_s2 + $0x1e8] sm:$0xff] }
  0x8d   : > { %v3590_v55 = vpack.c.bf16 %v848_v45, %v846_v53  ;;  %v1842_v53 = vpack.c.bf16 %v800_v23, %v798_v39  ;;  %v1844_v45 = vpack.c.bf16 %v805_v63, %v803_v62  ;;  %v809_v62 = vld [vmem:[%s4907_s2 + $0x158] sm:$0xff]  ;;  %v856_v39 = vld [vmem:[%s4907_s2 + $0x2d0] sm:$0xff]  ;;  %v859_v23 = vld [vmem:[%s4907_s2 + $0x2e8] sm:$0xff] }
  0x8e   : > { %v861_v63 = vld [vmem:[%s4907_s2 + $0x2f8] sm:$0xff] }
  0x8f   : > { %1835 = vmatpush1.bf16.msra.mxu0 %v1834_v22  ;;  %2083 = vmatpush1.bf16.msra.mxu1 %v3560_v20  ;;  %v850_v22 = vld [vmem:[%s4907_s2 + $0x2a0] sm:$0xff] }
  0x90   : > { %1837 = vmatprep.subr.bf16.mxu0 %v1836_v17  ;;  %2068 = vmatprep.subr.bf16.mxu1 %v3566_v13  ;;  %v852_v17 = vld [vmem:[%s4907_s2 + $0x2b0] sm:$0xff] }
  0x91   : > { %v3620_v50 = vpack.c.bf16 %v852_v17, %v850_v22  ;;  %v1846_v22 = vpack.c.bf16 %v804_v28, %v802_v31  ;;  %v1848_v17 = vpack.c.bf16 %v809_v62, %v807_v7  ;;  %v813_v7 = vld [vmem:[%s4907_s2 + $0x178] sm:$0xff]  ;;  %v860_v31 = vld [vmem:[%s4907_s2 + $0x2f0] sm:$0xff]  ;;  %v863_v28 = vld [vmem:[%s4907_s2 + $0x308] sm:$0xff] }
  0x92   : > { %v865_v62 = vld [vmem:[%s4907_s2 + $0x318] sm:$0xff] }
  0x93   : > { %1839 = vmatpush1.bf16.msra.mxu0 %v1838_v40  ;;  %2084 = vmatpush1.bf16.msra.mxu1 %v3590_v55  ;;  %v3626_v40 = vpack.c.bf16 %v857_v15, %v855_v29  ;;  %v806_v29 = vld [vmem:[%s4907_s2 + $0x140] sm:$0xff]  ;;  %v808_v15 = vld [vmem:[%s4907_s2 + $0x150] sm:$0xff] }
  0x94   : > { %1841 = vmatprep.subr.bf16.mxu0 %v1840_v12  ;;  %2069 = vmatprep.subr.bf16.mxu1 %v3596_v44  ;;  %v854_v12 = vld [vmem:[%s4907_s2 + $0x2c0] sm:$0xff] }
  0x95   : > { %v3650_v3 = vpack.c.bf16 %v856_v39, %v854_v12  ;;  %v1850_v12 = vpack.c.bf16 %v808_v15, %v806_v29  ;;  %v1852_v39 = vpack.c.bf16 %v813_v7, %v811_v21  ;;  %v817_v21 = vld [vmem:[%s4907_s2 + $0x198] sm:$0xff]  ;;  %v864_v29 = vld [vmem:[%s4907_s2 + $0x310] sm:$0xff]  ;;  %v867_v15 = vld [vmem:[%s4907_s2 + $0x328] sm:$0xff] }
  0x96   : > { %v869_v7 = vld [vmem:[%s4907_s2 + $0x338] sm:$0xff] }
  0x97   : > { %1843 = vmatpush1.bf16.msra.mxu0 %v1842_v53  ;;  %2085 = vmatpush1.bf16.msra.mxu1 %v3620_v50  ;;  %v3656_v53 = vpack.c.bf16 %v861_v63, %v859_v23  ;;  %v810_v23 = vld [vmem:[%s4907_s2 + $0x160] sm:$0xff]  ;;  %v812_v63 = vld [vmem:[%s4907_s2 + $0x170] sm:$0xff] }
  0x98   : > { %1845 = vmatprep.subr.bf16.mxu0 %v1844_v45  ;;  %2070 = vmatprep.subr.bf16.mxu1 %v3626_v40  ;;  %v858_v45 = vld [vmem:[%s4907_s2 + $0x2e0] sm:$0xff] }
  0x99   : > { %v3680_v57 = vpack.c.bf16 %v860_v31, %v858_v45  ;;  %v1854_v45 = vpack.c.bf16 %v812_v63, %v810_v23  ;;  %v1856_v31 = vpack.c.bf16 %v817_v21, %v815_v1  ;;  %v821_v1 = vld [vmem:[%s4907_s2 + $0x1b8] sm:$0xff]  ;;  %v868_v23 = vld [vmem:[%s4907_s2 + $0x330] sm:$0xff]  ;;  %v871_v63 = vld [vmem:[%s4907_s2 + $0x348] sm:$0xff] }
  0x9a   : > { %v873_v21 = vld [vmem:[%s4907_s2 + $0x358] sm:$0xff] }
  0x9b   : > { %1847 = vmatpush1.bf16.msra.mxu0 %v1846_v22  ;;  %2086 = vmatpush1.bf16.msra.mxu1 %v3650_v3  ;;  %v3686_v22 = vpack.c.bf16 %v865_v62, %v863_v28  ;;  %v814_v28 = vld [vmem:[%s4907_s2 + $0x180] sm:$0xff]  ;;  %v816_v62 = vld [vmem:[%s4907_s2 + $0x190] sm:$0xff] }
  0x9c   : > { %1849 = vmatprep.subr.bf16.mxu0 %v1848_v17  ;;  %2071 = vmatprep.subr.bf16.mxu1 %v3656_v53  ;;  %v862_v17 = vld [vmem:[%s4907_s2 + $0x300] sm:$0xff] }
  0x9d   : > { %v3710_v48 = vpack.c.bf16 %v864_v29, %v862_v17  ;;  %v1858_v17 = vpack.c.bf16 %v816_v62, %v814_v28  ;;  %v1860_v29 = vpack.c.bf16 %v821_v1, %v819_v5  ;;  %v825_v5 = vld [vmem:[%s4907_s2 + $0x1d8] sm:$0xff]  ;;  %v872_v28 = vld [vmem:[%s4907_s2 + $0x350] sm:$0xff]  ;;  %v875_v62 = vld [vmem:[%s4907_s2 + $0x368] sm:$0xff] }
  0x9e   : > { %v877_v1 = vld [vmem:[%s4907_s2 + $0x378] sm:$0xff] }
  0x9f   : > { %1851 = vmatpush1.bf16.msra.mxu0 %v1850_v12  ;;  %2087 = vmatpush1.bf16.msra.mxu1 %v3680_v57  ;;  %v3716_v12 = vpack.c.bf16 %v869_v7, %v867_v15  ;;  %v818_v15 = vld [vmem:[%s4907_s2 + $0x1a0] sm:$0xff]  ;;  %v820_v7 = vld [vmem:[%s4907_s2 + $0x1b0] sm:$0xff] }
  0xa0   : > { %1853 = vmatprep.subr.bf16.mxu0 %v1852_v39  ;;  %2072 = vmatprep.subr.bf16.mxu1 %v3686_v22  ;;  %v866_v39 = vld [vmem:[%s4907_s2 + $0x320] sm:$0xff] }
  0xa1   : > { %v3740_v37 = vpack.c.bf16 %v868_v23, %v866_v39  ;;  %v1862_v39 = vpack.c.bf16 %v820_v7, %v818_v15  ;;  %v1864_v23 = vpack.c.bf16 %v825_v5, %v823_v56  ;;  %v829_v56 = vld [vmem:[%s4907_s2 + $0x1f8] sm:$0xff]  ;;  %v876_v15 = vld [vmem:[%s4907_s2 + $0x370] sm:$0xff]  ;;  %v879_v7 = vld [vmem:[%s4907_s2 + $0x388] sm:$0xff] }
  0xa2   : > { %v881_v5 = vld [vmem:[%s4907_s2 + $0x398] sm:$0xff] }
  0xa3   : > { %1855 = vmatpush1.bf16.msra.mxu0 %v1854_v45  ;;  %2088 = vmatpush1.bf16.msra.mxu1 %v3710_v48  ;;  %v3746_v45 = vpack.c.bf16 %v873_v21, %v871_v63  ;;  %v822_v63 = vld [vmem:[%s4907_s2 + $0x1c0] sm:$0xff]  ;;  %v824_v21 = vld [vmem:[%s4907_s2 + $0x1d0] sm:$0xff]  ;;  %v3800_v61 = vpack.c.bf16 %v881_v5, %v879_v7  ;;  %v887_v5 = vld [vmem:[%s4907_s2 + $0x3c8] sm:$0xff] }
  0xa4   : > { %1857 = vmatprep.subr.bf16.mxu0 %v1856_v31  ;;  %2073 = vmatprep.subr.bf16.mxu1 %v3716_v12  ;;  %v870_v31 = vld [vmem:[%s4907_s2 + $0x340] sm:$0xff]  ;;  %v884_v7 = vld [vmem:[%s4907_s2 + $0x3b0] sm:$0xff] }
  0xa5   : > { %v3770_v4 = vpack.c.bf16 %v872_v28, %v870_v31  ;;  %v1866_v31 = vpack.c.bf16 %v824_v21, %v822_v63  ;;  %v1868_v28 = vpack.c.bf16 %v829_v56, %v827_v60  ;;  %v878_v60 = vld [vmem:[%s4907_s2 + $0x380] sm:$0xff]  ;;  %v885_v63 = vld [vmem:[%s4907_s2 + $0x3b8] sm:$0xff] }
  0xa7   : > { %1859 = vmatpush1.bf16.msra.mxu0 %v1858_v17  ;;  %2089 = vmatpush1.bf16.msra.mxu1 %v3740_v37  ;;  %v3776_v17 = vpack.c.bf16 %v877_v1, %v875_v62  ;;  %v826_v62 = vld [vmem:[%s4907_s2 + $0x1e0] sm:$0xff]  ;;  %v828_v1 = vld [vmem:[%s4907_s2 + $0x1f0] sm:$0xff] }
  0xa8   : > { %1861 = vmatprep.subr.bf16.mxu0 %v1860_v29  ;;  %2074 = vmatprep.subr.bf16.mxu1 %v3746_v45  ;;  %v874_v29 = vld [vmem:[%s4907_s2 + $0x360] sm:$0xff]  ;;  %v1870_v21 = vpack.c.bf16 %v828_v1, %v826_v62 }
  0xa9   : > { %v3797_v51 = vpack.c.bf16 %v876_v15, %v874_v29  ;;  %v882_v15 = vld [vmem:[%s4907_s2 + $0x3a0] sm:$0xff] }
  0xaa   : > { %v886_v1 = vld [vmem:[%s4907_s2 + $0x3c0] sm:$0xff] }
  0xab   : > { %1863 = vmatpush1.bf16.msra.mxu0 %v1862_v39  ;;  %2090 = vmatpush1.bf16.msra.mxu1 %v3770_v4  ;;  %v880_v39 = vld [vmem:[%s4907_s2 + $0x390] sm:$0xff] }
  0xac   : > { %1865 = vmatprep.subr.bf16.mxu0 %v1864_v23  ;;  %2075 = vmatprep.subr.bf16.mxu1 %v3776_v17  ;;  %v883_v23 = vld [vmem:[%s4907_s2 + $0x3a8] sm:$0xff]  ;;  %v3815_v56 = vpack.c.bf16 %v880_v39, %v878_v60  ;;  %v888_v60 = vld [vmem:[%s4907_s2 + $0x3d0] sm:$0xff] }
  0xad   : > { %v3818_v29 = vpack.c.bf16 %v885_v63, %v883_v23  ;;  %v5254_v39 = vld [vmem:[#allocation3_spill] sm:$0xff]  ;;  %v893_v63 = vld [vmem:[%s4907_s2 + $0x3f8] sm:$0xff] }
  0xae   : > { %v5255_v23 = vmax.f32 %v5254_v39, 0.0  ;;  %v892_v39 = vld [vmem:[%s4907_s2 + $0x3f0] sm:$0xff] }
  0xaf   : > { %1867 = vmatpush1.bf16.msra.mxu0 %v1866_v31  ;;  %2091 = vmatpush1.bf16.msra.mxu1 %v3797_v51  ;;  %v889_v31 = vld [vmem:[%s4907_s2 + $0x3d8] sm:$0xff] }
  0xb0   : > { %1869 = vmatprep.subr.bf16.mxu0 %v1868_v28  ;;  %2076 = vmatprep.subr.bf16.mxu1 %v3800_v61  ;;  %v3834_v28 = vpack.c.bf16 %v884_v7, %v882_v15  ;;  %v3837_v62 = vpack.c.bf16 %v889_v31, %v887_v5  ;;  %v3858_v7 = vpack.c.bf16 %v888_v60, %v886_v1  ;;  %v890_v31 = vld [vmem:[%s4907_s2 + $0x3e0] sm:$0xff]  ;;  %v5262_v1 = vld [vmem:[#allocation11_spill] sm:$0xff] }
  0xb1   : > { %v5263_v60 = vmax.f32 %v5262_v1, 0.0  ;;  %v5276_v1 = vmax.f32 %v2908_v9, 0.0  ;;  %v5284_v9 = vld [vmem:[#allocation41_spill] sm:$0xff] }
  0xb3   : > { %1871 = vmatpush1.bf16.msra.mxu0 %v1870_v21  ;;  %2092 = vmatpush1.bf16.msra.mxu1 %v3815_v56  ;;  %v5256_v21 = vld [vmem:[#allocation8_spill] sm:$0xff] }
  0xb4   : > { %1873 = vmatprep.subr.bf16.mxu0 %v3459_v0  ;;  %2077 = vmatprep.subr.bf16.mxu1 %v3818_v29  ;;  %v891_v0 = vld [vmem:[%s4907_s2 + $0x3e8] sm:$0xff]  ;;  %v5257_v15 = vmax.f32 %v5256_v21, 0.0  ;;  %v5260_v21 = vld [vmem:[#allocation12_spill] sm:$0xff] }
  0xb5   : > { %v3861_v5 = vpack.c.bf16 %v893_v63, %v891_v0  ;;  %v5264_v0 = vld [vmem:[#allocation16_spill] sm:$0xff] }
  0xb6   : > { %959 = vmatmul.mubr.f32.vlgmr.msra.gmra.mrb[0].mxu0 %v5255_v23  ;;  %v5258_v23 = vld [vmem:[#allocation7_spill] sm:$0xff]  ;;  %v5265_v63 = vmax.f32 %v5264_v0, 0.0  ;;  %v5282_v0 = vmax.f32 %v2924_v27, 0.0  ;;  %v5290_v27 = vld [vmem:[#allocation53_spill] sm:$0xff] }
  0xb7   : > { %964 = vmatprep.mubr.f32.mxu0 %v5257_v15  ;;  %1875 = vmatpush1.bf16.msra.mxu0 %v3467_v6  ;;  %v5259_v6 = vmax.f32 %v5258_v23, 0.0  ;;  %v5261_v15 = vmax.f32 %v5260_v21, 0.0 }
  0xb8   : > { %2093 = vmatpush1.bf16.msra.mxu1 %v3834_v28  ;;  %1877 = vmatprep.subr.bf16.mxu0 %v3479_v16  ;;  %v3875_v16 = vpack.c.bf16 %v892_v39, %v890_v31  ;;  %v5268_v31 = vld [vmem:[#allocation20_spill] sm:$0xff] }
  0xb9   : > { %2078 = vmatprep.subr.bf16.mxu1 %v3837_v62  ;;  %v5269_v39 = vmax.f32 %v5268_v31, 0.0  ;;  %v5294_v31 = vmax.f32 %v2956_v19, 0.0  ;;  %v5302_v19 = vld [vmem:[#allocation78_spill] sm:$0xff] }
  0xba   : > { %965 = vmatmul.mubr.f32.gmra.mrb[2].mxu0 %v5259_v6  ;;  %v5271_v6 = vmax.f32 %v2912_v26, 0.0 }
  0xbb   : > { %970 = vmatprep.mubr.f32.mxu0 %v5261_v15  ;;  %1879 = vmatpush1.bf16.msra.mxu0 %v3498_v54  ;;  %v5266_v54 = vld [vmem:[#allocation15_spill] sm:$0xff] }
  0xbc   : > { %2094 = vmatpush1.bf16.msra.mxu1 %v3858_v7  ;;  %1881 = vmatprep.subr.bf16.mxu0 %v3506_v59  ;;  %v5267_v23 = vmax.f32 %v5266_v54, 0.0  ;;  %v5270_v59 = vmax.f32 %v2875_v35, 0.0  ;;  %v5278_v35 = vld [vmem:[#allocation29_spill] sm:$0xff]  ;;  %v5288_v54 = vmax.f32 %v2940_v2, 0.0 }
  0xbd   : > { %2079 = vmatprep.subr.bf16.mxu1 %v3861_v5  ;;  %v5279_v26 = vmax.f32 %v5278_v35, 0.0  ;;  %v5296_v2 = vld [vmem:[#allocation65_spill] sm:$0xff] }
  0xbe   : > { %971 = vmatmul.mubr.f32.gmra.mrb[4].mxu0 %v5263_v60  ;;  %v5277_v60 = vmax.f32 %v2928_v33, 0.0  ;;  %v5285_v33 = vmax.f32 %v5284_v9, 0.0  ;;  %v5345_v9 = vld [vmem:[#allocation24_spill] sm:$0xff] }
  0xbf   : > { %976 = vmatprep.mubr.f32.mxu0 %v5265_v63  ;;  %1883 = vmatpush1.bf16.msra.mxu0 %v3527_v30  ;;  %v5272_v30 = vld [vmem:[#allocation19_spill] sm:$0xff]  ;;  %v5283_v63 = vmax.f32 %v2944_v36, 0.0  ;;  %v5291_v36 = vmax.f32 %v5290_v27, 0.0  ;;  %v5353_v27 = vld [vmem:[#allocation28_spill] sm:$0xff] }
  0xc0   : > { %2095 = vmatpush1.bf16.msra.mxu1 %v3875_v16  ;;  %1885 = vmatprep.subr.bf16.mxu0 %v3536_v14  ;;  %v5273_v21 = vmax.f32 %v5272_v30, 0.0  ;;  %v5274_v14 = vld [vmem:[#allocation32_spill] sm:$0xff] }
  0xc1   : > { %v5275_v15 = vmax.f32 %v5274_v14, 0.0 }
  0xc2   : > { %977 = vmatmul.mubr.f32.gmra.mrb[6].mxu0 %v5267_v23  ;;  %v5289_v23 = vmax.f32 %v2960_v42, 0.0  ;;  %v5297_v42 = vmax.f32 %v5296_v2, 0.0 }
  0xc3   : > { %982 = vmatprep.mubr.f32.mxu0 %v5269_v39  ;;  %1270 = vmatmul.mubr.f32.vlgmr.msra.gmra.mrb[0].mxu1 %v5270_v59  ;;  %v5295_v39 = vmax.f32 %v2976_v24, 0.0  ;;  %v5300_v59 = vmax.f32 %v2972_v43, 0.0  ;;  %v5303_v24 = vmax.f32 %v5302_v19, 0.0  ;;  %v5309_v43 = vmax.f32 %v2900_v34, 0.0  ;;  %v5316_v34 = vld [vmem:[#allocation30_spill] sm:$0xff] }
  0xc4   : > { %1275 = vmatprep.mubr.f32.mxu1 %v5271_v6  ;;  %1887 = vmatpush1.bf16.msra.mxu0 %v3560_v20  ;;  %v5280_v20 = vld [vmem:[#allocation44_spill] sm:$0xff]  ;;  %v5301_v6 = vmax.f32 %v2992_v49, 0.0  ;;  %v5310_v49 = vmax.f32 %v2920_v11, 0.0  ;;  %v5318_v11 = vmax.f32 %v3040_v25, 0.0  ;;  %v5325_v25 = vmax.f32 %v2948_v41, 0.0  ;;  %v5333_v41 = vld [vmem:[#allocation42_spill] sm:$0xff] }
  0xc5   : > { %1889 = vmatprep.subr.bf16.mxu0 %v3566_v13  ;;  %v5281_v13 = vmax.f32 %v5280_v20, 0.0  ;;  %v5334_v35 = vmax.f32 %v5333_v41, 0.0  ;;  %v5397_v41 = vld [vmem:[#allocation75_spill] sm:$0xff] }
  0xc6   : > { %983 = vmatmul.mubr.f32.gmra.mrb[8].mxu0 %v5273_v21  ;;  %v5307_v21 = vld [vmem:[#allocation27_spill] sm:$0xff] }
  0xc7   : > { %988 = vmatprep.mubr.f32.mxu0 %v5275_v15  ;;  %1276 = vmatmul.mubr.f32.gmra.mrb[2].mxu1 %v5276_v1  ;;  %v5308_v14 = vmax.f32 %v5307_v21, 0.0  ;;  %v5317_v15 = vmax.f32 %v5316_v34, 0.0  ;;  %v5371_v21 = vld [vmem:[#allocation84_spill] sm:$0xff] }
  0xc8   : > { %1281 = vmatprep.mubr.f32.mxu1 %v5277_v60  ;;  %1891 = vmatpush1.bf16.msra.mxu0 %v3590_v55  ;;  %v5286_v55 = vld [vmem:[#allocation56_spill] sm:$0xff] }
  0xc9   : > { %1893 = vmatprep.subr.bf16.mxu0 %v3596_v44  ;;  %v5287_v44 = vmax.f32 %v5286_v55, 0.0 }
  0xca   : > { %989 = vmatmul.mubr.f32.gmra.mrb[10].mxu0 %v5279_v26 }
  0xcb   : > { %994 = vmatprep.mubr.f32.mxu0 %v5281_v13  ;;  %1282 = vmatmul.mubr.f32.gmra.mrb[4].mxu1 %v5282_v0  ;;  %v5343_v0 = vld [vmem:[#allocation51_spill] sm:$0xff] }
  0xcc   : > { %1287 = vmatprep.mubr.f32.mxu1 %v5283_v63  ;;  %1895 = vmatpush1.bf16.msra.mxu0 %v3620_v50  ;;  %v5292_v50 = vld [vmem:[#allocation68_spill] sm:$0xff]  ;;  %v5344_v63 = vmax.f32 %v5343_v0, 0.0 }
  0xcd   : > { %1897 = vmatprep.subr.bf16.mxu0 %v3626_v40  ;;  %v5293_v40 = vmax.f32 %v5292_v50, 0.0  ;;  %v5355_v50 = vld [vmem:[#allocation33_spill] sm:$0xff]  ;;  %v5407_v0 = vld [vmem:[#allocation100_spill] sm:$0xff] }
  0xce   : > { %995 = vmatmul.mubr.f32.gmra.mrb[12].mxu0 %v5285_v33  ;;  %v5346_v33 = vmax.f32 %v5345_v9, 0.0  ;;  %v5409_v9 = vld [vmem:[#allocation89_spill] sm:$0xff] }
  0xcf   : > { %1000 = vmatprep.mubr.f32.mxu0 %v5287_v44  ;;  %1288 = vmatmul.mubr.f32.gmra.mrb[6].mxu1 %v5288_v54  ;;  %v5351_v54 = vld [vmem:[#allocation55_spill] sm:$0xff] }
  0xd0   : > { %1293 = vmatprep.mubr.f32.mxu1 %v5289_v23  ;;  %1899 = vmatpush1.bf16.msra.mxu0 %v3650_v3  ;;  %v5298_v3 = vld [vmem:[#allocation80_spill] sm:$0xff]  ;;  %v5352_v23 = vmax.f32 %v5351_v54, 0.0 }
  0xd1   : > { %1901 = vmatprep.subr.bf16.mxu0 %v3656_v53  ;;  %v5299_v53 = vmax.f32 %v5298_v3, 0.0  ;;  %v5415_v54 = vld [vmem:[#allocation104_spill] sm:$0xff] }
  0xd2   : > { %1001 = vmatmul.mubr.f32.gmra.mrb[14].mxu0 %v5291_v36  ;;  %v5354_v36 = vmax.f32 %v5353_v27, 0.0  ;;  %v5417_v27 = vld [vmem:[#allocation60_spill] sm:$0xff] }
  0xd3   : > { %1006 = vmatprep.mubr.f32.mxu0 %v5293_v40  ;;  %1294 = vmatmul.mubr.f32.gmra.mrb[8].mxu1 %v5294_v31  ;;  %v5356_v40 = vmax.f32 %v5355_v50, 0.0  ;;  %v5357_v31 = vld [vmem:[#allocation54_spill] sm:$0xff]  ;;  %v5419_v50 = vld [vmem:[#allocation92_spill] sm:$0xff] }
  0xd4   : > { %1299 = vmatprep.mubr.f32.mxu1 %v5295_v39  ;;  %1903 = vmatpush1.bf16.msra.mxu0 %v3680_v57  ;;  %v5304_v57 = vmax.f32 %v2904_v8, 0.0  ;;  %v5312_v8 = vld [vmem:[#allocation31_spill] sm:$0xff]  ;;  %v5359_v39 = vld [vmem:[#allocation90_spill] sm:$0xff] }
  0xd5   : > { %1905 = vmatprep.subr.bf16.mxu0 %v3686_v22  ;;  %v5305_v22 = vld [vmem:[#allocation22_spill] sm:$0xff]  ;;  %v5360_v2 = vmax.f32 %v5359_v39, 0.0  ;;  %v5423_v39 = vld [vmem:[#allocation64_spill] sm:$0xff] }
  0xd6   : > { %1007 = vmatmul.mubr.f32.gmra.mrb[16].mxu0 %v5297_v42  ;;  %v5306_v30 = vmax.f32 %v5305_v22, 0.0  ;;  %v5361_v42 = vld [vmem:[#allocation83_spill] sm:$0xff]  ;;  %v5369_v22 = vld [vmem:[#allocation36_spill] sm:$0xff] }
  0xd7   : > { %1012 = vmatprep.mubr.f32.mxu0 %v5299_v53  ;;  %1300 = vmatmul.mubr.f32.gmra.mrb[10].mxu1 %v5300_v59  ;;  %v5362_v3 = vmax.f32 %v5361_v42, 0.0  ;;  %v5363_v53 = vld [vmem:[#allocation37_spill] sm:$0xff] }
  0xd8   : > { %1305 = vmatprep.mubr.f32.mxu1 %v5301_v6  ;;  %1907 = vmatpush1.bf16.msra.mxu0 %v3710_v48  ;;  %v5311_v48 = vmax.f32 %v3004_v32, 0.0  ;;  %v5320_v32 = vmax.f32 %v2952_v18, 0.0  ;;  %v5328_v18 = vld [vmem:[#allocation43_spill] sm:$0xff]  ;;  %v5364_v59 = vmax.f32 %v5363_v53, 0.0  ;;  %v5365_v6 = vld [vmem:[#allocation58_spill] sm:$0xff]  ;;  %v5425_v42 = vld [vmem:[#allocation69_spill] sm:$0xff] }
  0xd9   : > { %1909 = vmatprep.subr.bf16.mxu0 %v3716_v12  ;;  %v5313_v12 = vmax.f32 %v5312_v8, 0.0  ;;  %v5366_v19 = vmax.f32 %v5365_v6, 0.0  ;;  %v5427_v53 = vld [vmem:[#allocation93_spill] sm:$0xff] }
  0xda   : > { %1013 = vmatmul.mubr.f32.gmra.mrb[18].mxu0 %v5303_v24  ;;  %v5367_v24 = vld [vmem:[#allocation63_spill] sm:$0xff]  ;;  %v5429_v6 = vld [vmem:[#allocation73_spill] sm:$0xff] }
  0xdb   : > { %1018 = vmatprep.mubr.f32.mxu0 %v5304_v57  ;;  %1306 = vmatmul.mubr.f32.gmra.mrb[12].mxu1 %v5306_v30  ;;  %v5368_v57 = vmax.f32 %v5367_v24, 0.0  ;;  %v5370_v30 = vmax.f32 %v5369_v22, 0.0  ;;  %v5431_v24 = vld [vmem:[#allocation72_spill] sm:$0xff]  ;;  %v5433_v22 = vld [vmem:[#allocation95_spill] sm:$0xff] }
  0xdc   : > { %1311 = vmatprep.mubr.f32.mxu1 %v5308_v14  ;;  %1911 = vmatpush1.bf16.msra.mxu0 %v3740_v37  ;;  %v5314_v37 = vmax.f32 %v2916_v10, 0.0  ;;  %v5321_v10 = vld [vmem:[#allocation34_spill] sm:$0xff]  ;;  %v5372_v14 = vmax.f32 %v5371_v21, 0.0  ;;  %v5435_v21 = vld [vmem:[#allocation77_spill] sm:$0xff] }
  0xdd   : > { %1913 = vmatprep.subr.bf16.mxu0 %v3746_v45  ;;  %v5315_v45 = vmax.f32 %v2936_v52, 0.0  ;;  %v5323_v52 = vld [vmem:[#allocation39_spill] sm:$0xff] }
  0xde   : > { %1019 = vmatmul.mubr.f32.gmra.mrb[20].mxu0 %v5309_v43  ;;  %v5324_v1 = vmax.f32 %v5323_v52, 0.0  ;;  %v5373_v43 = vld [vmem:[#allocation91_spill] sm:$0xff]  ;;  %v5387_v52 = vld [vmem:[#allocation49_spill] sm:$0xff] }
  0xdf   : > { %1024 = vmatprep.mubr.f32.mxu0 %v5310_v49  ;;  %1312 = vmatmul.mubr.f32.gmra.mrb[14].mxu1 %v5311_v48  ;;  %v5374_v49 = vmax.f32 %v5373_v43, 0.0  ;;  %v5375_v48 = vld [vmem:[#allocation67_spill] sm:$0xff]  ;;  %v5437_v43 = vld [vmem:[#allocation98_spill] sm:$0xff] }
  0xe0   : > { %1317 = vmatprep.mubr.f32.mxu1 %v5313_v12  ;;  %1915 = vmatpush1.bf16.msra.mxu0 %v3770_v4  ;;  %v5319_v4 = vmax.f32 %v2932_v47, 0.0  ;;  %v5327_v47 = vmax.f32 %v3052_v58, 0.0  ;;  %v5337_v58 = vld [vmem:[#allocation81_spill] sm:$0xff]  ;;  %v5376_v8 = vmax.f32 %v5375_v48, 0.0  ;;  %v5377_v12 = vld [vmem:[#allocation40_spill] sm:$0xff] }
  0xe1   : > { %1917 = vmatprep.subr.bf16.mxu0 %v3776_v17  ;;  %v5322_v17 = vmax.f32 %v5321_v10, 0.0  ;;  %v5385_v10 = vld [vmem:[#allocation85_spill] sm:$0xff] }
  0xe2   : > { %1025 = vmatmul.mubr.f32.gmra.mrb[22].mxu0 %v5314_v37  ;;  %v5378_v37 = vmax.f32 %v5377_v12, 0.0  ;;  %v5439_v48 = vld [vmem:[#allocation97_spill] sm:$0xff]  ;;  %v5441_v12 = vld [vmem:[#allocation102_spill] sm:$0xff] }
  0xe3   : > { %1030 = vmatprep.mubr.f32.mxu0 %v5315_v45  ;;  %1318 = vmatmul.mubr.f32.gmra.mrb[16].mxu1 %v5317_v15  ;;  %v5379_v45 = vld [vmem:[#allocation45_spill] sm:$0xff]  ;;  %v5381_v15 = vld [vmem:[#allocation66_spill] sm:$0xff] }
  0xe4   : > { %1323 = vmatprep.mubr.f32.mxu1 %v5318_v11  ;;  %1919 = vmatpush1.bf16.msra.mxu0 %v3797_v51  ;;  %v5329_v51 = vmax.f32 %v5328_v18, 0.0  ;;  %v5380_v34 = vmax.f32 %v5379_v45, 0.0  ;;  %v5382_v11 = vmax.f32 %v5381_v15, 0.0  ;;  %v5443_v45 = vld [vmem:[#allocation101_spill] sm:$0xff]  ;;  %v5445_v15 = vld [vmem:[#allocation6_spill] sm:$0xff] }
  0xe5   : > { %1921 = vmatprep.subr.bf16.mxu0 %v3800_v61  ;;  %v5326_v61 = vmax.f32 %v2968_v38, 0.0  ;;  %v5335_v38 = vld [vmem:[#allocation86_spill] sm:$0xff] }
  0xe6   : > { %1031 = vmatmul.mubr.f32.gmra.mrb[24].mxu0 %v5319_v4  ;;  %v5336_v26 = vmax.f32 %v5335_v38, 0.0  ;;  %v5383_v4 = vld [vmem:[#allocation94_spill] sm:$0xff]  ;;  %v5399_v38 = vld [vmem:[#allocation79_spill] sm:$0xff] }
  0xe7   : > { %1036 = vmatprep.mubr.f32.mxu0 %v5320_v32  ;;  %1324 = vmatmul.mubr.f32.gmra.mrb[18].mxu1 %v5322_v17  ;;  %v5384_v32 = vmax.f32 %v5383_v4, 0.0  ;;  %v5386_v17 = vmax.f32 %v5385_v10, 0.0  ;;  %v5447_v4 = vld [vmem:[#allocation5_spill] sm:$0xff]  ;;  %v5449_v10 = vld [vmem:[#allocation10_spill] sm:$0xff] }
  0xe8   : > { %1329 = vmatprep.mubr.f32.mxu1 %v5324_v1  ;;  %1923 = vmatpush1.bf16.msra.mxu0 %v3815_v56  ;;  %v5330_v56 = vmax.f32 %v2964_v46, 0.0  ;;  %v5341_v46 = vld [vmem:[#allocation46_spill] sm:$0xff]  ;;  %v5388_v1 = vmax.f32 %v5387_v52, 0.0  ;;  %v5451_v52 = vld [vmem:[#allocation9_spill] sm:$0xff] }
  0xe9   : > { %1925 = vmatprep.subr.bf16.mxu0 %v3818_v29  ;;  %v5331_v29 = vld [vmem:[#allocation21_spill] sm:$0xff]  ;;  %v5342_v13 = vmax.f32 %v5341_v46, 0.0  ;;  %v5405_v46 = vld [vmem:[#allocation96_spill] sm:$0xff] }
  0xea   : > { %1037 = vmatmul.mubr.f32.gmra.mrb[26].mxu0 %v5325_v25  ;;  %v5332_v60 = vmax.f32 %v5331_v29, 0.0  ;;  %v5389_v25 = vld [vmem:[#allocation70_spill] sm:$0xff]  ;;  %v5395_v29 = vld [vmem:[#allocation88_spill] sm:$0xff] }
  0xeb   : > { %1042 = vmatprep.mubr.f32.mxu0 %v5326_v61  ;;  %1330 = vmatmul.mubr.f32.gmra.mrb[20].mxu1 %v5327_v47  ;;  %v5390_v61 = vmax.f32 %v5389_v25, 0.0  ;;  %v5391_v47 = vld [vmem:[#allocation76_spill] sm:$0xff]  ;;  %v5453_v25 = vld [vmem:[#allocation14_spill] sm:$0xff] }
  0xec   : > { %1335 = vmatprep.mubr.f32.mxu1 %v5329_v51  ;;  %1927 = vmatpush1.bf16.msra.mxu0 %v3834_v28  ;;  %v5338_v28 = vmax.f32 %v5337_v58, 0.0  ;;  %v5392_v18 = vmax.f32 %v5391_v47, 0.0  ;;  %v5393_v51 = vld [vmem:[#allocation48_spill] sm:$0xff]  ;;  %v5455_v47 = vld [vmem:[#allocation13_spill] sm:$0xff] }
  0xed   : > { %1929 = vmatprep.subr.bf16.mxu0 %v3837_v62  ;;  %v5339_v62 = vld [vmem:[#allocation25_spill] sm:$0xff]  ;;  %v5401_v58 = vld [vmem:[#allocation52_spill] sm:$0xff] }
  0xee   : > { %1043 = vmatmul.mubr.f32.gmra.mrb[28].mxu0 %v5330_v56  ;;  %v5340_v20 = vmax.f32 %v5339_v62, 0.0  ;;  %v5394_v56 = vmax.f32 %v5393_v51, 0.0  ;;  %v5403_v62 = vld [vmem:[#allocation57_spill] sm:$0xff]  ;;  %v5457_v51 = vld [vmem:[#allocation18_spill] sm:$0xff] }
  0xef   : > { %1048 = vmatprep.mubr.f32.mxu0 %v5332_v60  ;;  %1336 = vmatmul.mubr.f32.gmra.mrb[22].mxu1 %v5334_v35  ;;  %v5396_v60 = vmax.f32 %v5395_v29, 0.0  ;;  %v5398_v35 = vmax.f32 %v5397_v41, 0.0  ;;  %v5459_v29 = vld [vmem:[#allocation17_spill] sm:$0xff]  ;;  %v5461_v41 = vld [vmem:[#allocation26_spill] sm:$0xff] }
  0xf0   : > { %1341 = vmatprep.mubr.f32.mxu1 %v5336_v26  ;;  %1931 = vmatpush1.bf16.msra.mxu0 %v3858_v7  ;;  %v5347_v7 = vld [vmem:[#allocation82_spill] sm:$0xff]  ;;  %v5400_v26 = vmax.f32 %v5399_v38, 0.0  ;;  %v5463_v38 = vld [vmem:[#allocation23_spill] sm:$0xff] }
  0xf1   : > { %1933 = vmatprep.subr.bf16.mxu0 %v3861_v5  ;;  %v5348_v55 = vmax.f32 %v5347_v7, 0.0  ;;  %v5349_v5 = vld [vmem:[#allocation87_spill] sm:$0xff]  ;;  %v5411_v7 = vld [vmem:[#allocation61_spill] sm:$0xff] }
  0xf2   : > { %1049 = vmatmul.mubr.f32.gmra.mrb[30].mxu0 %v5338_v28  ;;  %v5350_v44 = vmax.f32 %v5349_v5, 0.0  ;;  %v5402_v28 = vmax.f32 %v5401_v58, 0.0  ;;  %v5413_v5 = vld [vmem:[#allocation99_spill] sm:$0xff]  ;;  %v5465_v58 = vld [vmem:[#allocation38_spill] sm:$0xff] }
  0xf3   : > { %1054 = vmatprep.mubr.f32.mxu0 %v5340_v20  ;;  %1342 = vmatmul.mubr.f32.gmra.mrb[24].mxu1 %v5342_v13  ;;  %v5404_v20 = vmax.f32 %v5403_v62, 0.0  ;;  %v5406_v13 = vmax.f32 %v5405_v46, 0.0  ;;  %v5467_v62 = vld [vmem:[#allocation35_spill] sm:$0xff]  ;;  %v5469_v46 = vld [vmem:[#allocation50_spill] sm:$0xff] }
  0xf4   : > { %1347 = vmatprep.mubr.f32.mxu1 %v5344_v63  ;;  %1935 = vmatpush1.bf16.msra.mxu0 %v3875_v16  ;;  %v5358_v16 = vmax.f32 %v5357_v31, 0.0  ;;  %v5408_v63 = vmax.f32 %v5407_v0, 0.0  ;;  %v5421_v31 = vld [vmem:[#allocation103_spill] sm:$0xff] }
  0xf5   : > { %v5471_v0 = vld [vmem:[#allocation47_spill] sm:$0xff] }
  0xf6   : > { %1055 = vmatmul.mubr.f32.gmra.mrb[32].mxu0 %v5346_v33  ;;  %v5410_v33 = vmax.f32 %v5409_v9, 0.0  ;;  %v5473_v9 = vld [vmem:[#allocation62_spill] sm:$0xff] }
  0xf7   : > { %1060 = vmatprep.mubr.f32.mxu0 %v5348_v55  ;;  %1348 = vmatmul.mubr.f32.gmra.mrb[26].mxu1 %v5350_v44  ;;  %v5412_v55 = vmax.f32 %v5411_v7, 0.0  ;;  %v5414_v44 = vmax.f32 %v5413_v5, 0.0  ;;  %v5475_v7 = vld [vmem:[#allocation59_spill] sm:$0xff]  ;;  %v5477_v5 = vld [vmem:[#allocation74_spill] sm:$0xff] }
  0xf8   : > { %1353 = vmatprep.mubr.f32.mxu1 %v5352_v23  ;;  %v5416_v23 = vmax.f32 %v5415_v54, 0.0  ;;  %v5479_v54 = vld [vmem:[#allocation71_spill] sm:$0xff] }
  0xfa   : > { %1061 = vmatmul.mubr.f32.gmra.mrb[34].mxu0 %v5354_v36  ;;  %v5418_v36 = vmax.f32 %v5417_v27, 0.0 }
  0xfb   : > { %1066 = vmatprep.mubr.f32.mxu0 %v5356_v40  ;;  %1354 = vmatmul.mubr.f32.gmra.mrb[28].mxu1 %v5358_v16  ;;  %v5420_v40 = vmax.f32 %v5419_v50, 0.0  ;;  %v5422_v16 = vmax.f32 %v5421_v31, 0.0 }
  0xfc   : > { %1359 = vmatprep.mubr.f32.mxu1 %v5360_v2  ;;  %v5424_v2 = vmax.f32 %v5423_v39, 0.0 }
  0xfe   : > { %1067 = vmatmul.mubr.f32.gmra.mrb[36].mxu0 %v5362_v3  ;;  %v5426_v3 = vmax.f32 %v5425_v42, 0.0 }
  0xff   : > { %1072 = vmatprep.mubr.f32.mxu0 %v5364_v59  ;;  %1360 = vmatmul.mubr.f32.gmra.mrb[30].mxu1 %v5366_v19  ;;  %v5428_v59 = vmax.f32 %v5427_v53, 0.0  ;;  %v5430_v19 = vmax.f32 %v5429_v6, 0.0 }
 0x100   : > { %1365 = vmatprep.mubr.f32.mxu1 %v5368_v57  ;;  %v5432_v57 = vmax.f32 %v5431_v24, 0.0 }
 0x102   : > { %1073 = vmatmul.mubr.f32.gmra.mrb[38].mxu0 %v5370_v30  ;;  %v5434_v30 = vmax.f32 %v5433_v22, 0.0 }
 0x103   : > { %1078 = vmatprep.mubr.f32.mxu0 %v5372_v14  ;;  %1366 = vmatmul.mubr.f32.gmra.mrb[32].mxu1 %v5374_v49  ;;  %v5436_v14 = vmax.f32 %v5435_v21, 0.0  ;;  %v5438_v49 = vmax.f32 %v5437_v43, 0.0 }
 0x104   : > { %1371 = vmatprep.mubr.f32.mxu1 %v5376_v8  ;;  %v5440_v8 = vmax.f32 %v5439_v48, 0.0 }
 0x106   : > { %1079 = vmatmul.mubr.f32.gmra.mrb[40].mxu0 %v5378_v37  ;;  %v5442_v37 = vmax.f32 %v5441_v12, 0.0 }
 0x107   : > { %1084 = vmatprep.mubr.f32.mxu0 %v5380_v34  ;;  %1372 = vmatmul.mubr.f32.gmra.mrb[34].mxu1 %v5382_v11  ;;  %v5444_v34 = vmax.f32 %v5443_v45, 0.0  ;;  %v5446_v11 = vmax.f32 %v5445_v15, 0.0 }
 0x108   : > { %1377 = vmatprep.mubr.f32.mxu1 %v5384_v32  ;;  %v5448_v32 = vmax.f32 %v5447_v4, 0.0 }
 0x10a   : > { %1085 = vmatmul.mubr.f32.gmra.mrb[42].mxu0 %v5386_v17  ;;  %v5450_v17 = vmax.f32 %v5449_v10, 0.0 }
 0x10b   : > { %1090 = vmatprep.mubr.f32.mxu0 %v5388_v1  ;;  %1378 = vmatmul.mubr.f32.gmra.mrb[36].mxu1 %v5390_v61  ;;  %v5452_v1 = vmax.f32 %v5451_v52, 0.0  ;;  %v5454_v61 = vmax.f32 %v5453_v25, 0.0 }
 0x10c   : > { %1383 = vmatprep.mubr.f32.mxu1 %v5392_v18  ;;  %v5456_v18 = vmax.f32 %v5455_v47, 0.0 }
 0x10e   : > { %1091 = vmatmul.mubr.f32.gmra.mrb[44].mxu0 %v5394_v56  ;;  %v5458_v56 = vmax.f32 %v5457_v51, 0.0 }
 0x10f   : > { %1096 = vmatprep.mubr.f32.mxu0 %v5396_v60  ;;  %1384 = vmatmul.mubr.f32.gmra.mrb[38].mxu1 %v5398_v35  ;;  %v5460_v60 = vmax.f32 %v5459_v29, 0.0  ;;  %v5462_v35 = vmax.f32 %v5461_v41, 0.0 }
 0x110   : > { %1389 = vmatprep.mubr.f32.mxu1 %v5400_v26  ;;  %v5464_v26 = vmax.f32 %v5463_v38, 0.0 }
 0x112   : > { %1097 = vmatmul.mubr.f32.gmra.mrb[46].mxu0 %v5402_v28  ;;  %v5466_v28 = vmax.f32 %v5465_v58, 0.0 }
 0x113   : > { %1102 = vmatprep.mubr.f32.mxu0 %v5404_v20  ;;  %1390 = vmatmul.mubr.f32.gmra.mrb[40].mxu1 %v5406_v13  ;;  %v5468_v20 = vmax.f32 %v5467_v62, 0.0  ;;  %v5470_v13 = vmax.f32 %v5469_v46, 0.0 }
 0x114   : > { %1395 = vmatprep.mubr.f32.mxu1 %v5408_v63  ;;  %v5472_v63 = vmax.f32 %v5471_v0, 0.0 }
 0x116   : > { %1103 = vmatmul.mubr.f32.gmra.mrb[48].mxu0 %v5410_v33  ;;  %v5474_v33 = vmax.f32 %v5473_v9, 0.0 }
 0x117   : > { %1108 = vmatprep.mubr.f32.mxu0 %v5412_v55  ;;  %1396 = vmatmul.mubr.f32.gmra.mrb[42].mxu1 %v5414_v44  ;;  %v5476_v55 = vmax.f32 %v5475_v7, 0.0  ;;  %v5478_v44 = vmax.f32 %v5477_v5, 0.0 }
 0x118   : > { %1401 = vmatprep.mubr.f32.mxu1 %v5416_v23  ;;  %v5480_v23 = vmax.f32 %v5479_v54, 0.0 }
 0x11a   : > { %1109 = vmatmul.mubr.f32.gmra.mrb[50].mxu0 %v5418_v36 }
 0x11b   : > { %1114 = vmatprep.mubr.f32.mxu0 %v5420_v40  ;;  %1402 = vmatmul.mubr.f32.gmra.mrb[44].mxu1 %v5422_v16 }
 0x11e   : > { %1115 = vmatmul.mubr.f32.gmra.mrb[52].mxu0 %v5424_v2 }
 0x11f   : > { %1120 = vmatprep.mubr.f32.mxu0 %v5426_v3 }
 0x122   : > { %1121 = vmatmul.mubr.f32.gmra.mrb[54].mxu0 %v5428_v59 }
 0x123   : > { %1126 = vmatprep.mubr.f32.mxu0 %v5430_v19 }
 0x126   : > { %1127 = vmatmul.mubr.f32.gmra.mrb[56].mxu0 %v5432_v57 }
 0x127   : > { %1132 = vmatprep.mubr.f32.mxu0 %v5434_v30 }
 0x12a   : > { %1133 = vmatmul.mubr.f32.gmra.mrb[58].mxu0 %v5436_v14 }
 0x12b   : > { %1138 = vmatprep.mubr.f32.mxu0 %v5438_v49 }
 0x12e   : > { %1139 = vmatmul.mubr.f32.gmra.mrb[60].mxu0 %v5440_v8 }
 0x12f   : > { %1144 = vmatprep.mubr.f32.mxu0 %v5442_v37 }
 0x132   : > { %1145 = vmatmul.mubr.f32.gmra.mrb[62].mxu0 %v5444_v34 }
 0x133   : > { %1215 = vmatprep.mubr.f32.mxu0 %v5446_v11 }
 0x136   : > { %1216 = vmatmul.mubr.f32.vlgmr.msra.gmra.mrb[0].mxu0 %v5448_v32 }
 0x137   : > { %1221 = vmatprep.mubr.f32.mxu0 %v5450_v17 }
 0x13a   : > { %1222 = vmatmul.mubr.f32.gmra.mrb[2].mxu0 %v5452_v1 }
 0x13b   : > { %1227 = vmatprep.mubr.f32.mxu0 %v5454_v61 }
 0x13e   : > { %1228 = vmatmul.mubr.f32.gmra.mrb[4].mxu0 %v5456_v18 }
 0x13f   : > { %1233 = vmatprep.mubr.f32.mxu0 %v5458_v56 }
 0x142   : > { %1234 = vmatmul.mubr.f32.gmra.mrb[6].mxu0 %v5460_v60 }
 0x143   : > { %1239 = vmatprep.mubr.f32.mxu0 %v5462_v35 }
 0x146   : > { %1240 = vmatmul.mubr.f32.gmra.mrb[8].mxu0 %v5464_v26 }
 0x147   : > { %1245 = vmatprep.mubr.f32.mxu0 %v5466_v28 }
 0x14a   : > { %1246 = vmatmul.mubr.f32.gmra.mrb[10].mxu0 %v5468_v20 }
 0x14b   : > { %1251 = vmatprep.mubr.f32.mxu0 %v5470_v13 }
 0x14e   : > { %1252 = vmatmul.mubr.f32.gmra.mrb[12].mxu0 %v5472_v63 }
 0x14f   : > { %1257 = vmatprep.mubr.f32.mxu0 %v5474_v33 }
 0x152   : > { %1258 = vmatmul.mubr.f32.gmra.mrb[14].mxu0 %v5476_v55 }
 0x153   : > { %1263 = vmatprep.mubr.f32.mxu0 %v5478_v44 }
 0x156   : > { %1264 = vmatmul.mubr.f32.gmra.mrb[16].mxu0 %v5480_v23 }
 0x196   : > { %v1271_v27 = vpop.f32.mrb[0].mxu1 }
 0x197   : > { %v1273_v36 = vpop.f32.mrb[1].mxu1 }
 0x19a   : > { %v1277_v50 = vpop.f32.mrb[2].mxu1 }
 0x19b   : > { %v1279_v40 = vpop.f32.mrb[3].mxu1 }
 0x19e   : > { %v1283_v31 = vpop.f32.mrb[4].mxu1 }
 0x19f   : > { %v1285_v16 = vpop.f32.mrb[5].mxu1 }
 0x1a2   : > { %v1289_v39 = vpop.f32.mrb[6].mxu1 }
 0x1a3   : > { %v1291_v2 = vpop.f32.mrb[7].mxu1 }
 0x1a6   : > { %v1295_v42 = vpop.f32.mrb[8].mxu1 }
 0x1a7   : > { %v1297_v3 = vpop.f32.mrb[9].mxu1 }
 0x1aa   : > { %v1301_v53 = vpop.f32.mrb[10].mxu1 }
 0x1ab   : > { %v1303_v59 = vpop.f32.mrb[11].mxu1 }
 0x1ad   : > { %v1014_v6 = vpop.f32.mrb[18].mxu0 }
 0x1ae   : > { %v4151_v19 = vadd.f32 %v1271_v27, %v1014_v6  ;;  %v1016_v24 = vpop.f32.mrb[19].mxu0  ;;  %v1307_v57 = vpop.f32.mrb[12].mxu1 }
 0x1af   : > { %v4153_v22 = vadd.f32 %v1273_v36, %v1016_v24  ;;  %v4155_v30 = vpop.f32.mrb[13].mxu1 }
 0x1b0   : > { %1426 = vst [vmem:[%s2238_s29 + $0x90] sm:$0xff] %v4151_v19 }
 0x1b1   : > { %1427 = vst [vmem:[%s2238_s29 + $0x98] sm:$0xff] %v4153_v22  ;;  %v1020_v21 = vpop.f32.mrb[20].mxu0 }
 0x1b2   : > { %v4161_v14 = vadd.f32 %v1277_v50, %v1020_v21  ;;  %v1022_v43 = vpop.f32.mrb[21].mxu0  ;;  %v4163_v49 = vpop.f32.mrb[14].mxu1 }
 0x1b3   : > { %v4165_v48 = vadd.f32 %v1279_v40, %v1022_v43  ;;  %v4167_v8 = vpop.f32.mrb[15].mxu1 }
 0x1b4   : > { %1428 = vst [vmem:[%s2238_s29 + $0xa0] sm:$0xff] %v4161_v14  ;;  %v4183_v4 = vmul.f32 %v4161_v14, %v4161_v14 }
 0x1b5   : > { %1429 = vst [vmem:[%s2238_s29 + $0xa8] sm:$0xff] %v4165_v48  ;;  %v1026_v12 = vpop.f32.mrb[22].mxu0  ;;  %v4195_v17 = vmul.f32 %v4165_v48, %v4165_v48 }
 0x1b6   : > { %v4173_v37 = vadd.f32 %v1283_v31, %v1026_v12  ;;  %v1028_v45 = vpop.f32.mrb[23].mxu0  ;;  %v4175_v34 = vpop.f32.mrb[16].mxu1  ;;  %5481 = vst [vmem:[#allocation4_spill] sm:$0xff] %v4183_v4 }
 0x1b7   : > { %v4177_v15 = vadd.f32 %v1285_v16, %v1028_v45  ;;  %v4179_v11 = vpop.f32.mrb[17].mxu1  ;;  %5483 = vst [vmem:[#allocation8_spill] sm:$0xff] %v4195_v17 }
 0x1b8   : > { %1430 = vst [vmem:[%s2238_s29 + $0xb0] sm:$0xff] %v4173_v37  ;;  %v4191_v10 = vmul.f32 %v4173_v37, %v4173_v37 }
 0x1b9   : > { %1431 = vst [vmem:[%s2238_s29 + $0xb8] sm:$0xff] %v4177_v15  ;;  %v4201_v52 = vmul.f32 %v4177_v15, %v4177_v15  ;;  %v1032_v1 = vpop.f32.mrb[24].mxu0 }
 0x1ba   : > { %5482 = vst [vmem:[#allocation3_spill] sm:$0xff] %v4191_v10  ;;  %v4207_v47 = vadd.f32 %v1289_v39, %v1032_v1  ;;  %v1034_v18 = vpop.f32.mrb[25].mxu0  ;;  %v4209_v51 = vpop.f32.mrb[18].mxu1 }
 0x1bb   : > { %5484 = vst [vmem:[#allocation7_spill] sm:$0xff] %v4201_v52  ;;  %v4211_v56 = vadd.f32 %v1291_v2, %v1034_v18  ;;  %v4213_v29 = vpop.f32.mrb[19].mxu1 }
 0x1bc   : > { %1432 = vst [vmem:[%s2238_s29 + $0xc0] sm:$0xff] %v4207_v47  ;;  %v4231_v62 = vmul.f32 %v4207_v47, %v4207_v47 }
 0x1bd   : > { %1433 = vst [vmem:[%s2238_s29 + $0xc8] sm:$0xff] %v4211_v56  ;;  %v1038_v41 = vpop.f32.mrb[26].mxu0  ;;  %v4243_v13 = vmul.f32 %v4211_v56, %v4211_v56 }
 0x1be   : > { %v4221_v35 = vadd.f32 %v1295_v42, %v1038_v41  ;;  %v1040_v38 = vpop.f32.mrb[27].mxu0  ;;  %v4223_v26 = vpop.f32.mrb[20].mxu1  ;;  %5485 = vst [vmem:[#allocation12_spill] sm:$0xff] %v4231_v62 }
 0x1bf   : > { %v4225_v58 = vadd.f32 %v1297_v3, %v1040_v38  ;;  %v4227_v28 = vpop.f32.mrb[21].mxu1  ;;  %5487 = vst [vmem:[#allocation16_spill] sm:$0xff] %v4243_v13 }
 0x1c0   : > { %1434 = vst [vmem:[%s2238_s29 + $0xd0] sm:$0xff] %v4221_v35  ;;  %v4239_v46 = vmul.f32 %v4221_v35, %v4221_v35 }
 0x1c1   : > { %1435 = vst [vmem:[%s2238_s29 + $0xd8] sm:$0xff] %v4225_v58  ;;  %v4249_v0 = vmul.f32 %v4225_v58, %v4225_v58  ;;  %v1044_v63 = vpop.f32.mrb[28].mxu0 }
 0x1c2   : > { %5486 = vst [vmem:[#allocation11_spill] sm:$0xff] %v4239_v46  ;;  %v4255_v7 = vadd.f32 %v1301_v53, %v1044_v63  ;;  %v1046_v55 = vpop.f32.mrb[29].mxu0  ;;  %v4257_v5 = vpop.f32.mrb[22].mxu1 }
 0x1c3   : > { %5488 = vst [vmem:[#allocation15_spill] sm:$0xff] %v4249_v0  ;;  %v4259_v44 = vadd.f32 %v1303_v59, %v1046_v55  ;;  %v4261_v54 = vpop.f32.mrb[23].mxu1 }
 0x1c4   : > { %1436 = vst [vmem:[%s2238_s29 + $0xe0] sm:$0xff] %v4255_v7  ;;  %v4280_v39 = vmul.f32 %v4255_v7, %v4255_v7 }
 0x1c5   : > { %1437 = vst [vmem:[%s2238_s29 + $0xe8] sm:$0xff] %v4259_v44  ;;  %v1050_v27 = vpop.f32.mrb[30].mxu0  ;;  %v4292_v3 = vmul.f32 %v4259_v44, %v4259_v44 }
 0x1c6   : > { %v4269_v36 = vadd.f32 %v1307_v57, %v1050_v27  ;;  %v1052_v50 = vpop.f32.mrb[31].mxu0  ;;  %v4271_v40 = vpop.f32.mrb[24].mxu1  ;;  %5489 = vst [vmem:[#allocation20_spill] sm:$0xff] %v4280_v39 }
 0x1c7   : > { %v4274_v31 = vadd.f32 %v4155_v30, %v1052_v50  ;;  %v4276_v16 = vpop.f32.mrb[25].mxu1  ;;  %5491 = vst [vmem:[#allocation32_spill] sm:$0xff] %v4292_v3 }
 0x1c8   : > { %1438 = vst [vmem:[%s2238_s29 + $0xf0] sm:$0xff] %v4269_v36  ;;  %v4288_v42 = vmul.f32 %v4269_v36, %v4269_v36 }
 0x1c9   : > { %1439 = vst [vmem:[%s2238_s29 + $0xf8] sm:$0xff] %v4274_v31  ;;  %v4298_v53 = vmul.f32 %v4274_v31, %v4274_v31  ;;  %v1056_v59 = vpop.f32.mrb[32].mxu0 }
 0x1ca   : > { %5490 = vst [vmem:[#allocation19_spill] sm:$0xff] %v4288_v42  ;;  %v4305_v57 = vadd.f32 %v4163_v49, %v1056_v59  ;;  %v1058_v30 = vpop.f32.mrb[33].mxu0  ;;  %v4307_v21 = vpop.f32.mrb[26].mxu1 }
 0x1cb   : > { %5492 = vst [vmem:[#allocation29_spill] sm:$0xff] %v4298_v53  ;;  %v4310_v43 = vadd.f32 %v4167_v8, %v1058_v30  ;;  %v4312_v12 = vpop.f32.mrb[27].mxu1 }
 0x1cc   : > { %1440 = vst [vmem:[%s2238_s29 + $0x100] sm:$0xff] %v4305_v57  ;;  %v4332_v63 = vmul.f32 %v4305_v57, %v4305_v57 }
 0x1cd   : > { %1441 = vst [vmem:[%s2238_s29 + $0x108] sm:$0xff] %v4310_v43  ;;  %v1062_v1 = vpop.f32.mrb[34].mxu0 }
 0x1ce   : > { %v4321_v49 = vadd.f32 %v4175_v34, %v1062_v1  ;;  %v1064_v18 = vpop.f32.mrb[35].mxu0  ;;  %v4323_v41 = vpop.f32.mrb[28].mxu1  ;;  %5493 = vst [vmem:[#allocation44_spill] sm:$0xff] %v4332_v63  ;;  %v4929_v34 = vmov 1.0  }
 0x1cf   : > { %v4326_v8 = vadd.f32 %v4179_v11, %v1064_v18  ;;  %v4328_v38 = vpop.f32.mrb[29].mxu1  ;;  %v4344_v11 = vmul.f32 %v4310_v43, %v4310_v43  ;;  %1537 = vmatprep.mubr.f32.mxu1 %v4929_v34 }
 0x1d0   : > { %1442 = vst [vmem:[%s2238_s29 + $0x110] sm:$0xff] %v4321_v49  ;;  %v4340_v55 = vmul.f32 %v4321_v49, %v4321_v49 }
 0x1d1   : > { %5495 = vst [vmem:[#allocation56_spill] sm:$0xff] %v4344_v11  ;;  %1443 = vst [vmem:[%s2238_s29 + $0x118] sm:$0xff] %v4326_v8  ;;  %v4350_v27 = vmul.f32 %v4326_v8, %v4326_v8  ;;  %v1068_v50 = vpop.f32.mrb[36].mxu0 }
 0x1d2   : > { %5494 = vst [vmem:[#allocation41_spill] sm:$0xff] %v4340_v55  ;;  %v4357_v1 = vadd.f32 %v4209_v51, %v1068_v50  ;;  %v1070_v18 = vpop.f32.mrb[37].mxu0  ;;  %v4359_v24 = vpop.f32.mrb[30].mxu1 }
 0x1d3   : > { %5496 = vst [vmem:[#allocation53_spill] sm:$0xff] %v4350_v27  ;;  %v4362_v45 = vadd.f32 %v4213_v29, %v1070_v18  ;;  %v4364_v33 = vpop.f32.mrb[31].mxu1 }
 0x1d4   : > { %1444 = vst [vmem:[%s2238_s29 + $0x120] sm:$0xff] %v4357_v1  ;;  %v4384_v60 = vmul.f32 %v4357_v1, %v4357_v1 }
 0x1d5   : > { %1445 = vst [vmem:[%s2238_s29 + $0x128] sm:$0xff] %v4362_v45  ;;  %v1074_v30 = vpop.f32.mrb[38].mxu0 }
 0x1d6   : > { %v4373_v51 = vadd.f32 %v4223_v26, %v1074_v30  ;;  %v1076_v50 = vpop.f32.mrb[39].mxu0  ;;  %v4375_v61 = vpop.f32.mrb[32].mxu1  ;;  %5497 = vst [vmem:[#allocation68_spill] sm:$0xff] %v4384_v60 }
 0x1d7   : > { %v4378_v29 = vadd.f32 %v4227_v28, %v1076_v50  ;;  %v4380_v18 = vpop.f32.mrb[33].mxu1  ;;  %v4396_v28 = vmul.f32 %v4362_v45, %v4362_v45 }
 0x1d8   : > { %1446 = vst [vmem:[%s2238_s29 + $0x130] sm:$0xff] %v4373_v51  ;;  %v4392_v26 = vmul.f32 %v4373_v51, %v4373_v51 }
 0x1d9   : > { %5499 = vst [vmem:[#allocation80_spill] sm:$0xff] %v4396_v28  ;;  %1447 = vst [vmem:[%s2238_s29 + $0x138] sm:$0xff] %v4378_v29  ;;  %v4402_v30 = vmul.f32 %v4378_v29, %v4378_v29  ;;  %v1080_v50 = vpop.f32.mrb[40].mxu0 }
 0x1da   : > { %5498 = vst [vmem:[#allocation65_spill] sm:$0xff] %v4392_v26  ;;  %v4409_v59 = vadd.f32 %v4257_v5, %v1080_v50  ;;  %v1082_v2 = vpop.f32.mrb[41].mxu0  ;;  %v4411_v6 = vpop.f32.mrb[34].mxu1 }
 0x1db   : > { %5500 = vst [vmem:[#allocation78_spill] sm:$0xff] %v4402_v30  ;;  %v4414_v20 = vadd.f32 %v4261_v54, %v1082_v2  ;;  %v4416_v9 = vpop.f32.mrb[35].mxu1 }
 0x1dc   : > { %1448 = vst [vmem:[%s2238_s29 + $0x140] sm:$0xff] %v4409_v59  ;;  %v4437_v32 = vmul.f32 %v4409_v59, %v4409_v59 }
 0x1dd   : > { %1449 = vst [vmem:[%s2238_s29 + $0x148] sm:$0xff] %v4414_v20  ;;  %v1086_v5 = vpop.f32.mrb[42].mxu0 }
 0x1de   : > { %v4426_v50 = vadd.f32 %v4271_v40, %v1086_v5  ;;  %v1088_v23 = vpop.f32.mrb[43].mxu0  ;;  %v4428_v54 = vpop.f32.mrb[36].mxu1  ;;  %5501 = vst [vmem:[#allocation22_spill] sm:$0xff] %v4437_v32 }
 0x1df   : > { %v4431_v2 = vadd.f32 %v4276_v16, %v1088_v23  ;;  %v4433_v25 = vpop.f32.mrb[37].mxu1  ;;  %v4449_v23 = vmul.f32 %v4414_v20, %v4414_v20 }
 0x1e0   : > { %1450 = vst [vmem:[%s2238_s29 + $0x150] sm:$0xff] %v4426_v50  ;;  %v4445_v5 = vmul.f32 %v4426_v50, %v4426_v50 }
 0x1e1   : > { %5503 = vst [vmem:[#allocation31_spill] sm:$0xff] %v4449_v23  ;;  %1451 = vst [vmem:[%s2238_s29 + $0x158] sm:$0xff] %v4431_v2  ;;  %v4455_v16 = vmul.f32 %v4431_v2, %v4431_v2  ;;  %v1092_v34 = vpop.f32.mrb[44].mxu0 }
 0x1e2   : > { %5502 = vst [vmem:[#allocation27_spill] sm:$0xff] %v4445_v5  ;;  %v4462_v26 = vadd.f32 %v4307_v21, %v1092_v34  ;;  %v1094_v28 = vpop.f32.mrb[45].mxu0  ;;  %v4464_v30 = vpop.f32.mrb[38].mxu1 }
 0x1e3   : > { %5504 = vst [vmem:[#allocation30_spill] sm:$0xff] %v4455_v16  ;;  %v4467_v63 = vadd.f32 %v4312_v12, %v1094_v28  ;;  %v4469_v55 = vpop.f32.mrb[39].mxu1 }
 0x1e4   : > { %1452 = vst [vmem:[%s2238_s29 + $0x160] sm:$0xff] %v4462_v26  ;;  %v4489_v32 = vmul.f32 %v4462_v26, %v4462_v26 }
 0x1e5   : > { %1453 = vst [vmem:[%s2238_s29 + $0x168] sm:$0xff] %v4467_v63  ;;  %v1098_v40 = vpop.f32.mrb[46].mxu0 }
 0x1e6   : > { %v4478_v21 = vadd.f32 %v4323_v41, %v1098_v40  ;;  %v1100_v34 = vpop.f32.mrb[47].mxu0  ;;  %v4480_v60 = vpop.f32.mrb[40].mxu1  ;;  %5505 = vst [vmem:[#allocation34_spill] sm:$0xff] %v4489_v32 }
 0x1e7   : > { %v4483_v12 = vadd.f32 %v4328_v38, %v1100_v34  ;;  %v4485_v28 = vpop.f32.mrb[41].mxu1  ;;  %v4501_v38 = vmul.f32 %v4467_v63, %v4467_v63 }
 0x1e8   : > { %1454 = vst [vmem:[%s2238_s29 + $0x170] sm:$0xff] %v4478_v21  ;;  %v4497_v40 = vmul.f32 %v4478_v21, %v4478_v21 }
 0x1e9   : > { %5507 = vst [vmem:[#allocation43_spill] sm:$0xff] %v4501_v38  ;;  %1455 = vst [vmem:[%s2238_s29 + $0x178] sm:$0xff] %v4483_v12  ;;  %v4507_v34 = vmul.f32 %v4483_v12, %v4483_v12  ;;  %v1104_v11 = vpop.f32.mrb[48].mxu0 }
 0x1ea   : > { %5506 = vst [vmem:[#allocation39_spill] sm:$0xff] %v4497_v40  ;;  %v4514_v23 = vadd.f32 %v4359_v24, %v1104_v11  ;;  %v1106_v16 = vpop.f32.mrb[49].mxu0  ;;  %v1397_v27 = vpop.f32.mrb[42].mxu1 }
 0x1eb   : > { %5508 = vst [vmem:[#allocation21_spill] sm:$0xff] %v4507_v34  ;;  %v4517_v39 = vadd.f32 %v4364_v33, %v1106_v16  ;;  %v1399_v42 = vpop.f32.mrb[43].mxu1 }
 0x1ec   : > { %1456 = vst [vmem:[%s2238_s29 + $0x180] sm:$0xff] %v4514_v23  ;;  %v4533_v16 = vmul.f32 %v4514_v23, %v4514_v23 }
 0x1ed   : > { %1457 = vst [vmem:[%s2238_s29 + $0x188] sm:$0xff] %v4517_v39  ;;  %v1110_v5 = vpop.f32.mrb[50].mxu0 }
 0x1ee   : > { %v4526_v41 = vadd.f32 %v4375_v61, %v1110_v5  ;;  %v1112_v24 = vpop.f32.mrb[51].mxu0  ;;  %v1403_v11 = vpop.f32.mrb[44].mxu1  ;;  %5509 = vst [vmem:[#allocation42_spill] sm:$0xff] %v4533_v16 }
 0x1ef   : > { %v4529_v32 = vadd.f32 %v4380_v18, %v1112_v24  ;;  %v1405_v33 = vpop.f32.mrb[45].mxu1  ;;  %v4545_v18 = vmul.f32 %v4517_v39, %v4517_v39 }
 0x1f0   : > { %1458 = vst [vmem:[%s2238_s29 + $0x190] sm:$0xff] %v4526_v41  ;;  %v4541_v61 = vmul.f32 %v4526_v41, %v4526_v41 }
 0x1f1   : > { %5511 = vst [vmem:[#allocation81_spill] sm:$0xff] %v4545_v18  ;;  %1459 = vst [vmem:[%s2238_s29 + $0x198] sm:$0xff] %v4529_v32  ;;  %v4551_v5 = vmul.f32 %v4529_v32, %v4529_v32  ;;  %v1116_v24 = vpop.f32.mrb[52].mxu0 }
 0x1f2   : > { %5510 = vst [vmem:[#allocation86_spill] sm:$0xff] %v4541_v61  ;;  %v4558_v38 = vadd.f32 %v4411_v6, %v1116_v24  ;;  %v1118_v34 = vpop.f32.mrb[53].mxu0 }
 0x1f3   : > { %5512 = vst [vmem:[#allocation25_spill] sm:$0xff] %v4551_v5  ;;  %v4561_v53 = vadd.f32 %v4416_v9, %v1118_v34 }
 0x1f4   : > { %1460 = vst [vmem:[%s2238_s29 + $0x1a0] sm:$0xff] %v4558_v38  ;;  %v4577_v9 = vmul.f32 %v4558_v38, %v4558_v38 }
 0x1f5   : > { %1461 = vst [vmem:[%s2238_s29 + $0x1a8] sm:$0xff] %v4561_v53  ;;  %v1122_v46 = vpop.f32.mrb[54].mxu0 }
 0x1f6   : > { %v4570_v40 = vadd.f32 %v4428_v54, %v1122_v46  ;;  %v1124_v3 = vpop.f32.mrb[55].mxu0  ;;  %5513 = vst [vmem:[#allocation46_spill] sm:$0xff] %v4577_v9  ;;  %v4589_v46 = vmul.f32 %v4561_v53, %v4561_v53 }
 0x1f7   : > { %v4573_v6 = vadd.f32 %v4433_v25, %v1124_v3 }
 0x1f8   : > { %1462 = vst [vmem:[%s2238_s29 + $0x1b0] sm:$0xff] %v4570_v40  ;;  %v4585_v24 = vmul.f32 %v4570_v40, %v4570_v40  ;;  %5515 = vst [vmem:[#allocation24_spill] sm:$0xff] %v4589_v46 }
 0x1f9   : > { %1463 = vst [vmem:[%s2238_s29 + $0x1b8] sm:$0xff] %v4573_v6  ;;  %v4595_v25 = vmul.f32 %v4573_v6, %v4573_v6  ;;  %v1128_v3 = vpop.f32.mrb[56].mxu0 }
 0x1fa   : > { %5514 = vst [vmem:[#allocation51_spill] sm:$0xff] %v4585_v24  ;;  %v4602_v34 = vadd.f32 %v4464_v30, %v1128_v3  ;;  %v1130_v16 = vpop.f32.mrb[57].mxu0 }
 0x1fb   : > { %5516 = vst [vmem:[#allocation82_spill] sm:$0xff] %v4595_v25  ;;  %v4605_v61 = vadd.f32 %v4469_v55, %v1130_v16 }
 0x1fc   : > { %1464 = vst [vmem:[%s2238_s29 + $0x1c0] sm:$0xff] %v4602_v34  ;;  %v4621_v55 = vmul.f32 %v4602_v34, %v4602_v34 }
 0x1fd   : > { %1465 = vst [vmem:[%s2238_s29 + $0x1c8] sm:$0xff] %v4605_v61  ;;  %v1134_v5 = vpop.f32.mrb[58].mxu0 }
 0x1fe   : > { %v4614_v54 = vadd.f32 %v4480_v60, %v1134_v5  ;;  %v1136_v62 = vpop.f32.mrb[59].mxu0  ;;  %5517 = vst [vmem:[#allocation87_spill] sm:$0xff] %v4621_v55  ;;  %v4633_v60 = vmul.f32 %v4605_v61, %v4605_v61 }
 0x1ff   : > { %v4617_v30 = vadd.f32 %v4485_v28, %v1136_v62 }
 0x200   : > { %1466 = vst [vmem:[%s2238_s29 + $0x1d0] sm:$0xff] %v4614_v54  ;;  %v4629_v3 = vmul.f32 %v4614_v54, %v4614_v54  ;;  %5519 = vst [vmem:[#allocation28_spill] sm:$0xff] %v4633_v60 }
 0x201   : > { %1467 = vst [vmem:[%s2238_s29 + $0x1d8] sm:$0xff] %v4617_v30  ;;  %v4639_v62 = vmul.f32 %v4617_v30, %v4617_v30  ;;  %v1140_v28 = vpop.f32.mrb[60].mxu0 }
 0x202   : > { %5518 = vst [vmem:[#allocation55_spill] sm:$0xff] %v4629_v3  ;;  %v4645_v16 = vadd.f32 %v1397_v27, %v1140_v28  ;;  %v1142_v9 = vpop.f32.mrb[61].mxu0 }
 0x203   : > { %5520 = vst [vmem:[#allocation33_spill] sm:$0xff] %v4639_v62  ;;  %v4647_v24 = vadd.f32 %v1399_v42, %v1142_v9 }
 0x204   : > { %1468 = vst [vmem:[%s2238_s29 + $0x1e0] sm:$0xff] %v4645_v16  ;;  %v4661_v27 = vmul.f32 %v4645_v16, %v4645_v16 }
 0x205   : > { %1469 = vst [vmem:[%s2238_s29 + $0x1e8] sm:$0xff] %v4647_v24  ;;  %v1146_v25 = vpop.f32.mrb[62].mxu0 }
 0x206   : > { %v4655_v5 = vadd.f32 %v1403_v11, %v1146_v25  ;;  %v1148_v13 = vpop.f32.mrb[63].mxu0  ;;  %5521 = vst [vmem:[#allocation54_spill] sm:$0xff] %v4661_v27  ;;  %v4673_v11 = vmul.f32 %v4647_v24, %v4647_v24 }
 0x207   : > { %v4657_v18 = vadd.f32 %v1405_v33, %v1148_v13 }
 0x208   : > { %1470 = vst [vmem:[%s2238_s29 + $0x1f0] sm:$0xff] %v4655_v5  ;;  %v4669_v9 = vmul.f32 %v4655_v5, %v4655_v5  ;;  %5523 = vst [vmem:[#allocation83_spill] sm:$0xff] %v4673_v11 }
 0x209   : > { %1471 = vst [vmem:[%s2238_s29 + $0x1f8] sm:$0xff] %v4657_v18  ;;  %v4679_v13 = vmul.f32 %v4657_v18, %v4657_v18  ;;  %v1217_v33 = vpop.f32.mrb[0].mxu0 }
 0x20a   : > { %5522 = vst [vmem:[#allocation90_spill] sm:$0xff] %v4669_v9  ;;  %1408 = vst [vmem:[%s2238_s29] sm:$0xff] %v1217_v33  ;;  %v1219_v46 = vpop.f32.mrb[1].mxu0  ;;  %v4689_v3 = vmul.f32 %v1217_v33, %v1217_v33 }
 0x20b   : > { %5524 = vst [vmem:[#allocation37_spill] sm:$0xff] %v4679_v13  ;;  %1409 = vst [vmem:[%s2238_s29 + $0x8] sm:$0xff] %v1219_v46  ;;  %v4694_v0 = vmul.f32 %v1219_v46, %v1219_v46 }
 0x20c   : > { %5525 = vst [vmem:[#allocation58_spill] sm:$0xff] %v4689_v3 }
 0x20d   : > { %v1223_v55 = vpop.f32.mrb[2].mxu0  ;;  %5527 = vst [vmem:[#allocation36_spill] sm:$0xff] %v4694_v0 }
 0x20e   : > { %1410 = vst [vmem:[%s2238_s29 + $0x10] sm:$0xff] %v1223_v55  ;;  %v1938_v60 = vpack.c.bf16 %v1223_v55, %v1217_v33  ;;  %v4692_v62 = vmul.f32 %v1223_v55, %v1223_v55  ;;  %v1225_v25 = vpop.f32.mrb[3].mxu0 }
 0x20f   : > { %1411 = vst [vmem:[%s2238_s29 + $0x18] sm:$0xff] %v1225_v25  ;;  %v1936_v28 = vpack.c.bf16 %v1225_v25, %v1219_v46  ;;  %v4697_v27 = vmul.f32 %v1225_v25, %v1225_v25 }
 0x210   : > { %5526 = vst [vmem:[#allocation63_spill] sm:$0xff] %v4692_v62 }
 0x211   : > { %5528 = vst [vmem:[#allocation84_spill] sm:$0xff] %v4697_v27  ;;  %v1229_v9 = vpop.f32.mrb[4].mxu0  ;;  %1937 = vmatprep.subr.bf16.mxu1 %v1936_v28 }
 0x212   : > { %1412 = vst [vmem:[%s2238_s29 + $0x20] sm:$0xff] %v1229_v9  ;;  %v1231_v55 = vpop.f32.mrb[5].mxu0  ;;  %1939 = vmatpush1.bf16.msra.mxu1 %v1938_v60  ;;  %v4705_v13 = vmul.f32 %v1229_v9, %v1229_v9 }
 0x213   : > { %1413 = vst [vmem:[%s2238_s29 + $0x28] sm:$0xff] %v1231_v55  ;;  %v4710_v4 = vmul.f32 %v1231_v55, %v1231_v55 }
 0x214   : > { %5529 = vst [vmem:[#allocation91_spill] sm:$0xff] %v4705_v13 }
 0x215   : > { %v1235_v33 = vpop.f32.mrb[6].mxu0  ;;  %5531 = vst [vmem:[#allocation40_spill] sm:$0xff] %v4710_v4 }
 0x216   : > { %1414 = vst [vmem:[%s2238_s29 + $0x30] sm:$0xff] %v1235_v33  ;;  %v1942_v46 = vpack.c.bf16 %v1235_v33, %v1229_v9  ;;  %v4708_v25 = vmul.f32 %v1235_v33, %v1235_v33  ;;  %v1237_v42 = vpop.f32.mrb[7].mxu0 }
 0x217   : > { %1415 = vst [vmem:[%s2238_s29 + $0x38] sm:$0xff] %v1237_v42  ;;  %v1940_v28 = vpack.c.bf16 %v1237_v42, %v1231_v55  ;;  %v4713_v11 = vmul.f32 %v1237_v42, %v1237_v42 }
 0x218   : > { %5530 = vst [vmem:[#allocation67_spill] sm:$0xff] %v4708_v25 }
 0x219   : > { %5532 = vst [vmem:[#allocation45_spill] sm:$0xff] %v4713_v11  ;;  %v1241_v10 = vpop.f32.mrb[8].mxu0  ;;  %1941 = vmatprep.subr.bf16.mxu1 %v1940_v28 }
 0x21a   : > { %1416 = vst [vmem:[%s2238_s29 + $0x40] sm:$0xff] %v1241_v10  ;;  %v1243_v9 = vpop.f32.mrb[9].mxu0  ;;  %1943 = vmatpush1.bf16.msra.mxu1 %v1942_v46  ;;  %v4721_v52 = vmul.f32 %v1241_v10, %v1241_v10 }
 0x21b   : > { %1417 = vst [vmem:[%s2238_s29 + $0x48] sm:$0xff] %v1243_v9  ;;  %v1579_v13 = vmul.f32 %v1243_v9, %v1243_v9 }
 0x21d   : > { %v1247_v33 = vpop.f32.mrb[10].mxu0 }
 0x21e   : > { %1418 = vst [vmem:[%s2238_s29 + $0x50] sm:$0xff] %v1247_v33  ;;  %v1946_v42 = vpack.c.bf16 %v1247_v33, %v1241_v10  ;;  %v4724_v55 = vmul.f32 %v1247_v33, %v1247_v33  ;;  %v1249_v60 = vpop.f32.mrb[11].mxu0 }
 0x21f   : > { %1419 = vst [vmem:[%s2238_s29 + $0x58] sm:$0xff] %v1249_v60  ;;  %v1944_v28 = vpack.c.bf16 %v1249_v60, %v1243_v9  ;;  %v1581_v25 = vmul.f32 %v1249_v60, %v1249_v60 }
 0x220   : > { %v2010_v46 = vpack.c.bf16 %v4724_v55, %v4721_v52 }
 0x221   : > { %v1253_v17 = vpop.f32.mrb[12].mxu0  ;;  %1945 = vmatprep.subr.bf16.mxu1 %v1944_v28  ;;  %v2008_v4 = vpack.c.bf16 %v1581_v25, %v1579_v13 }
 0x222   : > { %1420 = vst [vmem:[%s2238_s29 + $0x60] sm:$0xff] %v1253_v17  ;;  %v1255_v11 = vpop.f32.mrb[13].mxu0  ;;  %1947 = vmatpush1.bf16.msra.mxu1 %v1946_v42  ;;  %v1582_v33 = vmul.f32 %v1253_v17, %v1253_v17 }
 0x223   : > { %1421 = vst [vmem:[%s2238_s29 + $0x68] sm:$0xff] %v1255_v11  ;;  %v1583_v60 = vmul.f32 %v1255_v11, %v1255_v11 }
 0x225   : > { %v1259_v10 = vpop.f32.mrb[14].mxu0 }
 0x226   : > { %1422 = vst [vmem:[%s2238_s29 + $0x70] sm:$0xff] %v1259_v10  ;;  %v1950_v3 = vpack.c.bf16 %v1259_v10, %v1253_v17  ;;  %v1584_v62 = vmul.f32 %v1259_v10, %v1259_v10  ;;  %v1261_v9 = vpop.f32.mrb[15].mxu0  ;;  %v5533_v17 = vpack.c.bf16 %v4177_v15, %v4165_v48  ;;  %v5538_v48 = vpack.c.bf16 %v4269_v36, %v4255_v7  ;;  %v5581_v10 = vld [vmem:[#allocation32_spill] sm:$0xff] }
 0x227   : > { %1423 = vst [vmem:[%s2238_s29 + $0x78] sm:$0xff] %v1261_v9  ;;  %v1948_v0 = vpack.c.bf16 %v1261_v9, %v1255_v11  ;;  %v1585_v27 = vmul.f32 %v1261_v9, %v1261_v9  ;;  %v5541_v15 = vpack.c.bf16 %v4378_v29, %v4362_v45  ;;  %v5546_v7 = vpack.c.bf16 %v4478_v21, %v4462_v26  ;;  %v5556_v45 = vld [vmem:[#allocation36_spill] sm:$0xff]  ;;  %v5583_v9 = vld [vmem:[#allocation19_spill] sm:$0xff] }
 0x228   : > { %v2014_v52 = vpack.c.bf16 %v1584_v62, %v1582_v33  ;;  %v5534_v62 = vpack.c.bf16 %v4173_v37, %v4161_v14  ;;  %v5539_v14 = vpack.c.bf16 %v4326_v8, %v4310_v43  ;;  %v5540_v37 = vpack.c.bf16 %v4321_v49, %v4305_v57  ;;  %v5555_v43 = vld [vmem:[#allocation84_spill] sm:$0xff] }
 0x229   : > { %v1265_v55 = vpop.f32.mrb[16].mxu0  ;;  %1949 = vmatprep.subr.bf16.mxu1 %v1948_v0  ;;  %v2012_v13 = vpack.c.bf16 %v1585_v27, %v1583_v60  ;;  %v5535_v0 = vpack.c.bf16 %v4225_v58, %v4211_v56  ;;  %v5537_v27 = vpack.c.bf16 %v4274_v31, %v4259_v44  ;;  %v5543_v56 = vpack.c.bf16 %v4431_v2, %v4414_v20  ;;  %v5563_v29 = vld [vmem:[#allocation40_spill] sm:$0xff]  ;;  %v5566_v2 = vld [vmem:[#allocation91_spill] sm:$0xff] }
 0x22a   : > { %1424 = vst [vmem:[%s2238_s29 + $0x80] sm:$0xff] %v1265_v55  ;;  %v1267_v25 = vpop.f32.mrb[17].mxu0  ;;  %1951 = vmatpush1.bf16.msra.mxu1 %v1950_v3  ;;  %v1954_v28 = vpack.c.bf16 %v4151_v19, %v1265_v55  ;;  %v5536_v3 = vpack.c.bf16 %v4221_v35, %v4207_v47  ;;  %v5542_v47 = vpack.c.bf16 %v4373_v51, %v4357_v1  ;;  %v5558_v8 = vmov 1.0   ;;  %v5562_v51 = vld [vmem:[#allocation45_spill] sm:$0xff]  ;;  %v5578_v11 = vld [vmem:[#allocation12_spill] sm:$0xff] }
 0x22b   : > { %1425 = vst [vmem:[%s2238_s29 + $0x88] sm:$0xff] %v1267_v25  ;;  %v1952_v42 = vpack.c.bf16 %v4153_v22, %v1267_v25  ;;  %v5544_v35 = vpack.c.bf16 %v4426_v50, %v4409_v59  ;;  %v5545_v58 = vpack.c.bf16 %v4483_v12, %v4467_v63  ;;  %v5547_v44 = vpack.c.bf16 %v4529_v32, %v4517_v39  ;;  %v5559_v63 = vld [vmem:[#allocation63_spill] sm:$0xff]  ;;  %v5560_v59 = vld [vmem:[#allocation58_spill] sm:$0xff]  ;;  %v5584_v60 = vld [vmem:[#allocation20_spill] sm:$0xff] }
 0x22c   : > { %v5548_v20 = vpack.c.bf16 %v4526_v41, %v4514_v23  ;;  %v5549_v36 = vpack.c.bf16 %v4573_v6, %v4561_v53  ;;  %v5550_v31 = vpack.c.bf16 %v4570_v40, %v4558_v38  ;;  %v5551_v57 = vpack.c.bf16 %v4617_v30, %v4605_v61  ;;  %v5565_v50 = vld [vmem:[#allocation67_spill] sm:$0xff]  ;;  %v5569_v6 = vld [vmem:[#allocation8_spill] sm:$0xff] }
 0x22d   : > { %1953 = vmatprep.subr.bf16.mxu1 %v1952_v42  ;;  %v5552_v32 = vpack.c.bf16 %v4614_v54, %v4602_v34  ;;  %v5553_v39 = vpack.c.bf16 %v4657_v18, %v4647_v24  ;;  %v5554_v53 = vpack.c.bf16 %v4655_v5, %v4645_v16  ;;  %v5557_v49 = vpack.c.bf16 %v5555_v43, %v5556_v45  ;;  %v5568_v18 = vld [vmem:[#allocation7_spill] sm:$0xff]  ;;  %v5572_v24 = vld [vmem:[#allocation4_spill] sm:$0xff]  ;;  %v5589_v42 = vld [vmem:[#allocation41_spill] sm:$0xff] }
 0x22e   : > { %1955 = vmatpush1.bf16.msra.mxu1 %v1954_v28  ;;  %v5561_v1 = vpack.c.bf16 %v5559_v63, %v5560_v59  ;;  %v5564_v26 = vpack.c.bf16 %v5562_v51, %v5563_v29  ;;  %v5567_v23 = vpack.c.bf16 %v5565_v50, %v5566_v2  ;;  %v1587_v21 = vmul.f32 %v1267_v25, %v1267_v25  ;;  %v5574_v30 = vld [vmem:[#allocation15_spill] sm:$0xff]  ;;  %v5590_v28 = vld [vmem:[#allocation44_spill] sm:$0xff]  ;;  %v5613_v43 = vld [vmem:[#allocation86_spill] sm:$0xff] }
 0x22f   : > { %1957 = vmatprep.subr.bf16.mxu1 %v5533_v17  ;;  %v1589_v12 = vmul.f32 %v4153_v22, %v4153_v22  ;;  %v1586_v41 = vmul.f32 %v1265_v55, %v1265_v55  ;;  %v1588_v38 = vmul.f32 %v4151_v19, %v4151_v19  ;;  %v5570_v34 = vpack.c.bf16 %v5568_v18, %v5569_v6  ;;  %v5575_v22 = vld [vmem:[#allocation16_spill] sm:$0xff]  ;;  %v5577_v5 = vld [vmem:[#allocation11_spill] sm:$0xff]  ;;  %v5580_v19 = vld [vmem:[#allocation29_spill] sm:$0xff] }
 0x230   : > { %v5576_v16 = vpack.c.bf16 %v5574_v30, %v5575_v22  ;;  %v5582_v33 = vpack.c.bf16 %v5580_v19, %v5581_v10  ;;  %v5586_v55 = vld [vmem:[#allocation53_spill] sm:$0xff]  ;;  %v5591_v17 = vpack.c.bf16 %v5589_v42, %v5590_v28  ;;  %v5614_v45 = vld [vmem:[#allocation42_spill] sm:$0xff]  ;;  %v5617_v59 = vld [vmem:[#allocation24_spill] sm:$0xff] }
 0x231   : > { %v2016_v40 = vpack.c.bf16 %v1589_v12, %v1587_v21  ;;  %v2018_v61 = vpack.c.bf16 %v1588_v38, %v1586_v41  ;;  %v5616_v63 = vld [vmem:[#allocation82_spill] sm:$0xff]  ;;  %v5619_v51 = vld [vmem:[#allocation51_spill] sm:$0xff]  ;;  %v5622_v50 = vld [vmem:[#allocation33_spill] sm:$0xff] }
 0x232   : > { %1959 = vmatpush1.bf16.msra.mxu1 %v5534_v62  ;;  %v5592_v62 = vld [vmem:[#allocation78_spill] sm:$0xff]  ;;  %v5623_v2 = vld [vmem:[#allocation28_spill] sm:$0xff]  ;;  %v5625_v21 = vld [vmem:[#allocation55_spill] sm:$0xff] }
 0x233   : > { %1961 = vmatprep.subr.bf16.mxu1 %v5535_v0  ;;  %v5593_v0 = vld [vmem:[#allocation80_spill] sm:$0xff]  ;;  %v5620_v29 = vld [vmem:[#allocation46_spill] sm:$0xff]  ;;  %v5626_v12 = vld [vmem:[#allocation87_spill] sm:$0xff] }
 0x234   : > { %v5627_v41 = vpack.c.bf16 %v5625_v21, %v5626_v12  ;;  %v5629_v38 = vld [vmem:[#allocation83_spill] sm:$0xff]  ;;  %v5631_v18 = vld [vmem:[#allocation90_spill] sm:$0xff] }
 0x235   : > { %v5632_v6 = vld [vmem:[#allocation54_spill] sm:$0xff] }
 0x236   : > { %1963 = vmatpush1.bf16.msra.mxu1 %v5536_v3  ;;  %v5594_v3 = vpack.c.bf16 %v5592_v62, %v5593_v0  ;;  %v5634_v22 = vld [vmem:[#allocation2_spill] sm:$0xff] }
 0x237   : > { %1965 = vmatprep.subr.bf16.mxu1 %v5537_v27  ;;  %v5595_v27 = vld [vmem:[#allocation65_spill] sm:$0xff]  ;;  %v1472_v19 = vld [vmem:[%s4909_s4] ss:$2 sm:$0x3] }
 0x23a   : > { %1967 = vmatpush1.bf16.msra.mxu1 %v5538_v48  ;;  %v5596_v48 = vld [vmem:[#allocation68_spill] sm:$0xff] }
 0x23b   : > { %1969 = vmatprep.subr.bf16.mxu1 %v5539_v14  ;;  %v5597_v14 = vpack.c.bf16 %v5595_v27, %v5596_v48 }
 0x23e   : > { %1971 = vmatpush1.bf16.msra.mxu1 %v5540_v37  ;;  %v5598_v37 = vld [vmem:[#allocation30_spill] sm:$0xff] }
 0x23f   : > { %1973 = vmatprep.subr.bf16.mxu1 %v5541_v15  ;;  %v5599_v15 = vld [vmem:[#allocation31_spill] sm:$0xff] }
 0x242   : > { %1975 = vmatpush1.bf16.msra.mxu1 %v5542_v47  ;;  %v5600_v47 = vpack.c.bf16 %v5598_v37, %v5599_v15 }
 0x243   : > { %1977 = vmatprep.subr.bf16.mxu1 %v5543_v56  ;;  %v5601_v56 = vld [vmem:[#allocation27_spill] sm:$0xff] }
 0x246   : > { %1979 = vmatpush1.bf16.msra.mxu1 %v5544_v35  ;;  %v5602_v35 = vld [vmem:[#allocation22_spill] sm:$0xff] }
 0x247   : > { %1981 = vmatprep.subr.bf16.mxu1 %v5545_v58  ;;  %v5603_v58 = vpack.c.bf16 %v5601_v56, %v5602_v35 }
 0x24a   : > { %1983 = vmatpush1.bf16.msra.mxu1 %v5546_v7  ;;  %v5604_v7 = vld [vmem:[#allocation21_spill] sm:$0xff] }
 0x24b   : > { %1985 = vmatprep.subr.bf16.mxu1 %v5547_v44  ;;  %v5605_v44 = vld [vmem:[#allocation43_spill] sm:$0xff] }
 0x24e   : > { %1987 = vmatpush1.bf16.msra.mxu1 %v5548_v20  ;;  %v5606_v20 = vpack.c.bf16 %v5604_v7, %v5605_v44 }
 0x24f   : > { %1989 = vmatprep.subr.bf16.mxu1 %v5549_v36  ;;  %v5607_v36 = vld [vmem:[#allocation39_spill] sm:$0xff] }
 0x252   : > { %1991 = vmatpush1.bf16.msra.mxu1 %v5550_v31  ;;  %v5608_v31 = vld [vmem:[#allocation34_spill] sm:$0xff] }
 0x253   : > { %1993 = vmatprep.subr.bf16.mxu1 %v5551_v57  ;;  %v5609_v57 = vpack.c.bf16 %v5607_v36, %v5608_v31 }
 0x256   : > { %1995 = vmatpush1.bf16.msra.mxu1 %v5552_v32  ;;  %v5610_v32 = vld [vmem:[#allocation25_spill] sm:$0xff] }
 0x257   : > { %1997 = vmatprep.subr.bf16.mxu1 %v5553_v39  ;;  %v5611_v39 = vld [vmem:[#allocation81_spill] sm:$0xff] }
 0x25a   : > { %1999 = vmatpush1.bf16.msra.mxu1 %v5554_v53  ;;  %v5612_v53 = vpack.c.bf16 %v5610_v32, %v5611_v39 }
 0x25b   : > { %2001 = vmatprep.subr.bf16.mxu1 %v5557_v49  ;;  %v5615_v49 = vpack.c.bf16 %v5613_v43, %v5614_v45 }
 0x25d   : > { %1538 = vmatmul.mubr.f32.vlgmr.msra.gmra.mrb[46].mxu1 %v5558_v8 }
 0x25e   : > { %2003 = vmatpush1.bf16.msra.mxu1 %v5561_v1  ;;  %1698 = vmatprep.mubr.f32.mxu1 %v5558_v8  ;;  %v5618_v1 = vpack.c.bf16 %v5616_v63, %v5617_v59 }
 0x25f   : > { %2005 = vmatprep.subr.bf16.mxu1 %v5564_v26  ;;  %v5621_v26 = vpack.c.bf16 %v5619_v51, %v5620_v29 }
 0x262   : > { %2007 = vmatpush1.bf16.msra.mxu1 %v5567_v23  ;;  %v5624_v23 = vpack.c.bf16 %v5622_v50, %v5623_v2 }
 0x263   : > { %2009 = vmatprep.subr.bf16.mxu1 %v2008_v4  ;;  %v5571_v4 = vld [vmem:[#allocation3_spill] sm:$0xff] }
 0x264   : > { %v5573_v54 = vpack.c.bf16 %v5571_v4, %v5572_v24  ;;  %v2181_v4 = vmov 1966171168  }
 0x265   : > { %v1548_v24 = vunpack.c.l.s4 %v2181_v4 }
 0x266   : > { %2011 = vmatpush1.bf16.msra.mxu1 %v2010_v46  ;;  %v5579_v46 = vpack.c.bf16 %v5577_v5, %v5578_v11 }
 0x267   : > { %2013 = vmatprep.subr.bf16.mxu1 %v2012_v13  ;;  %v5587_v13 = vld [vmem:[#allocation56_spill] sm:$0xff] }
 0x268   : > { %v5588_v25 = vpack.c.bf16 %v5586_v55, %v5587_v13  ;;  %v1802_v13 = vld [vmem:[%s4909_s4 + $0x1] ss:$2 sm:$0x3] }
 0x26a   : > { %2015 = vmatpush1.bf16.msra.mxu1 %v2014_v52  ;;  %v5585_v52 = vpack.c.bf16 %v5583_v9, %v5584_v60 }
 0x26b   : > { %2017 = vmatprep.subr.bf16.mxu1 %v2016_v40  ;;  %v5628_v40 = vld [vmem:[#allocation37_spill] sm:$0xff] }
 0x26e   : > { %2019 = vmatpush1.bf16.msra.mxu1 %v2018_v61  ;;  %v5630_v61 = vpack.c.bf16 %v5628_v40, %v5629_v38 }
 0x26f   : > { %2021 = vmatprep.subr.bf16.mxu1 %v5570_v34  ;;  %v5633_v34 = vpack.c.bf16 %v5631_v18, %v5632_v6 }
 0x272   : > { %2023 = vmatpush1.bf16.msra.mxu1 %v5573_v54  ;;  %v1549_v54 = vunpack.c.0.s8 %v1548_v24 }
 0x273   : > { %2025 = vmatprep.subr.bf16.mxu1 %v5576_v16 }
 0x274   : > { %v1552_v16 = vsub.s32 %v1549_v54, %v5634_v22 }
 0x276   : > { %2027 = vmatpush1.bf16.msra.mxu1 %v5579_v46 }
 0x277   : > { %2029 = vmatprep.subr.bf16.mxu1 %v5582_v33  ;;  %v5635_v33 = vlaneseq }
 0x279   : > { %vm1565_vm0 = vcmp.lt.s32.totalorder %v5635_v33, 256 }
 0x27a   : > { %2031 = vmatpush1.bf16.msra.mxu1 %v5585_v52 }
 0x27b   : > { %2033 = vmatprep.subr.bf16.mxu1 %v5588_v25 }
 0x27e   : > { %2035 = vmatpush1.bf16.msra.mxu1 %v5591_v17 }
 0x27f   : > { %2037 = vmatprep.subr.bf16.mxu1 %v5594_v3 }
 0x282   : > { %2039 = vmatpush1.bf16.msra.mxu1 %v5597_v14 }
 0x283   : > { %2041 = vmatprep.subr.bf16.mxu1 %v5600_v47 }
 0x286   : > { %2043 = vmatpush1.bf16.msra.mxu1 %v5603_v58 }
 0x287   : > { %2045 = vmatprep.subr.bf16.mxu1 %v5606_v20 }
 0x28a   : > { %2047 = vmatpush1.bf16.msra.mxu1 %v5609_v57 }
 0x28b   : > { %2049 = vmatprep.subr.bf16.mxu1 %v5612_v53 }
 0x28e   : > { %2051 = vmatpush1.bf16.msra.mxu1 %v5615_v49 }
 0x28f   : > { %2053 = vmatprep.subr.bf16.mxu1 %v5618_v1 }
 0x292   : > { %2055 = vmatpush1.bf16.msra.mxu1 %v5621_v26 }
 0x293   : > { %2057 = vmatprep.subr.bf16.mxu1 %v5624_v23 }
 0x296   : > { %2059 = vmatpush1.bf16.msra.mxu1 %v5627_v41 }
 0x297   : > { %2061 = vmatprep.subr.bf16.mxu1 %v5630_v61 }
 0x29a   : > { %2063 = vmatpush1.bf16.msra.mxu1 %v5633_v34 }
 0x29d   : > { %1699 = vmatmul.mubr.f32.vlgmr.msra.gmra.mrb[48].mxu1 %v5558_v8 }
 0x330   : > { %v1539_v30 = vpop.f32.mrb[46].mxu1 }
 0x331   : > { %v1541_v5 = vpop.f32.mrb[47].mxu1 }
 0x332   : > { %v1546_v11 = vcombine.low %v1539_v30, %v1541_v5 }
 0x334   : > { %v1553_v46 = vrot.slane %v1546_v11, %v1552_v16 }
 0x336   : > { %v1560_v10 = vrot.slane %v1553_v46, %v1552_v16 }
 0x338   : > { %v1562_v9 = vadd.f32 %v1560_v10, %v1472_v19 }
 0x33a   : > { %1567 = vst.msk [vmem:[%s4909_s4] ss:$2 sm:$0x3] %vm1565_vm0, %v1562_v9 }
 0x370   : > { %v1700_v8 = vpop.f32.mrb[48].mxu1 }
 0x371   : > { %v1702_v60 = vpop.f32.mrb[49].mxu1 }
 0x372   : > { %v1707_v52 = vcombine.low %v1700_v8, %v1702_v60 }
 0x374   : > { %v1714_v55 = vrot.slane %v1707_v52, %v1552_v16 }
 0x376   : > { %v1721_v25 = vrot.slane %v1714_v55, %v1552_v16 }
 0x378   : > { %v1723_v42 = vadd.f32 %v1802_v13, %v1721_v25 }
 0x37a   : > { %1803 = vst.msk [vmem:[%s4909_s4 + $0x1] ss:$2 sm:$0x3] %vm1565_vm0, %v1723_v42 }
 0x37b PF: > { %s15_s15 = sadd.s32 1, %s2177_s15  }
 0x37c   : > { %p12_p5 = scmp.ge.s32.totalorder %s15_s15, 4  }
 0x37e   :  { %14 = sbr.rel (!%p12_p5) target bundleno = 1 (0x1), region = 76 }

// kernel: recover_channel.9
= control target key start
LH: loop header
LB: loop body
LE: loop exit
PB: predicated region body
PF: predicated region fallthrough
CT: control target
= control target key end

     0   :  { %7 = vsyncpa [#allocation3], 0  ;;  %s1031_s0 = inlined_call_operand.vmem [shape: f32[512,256], index: 0, kind: input, shape index: {}]   ;;  %s1032_s1 = inlined_call_operand.vmem [shape: f32[2,256], index: 1, kind: input, shape index: {}]   ;;  %s1033_s2 = inlined_call_operand.hbm [shape: f32[512,256], index: 2, kind: output, shape index: {}]  }
   0x1   :  { %9 = vsyncpa [#allocation3 + $0x1], 0  ;;  %s647_s9 = smov 0   ;;  %s649_s10 = smov 0  }
   0x2   :  { %s651_s11 = smov 0   ;;  %s653_s12 = smov 0  }
   0x3 LB: > { %s668_s13 = sadd.s32 4294967295, %s627_s12   ;;  %s506_s14 = sadd.s32 4294967294, %s627_s12   ;;  %s627_s12 = sphi %s653_s12, %s1039_s12   ;;  %s623_s11 = sphi %s651_s11, %s1038_s11   ;;  %s619_s10 = sphi %s649_s10, %s1037_s10   ;;  %s615_s9 = sphi %s647_s9, %s1036_s9  }
   0x4   : > { %s672_s15 = sadd.s32 1, %s627_s12   ;;  %s69_s16 = sadd.s32 1, %s623_s11 }
   0x5   : > { %s66_s17 = ssub.s32 %s627_s12, %s672_s15  ;;  %p79_p0 = scmp.ne.s32.totalorder %s623_s11, %s619_s10 }
   0x6   : > { %p67_p1 = scmp.eq.s32.totalorder %s66_s17, 0  ;;  %p80_p2 = scmp.eq.s32.totalorder %s668_s13, 1 }
   0x7   : > { %p85_p3 = scmp.ne.s32.totalorder %s619_s10, %s615_s9  ;;  %p86_p4 = scmp.eq.s32.totalorder %s506_s14, 1 }
   0x8   : > { %s683_s18 = scalar_select %p67_p1, %s623_s11, %s69_s16  }
   0x9   : > { %p685_p5 = por %p80_p2, %p79_p0  ;;  %p689_p6 = por %p86_p4, %p85_p3 }
   0xa   : > { %p509_p7 = scmp.ge.s32.totalorder %s627_s12, 1  ;;  %p117_p8 = scmp.lt.s32.totalorder %s627_s12, 3 }
   0xc   : > { %p118_p9 = pnand %p509_p7, %p117_p8 }
   0xd   : > { %s511_s21 = sshll.u32 (!%p118_p9), %s668_s13, 5  ;;  %v214_v0 = vlaneseq (!%p118_p9)  ;;  %s137_s22 = sand.u32 (!%p118_p9), 1, %s619_s10   ;;  %v212_v1 = vld [vmem:[%s1032_s1] ss:$2 sm:$0x3] (!%p118_p9) }
   0xe   : > { %121 = sbr.rel (%p118_p9) target bundleno = 81 (0x51), region = 28  ;;  %p141_p10 = scmp.lt.s32.totalorder (!%p118_p9), %s511_s21, 63  ;;  %v514_v3 = vld [vmem:[%s1032_s1 + $0x1] ss:$2 sm:$0x3] (!%p118_p9) }
   0xf   : > { %v215_v2 = vshrl.u32 (!%p118_p9), %v214_v0, 7  ;;  %s705_s28 = sshll.u32 (!%p118_p9), %s137_s22, 9  ;;  %s523_s5 = sshll.u32 (!%p118_p9), %s668_s13, 13 }
  0x10   : > { %s750_s4 = scalar_lea.vmem (!%p118_p9), [#allocation2], %s705_s28  ;;  %s978_s13 = scalar_lea.hbm (!%p118_p9), %s1033_s2, %s523_s5 }
  0x11   : > { %v216_v4 = vsub.s32 (!%p118_p9), 0, %v215_v2  ;;  %v220_v5 = vsub.s32 (!%p118_p9), 1, %v215_v2  ;;  %s444_s6 = sshll.u32 (!%p118_p9), %s750_s4, 4  ;;  %s990_s14 = scalar_lea.sflag (!%p118_p9), [#allocation3], %s137_s22  ;;  %s980_s6 = int_to_ptr.vmem [resolvable:$true] %s444_s6 }
  0x12   : > { %s565_s16 = scalar_lea.vmem (!%p118_p9), %s980_s6, 8192  ;;  %s629_s17 = smov (!%p118_p9), [#allocation2]  }
  0x13   : > { %v712_v6 = vrot.slane (!%p118_p9), %v212_v1, %v216_v4  ;;  %v714_v7 = vrot.slane (!%p118_p9), %v514_v3, %v216_v4  ;;  %v716_v8 = vrot.slane (!%p118_p9), %v212_v1, %v220_v5  ;;  %v718_v9 = vrot.slane (!%p118_p9), %v514_v3, %v220_v5  ;;  %p566_p11 = scmp.ne.s32.totalorder (!%p118_p9), %s980_s6, %s565_s16 }
  0x15   : > { %s1041_s21 = smov (!%p141_p10, %s511_s21), 63  ;;  %p567_p12 = pnand %p566_p11, %p685_p5 }
  0x16   : > { %s521_s27 = sshll.u32 %s1041_s21, 4  ;;  %s569_s21 = sshll.u32 %s629_s17, 4  ;;  %s570_s21 = int_to_ptr.vmem [resolvable:$false] %s569_s21 }
  0x17   : > { %s710_s3 = scalar_lea.vmem %s1031_s0, %s521_s27  ;;  %p568_p13 = pneg %p567_p12 }
  0x18   : > { %v148_v10 = vld [vmem:[%s710_s3] sm:$0xff]  ;;  %v149_v11 = vld [vmem:[%s710_s3 + $0x8] sm:$0xff]  ;;  %v150_v12 = vld [vmem:[%s710_s3 + $0x10] sm:$0xff]  ;;  %s571_s23 = scalar_lea.vmem %s570_s21, 16384  ;;  %p572_p0 = scmp.lt.s32.totalorder %s980_s6, %s570_s21 }
  0x19   : > { %v224_v13 = vmul.f32 %v712_v6, %v148_v10  ;;  %v225_v14 = vmul.f32 %v716_v8, %v149_v11  ;;  %v226_v15 = vmul.f32 %v712_v6, %v150_v12  ;;  %v151_v16 = vld [vmem:[%s710_s3 + $0x18] sm:$0xff]  ;;  %v152_v17 = vld [vmem:[%s710_s3 + $0x20] sm:$0xff]  ;;  %v153_v18 = vld [vmem:[%s710_s3 + $0x28] sm:$0xff]  ;;  %p573_p1 = scmp.lt.s32.totalorder %s571_s23, %s565_s16 }
  0x1a   : > { %v227_v19 = vmul.f32 %v716_v8, %v151_v16  ;;  %v228_v20 = vmul.f32 %v712_v6, %v152_v17  ;;  %v229_v21 = vmul.f32 %v716_v8, %v153_v18  ;;  %v154_v22 = vld [vmem:[%s710_s3 + $0x30] sm:$0xff]  ;;  %v155_v23 = vld [vmem:[%s710_s3 + $0x38] sm:$0xff]  ;;  %v156_v24 = vld [vmem:[%s710_s3 + $0x40] sm:$0xff] }
  0x1b   : > { %v301_v25 = vadd.f32 %v714_v7, %v224_v13  ;;  %v302_v26 = vadd.f32 %v718_v9, %v225_v14  ;;  %v303_v27 = vadd.f32 %v714_v7, %v226_v15  ;;  %v230_v28 = vmul.f32 %v712_v6, %v154_v22  ;;  %v157_v29 = vld [vmem:[%s710_s3 + $0x48] sm:$0xff]  ;;  %v158_v30 = vld [vmem:[%s710_s3 + $0x50] sm:$0xff]  ;;  %v159_v31 = vld [vmem:[%s710_s3 + $0x58] sm:$0xff]  ;;  %p574_p2 = por %p573_p1, %p572_p0 }
  0x1c   : > { %v304_v32 = vadd.f32 %v718_v9, %v227_v19  ;;  %v305_v33 = vadd.f32 %v714_v7, %v228_v20  ;;  %v306_v34 = vadd.f32 %v718_v9, %v229_v21  ;;  %v231_v35 = vmul.f32 %v716_v8, %v155_v23  ;;  %v160_v36 = vld [vmem:[%s710_s3 + $0x60] sm:$0xff]  ;;  %v161_v37 = vld [vmem:[%s710_s3 + $0x68] sm:$0xff]  ;;  %v162_v38 = vld [vmem:[%s710_s3 + $0x70] sm:$0xff] }
  0x1d   : > { %365 = vst [vmem:[%s750_s4] sm:$0xff] %v301_v25  ;;  %366 = vst [vmem:[%s750_s4 + $0x8] sm:$0xff] %v302_v26  ;;  %v307_v39 = vadd.f32 %v714_v7, %v230_v28  ;;  %v232_v40 = vmul.f32 %v712_v6, %v156_v24  ;;  %v233_v41 = vmul.f32 %v716_v8, %v157_v29  ;;  %v163_v43 = vld [vmem:[%s710_s3 + $0x78] sm:$0xff]  ;;  %v164_v48 = vld [vmem:[%s710_s3 + $0x80] sm:$0xff]  ;;  %p575_p3 = pnand %p574_p2, %p568_p13 }
  0x1e   : > { %367 = vst [vmem:[%s750_s4 + $0x10] sm:$0xff] %v303_v27  ;;  %v234_v42 = vmul.f32 %v712_v6, %v158_v30  ;;  %368 = vst [vmem:[%s750_s4 + $0x18] sm:$0xff] %v304_v32  ;;  %v308_v44 = vadd.f32 %v718_v9, %v231_v35  ;;  %v235_v45 = vmul.f32 %v716_v8, %v159_v31  ;;  %v165_v49 = vld [vmem:[%s710_s3 + $0x88] sm:$0xff]  ;;  %v166_v50 = vld [vmem:[%s710_s3 + $0x90] sm:$0xff] }
  0x1f   : > { %369 = vst [vmem:[%s750_s4 + $0x20] sm:$0xff] %v305_v33  ;;  %370 = vst [vmem:[%s750_s4 + $0x28] sm:$0xff] %v306_v34  ;;  %v236_v46 = vmul.f32 %v712_v6, %v160_v36  ;;  %v237_v47 = vmul.f32 %v716_v8, %v161_v37  ;;  %v309_v51 = vadd.f32 %v714_v7, %v232_v40  ;;  %v167_v55 = vld [vmem:[%s710_s3 + $0x98] sm:$0xff]  ;;  %v168_v56 = vld [vmem:[%s710_s3 + $0xa0] sm:$0xff] }
  0x20   : > { %371 = vst [vmem:[%s750_s4 + $0x30] sm:$0xff] %v307_v39  ;;  %v310_v52 = vadd.f32 %v718_v9, %v233_v41  ;;  %v311_v53 = vadd.f32 %v714_v7, %v234_v42  ;;  %v238_v54 = vmul.f32 %v712_v6, %v162_v38  ;;  %v169_v57 = vld [vmem:[%s710_s3 + $0xa8] sm:$0xff]  ;;  %372 = vst [vmem:[%s750_s4 + $0x38] sm:$0xff] %v308_v44  ;;  %v170_v62 = vld [vmem:[%s710_s3 + $0xb0] sm:$0xff] }
  0x21   : > { %v312_v58 = vadd.f32 %v718_v9, %v235_v45  ;;  %v313_v59 = vadd.f32 %v714_v7, %v236_v46  ;;  %v314_v60 = vadd.f32 %v718_v9, %v237_v47  ;;  %v239_v61 = vmul.f32 %v716_v8, %v163_v43  ;;  %373 = vst [vmem:[%s750_s4 + $0x40] sm:$0xff] %v309_v51  ;;  %v171_v3 = vld [vmem:[%s710_s3 + $0xb8] sm:$0xff]  ;;  %v172_v12 = vld [vmem:[%s710_s3 + $0xc0] sm:$0xff]  ;;  %v173_v13 = vld [vmem:[%s710_s3 + $0xc8] sm:$0xff] }
  0x22   : > { %374 = vst [vmem:[%s750_s4 + $0x48] sm:$0xff] %v310_v52  ;;  %375 = vst [vmem:[%s750_s4 + $0x50] sm:$0xff] %v311_v53  ;;  %v315_v63 = vadd.f32 %v714_v7, %v238_v54  ;;  %v240_v0 = vmul.f32 %v712_v6, %v164_v48  ;;  %v241_v1 = vmul.f32 %v716_v8, %v165_v49  ;;  %v174_v14 = vld [vmem:[%s710_s3 + $0xd0] sm:$0xff]  ;;  %v175_v19 = vld [vmem:[%s710_s3 + $0xd8] sm:$0xff] }
  0x23   : > { %v242_v2 = vmul.f32 %v712_v6, %v166_v50  ;;  %376 = vst [vmem:[%s750_s4 + $0x58] sm:$0xff] %v312_v58  ;;  %377 = vst [vmem:[%s750_s4 + $0x60] sm:$0xff] %v313_v59  ;;  %v316_v4 = vadd.f32 %v718_v9, %v239_v61  ;;  %v243_v5 = vmul.f32 %v716_v8, %v167_v55  ;;  %v176_v20 = vld [vmem:[%s710_s3 + $0xe0] sm:$0xff]  ;;  %v177_v21 = vld [vmem:[%s710_s3 + $0xe8] sm:$0xff] }
  0x24   : > { %378 = vst [vmem:[%s750_s4 + $0x68] sm:$0xff] %v314_v60  ;;  %v244_v10 = vmul.f32 %v712_v6, %v168_v56  ;;  %v245_v11 = vmul.f32 %v716_v8, %v169_v57  ;;  %379 = vst [vmem:[%s750_s4 + $0x70] sm:$0xff] %v315_v63  ;;  %v317_v15 = vadd.f32 %v714_v7, %v240_v0  ;;  %v178_v26 = vld [vmem:[%s710_s3 + $0xf0] sm:$0xff]  ;;  %v179_v31 = vld [vmem:[%s710_s3 + $0xf8] sm:$0xff] }
  0x25   : > { %v318_v16 = vadd.f32 %v718_v9, %v241_v1  ;;  %v319_v17 = vadd.f32 %v714_v7, %v242_v2  ;;  %v246_v18 = vmul.f32 %v712_v6, %v170_v62  ;;  %380 = vst [vmem:[%s750_s4 + $0x78] sm:$0xff] %v316_v4  ;;  %v320_v22 = vadd.f32 %v718_v9, %v243_v5  ;;  %v180_v36 = vld [vmem:[%s710_s3 + $0x100] sm:$0xff]  ;;  %v181_v37 = vld [vmem:[%s710_s3 + $0x108] sm:$0xff]  ;;  %v182_v38 = vld [vmem:[%s710_s3 + $0x110] sm:$0xff] }
  0x26   : > { %v321_v23 = vadd.f32 %v714_v7, %v244_v10  ;;  %v322_v24 = vadd.f32 %v718_v9, %v245_v11  ;;  %v247_v25 = vmul.f32 %v716_v8, %v171_v3  ;;  %381 = vst [vmem:[%s750_s4 + $0x80] sm:$0xff] %v317_v15  ;;  %v248_v28 = vmul.f32 %v712_v6, %v172_v12  ;;  %v183_v43 = vld [vmem:[%s710_s3 + $0x118] sm:$0xff]  ;;  %v184_v44 = vld [vmem:[%s710_s3 + $0x120] sm:$0xff]  ;;  %v185_v45 = vld [vmem:[%s710_s3 + $0x128] sm:$0xff] }
  0x27   : > { %382 = vst [vmem:[%s750_s4 + $0x88] sm:$0xff] %v318_v16  ;;  %383 = vst [vmem:[%s750_s4 + $0x90] sm:$0xff] %v319_v17  ;;  %v323_v27 = vadd.f32 %v714_v7, %v246_v18  ;;  %v249_v29 = vmul.f32 %v716_v8, %v173_v13  ;;  %v250_v30 = vmul.f32 %v712_v6, %v174_v14  ;;  %v186_v50 = vld [vmem:[%s710_s3 + $0x130] sm:$0xff]  ;;  %v187_v55 = vld [vmem:[%s710_s3 + $0x138] sm:$0xff] }
  0x28   : > { %384 = vst [vmem:[%s750_s4 + $0x98] sm:$0xff] %v320_v22  ;;  %385 = vst [vmem:[%s750_s4 + $0xa0] sm:$0xff] %v321_v23  ;;  %v324_v32 = vadd.f32 %v718_v9, %v247_v25  ;;  %v251_v33 = vmul.f32 %v716_v8, %v175_v19  ;;  %v252_v34 = vmul.f32 %v712_v6, %v176_v20  ;;  %v188_v60 = vld [vmem:[%s710_s3 + $0x140] sm:$0xff]  ;;  %v189_v61 = vld [vmem:[%s710_s3 + $0x148] sm:$0xff] }
  0x29   : > { %386 = vst [vmem:[%s750_s4 + $0xa8] sm:$0xff] %v322_v24  ;;  %v253_v35 = vmul.f32 %v716_v8, %v177_v21  ;;  %387 = vst [vmem:[%s750_s4 + $0xb0] sm:$0xff] %v323_v27  ;;  %v325_v39 = vadd.f32 %v714_v7, %v248_v28  ;;  %v326_v40 = vadd.f32 %v718_v9, %v249_v29  ;;  %v190_v62 = vld [vmem:[%s710_s3 + $0x150] sm:$0xff]  ;;  %v191_v3 = vld [vmem:[%s710_s3 + $0x158] sm:$0xff] }
  0x2a   : > { %v327_v41 = vadd.f32 %v714_v7, %v250_v30  ;;  %v254_v42 = vmul.f32 %v712_v6, %v178_v26  ;;  %388 = vst [vmem:[%s750_s4 + $0xb8] sm:$0xff] %v324_v32  ;;  %v328_v46 = vadd.f32 %v718_v9, %v251_v33  ;;  %v329_v47 = vadd.f32 %v714_v7, %v252_v34  ;;  %v192_v4 = vld [vmem:[%s710_s3 + $0x160] sm:$0xff]  ;;  %v193_v5 = vld [vmem:[%s710_s3 + $0x168] sm:$0xff]  ;;  %v194_v14 = vld [vmem:[%s710_s3 + $0x170] sm:$0xff] }
  0x2b   : > { %v330_v48 = vadd.f32 %v718_v9, %v253_v35  ;;  %v255_v49 = vmul.f32 %v716_v8, %v179_v31  ;;  %389 = vst [vmem:[%s750_s4 + $0xc0] sm:$0xff] %v325_v39  ;;  %390 = vst [vmem:[%s750_s4 + $0xc8] sm:$0xff] %v326_v40  ;;  %v256_v52 = vmul.f32 %v712_v6, %v180_v36  ;;  %v195_v19 = vld [vmem:[%s710_s3 + $0x178] sm:$0xff]  ;;  %v196_v24 = vld [vmem:[%s710_s3 + $0x180] sm:$0xff] }
  0x2c   : > { %391 = vst [vmem:[%s750_s4 + $0xd0] sm:$0xff] %v327_v41  ;;  %v331_v51 = vadd.f32 %v714_v7, %v254_v42  ;;  %v257_v53 = vmul.f32 %v716_v8, %v181_v37  ;;  %v258_v54 = vmul.f32 %v712_v6, %v182_v38  ;;  %392 = vst [vmem:[%s750_s4 + $0xd8] sm:$0xff] %v328_v46  ;;  %v197_v25 = vld [vmem:[%s710_s3 + $0x188] sm:$0xff]  ;;  %v198_v26 = vld [vmem:[%s710_s3 + $0x190] sm:$0xff] }
  0x2d   : > { %393 = vst [vmem:[%s750_s4 + $0xe0] sm:$0xff] %v329_v47  ;;  %394 = vst [vmem:[%s750_s4 + $0xe8] sm:$0xff] %v330_v48  ;;  %v332_v56 = vadd.f32 %v718_v9, %v255_v49  ;;  %v259_v57 = vmul.f32 %v716_v8, %v183_v43  ;;  %v260_v58 = vmul.f32 %v712_v6, %v184_v44  ;;  %v199_v31 = vld [vmem:[%s710_s3 + $0x198] sm:$0xff]  ;;  %v200_v32 = vld [vmem:[%s710_s3 + $0x1a0] sm:$0xff] }
  0x2e   : > { %v261_v59 = vmul.f32 %v716_v8, %v185_v45  ;;  %395 = vst [vmem:[%s750_s4 + $0xf0] sm:$0xff] %v331_v51  ;;  %v333_v63 = vadd.f32 %v714_v7, %v256_v52  ;;  %v334_v0 = vadd.f32 %v718_v9, %v257_v53  ;;  %v335_v1 = vadd.f32 %v714_v7, %v258_v54  ;;  %v201_v33 = vld [vmem:[%s710_s3 + $0x1a8] sm:$0xff]  ;;  %v202_v38 = vld [vmem:[%s710_s3 + $0x1b0] sm:$0xff]  ;;  %v203_v43 = vld [vmem:[%s710_s3 + $0x1b8] sm:$0xff] }
  0x2f   : > { %v262_v2 = vmul.f32 %v712_v6, %v186_v50  ;;  %396 = vst [vmem:[%s750_s4 + $0xf8] sm:$0xff] %v332_v56  ;;  %v336_v10 = vadd.f32 %v718_v9, %v259_v57  ;;  %v337_v11 = vadd.f32 %v714_v7, %v260_v58  ;;  %v263_v13 = vmul.f32 %v716_v8, %v187_v55  ;;  %v204_v48 = vld [vmem:[%s710_s3 + $0x1c0] sm:$0xff]  ;;  %v205_v49 = vld [vmem:[%s710_s3 + $0x1c8] sm:$0xff]  ;;  %v206_v50 = vld [vmem:[%s710_s3 + $0x1d0] sm:$0xff] }
  0x30   : > { %v338_v12 = vadd.f32 %v718_v9, %v261_v59  ;;  %397 = vst [vmem:[%s750_s4 + $0x100] sm:$0xff] %v333_v63  ;;  %398 = vst [vmem:[%s750_s4 + $0x108] sm:$0xff] %v334_v0  ;;  %v264_v16 = vmul.f32 %v712_v6, %v188_v60  ;;  %v265_v17 = vmul.f32 %v716_v8, %v189_v61  ;;  %v207_v55 = vld [vmem:[%s710_s3 + $0x1d8] sm:$0xff]  ;;  %v208_v56 = vld [vmem:[%s710_s3 + $0x1e0] sm:$0xff] }
  0x31   : > { %399 = vst [vmem:[%s750_s4 + $0x110] sm:$0xff] %v335_v1  ;;  %v339_v15 = vadd.f32 %v714_v7, %v262_v2  ;;  %v266_v18 = vmul.f32 %v712_v6, %v190_v62  ;;  %400 = vst [vmem:[%s750_s4 + $0x118] sm:$0xff] %v336_v10  ;;  %v340_v20 = vadd.f32 %v718_v9, %v263_v13  ;;  %v209_v57 = vld [vmem:[%s710_s3 + $0x1e8] sm:$0xff]  ;;  %v210_v62 = vld [vmem:[%s710_s3 + $0x1f0] sm:$0xff] }
  0x32   : > { %401 = vst [vmem:[%s750_s4 + $0x120] sm:$0xff] %v337_v11  ;;  %402 = vst [vmem:[%s750_s4 + $0x128] sm:$0xff] %v338_v12  ;;  %v267_v21 = vmul.f32 %v716_v8, %v191_v3  ;;  %v268_v22 = vmul.f32 %v712_v6, %v192_v4  ;;  %v269_v23 = vmul.f32 %v716_v8, %v193_v5  ;;  %v211_v3 = vld [vmem:[%s710_s3 + $0x1f8] sm:$0xff] }
  0x33   : > { %403 = vst [vmem:[%s750_s4 + $0x130] sm:$0xff] %v339_v15  ;;  %v341_v27 = vadd.f32 %v714_v7, %v264_v16  ;;  %v342_v28 = vadd.f32 %v718_v9, %v265_v17  ;;  %v343_v29 = vadd.f32 %v714_v7, %v266_v18  ;;  %v270_v30 = vmul.f32 %v712_v6, %v194_v14 }
  0x34   : > { %404 = vst [vmem:[%s750_s4 + $0x138] sm:$0xff] %v340_v20  ;;  %v344_v34 = vadd.f32 %v718_v9, %v267_v21  ;;  %v345_v35 = vadd.f32 %v714_v7, %v268_v22  ;;  %v346_v36 = vadd.f32 %v718_v9, %v269_v23  ;;  %v271_v37 = vmul.f32 %v716_v8, %v195_v19 }
  0x35   : > { %405 = vst [vmem:[%s750_s4 + $0x140] sm:$0xff] %v341_v27  ;;  %406 = vst [vmem:[%s750_s4 + $0x148] sm:$0xff] %v342_v28  ;;  %v347_v39 = vadd.f32 %v714_v7, %v270_v30  ;;  %v272_v40 = vmul.f32 %v712_v6, %v196_v24  ;;  %v273_v41 = vmul.f32 %v716_v8, %v197_v25 }
  0x36   : > { %407 = vst [vmem:[%s750_s4 + $0x150] sm:$0xff] %v343_v29  ;;  %v274_v42 = vmul.f32 %v712_v6, %v198_v26  ;;  %408 = vst [vmem:[%s750_s4 + $0x158] sm:$0xff] %v344_v34  ;;  %v348_v44 = vadd.f32 %v718_v9, %v271_v37  ;;  %v275_v45 = vmul.f32 %v716_v8, %v199_v31 }
  0x37   : > { %409 = vst [vmem:[%s750_s4 + $0x160] sm:$0xff] %v345_v35  ;;  %410 = vst [vmem:[%s750_s4 + $0x168] sm:$0xff] %v346_v36  ;;  %v276_v46 = vmul.f32 %v712_v6, %v200_v32  ;;  %v277_v47 = vmul.f32 %v716_v8, %v201_v33  ;;  %v349_v51 = vadd.f32 %v714_v7, %v272_v40 }
  0x38   : > { %411 = vst [vmem:[%s750_s4 + $0x170] sm:$0xff] %v347_v39  ;;  %v350_v52 = vadd.f32 %v718_v9, %v273_v41  ;;  %v351_v53 = vadd.f32 %v714_v7, %v274_v42  ;;  %v278_v54 = vmul.f32 %v712_v6, %v202_v38  ;;  %412 = vst [vmem:[%s750_s4 + $0x178] sm:$0xff] %v348_v44 }
  0x39   : > { %v352_v58 = vadd.f32 %v718_v9, %v275_v45  ;;  %v353_v59 = vadd.f32 %v714_v7, %v276_v46  ;;  %v354_v60 = vadd.f32 %v718_v9, %v277_v47  ;;  %v279_v61 = vmul.f32 %v716_v8, %v203_v43  ;;  %413 = vst [vmem:[%s750_s4 + $0x180] sm:$0xff] %v349_v51 }
  0x3a   : > { %414 = vst [vmem:[%s750_s4 + $0x188] sm:$0xff] %v350_v52  ;;  %415 = vst [vmem:[%s750_s4 + $0x190] sm:$0xff] %v351_v53  ;;  %v355_v63 = vadd.f32 %v714_v7, %v278_v54  ;;  %v280_v0 = vmul.f32 %v712_v6, %v204_v48  ;;  %v281_v1 = vmul.f32 %v716_v8, %v205_v49 }
  0x3b   : > { %v282_v2 = vmul.f32 %v712_v6, %v206_v50  ;;  %416 = vst [vmem:[%s750_s4 + $0x198] sm:$0xff] %v352_v58  ;;  %417 = vst [vmem:[%s750_s4 + $0x1a0] sm:$0xff] %v353_v59  ;;  %v356_v4 = vadd.f32 %v718_v9, %v279_v61  ;;  %v283_v5 = vmul.f32 %v716_v8, %v207_v55 }
  0x3c   : > { %418 = vst [vmem:[%s750_s4 + $0x1a8] sm:$0xff] %v354_v60  ;;  %v284_v10 = vmul.f32 %v712_v6, %v208_v56  ;;  %v285_v11 = vmul.f32 %v716_v8, %v209_v57  ;;  %419 = vst [vmem:[%s750_s4 + $0x1b0] sm:$0xff] %v355_v63  ;;  %v357_v12 = vadd.f32 %v714_v7, %v280_v0 }
  0x3d   : > { %v358_v13 = vadd.f32 %v718_v9, %v281_v1  ;;  %v359_v14 = vadd.f32 %v714_v7, %v282_v2  ;;  %v286_v15 = vmul.f32 %v712_v6, %v210_v62  ;;  %420 = vst [vmem:[%s750_s4 + $0x1b8] sm:$0xff] %v356_v4  ;;  %v360_v16 = vadd.f32 %v718_v9, %v283_v5 }
  0x3e   : > { %v361_v17 = vadd.f32 %v714_v7, %v284_v10  ;;  %v362_v18 = vadd.f32 %v718_v9, %v285_v11  ;;  %v287_v19 = vmul.f32 %v716_v8, %v211_v3  ;;  %421 = vst [vmem:[%s750_s4 + $0x1c0] sm:$0xff] %v357_v12 }
  0x3f   : > { %422 = vst [vmem:[%s750_s4 + $0x1c8] sm:$0xff] %v358_v13  ;;  %423 = vst [vmem:[%s750_s4 + $0x1d0] sm:$0xff] %v359_v14  ;;  %v363_v20 = vadd.f32 %v714_v7, %v286_v15 }
  0x40   : > { %424 = vst [vmem:[%s750_s4 + $0x1d8] sm:$0xff] %v360_v16  ;;  %425 = vst [vmem:[%s750_s4 + $0x1e0] sm:$0xff] %v361_v17  ;;  %v364_v6 = vadd.f32 %v718_v9, %v287_v19 }
  0x41   : > { %426 = vst [vmem:[%s750_s4 + $0x1e8] sm:$0xff] %v362_v18  ;;  %427 = vst [vmem:[%s750_s4 + $0x1f0] sm:$0xff] %v363_v20 }
  0x42   : > { %428 = vst [vmem:[%s750_s4 + $0x1f8] sm:$0xff] %v364_v6 }
  0x43   : > { %578 = shalt.err (!%p575_p3)
}
  0x44   : > { %s579_s22 = scalar_lea.hbm %s978_s13, 8192  ;;  %s583_s26 = scalar_lea.hbm %s1033_s2, 16384 }
  0x45   : > { %p580_p4 = scmp.ne.s32.totalorder %s978_s13, %s579_s22  ;;  %p584_p9 = scmp.lt.u32.totalorder %s978_s13, %s1033_s2 }
  0x46   : > { %p585_p10 = scmp.lt.u32.totalorder %s583_s26, %s579_s22  ;;  %p587_p12 = scmp.lt.u32.totalorder %s579_s22, %s978_s13 }
  0x47   : > { %p581_p7 = pnand %p580_p4, %p685_p5 }
  0x48   : > { %p586_p11 = por %p585_p10, %p584_p9 }
  0x49   : > { %p582_p8 = pneg %p581_p7 }
  0x4a   : > { %p588_p13 = por %p587_p12, %p586_p11 }
  0x4c   : > { %p589_p0 = pnand %p588_p13, %p582_p8 }
  0x4e   : > { %592 = shalt.err (!%p589_p0)
}
  0x4f   : > { %s630_s29 = smov 256   ;;  %s631_s30 = smov 16  }
  0x50   : > { %524 = dma.vmem_to_hbm [thread:$0]  (%p685_p5), %s980_s6, 8192, %s978_s13, %s990_s14, %s630_s29, %s630_s29, %s631_s30  }
  0x51 PF: > { %p530_p1 = scmp.ge.s32.totalorder %s627_s12, 2  ;;  %s459_s3 = sand.u32 1, %s615_s9  }
  0x52   : > { %s460_s4 = scalar_lea.sflag [#allocation3], %s459_s3 }
  0x53   : > { %p527_p2 = pnand %p530_p1, %p689_p6 }
  0x55   : > { %610 = dma.done.wait (!%p527_p2), %s460_s4, 8192  }
  0x56   : > { %612 = vsyncadd (!%p527_p2), %s460_s4, 4294959104  ;;  %p12_p3 = scmp.ge.s32.totalorder %s672_s15, 4   ;;  %s1036_s9 = smov %s619_s10 }
  0x57   : > { %s1037_s10 = smov %s623_s11  ;;  %s1038_s11 = smov %s683_s18 }
  0x58   : > { %s1039_s12 = smov %s672_s15  ;;  %14 = sbr.rel (!%p12_p3) target bundleno = 3 (0x3), region = 64 }
  0x5f   :  { %465 = vsyncpa [#allocation3], 1 }
  0x60   :  { %467 = vsyncpa [#allocation3 + $0x1], 1 }

</bundles_post_ra>
